<compile_context>
chip_gen: v7x
topology: tpu7x:2x2x1
jax: 0.10.0
libtpu: 0.0.40
codegen_flags: <defaults>
</compile_context>

<pallas_src>
import numpy as np
import jax
import jax.numpy as jnp
from jax.experimental import pallas as pl
from jax.experimental.pallas import tpu as pltpu

_EPS = 1e-5
_ACT_DTYPE = jnp.bfloat16      # activation storage dtype between stages


# ----------------------------- Pallas kernel --------------------------------

def _conv_stage_kernel(w_ref, p_ref, shift_ref, o_ref):
    # w_ref:     (Cout, K)  bf16 — conv weight with BN scale folded in (resident)
    # p_ref:     (K, TM)    bf16 — transposed im2col patch tile (lane dim = TM)
    # shift_ref: (Cout, 1)  f32  — folded conv-bias + BN shift (resident)
    # o_ref:     (Cout, TM) bf16 — lane-dense output tile
    acc = jnp.dot(w_ref[...], p_ref[...], preferred_element_type=jnp.float32)
    o_ref[...] = jnp.maximum(acc + shift_ref[...], 0.0).astype(o_ref.dtype)


# ------------------------------- glue (JAX) ----------------------------------

def _im2col_cf_k3_s2(x):
    """Channel-first im2col: x (C, N, D, H, W) -> P^T of shape (C*27, N*Do*Ho*Wo).

    K ordering is (cin, kd, kh, kw), matching w.reshape(Cout, Cin*27).
    """
    C, N, D, H, W = x.shape
    assert D % 2 == 0 and H % 2 == 0 and W % 2 == 0, "k3/s2/p1 stage expects even dims"
    Do, Ho, Wo = D // 2, H // 2, W // 2
    xp = jnp.pad(x, ((0, 0), (0, 0), (1, 1), (1, 1), (1, 1)))
    taps = []
    for kd in range(3):
        for kh in range(3):
            for kw in range(3):
                taps.append(
                    xp[:, :, kd:kd + 2 * Do:2, kh:kh + 2 * Ho:2, kw:kw + 2 * Wo:2])
    p = jnp.stack(taps, axis=1)                        # (C, 27, N, Do, Ho, Wo)
    return p.reshape(C * 27, N * Do * Ho * Wo), (N, Do, Ho, Wo)


def _pick_tm(M, K, target_bytes=2 * 1024 * 1024):
    """M-tile: multiple of 128, ~2 MiB bf16 patch block, grid >= 4 when possible."""
    cap = max(128, (target_bytes // (2 * K)) // 128 * 128)
    cap = min(cap, 16384)
    quarter = max(128, (M // 4) // 128 * 128)          # >= 4 grid steps
    return min(quarter, cap)


def conv_stage(x, p):
    """One Stage (conv3d k3/s2/p1 + BN(eval) + ReLU), channel-first layout.

    x: (Cin, N, D, H, W)  ->  (Cout, N, D//2, H//2, W//2) in _ACT_DTYPE.
    """
    w, b = p["w"], p["b"]                              # w: (Cout, Cin, 3, 3, 3)
    gamma, beta, mean, var = p["gamma"], p["beta"], p["mean"], p["var"]
    Cout, Cin = w.shape[0], w.shape[1]
    assert x.shape[0] == Cin

    pT, (N, Do, Ho, Wo) = _im2col_cf_k3_s2(x.astype(_ACT_DTYPE))   # (K, M) bf16
    K, M = pT.shape

    inv_std = 1.0 / jnp.sqrt(var + _EPS)
    scale = (gamma * inv_std).astype(jnp.float32)                       # (Cout,)
    shift = (beta + (b - mean) * scale).reshape(Cout, 1).astype(jnp.float32)
    w_s = w.reshape(Cout, K).astype(jnp.float32) * scale[:, None]       # (Cout, K)

    if M < 512:
        # Tail stages (M = 128 / 16): a Pallas launch would be pure overhead.
        out = jnp.maximum(
            jnp.dot(w_s, pT.astype(jnp.float32),
                    preferred_element_type=jnp.float32) + shift, 0.0)
        return out.astype(_ACT_DTYPE).reshape(Cout, N, Do, Ho, Wo)

    tm = _pick_tm(M, K)
    Mp = pl.cdiv(M, tm) * tm
    if Mp != M:
        pT = jnp.pad(pT, ((0, 0), (0, Mp - M)))        # no-op for the test shapes
    w_b = w_s.astype(jnp.bfloat16)

    out = pl.pallas_call(
        _conv_stage_kernel,
        out_shape=jax.ShapeDtypeStruct((Cout, Mp), _ACT_DTYPE),
        grid_spec=pltpu.PrefetchScalarGridSpec(
            num_scalar_prefetch=0,
            grid=(Mp // tm,),
            in_specs=[
                pl.BlockSpec((Cout, K), lambda i: (0, 0)),   # weight, resident
                pl.BlockSpec((K, tm), lambda i: (0, i)),     # patch slab, streamed
                pl.BlockSpec((Cout, 1), lambda i: (0, 0)),   # shift, resident
            ],
            out_specs=pl.BlockSpec((Cout, tm), lambda i: (0, i)),
        ),
        compiler_params=pltpu.CompilerParams(
            dimension_semantics=("parallel",),
            vmem_limit_bytes=32 * 1024 * 1024,
        ),
    )(w_b, pT, shift)

    if Mp != M:
        out = out[:, :M]
    return out.reshape(Cout, N, Do, Ho, Wo)


def adaptive_avg_pool3d_to2_cf(x):
    """AdaptiveAvgPool3d((2,2,2)) in channel-first (C, N, D, H, W), even dims."""
    C, N, D, H, W = x.shape
    assert D % 2 == 0 and H % 2 == 0 and W % 2 == 0
    x = x.astype(jnp.float32).reshape(C, N, 2, D // 2, 2, H // 2, 2, W // 2)
    return x.mean(axis=(3, 5, 7))                      # (C, N, 2, 2, 2) f32


def image_encoder_affine_forward(x_ncdhw, params):
    """Full ImageEncoderAffine.forward. Input NCDHW, output (N, 128*2*2*2) f32."""
    x = jnp.transpose(x_ncdhw, (1, 0, 2, 3, 4))        # NCDHW -> (C, N, D, H, W)
    for p in params:
        x = conv_stage(x, p)
    x = adaptive_avg_pool3d_to2_cf(x)                  # (128, N, 2, 2, 2)
    x = jnp.transpose(x, (1, 0, 2, 3, 4))              # (N, 128, 2, 2, 2)
    return x.reshape(x.shape[0], -1)


# --------------------------- reference (pure JAX) -----------------------------

def reference_forward(x_ncdhw, params):
    x = jnp.transpose(x_ncdhw, (0, 2, 3, 4, 1))        # NCDHW -> NDHWC
    for p in params:
        w = jnp.transpose(p["w"], (2, 3, 4, 1, 0))     # DHWIO
        y = jax.lax.conv_general_dilated(
            x, w, window_strides=(2, 2, 2),
            padding=((1, 1), (1, 1), (1, 1)),
            dimension_numbers=("NDHWC", "DHWIO", "NDHWC"))
        y = y + p["b"]
        y = (y - p["mean"]) / jnp.sqrt(p["var"] + _EPS) * p["gamma"] + p["beta"]
        x = jnp.maximum(y, 0.0)
    N, D, H, W, C = x.shape
    x = x.reshape(N, 2, D // 2, 2, H // 2, 2, W // 2, C).mean(axis=(2, 4, 6))
    x = jnp.transpose(x, (0, 4, 1, 2, 3))              # (N, C, 2, 2, 2)
    return x.reshape(x.shape[0], -1)


# ------------------------------- params init ---------------------------------

def init_params(key):
    nc = [8, 16, 32, 64, 128]
    pre = 2
    params = []
    for c in nc:
        key, k1, k2, k3, k4, k5, k6 = jax.random.split(key, 7)
        fan_in = pre * 27
        params.append(dict(
            w=jax.random.normal(k1, (c, pre, 3, 3, 3), jnp.float32) / np.sqrt(fan_in),
            b=0.01 * jax.random.normal(k2, (c,), jnp.float32),
            gamma=1.0 + 0.1 * jax.random.normal(k3, (c,), jnp.float32),
            beta=0.1 * jax.random.normal(k4, (c,), jnp.float32),
            mean=0.1 * jax.random.normal(k5, (c,), jnp.float32),
            var=1.0 + 0.5 * jax.random.uniform(k6, (c,), jnp.float32),
        ))
        pre = c
    return params


# ---------------------------------- main --------------------------------------

if __name__ == "__main__":
    key = jax.random.PRNGKey(0)
    kx, kp = jax.random.split(key)

    # Input: batch=2, channels=2 (pre_nc in __init__), spatial 64^3 so that the
    # five stride-2 stages end at 2^3 and AdaptiveAvgPool3d((2,2,2)) matches.
    x = jax.random.normal(kx, (2, 2, 64, 64, 64), jnp.float32)
    params = init_params(kp)

    fwd = jax.jit(image_encoder_affine_forward)
    ref_fwd = jax.jit(reference_forward)

    out = jax.block_until_ready(fwd(x, params))
    ref = jax.block_until_ready(ref_fwd(x, params))

    assert out.shape == (2, 128 * 2 * 2 * 2)
    assert bool(jnp.all(jnp.isfinite(out)))
    rel_err = float(jnp.max(jnp.abs(out - ref)) / (jnp.max(jnp.abs(ref)) + 1e-6))
    assert rel_err < 5e-2, f"mismatch vs reference: rel_err={rel_err}"

    print("KERNEL_OK")
</pallas_src>

<mosaic_0001>
module attributes {stable_mosaic.version = 11 : i64} {
  func.func @_conv_stage_kernel(%arg0: i32, %arg1: memref<8x54xbf16, #tpu.memory_space<vmem>>, %arg2: memref<54x16384xbf16, #tpu.memory_space<vmem>>, %arg3: memref<8x1xf32, #tpu.memory_space<vmem>>, %arg4: memref<8x16384xbf16, #tpu.memory_space<vmem>>) attributes {dimension_semantics = [#tpu.dimension_semantics<parallel>], iteration_bounds = array<i64: 4>, scalar_prefetch = 0 : i64, scratch_operands = 0 : i64, tpu.core_type = #tpu.core_type<tc>, window_params = [{pipeline_mode = #tpu.pipeline_mode<synchronous>, transform_indices = @transform_0, window_bounds = array<i64: 8, 54>}, {transform_indices = @transform_1, window_bounds = array<i64: 54, 16384>}, {pipeline_mode = #tpu.pipeline_mode<synchronous>, transform_indices = @transform_2, window_bounds = array<i64: 8, 1>}, {transform_indices = @transform_3, window_bounds = array<i64: 8, 16384>}]} {
    %c0 = arith.constant 0 : index
    %c0_0 = arith.constant 0 : index
    %0 = vector.load %arg1[%c0, %c0_0] : memref<8x54xbf16, #tpu.memory_space<vmem>>, vector<8x54xbf16>
    %c0_1 = arith.constant 0 : index
    %c0_2 = arith.constant 0 : index
    %1 = vector.load %arg2[%c0_1, %c0_2] : memref<54x16384xbf16, #tpu.memory_space<vmem>>, vector<54x16384xbf16>
    %cst = arith.constant dense<0.000000e+00> : vector<8x16384xf32>
    %2 = tpu.matmul %0, %1, %cst {dimension_numbers = #tpu.dot_dimension_numbers<[1], [0], [0], [1], [0, 0, 1, 1], [], []>} : vector<8x54xbf16>, vector<54x16384xbf16>, vector<8x16384xf32> -> vector<8x16384xf32>
    %c0_3 = arith.constant 0 : index
    %c0_4 = arith.constant 0 : index
    %3 = vector.load %arg3[%c0_3, %c0_4] : memref<8x1xf32, #tpu.memory_space<vmem>>, vector<8x1xf32>
    %4 = vector.broadcast %3 : vector<8x1xf32> to vector<8x16384xf32>
    %5 = arith.addf %2, %4 : vector<8x16384xf32>
    %cst_5 = arith.constant 0.000000e+00 : f32
    %6 = vector.broadcast %cst_5 : f32 to vector<8x16384xf32>
    %7 = arith.maximumf %5, %6 : vector<8x16384xf32>
    %8 = arith.truncf %7 : vector<8x16384xf32> to vector<8x16384xbf16>
    %c0_6 = arith.constant 0 : index
    %c0_7 = arith.constant 0 : index
    %9 = vector.load %arg4[%c0_6, %c0_7] : memref<8x16384xbf16, #tpu.memory_space<vmem>>, vector<8x16384xbf16>
    tpu.vector_store %arg4[%c0_6, %c0_7], %8 {strides = array<i32>} : memref<8x16384xbf16, #tpu.memory_space<vmem>>, vector<8x16384xbf16>,
    return
  }
  func.func @transform_0(%arg0: i32) -> (i32, i32) {
    %c0_i32 = arith.constant 0 : i32
    %c0_i32_0 = arith.constant 0 : i32
    %c0_i32_1 = arith.constant 0 : i32
    return %c0_i32, %c0_i32_0 : i32, i32
  }
  func.func @transform_1(%arg0: i32) -> (i32, i32) {
    %c0_i32 = arith.constant 0 : i32
    %c0_i32_0 = arith.constant 0 : i32
    return %c0_i32, %arg0 : i32, i32
  }
  func.func @transform_2(%arg0: i32) -> (i32, i32) {
    %c0_i32 = arith.constant 0 : i32
    %c0_i32_0 = arith.constant 0 : i32
    %c0_i32_1 = arith.constant 0 : i32
    return %c0_i32, %c0_i32_0 : i32, i32
  }
  func.func @transform_3(%arg0: i32) -> (i32, i32) {
    %c0_i32 = arith.constant 0 : i32
    %c0_i32_0 = arith.constant 0 : i32
    return %c0_i32, %arg0 : i32, i32
  }
}

module attributes {stable_mosaic.version = 11 : i64} {
  func.func @_conv_stage_kernel(%arg0: i32, %arg1: memref<16x216xbf16, #tpu.memory_space<vmem>>, %arg2: memref<216x2048xbf16, #tpu.memory_space<vmem>>, %arg3: memref<16x1xf32, #tpu.memory_space<vmem>>, %arg4: memref<16x2048xbf16, #tpu.memory_space<vmem>>) attributes {dimension_semantics = [#tpu.dimension_semantics<parallel>], iteration_bounds = array<i64: 4>, scalar_prefetch = 0 : i64, scratch_operands = 0 : i64, tpu.core_type = #tpu.core_type<tc>, window_params = [{pipeline_mode = #tpu.pipeline_mode<synchronous>, transform_indices = @transform_0, window_bounds = array<i64: 16, 216>}, {transform_indices = @transform_1, window_bounds = array<i64: 216, 2048>}, {pipeline_mode = #tpu.pipeline_mode<synchronous>, transform_indices = @transform_2, window_bounds = array<i64: 16, 1>}, {transform_indices = @transform_3, window_bounds = array<i64: 16, 2048>}]} {
    %c0 = arith.constant 0 : index
    %c0_0 = arith.constant 0 : index
    %0 = vector.load %arg1[%c0, %c0_0] : memref<16x216xbf16, #tpu.memory_space<vmem>>, vector<16x216xbf16>
    %c0_1 = arith.constant 0 : index
    %c0_2 = arith.constant 0 : index
    %1 = vector.load %arg2[%c0_1, %c0_2] : memref<216x2048xbf16, #tpu.memory_space<vmem>>, vector<216x2048xbf16>
    %cst = arith.constant dense<0.000000e+00> : vector<16x2048xf32>
    %2 = tpu.matmul %0, %1, %cst {dimension_numbers = #tpu.dot_dimension_numbers<[1], [0], [0], [1], [0, 0, 1, 1], [], []>} : vector<16x216xbf16>, vector<216x2048xbf16>, vector<16x2048xf32> -> vector<16x2048xf32>
    %c0_3 = arith.constant 0 : index
    %c0_4 = arith.constant 0 : index
    %3 = vector.load %arg3[%c0_3, %c0_4] : memref<16x1xf32, #tpu.memory_space<vmem>>, vector<16x1xf32>
    %4 = vector.broadcast %3 : vector<16x1xf32> to vector<16x2048xf32>
    %5 = arith.addf %2, %4 : vector<16x2048xf32>
    %cst_5 = arith.constant 0.000000e+00 : f32
    %6 = vector.broadcast %cst_5 : f32 to vector<16x2048xf32>
    %7 = arith.maximumf %5, %6 : vector<16x2048xf32>
    %8 = arith.truncf %7 : vector<16x2048xf32> to vector<16x2048xbf16>
    %c0_6 = arith.constant 0 : index
    %c0_7 = arith.constant 0 : index
    %9 = vector.load %arg4[%c0_6, %c0_7] : memref<16x2048xbf16, #tpu.memory_space<vmem>>, vector<16x2048xbf16>
    tpu.vector_store %arg4[%c0_6, %c0_7], %8 {strides = array<i32>} : memref<16x2048xbf16, #tpu.memory_space<vmem>>, vector<16x2048xbf16>,
    return
  }
  func.func @transform_0(%arg0: i32) -> (i32, i32) {
    %c0_i32 = arith.constant 0 : i32
    %c0_i32_0 = arith.constant 0 : i32
    %c0_i32_1 = arith.constant 0 : i32
    return %c0_i32, %c0_i32_0 : i32, i32
  }
  func.func @transform_1(%arg0: i32) -> (i32, i32) {
    %c0_i32 = arith.constant 0 : i32
    %c0_i32_0 = arith.constant 0 : i32
    return %c0_i32, %arg0 : i32, i32
  }
  func.func @transform_2(%arg0: i32) -> (i32, i32) {
    %c0_i32 = arith.constant 0 : i32
    %c0_i32_0 = arith.constant 0 : i32
    %c0_i32_1 = arith.constant 0 : i32
    return %c0_i32, %c0_i32_0 : i32, i32
  }
  func.func @transform_3(%arg0: i32) -> (i32, i32) {
    %c0_i32 = arith.constant 0 : i32
    %c0_i32_0 = arith.constant 0 : i32
    return %c0_i32, %arg0 : i32, i32
  }
}

module attributes {stable_mosaic.version = 11 : i64} {
  func.func @_conv_stage_kernel(%arg0: i32, %arg1: memref<32x432xbf16, #tpu.memory_space<vmem>>, %arg2: memref<432x256xbf16, #tpu.memory_space<vmem>>, %arg3: memref<32x1xf32, #tpu.memory_space<vmem>>, %arg4: memref<32x256xbf16, #tpu.memory_space<vmem>>) attributes {dimension_semantics = [#tpu.dimension_semantics<parallel>], iteration_bounds = array<i64: 4>, scalar_prefetch = 0 : i64, scratch_operands = 0 : i64, tpu.core_type = #tpu.core_type<tc>, window_params = [{pipeline_mode = #tpu.pipeline_mode<synchronous>, transform_indices = @transform_0, window_bounds = array<i64: 32, 432>}, {transform_indices = @transform_1, window_bounds = array<i64: 432, 256>}, {pipeline_mode = #tpu.pipeline_mode<synchronous>, transform_indices = @transform_2, window_bounds = array<i64: 32, 1>}, {transform_indices = @transform_3, window_bounds = array<i64: 32, 256>}]} {
    %c0 = arith.constant 0 : index
    %c0_0 = arith.constant 0 : index
    %0 = vector.load %arg1[%c0, %c0_0] : memref<32x432xbf16, #tpu.memory_space<vmem>>, vector<32x432xbf16>
    %c0_1 = arith.constant 0 : index
    %c0_2 = arith.constant 0 : index
    %1 = vector.load %arg2[%c0_1, %c0_2] : memref<432x256xbf16, #tpu.memory_space<vmem>>, vector<432x256xbf16>
    %cst = arith.constant dense<0.000000e+00> : vector<32x256xf32>
    %2 = tpu.matmul %0, %1, %cst {dimension_numbers = #tpu.dot_dimension_numbers<[1], [0], [0], [1], [0, 0, 1, 1], [], []>} : vector<32x432xbf16>, vector<432x256xbf16>, vector<32x256xf32> -> vector<32x256xf32>
    %c0_3 = arith.constant 0 : index
    %c0_4 = arith.constant 0 : index
    %3 = vector.load %arg3[%c0_3, %c0_4] : memref<32x1xf32, #tpu.memory_space<vmem>>, vector<32x1xf32>
    %4 = vector.broadcast %3 : vector<32x1xf32> to vector<32x256xf32>
    %5 = arith.addf %2, %4 : vector<32x256xf32>
    %cst_5 = arith.constant 0.000000e+00 : f32
    %6 = vector.broadcast %cst_5 : f32 to vector<32x256xf32>
    %7 = arith.maximumf %5, %6 : vector<32x256xf32>
    %8 = arith.truncf %7 : vector<32x256xf32> to vector<32x256xbf16>
    %c0_6 = arith.constant 0 : index
    %c0_7 = arith.constant 0 : index
    %9 = vector.load %arg4[%c0_6, %c0_7] : memref<32x256xbf16, #tpu.memory_space<vmem>>, vector<32x256xbf16>
    tpu.vector_store %arg4[%c0_6, %c0_7], %8 {strides = array<i32>} : memref<32x256xbf16, #tpu.memory_space<vmem>>, vector<32x256xbf16>,
    return
  }
  func.func @transform_0(%arg0: i32) -> (i32, i32) {
    %c0_i32 = arith.constant 0 : i32
    %c0_i32_0 = arith.constant 0 : i32
    %c0_i32_1 = arith.constant 0 : i32
    return %c0_i32, %c0_i32_0 : i32, i32
  }
  func.func @transform_1(%arg0: i32) -> (i32, i32) {
    %c0_i32 = arith.constant 0 : i32
    %c0_i32_0 = arith.constant 0 : i32
    return %c0_i32, %arg0 : i32, i32
  }
  func.func @transform_2(%arg0: i32) -> (i32, i32) {
    %c0_i32 = arith.constant 0 : i32
    %c0_i32_0 = arith.constant 0 : i32
    %c0_i32_1 = arith.constant 0 : i32
    return %c0_i32, %c0_i32_0 : i32, i32
  }
  func.func @transform_3(%arg0: i32) -> (i32, i32) {
    %c0_i32 = arith.constant 0 : i32
    %c0_i32_0 = arith.constant 0 : i32
    return %c0_i32, %arg0 : i32, i32
  }
}

</mosaic_0001>

<bundles_post_ra>
// kernel: image_encoder_affine_forward.3
= control target key start
LH: loop header
LB: loop body
LE: loop exit
PB: predicated region body
PF: predicated region fallthrough
CT: control target
= control target key end

     0   :  { %8 = vsyncpa [#allocation3], 0  ;;  %s8820_s0 = inlined_call_operand.vmem [shape: bf16[8,54], index: 0, kind: input, shape index: {}]   ;;  %s8821_s1 = inlined_call_operand.hbm [shape: bf16[54,65536], index: 1, kind: input, shape index: {}]   ;;  %s8822_s2 = inlined_call_operand.vmem [shape: f32[8,1], index: 2, kind: input, shape index: {}]   ;;  %s8823_s3 = inlined_call_operand.vmem [shape: bf16[8,65536], index: 3, kind: output, shape index: {}]  }
   0x1   :  { %10 = vsyncpa [#allocation3 + $0x1], 0  ;;  %s7721_s12 = smov 0   ;;  %s7723_s13 = smov 0  }
   0x2   :  { %s7725_s14 = smov 0   ;;  %s7727_s15 = smov 0  }
   0x3 LB: > { %s6673_s16 = sadd.s32 4294967295, %s7694_s15   ;;  %s7741_s17 = sadd.s32 1, %s7694_s15   ;;  %s7694_s15 = sphi %s7727_s15, %s8829_s15   ;;  %s7690_s14 = sphi %s7725_s14, %s8828_s14   ;;  %s7686_s13 = sphi %s7723_s13, %s8827_s13   ;;  %s7682_s12 = sphi %s7721_s12, %s8826_s12  }
   0x4   : > { %s41_s18 = ssub.s32 %s7694_s15, %s7741_s17  ;;  %s44_s19 = sadd.s32 1, %s7690_s14 }
   0x5   : > { %p42_p0 = scmp.eq.s32.totalorder %s41_s18, 0  ;;  %p51_p1 = scmp.ne.s32.totalorder %s7690_s14, %s7686_s13 }
   0x6   : > { %p52_p2 = scmp.eq.s32.totalorder %s7694_s15, 0  ;;  %p57_p3 = scmp.ne.s32.totalorder %s7686_s13, %s7682_s12 }
   0x7   : > { %s7751_s20 = scalar_select %p42_p0, %s7690_s14, %s44_s19  }
   0x8   : > { %p53_p4 = por %p52_p2, %p51_p1  ;;  %p58_p5 = scmp.eq.s32.totalorder %s6673_s16, 0 }
   0x9   : > { %p7461_p6 = scmp.lt.s32.totalorder %s7694_s15, 4  ;;  %s134_s22 = sand.u32 1, %s7690_s14  }
   0xa   : > { %p7756_p7 = por %p58_p5, %p57_p3  ;;  %s7453_s23 = smul.u32 3584, %s134_s22 }
   0xb   : > { %s7388_s24 = sshll.u32 %s7694_s15, 13  ;;  %p7762_p8 = pnand %p7461_p6, %p53_p4 }
   0xc   : > { %s7769_s28 = scalar_lea.hbm %s8821_s1, %s7388_s24  ;;  %s138_s29 = scalar_lea.vmem [#allocation2], %s7453_s23 }
   0xd   : > { %s145_s30 = sshll.u32 %s138_s29, 4  ;;  %s7773_s4 = scalar_lea.sflag [#allocation3], %s134_s22  ;;  %s7771_s30 = int_to_ptr.vmem [resolvable:$true] %s145_s30 }
   0xe   : > { %s7630_s5 = scalar_lea.hbm %s7769_s28, 57344  ;;  %p7632_p10 = pneg %p7762_p8 }
   0xf   : > { %p7631_p9 = scmp.ne.s32.totalorder %s7769_s28, %s7630_s5  ;;  %s7635_s8 = scalar_lea.hbm %s8821_s1, 229376 }
  0x10   : > { %p7636_p13 = scmp.lt.u32.totalorder %s7769_s28, %s8821_s1  ;;  %p7637_p0 = scmp.lt.u32.totalorder %s7635_s8, %s7630_s5 }
  0x11   : > { %p7633_p11 = pnand %p7632_p10, %p7631_p9  ;;  %p7639_p2 = scmp.lt.u32.totalorder %s7630_s5, %s7769_s28 }
  0x12   : > { %p7638_p1 = por %p7637_p0, %p7636_p13 }
  0x13   : > { %p7634_p12 = pneg %p7633_p11 }
  0x14   : > { %p7640_p3 = por %p7639_p2, %p7638_p1 }
  0x16   : > { %p7641_p4 = pnand %p7640_p3, %p7634_p12 }
  0x18   : > { %7644 = shalt.err (!%p7641_p4)
}
  0x19   : > { %s7645_s11 = scalar_lea.vmem %s7771_s30, 57344  ;;  %s7696_s12 = smov [#allocation2]  }
  0x1a   : > { %p7646_p5 = scmp.ne.s32.totalorder %s7771_s30, %s7645_s11  ;;  %s7650_s18 = sshll.u32 %s7696_s12, 4  ;;  %s7651_s18 = int_to_ptr.vmem [resolvable:$false] %s7650_s18 }
  0x1b   : > { %s7652_s19 = scalar_lea.vmem %s7651_s18, 114688  ;;  %p7653_p11 = scmp.lt.s32.totalorder %s7771_s30, %s7651_s18 }
  0x1c   : > { %p7648_p6 = pnand %p7646_p5, %p7632_p10  ;;  %p7654_p13 = scmp.lt.s32.totalorder %s7652_s19, %s7645_s11 }
  0x1e   : > { %p7649_p9 = pneg %p7648_p6  ;;  %p7655_p0 = por %p7654_p13, %p7653_p11 }
  0x20   : > { %p7656_p1 = pnand %p7655_p0, %p7649_p9 }
  0x22   : > { %7659 = shalt.err (!%p7656_p1)
}
  0x23   : > { %s7697_s22 = smov 32768   ;;  %s7698_s23 = smov 8192  }
  0x24   : > { %s7699_s24 = smov 512   ;;  %p6679_p10 = scmp.ge.s32.totalorder %s7694_s15, 1 }
  0x25   : > { %7460 = dma.hbm_to_vmem [thread:$0]  (!%p7762_p8), %s7769_s28, 57344, %s7771_s30, %s7773_s4, %s7697_s22, %s7698_s23, %s7699_s24  }
  0x26   : > { %p153_p12 = scmp.lt.s32.totalorder %s7694_s15, 5 }
  0x28   : > { %p154_p2 = pnand %p6679_p10, %p153_p12 }
  0x29   : > { %s159_s26 = sand.u32 (!%p154_p2), 1, %s7686_s13  }
  0x2a   : > { %157 = sbr.rel (%p154_p2) target bundleno = 786 (0x312), region = 32  ;;  %s160_s29 = scalar_lea.sflag (!%p154_p2), [#allocation3], %s159_s26 }
  0x2b   : > { %s7454_s27 = smul.u32 (!%p154_p2), 3584, %s159_s26 }
  0x2d   : > { %s7804_s5 = scalar_lea.vmem (!%p154_p2), [#allocation2], %s7454_s27 }
  0x31   : > { %7677 = dma.done.wait (%p7756_p7), %s160_s29, 57344  }
  0x32   : > { %7679 = vsyncadd (%p7756_p7), %s160_s29, 4294909952  ;;  %v7700_v0 = vmov 0   ;;  %v195_v1 = vld [vmem:[%s7804_s5] sm:$0xff]  ;;  %v196_v3 = vld [vmem:[%s7804_s5 + $0x8] sm:$0xff]  ;;  %vm2893_vm0 = vcmask 1042432   ;;  %vm2889_vm1 = vcmask 441344  }
  0x33   : > { %3310 = vmatprep.mubr.bf16.mxu0 %v7700_v0  ;;  %3351 = vmatprep.mubr.bf16.mxu1 %v7700_v0  ;;  %v259_v2 = vld [vmem:[%s7804_s5 + $0x200] sm:$0xff]  ;;  %v260_v5 = vld [vmem:[%s7804_s5 + $0x208] sm:$0xff]  ;;  %v197_v31 = vld [vmem:[%s7804_s5 + $0x10] sm:$0xff]  ;;  %s6680_s7 = sshll.u32 %s6673_s16, 7 }
  0x34   : > { %7498 = vset.pattern.permute.xlu0 %v7700_v0  ;;  %v6683_v4 = vcombine.high %v195_v1, %v259_v2  ;;  %v6682_v6 = vcombine.low %v195_v1, %v259_v2  ;;  %v323_v7 = vld [vmem:[%s7804_s5 + $0x400] sm:$0xff]  ;;  %v6685_v9 = vcombine.high %v196_v3, %v260_v5  ;;  %v6684_v10 = vcombine.low %v196_v3, %v260_v5  ;;  %v324_v12 = vld [vmem:[%s7804_s5 + $0x408] sm:$0xff]  ;;  %v261_v32 = vld [vmem:[%s7804_s5 + $0x210] sm:$0xff]  ;;  %p188_p7 = scmp.lt.s32.totalorder %s6680_s7, 511 }
  0x35   : > { %v387_v8 = vld [vmem:[%s7804_s5 + $0x600] sm:$0xff]  ;;  %v388_v13 = vld [vmem:[%s7804_s5 + $0x608] sm:$0xff]  ;;  %v198_v33 = vld [vmem:[%s7804_s5 + $0x18] sm:$0xff]  ;;  %v6687_v36 = vcombine.high %v197_v31, %v261_v32  ;;  %v6686_v44 = vcombine.low %v197_v31, %v261_v32 }
  0x36   : > { %v6811_v11 = vcombine.high %v323_v7, %v387_v8  ;;  %v451_v14 = vld [vmem:[%s7804_s5 + $0x800] sm:$0xff]  ;;  %3278 = vmatprep.subr.bf16.mxu0 %v6683_v4  ;;  %v6813_v15 = vcombine.high %v324_v12, %v388_v13  ;;  %v452_v17 = vld [vmem:[%s7804_s5 + $0x808] sm:$0xff]  ;;  %3319 = vmatprep.subr.bf16.mxu1 %v6685_v9  ;;  %v6810_v19 = vcombine.low %v323_v7, %v387_v8  ;;  %v262_v34 = vld [vmem:[%s7804_s5 + $0x218] sm:$0xff]  ;;  %s8831_s7 = smov (!%p188_p7, %s6680_s7), 511 }
  0x37   : > { %v515_v16 = vld [vmem:[%s7804_s5 + $0xa00] sm:$0xff]  ;;  %v516_v18 = vld [vmem:[%s7804_s5 + $0xa08] sm:$0xff]  ;;  %3279 = vmatpush1.bf16.msra.mxu0 %v6682_v6  ;;  %3320 = vmatpush1.bf16.msra.mxu1 %v6684_v10  ;;  %v6812_v20 = vcombine.low %v324_v12, %v388_v13  ;;  %v6689_v38 = vcombine.high %v198_v33, %v262_v34  ;;  %v325_v39 = vld [vmem:[%s7804_s5 + $0x410] sm:$0xff]  ;;  %v6688_v45 = vcombine.low %v198_v33, %v262_v34  ;;  %s6681_s15 = sshll.u32 %s8831_s7, 2 }
  0x38   : > { %3280 = vmatprep.subr.bf16.mxu0 %v6811_v11  ;;  %v6939_v21 = vcombine.high %v451_v14, %v515_v16  ;;  %3321 = vmatprep.subr.bf16.mxu1 %v6813_v15  ;;  %v6941_v22 = vcombine.high %v452_v17, %v516_v18  ;;  %v579_v23 = vld [vmem:[%s7804_s5 + $0xc00] sm:$0x77]  ;;  %v580_v24 = vld [vmem:[%s7804_s5 + $0xc08] sm:$0x77]  ;;  %v6938_v25 = vcombine.low %v451_v14, %v515_v16  ;;  %v389_v40 = vld [vmem:[%s7804_s5 + $0x610] sm:$0xff]  ;;  %s8193_s9 = scalar_lea.vmem %s8823_s3, %s6681_s15 }
  0x39   : > { %v6940_v26 = vcombine.low %v452_v17, %v516_v18  ;;  %v7067_v27 = vcombine.high %v579_v23, %v579_v23  ;;  %v7066_v28 = vcombine.low %v579_v23, %v579_v23  ;;  %v7069_v29 = vcombine.high %v580_v24, %v580_v24  ;;  %v326_v41 = vld [vmem:[%s7804_s5 + $0x418] sm:$0xff]  ;;  %v7842_v43 = vld [vmem:[%s8820_s0] sm:$0xf]  ;;  %v453_v48 = vld [vmem:[%s7804_s5 + $0x810] sm:$0xff] }
  0x3a   : > { %v7068_v30 = vcombine.low %v580_v24, %v580_v24  ;;  %v390_v42 = vld [vmem:[%s7804_s5 + $0x618] sm:$0xff]  ;;  %v6815_v46 = vcombine.high %v325_v39, %v389_v40  ;;  %v517_v49 = vld [vmem:[%s7804_s5 + $0xa10] sm:$0xff]  ;;  %v6814_v52 = vcombine.low %v325_v39, %v389_v40  ;;  %v199_v1 = vld [vmem:[%s7804_s5 + $0x20] sm:$0xff] }
  0x3b   : > { %3281 = vmatpush1.bf16.msra.mxu0 %v6810_v19  ;;  %3322 = vmatpush1.bf16.msra.mxu1 %v6812_v20  ;;  %v2895_v35 = vsel %vm2893_vm0, %v7066_v28, 0  ;;  %v6817_v47 = vcombine.high %v326_v41, %v390_v42  ;;  %v454_v50 = vld [vmem:[%s7804_s5 + $0x818] sm:$0xff]  ;;  %v6816_v53 = vcombine.low %v326_v41, %v390_v42  ;;  %v6943_v54 = vcombine.high %v453_v48, %v517_v49  ;;  %v581_v56 = vld [vmem:[%s7804_s5 + $0xc10] sm:$0x77]  ;;  %v263_v2 = vld [vmem:[%s7804_s5 + $0x220] sm:$0xff] }
  0x3c   : > { %3282 = vmatprep.subr.bf16.mxu0 %v6939_v21  ;;  %3323 = vmatprep.subr.bf16.mxu1 %v6941_v22  ;;  %v2901_v37 = vsel %vm2893_vm0, %v7068_v30, 0  ;;  %v518_v51 = vld [vmem:[%s7804_s5 + $0xa18] sm:$0xff]  ;;  %v6942_v58 = vcombine.low %v453_v48, %v517_v49  ;;  %v7071_v60 = vcombine.high %v581_v56, %v581_v56  ;;  %v7070_v61 = vcombine.low %v581_v56, %v581_v56  ;;  %v200_v3 = vld [vmem:[%s7804_s5 + $0x28] sm:$0xff]  ;;  %v327_v9 = vld [vmem:[%s7804_s5 + $0x420] sm:$0xff] }
  0x3d   : > { %v6945_v55 = vcombine.high %v454_v50, %v518_v51  ;;  %v582_v57 = vld [vmem:[%s7804_s5 + $0xc18] sm:$0x77]  ;;  %v6944_v59 = vcombine.low %v454_v50, %v518_v51  ;;  %v264_v4 = vld [vmem:[%s7804_s5 + $0x228] sm:$0xff]  ;;  %v6691_v6 = vcombine.high %v199_v1, %v263_v2  ;;  %v391_v10 = vld [vmem:[%s7804_s5 + $0x620] sm:$0xff]  ;;  %v6690_v14 = vcombine.low %v199_v1, %v263_v2 }
  0x3e   : > { %v7073_v62 = vcombine.high %v582_v57, %v582_v57  ;;  %v7072_v63 = vcombine.low %v582_v57, %v582_v57  ;;  %v2907_v5 = vsel %vm2893_vm0, %v7070_v61, 0  ;;  %v6693_v8 = vcombine.high %v200_v3, %v264_v4  ;;  %v328_v11 = vld [vmem:[%s7804_s5 + $0x428] sm:$0xff]  ;;  %v643_v13 = vld [vmem:[%s8822_s2] sm:$0xff]  ;;  %v201_v34 = vld [vmem:[%s7804_s5 + $0x30] sm:$0xff] }
  0x3f   : > { %3283 = vmatpush1.bf16.msra.mxu0 %v6938_v25  ;;  %3324 = vmatpush1.bf16.msra.mxu1 %v6940_v26  ;;  %v392_v12 = vld [vmem:[%s7804_s5 + $0x628] sm:$0xff]  ;;  %v6692_v15 = vcombine.low %v200_v3, %v264_v4  ;;  %v6819_v16 = vcombine.high %v327_v9, %v391_v10  ;;  %v455_v18 = vld [vmem:[%s7804_s5 + $0x820] sm:$0xff]  ;;  %v6818_v22 = vcombine.low %v327_v9, %v391_v10  ;;  %v329_v42 = vld [vmem:[%s7804_s5 + $0x430] sm:$0xff] }
  0x40   : > { %7194 = vmatprep.subr.msk.bf16.mxu0 %vm2893_vm0, %v7067_v27  ;;  %7196 = vmatprep.subr.msk.bf16.mxu1 %vm2893_vm0, %v7069_v29  ;;  %v2913_v7 = vsel %vm2893_vm0, %v7072_v63, 0  ;;  %v6821_v17 = vcombine.high %v328_v11, %v392_v12  ;;  %v519_v19 = vld [vmem:[%s7804_s5 + $0xa20] sm:$0xff]  ;;  %v456_v20 = vld [vmem:[%s7804_s5 + $0x828] sm:$0xff]  ;;  %v6820_v23 = vcombine.low %v328_v11, %v392_v12  ;;  %v457_v51 = vld [vmem:[%s7804_s5 + $0x830] sm:$0xff] }
  0x41   : > { %646 = vperm.xlu0 %7498, %v643_v13   ;;  %v520_v21 = vld [vmem:[%s7804_s5 + $0xa28] sm:$0xff]  ;;  %v6947_v24 = vcombine.high %v455_v18, %v519_v19  ;;  %v583_v26 = vld [vmem:[%s7804_s5 + $0xc20] sm:$0x77]  ;;  %v6946_v28 = vcombine.low %v455_v18, %v519_v19 }
  0x42   : > { %v6949_v25 = vcombine.high %v456_v20, %v520_v21  ;;  %v584_v27 = vld [vmem:[%s7804_s5 + $0xc28] sm:$0x77]  ;;  %v6948_v29 = vcombine.low %v456_v20, %v520_v21  ;;  %v7075_v30 = vcombine.high %v583_v26, %v583_v26  ;;  %v7074_v31 = vcombine.low %v583_v26, %v583_v26  ;;  %v203_v4 = vld [vmem:[%s7804_s5 + $0x40] sm:$0xff] }
  0x43   : > { %3285 = vmatpush1.bf16.msra.mxu0 %v2895_v35  ;;  %3326 = vmatpush1.bf16.msra.mxu1 %v2901_v37  ;;  %v7077_v32 = vcombine.high %v584_v27, %v584_v27  ;;  %v7076_v33 = vcombine.low %v584_v27, %v584_v27  ;;  %v265_v35 = vld [vmem:[%s7804_s5 + $0x230] sm:$0xff]  ;;  %v266_v37 = vld [vmem:[%s7804_s5 + $0x238] sm:$0xff]  ;;  %v331_v12 = vld [vmem:[%s7804_s5 + $0x440] sm:$0xff] }
  0x44   : > { %3360 = vmatprep.subr.bf16.mxu0 %v6687_v36  ;;  %3401 = vmatprep.subr.bf16.mxu1 %v6689_v38  ;;  %v202_v36 = vld [vmem:[%s7804_s5 + $0x38] sm:$0xff]  ;;  %v2919_v38 = vsel %vm2893_vm0, %v7074_v31, 0  ;;  %v6695_v39 = vcombine.high %v201_v34, %v265_v35  ;;  %v395_v13 = vld [vmem:[%s7804_s5 + $0x640] sm:$0xff] }
  0x45   : > { %v2925_v40 = vsel %vm2893_vm0, %v7076_v33, 0  ;;  %v6697_v41 = vcombine.high %v202_v36, %v266_v37  ;;  %v6696_v48 = vcombine.low %v202_v36, %v266_v37  ;;  %v6827_v18 = vcombine.high %v331_v12, %v395_v13  ;;  %v459_v20 = vld [vmem:[%s7804_s5 + $0x840] sm:$0xff]  ;;  %v205_v36 = vld [vmem:[%s7804_s5 + $0x50] sm:$0xff] }
  0x46   : > { %7195 = vmatmul.mubr.msk.bf16.vlgmr.msra.gmra.mrb[0].mxu0 %vm2889_vm1, %v7842_v43  ;;  %7197 = vmatmul.mubr.msk.bf16.vlgmr.msra.gmra.mrb[0].mxu1 %vm2889_vm1, %v7842_v43  ;;  %v523_v21 = vld [vmem:[%s7804_s5 + $0xa40] sm:$0xff]  ;;  %v269_v37 = vld [vmem:[%s7804_s5 + $0x250] sm:$0xff] }
  0x47   : > { %3361 = vmatpush1.bf16.msra.mxu0 %v6686_v44  ;;  %3402 = vmatpush1.bf16.msra.mxu1 %v6688_v45  ;;  %v393_v44 = vld [vmem:[%s7804_s5 + $0x630] sm:$0xff]  ;;  %v330_v45 = vld [vmem:[%s7804_s5 + $0x438] sm:$0xff]  ;;  %v6955_v26 = vcombine.high %v459_v20, %v523_v21 }
  0x48   : > { %3362 = vmatprep.subr.bf16.mxu0 %v6815_v46  ;;  %3403 = vmatprep.subr.bf16.mxu1 %v6817_v47  ;;  %v394_v46 = vld [vmem:[%s7804_s5 + $0x638] sm:$0xff]  ;;  %v6694_v47 = vcombine.low %v201_v34, %v265_v35  ;;  %v6823_v49 = vcombine.high %v329_v42, %v393_v44 }
  0x49   : > { %3392 = vmatprep.mubr.bf16.mxu0 %v7700_v0  ;;  %3433 = vmatprep.mubr.bf16.mxu1 %v7700_v0  ;;  %v6825_v50 = vcombine.high %v330_v45, %v394_v46  ;;  %v6824_v56 = vcombine.low %v330_v45, %v394_v46  ;;  %v333_v45 = vld [vmem:[%s7804_s5 + $0x450] sm:$0xff] }
  0x4a   : > { %v397_v46 = vld [vmem:[%s7804_s5 + $0x650] sm:$0xff] }
  0x4b   : > { %3363 = vmatpush1.bf16.msra.mxu0 %v6814_v52  ;;  %3404 = vmatpush1.bf16.msra.mxu1 %v6816_v53  ;;  %v521_v52 = vld [vmem:[%s7804_s5 + $0xa30] sm:$0xff]  ;;  %v458_v53 = vld [vmem:[%s7804_s5 + $0x838] sm:$0xff] }
  0x4c   : > { %3364 = vmatprep.subr.bf16.mxu0 %v6943_v54  ;;  %3405 = vmatprep.subr.bf16.mxu1 %v6945_v55  ;;  %v522_v54 = vld [vmem:[%s7804_s5 + $0xa38] sm:$0xff]  ;;  %v6822_v55 = vcombine.low %v329_v42, %v393_v44  ;;  %v6951_v57 = vcombine.high %v457_v51, %v521_v52  ;;  %v6950_v61 = vcombine.low %v457_v51, %v521_v52 }
  0x4d   : > { %v6831_v51 = vcombine.high %v333_v45, %v397_v46 }
  0x4f   : > { %3365 = vmatpush1.bf16.msra.mxu0 %v6942_v58  ;;  %3406 = vmatpush1.bf16.msra.mxu1 %v6944_v59  ;;  %v6953_v58 = vcombine.high %v458_v53, %v522_v54  ;;  %v585_v59 = vld [vmem:[%s7804_s5 + $0xc30] sm:$0x77] }
  0x50   : > { %7198 = vmatprep.subr.msk.bf16.mxu0 %vm2893_vm0, %v7071_v60  ;;  %7200 = vmatprep.subr.msk.bf16.mxu1 %vm2893_vm0, %v7073_v62  ;;  %v586_v60 = vld [vmem:[%s7804_s5 + $0xc38] sm:$0x77]  ;;  %v6952_v62 = vcombine.low %v458_v53, %v522_v54  ;;  %v7079_v63 = vcombine.high %v585_v59, %v585_v59  ;;  %v7078_v1 = vcombine.low %v585_v59, %v585_v59  ;;  %v461_v53 = vld [vmem:[%s7804_s5 + $0x850] sm:$0xff] }
  0x51   : > { %v7081_v2 = vcombine.high %v586_v60, %v586_v60  ;;  %v7080_v3 = vcombine.low %v586_v60, %v586_v60  ;;  %v525_v54 = vld [vmem:[%s7804_s5 + $0xa50] sm:$0xff] }
  0x52   : > { %v6959_v59 = vcombine.high %v461_v53, %v525_v54 }
  0x53   : > { %3367 = vmatpush1.bf16.msra.mxu0 %v2907_v5  ;;  %3408 = vmatpush1.bf16.msra.mxu1 %v2913_v7  ;;  %v267_v5 = vld [vmem:[%s7804_s5 + $0x240] sm:$0xff]  ;;  %v268_v7 = vld [vmem:[%s7804_s5 + $0x248] sm:$0xff]  ;;  %v2937_v10 = vsel %vm2893_vm0, %v7080_v3, 0 }
  0x54   : > { %3442 = vmatprep.subr.bf16.mxu0 %v6691_v6  ;;  %3483 = vmatprep.subr.bf16.mxu1 %v6693_v8  ;;  %v204_v6 = vld [vmem:[%s7804_s5 + $0x48] sm:$0xff]  ;;  %v2931_v8 = vsel %vm2893_vm0, %v7078_v1, 0  ;;  %v6699_v9 = vcombine.high %v203_v4, %v267_v5 }
  0x55   : > { %v6701_v11 = vcombine.high %v204_v6, %v268_v7 }
  0x56   : > { %7199 = vmatmul.mubr.msk.bf16.vlgmr.msra.gmra.mrb[4].mxu0 %vm2889_vm1, %v7842_v43  ;;  %7201 = vmatmul.mubr.msk.bf16.vlgmr.msra.gmra.mrb[4].mxu1 %vm2889_vm1, %v7842_v43 }
  0x57   : > { %3443 = vmatpush1.bf16.msra.mxu0 %v6690_v14  ;;  %3484 = vmatpush1.bf16.msra.mxu1 %v6692_v15  ;;  %v332_v14 = vld [vmem:[%s7804_s5 + $0x448] sm:$0xff] }
  0x58   : > { %3444 = vmatprep.subr.bf16.mxu0 %v6819_v16  ;;  %3485 = vmatprep.subr.bf16.mxu1 %v6821_v17  ;;  %v396_v15 = vld [vmem:[%s7804_s5 + $0x648] sm:$0xff]  ;;  %v6698_v16 = vcombine.low %v203_v4, %v267_v5  ;;  %v6700_v17 = vcombine.low %v204_v6, %v268_v7  ;;  %v207_v6 = vld [vmem:[%s7804_s5 + $0x60] sm:$0xff] }
  0x59   : > { %3474 = vmatprep.mubr.bf16.mxu0 %v7700_v0  ;;  %3515 = vmatprep.mubr.bf16.mxu1 %v7700_v0  ;;  %v6829_v19 = vcombine.high %v332_v14, %v396_v15  ;;  %v271_v7 = vld [vmem:[%s7804_s5 + $0x260] sm:$0xff] }
  0x5b   : > { %3445 = vmatpush1.bf16.msra.mxu0 %v6818_v22  ;;  %3486 = vmatpush1.bf16.msra.mxu1 %v6820_v23  ;;  %v460_v22 = vld [vmem:[%s7804_s5 + $0x848] sm:$0xff] }
  0x5c   : > { %3446 = vmatprep.subr.bf16.mxu0 %v6947_v24  ;;  %3487 = vmatprep.subr.bf16.mxu1 %v6949_v25  ;;  %v524_v23 = vld [vmem:[%s7804_s5 + $0xa48] sm:$0xff]  ;;  %v6826_v24 = vcombine.low %v331_v12, %v395_v13  ;;  %v6828_v25 = vcombine.low %v332_v14, %v396_v15  ;;  %v335_v14 = vld [vmem:[%s7804_s5 + $0x460] sm:$0xff] }
  0x5d   : > { %v6957_v27 = vcombine.high %v460_v22, %v524_v23  ;;  %v6956_v31 = vcombine.low %v460_v22, %v524_v23  ;;  %v399_v15 = vld [vmem:[%s7804_s5 + $0x660] sm:$0xff] }
  0x5e   : > { %v463_v22 = vld [vmem:[%s7804_s5 + $0x860] sm:$0xff] }
  0x5f   : > { %3447 = vmatpush1.bf16.msra.mxu0 %v6946_v28  ;;  %3488 = vmatpush1.bf16.msra.mxu1 %v6948_v29  ;;  %v587_v28 = vld [vmem:[%s7804_s5 + $0xc40] sm:$0x77]  ;;  %v588_v29 = vld [vmem:[%s7804_s5 + $0xc48] sm:$0x77] }
  0x60   : > { %7202 = vmatprep.subr.msk.bf16.mxu0 %vm2893_vm0, %v7075_v30  ;;  %7204 = vmatprep.subr.msk.bf16.mxu1 %vm2893_vm0, %v7077_v32  ;;  %v6954_v30 = vcombine.low %v459_v20, %v523_v21  ;;  %v7083_v32 = vcombine.high %v587_v28, %v587_v28  ;;  %v7082_v33 = vcombine.low %v587_v28, %v587_v28  ;;  %v527_v23 = vld [vmem:[%s7804_s5 + $0xa60] sm:$0xff] }
  0x61   : > { %v7085_v34 = vcombine.high %v588_v29, %v588_v29  ;;  %v7084_v35 = vcombine.low %v588_v29, %v588_v29  ;;  %v6835_v20 = vcombine.high %v335_v14, %v399_v15  ;;  %v6963_v28 = vcombine.high %v463_v22, %v527_v23 }
  0x63   : > { %3449 = vmatpush1.bf16.msra.mxu0 %v2919_v38  ;;  %3490 = vmatpush1.bf16.msra.mxu1 %v2925_v40  ;;  %v206_v38 = vld [vmem:[%s7804_s5 + $0x58] sm:$0xff]  ;;  %v2943_v40 = vsel %vm2893_vm0, %v7082_v33, 0  ;;  %v2949_v42 = vsel %vm2893_vm0, %v7084_v35, 0 }
  0x64   : > { %3524 = vmatprep.subr.bf16.mxu0 %v6695_v39  ;;  %3565 = vmatprep.subr.bf16.mxu1 %v6697_v41  ;;  %v270_v39 = vld [vmem:[%s7804_s5 + $0x258] sm:$0xff]  ;;  %v6703_v41 = vcombine.high %v205_v36, %v269_v37 }
  0x65   : > { %v6705_v44 = vcombine.high %v206_v38, %v270_v39 }
  0x66   : > { %7203 = vmatmul.mubr.msk.bf16.vlgmr.msra.gmra.mrb[8].mxu0 %vm2889_vm1, %v7842_v43  ;;  %7205 = vmatmul.mubr.msk.bf16.vlgmr.msra.gmra.mrb[8].mxu1 %vm2889_vm1, %v7842_v43 }
  0x67   : > { %3525 = vmatpush1.bf16.msra.mxu0 %v6694_v47  ;;  %3566 = vmatpush1.bf16.msra.mxu1 %v6696_v48  ;;  %v334_v47 = vld [vmem:[%s7804_s5 + $0x458] sm:$0xff] }
  0x68   : > { %3526 = vmatprep.subr.bf16.mxu0 %v6823_v49  ;;  %3567 = vmatprep.subr.bf16.mxu1 %v6825_v50  ;;  %v398_v48 = vld [vmem:[%s7804_s5 + $0x658] sm:$0xff]  ;;  %v6702_v49 = vcombine.low %v205_v36, %v269_v37  ;;  %v6704_v50 = vcombine.low %v206_v38, %v270_v39  ;;  %v209_v38 = vld [vmem:[%s7804_s5 + $0x70] sm:$0xff] }
  0x69   : > { %3556 = vmatprep.mubr.bf16.mxu0 %v7700_v0  ;;  %3597 = vmatprep.mubr.bf16.mxu1 %v7700_v0  ;;  %v6833_v52 = vcombine.high %v334_v47, %v398_v48  ;;  %v273_v39 = vld [vmem:[%s7804_s5 + $0x270] sm:$0xff] }
  0x6b   : > { %3527 = vmatpush1.bf16.msra.mxu0 %v6822_v55  ;;  %3568 = vmatpush1.bf16.msra.mxu1 %v6824_v56  ;;  %v462_v55 = vld [vmem:[%s7804_s5 + $0x858] sm:$0xff] }
  0x6c   : > { %3528 = vmatprep.subr.bf16.mxu0 %v6951_v57  ;;  %3569 = vmatprep.subr.bf16.mxu1 %v6953_v58  ;;  %v526_v56 = vld [vmem:[%s7804_s5 + $0xa58] sm:$0xff]  ;;  %v6830_v57 = vcombine.low %v333_v45, %v397_v46  ;;  %v6832_v58 = vcombine.low %v334_v47, %v398_v48  ;;  %v337_v47 = vld [vmem:[%s7804_s5 + $0x470] sm:$0xff] }
  0x6d   : > { %v6961_v60 = vcombine.high %v462_v55, %v526_v56  ;;  %v6960_v1 = vcombine.low %v462_v55, %v526_v56  ;;  %v401_v48 = vld [vmem:[%s7804_s5 + $0x670] sm:$0xff] }
  0x6e   : > { %v465_v55 = vld [vmem:[%s7804_s5 + $0x870] sm:$0xff] }
  0x6f   : > { %3529 = vmatpush1.bf16.msra.mxu0 %v6950_v61  ;;  %3570 = vmatpush1.bf16.msra.mxu1 %v6952_v62  ;;  %v589_v61 = vld [vmem:[%s7804_s5 + $0xc50] sm:$0x77]  ;;  %v590_v62 = vld [vmem:[%s7804_s5 + $0xc58] sm:$0x77] }
  0x70   : > { %7206 = vmatprep.subr.msk.bf16.mxu0 %vm2893_vm0, %v7079_v63  ;;  %7208 = vmatprep.subr.msk.bf16.mxu1 %vm2893_vm0, %v7081_v2  ;;  %v6958_v63 = vcombine.low %v461_v53, %v525_v54  ;;  %v7087_v2 = vcombine.high %v589_v61, %v589_v61  ;;  %v7086_v3 = vcombine.low %v589_v61, %v589_v61  ;;  %v529_v56 = vld [vmem:[%s7804_s5 + $0xa70] sm:$0xff] }
  0x71   : > { %v7089_v4 = vcombine.high %v590_v62, %v590_v62  ;;  %v7088_v5 = vcombine.low %v590_v62, %v590_v62  ;;  %v6839_v53 = vcombine.high %v337_v47, %v401_v48  ;;  %v6967_v61 = vcombine.high %v465_v55, %v529_v56 }
  0x73   : > { %3531 = vmatpush1.bf16.msra.mxu0 %v2931_v8  ;;  %3572 = vmatpush1.bf16.msra.mxu1 %v2937_v10  ;;  %v208_v8 = vld [vmem:[%s7804_s5 + $0x68] sm:$0xff]  ;;  %v2955_v10 = vsel %vm2893_vm0, %v7086_v3, 0  ;;  %v2961_v12 = vsel %vm2893_vm0, %v7088_v5, 0 }
  0x74   : > { %3606 = vmatprep.subr.bf16.mxu0 %v6699_v9  ;;  %3647 = vmatprep.subr.bf16.mxu1 %v6701_v11  ;;  %v272_v9 = vld [vmem:[%s7804_s5 + $0x268] sm:$0xff]  ;;  %v6707_v11 = vcombine.high %v207_v6, %v271_v7 }
  0x75   : > { %v6709_v13 = vcombine.high %v208_v8, %v272_v9 }
  0x76   : > { %7207 = vmatmul.mubr.msk.bf16.vlgmr.msra.gmra.mrb[12].mxu0 %vm2889_vm1, %v7842_v43  ;;  %7209 = vmatmul.mubr.msk.bf16.vlgmr.msra.gmra.mrb[12].mxu1 %vm2889_vm1, %v7842_v43 }
  0x77   : > { %3607 = vmatpush1.bf16.msra.mxu0 %v6698_v16  ;;  %3648 = vmatpush1.bf16.msra.mxu1 %v6700_v17  ;;  %v336_v16 = vld [vmem:[%s7804_s5 + $0x468] sm:$0xff] }
  0x78   : > { %3608 = vmatprep.subr.bf16.mxu0 %v6827_v18  ;;  %3649 = vmatprep.subr.bf16.mxu1 %v6829_v19  ;;  %v400_v17 = vld [vmem:[%s7804_s5 + $0x668] sm:$0xff]  ;;  %v6706_v18 = vcombine.low %v207_v6, %v271_v7  ;;  %v6708_v19 = vcombine.low %v208_v8, %v272_v9  ;;  %v211_v8 = vld [vmem:[%s7804_s5 + $0x80] sm:$0xff] }
  0x79   : > { %3638 = vmatprep.mubr.bf16.mxu0 %v7700_v0  ;;  %3679 = vmatprep.mubr.bf16.mxu1 %v7700_v0  ;;  %v6837_v21 = vcombine.high %v336_v16, %v400_v17  ;;  %v275_v9 = vld [vmem:[%s7804_s5 + $0x280] sm:$0xff] }
  0x7b   : > { %3609 = vmatpush1.bf16.msra.mxu0 %v6826_v24  ;;  %3650 = vmatpush1.bf16.msra.mxu1 %v6828_v25  ;;  %v464_v24 = vld [vmem:[%s7804_s5 + $0x868] sm:$0xff] }
  0x7c   : > { %3610 = vmatprep.subr.bf16.mxu0 %v6955_v26  ;;  %3651 = vmatprep.subr.bf16.mxu1 %v6957_v27  ;;  %v528_v25 = vld [vmem:[%s7804_s5 + $0xa68] sm:$0xff]  ;;  %v6834_v26 = vcombine.low %v335_v14, %v399_v15  ;;  %v6836_v27 = vcombine.low %v336_v16, %v400_v17  ;;  %v339_v16 = vld [vmem:[%s7804_s5 + $0x480] sm:$0xff] }
  0x7d   : > { %v6965_v29 = vcombine.high %v464_v24, %v528_v25  ;;  %v6964_v33 = vcombine.low %v464_v24, %v528_v25  ;;  %v403_v17 = vld [vmem:[%s7804_s5 + $0x680] sm:$0xff] }
  0x7e   : > { %v467_v24 = vld [vmem:[%s7804_s5 + $0x880] sm:$0xff] }
  0x7f   : > { %3611 = vmatpush1.bf16.msra.mxu0 %v6954_v30  ;;  %3652 = vmatpush1.bf16.msra.mxu1 %v6956_v31  ;;  %v591_v30 = vld [vmem:[%s7804_s5 + $0xc60] sm:$0x77]  ;;  %v592_v31 = vld [vmem:[%s7804_s5 + $0xc68] sm:$0x77] }
  0x80   : > { %7210 = vmatprep.subr.msk.bf16.mxu0 %vm2893_vm0, %v7083_v32  ;;  %7212 = vmatprep.subr.msk.bf16.mxu1 %vm2893_vm0, %v7085_v34  ;;  %v6962_v32 = vcombine.low %v463_v22, %v527_v23  ;;  %v7091_v34 = vcombine.high %v591_v30, %v591_v30  ;;  %v7090_v35 = vcombine.low %v591_v30, %v591_v30  ;;  %v531_v25 = vld [vmem:[%s7804_s5 + $0xa80] sm:$0xff] }
  0x81   : > { %v7093_v36 = vcombine.high %v592_v31, %v592_v31  ;;  %v7092_v37 = vcombine.low %v592_v31, %v592_v31  ;;  %v6843_v22 = vcombine.high %v339_v16, %v403_v17  ;;  %v6971_v30 = vcombine.high %v467_v24, %v531_v25 }
  0x83   : > { %3613 = vmatpush1.bf16.msra.mxu0 %v2943_v40  ;;  %3654 = vmatpush1.bf16.msra.mxu1 %v2949_v42  ;;  %v210_v40 = vld [vmem:[%s7804_s5 + $0x78] sm:$0xff]  ;;  %v2967_v42 = vsel %vm2893_vm0, %v7090_v35, 0  ;;  %v2973_v45 = vsel %vm2893_vm0, %v7092_v37, 0 }
  0x84   : > { %3688 = vmatprep.subr.bf16.mxu0 %v6703_v41  ;;  %3729 = vmatprep.subr.bf16.mxu1 %v6705_v44  ;;  %v274_v41 = vld [vmem:[%s7804_s5 + $0x278] sm:$0xff]  ;;  %v6711_v44 = vcombine.high %v209_v38, %v273_v39 }
  0x85   : > { %v6713_v46 = vcombine.high %v210_v40, %v274_v41 }
  0x86   : > { %7211 = vmatmul.mubr.msk.bf16.vlgmr.msra.gmra.mrb[16].mxu0 %vm2889_vm1, %v7842_v43  ;;  %7213 = vmatmul.mubr.msk.bf16.vlgmr.msra.gmra.mrb[16].mxu1 %vm2889_vm1, %v7842_v43 }
  0x87   : > { %3689 = vmatpush1.bf16.msra.mxu0 %v6702_v49  ;;  %3730 = vmatpush1.bf16.msra.mxu1 %v6704_v50  ;;  %v338_v49 = vld [vmem:[%s7804_s5 + $0x478] sm:$0xff] }
  0x88   : > { %3690 = vmatprep.subr.bf16.mxu0 %v6831_v51  ;;  %3731 = vmatprep.subr.bf16.mxu1 %v6833_v52  ;;  %v402_v50 = vld [vmem:[%s7804_s5 + $0x678] sm:$0xff]  ;;  %v6710_v51 = vcombine.low %v209_v38, %v273_v39  ;;  %v6712_v52 = vcombine.low %v210_v40, %v274_v41  ;;  %v213_v40 = vld [vmem:[%s7804_s5 + $0x90] sm:$0xff] }
  0x89   : > { %3720 = vmatprep.mubr.bf16.mxu0 %v7700_v0  ;;  %3761 = vmatprep.mubr.bf16.mxu1 %v7700_v0  ;;  %v6841_v54 = vcombine.high %v338_v49, %v402_v50  ;;  %v277_v41 = vld [vmem:[%s7804_s5 + $0x290] sm:$0xff] }
  0x8b   : > { %3691 = vmatpush1.bf16.msra.mxu0 %v6830_v57  ;;  %3732 = vmatpush1.bf16.msra.mxu1 %v6832_v58  ;;  %v466_v57 = vld [vmem:[%s7804_s5 + $0x878] sm:$0xff] }
  0x8c   : > { %3692 = vmatprep.subr.bf16.mxu0 %v6959_v59  ;;  %3733 = vmatprep.subr.bf16.mxu1 %v6961_v60  ;;  %v530_v58 = vld [vmem:[%s7804_s5 + $0xa78] sm:$0xff]  ;;  %v6838_v59 = vcombine.low %v337_v47, %v401_v48  ;;  %v6840_v60 = vcombine.low %v338_v49, %v402_v50  ;;  %v341_v49 = vld [vmem:[%s7804_s5 + $0x490] sm:$0xff] }
  0x8d   : > { %v6969_v62 = vcombine.high %v466_v57, %v530_v58  ;;  %v6968_v3 = vcombine.low %v466_v57, %v530_v58  ;;  %v405_v50 = vld [vmem:[%s7804_s5 + $0x690] sm:$0xff] }
  0x8e   : > { %v469_v57 = vld [vmem:[%s7804_s5 + $0x890] sm:$0xff] }
  0x8f   : > { %3693 = vmatpush1.bf16.msra.mxu0 %v6958_v63  ;;  %3734 = vmatpush1.bf16.msra.mxu1 %v6960_v1  ;;  %v593_v63 = vld [vmem:[%s7804_s5 + $0xc70] sm:$0x77]  ;;  %v594_v1 = vld [vmem:[%s7804_s5 + $0xc78] sm:$0x77] }
  0x90   : > { %7214 = vmatprep.subr.msk.bf16.mxu0 %vm2893_vm0, %v7087_v2  ;;  %7216 = vmatprep.subr.msk.bf16.mxu1 %vm2893_vm0, %v7089_v4  ;;  %v6966_v2 = vcombine.low %v465_v55, %v529_v56  ;;  %v7095_v4 = vcombine.high %v593_v63, %v593_v63  ;;  %v7094_v5 = vcombine.low %v593_v63, %v593_v63  ;;  %v533_v58 = vld [vmem:[%s7804_s5 + $0xa90] sm:$0xff] }
  0x91   : > { %v7097_v6 = vcombine.high %v594_v1, %v594_v1  ;;  %v7096_v7 = vcombine.low %v594_v1, %v594_v1  ;;  %v6847_v55 = vcombine.high %v341_v49, %v405_v50  ;;  %v6975_v63 = vcombine.high %v469_v57, %v533_v58 }
  0x93   : > { %3695 = vmatpush1.bf16.msra.mxu0 %v2955_v10  ;;  %3736 = vmatpush1.bf16.msra.mxu1 %v2961_v12  ;;  %v212_v10 = vld [vmem:[%s7804_s5 + $0x88] sm:$0xff]  ;;  %v2979_v12 = vsel %vm2893_vm0, %v7094_v5, 0  ;;  %v2985_v14 = vsel %vm2893_vm0, %v7096_v7, 0 }
  0x94   : > { %3770 = vmatprep.subr.bf16.mxu0 %v6707_v11  ;;  %3811 = vmatprep.subr.bf16.mxu1 %v6709_v13  ;;  %v276_v11 = vld [vmem:[%s7804_s5 + $0x288] sm:$0xff]  ;;  %v6715_v13 = vcombine.high %v211_v8, %v275_v9 }
  0x95   : > { %v6717_v15 = vcombine.high %v212_v10, %v276_v11 }
  0x96   : > { %7215 = vmatmul.mubr.msk.bf16.vlgmr.msra.gmra.mrb[20].mxu0 %vm2889_vm1, %v7842_v43  ;;  %7217 = vmatmul.mubr.msk.bf16.vlgmr.msra.gmra.mrb[20].mxu1 %vm2889_vm1, %v7842_v43 }
  0x97   : > { %3771 = vmatpush1.bf16.msra.mxu0 %v6706_v18  ;;  %3812 = vmatpush1.bf16.msra.mxu1 %v6708_v19  ;;  %v340_v18 = vld [vmem:[%s7804_s5 + $0x488] sm:$0xff] }
  0x98   : > { %3772 = vmatprep.subr.bf16.mxu0 %v6835_v20  ;;  %3813 = vmatprep.subr.bf16.mxu1 %v6837_v21  ;;  %v404_v19 = vld [vmem:[%s7804_s5 + $0x688] sm:$0xff]  ;;  %v6714_v20 = vcombine.low %v211_v8, %v275_v9  ;;  %v6716_v21 = vcombine.low %v212_v10, %v276_v11  ;;  %v215_v10 = vld [vmem:[%s7804_s5 + $0xa0] sm:$0xff] }
  0x99   : > { %3802 = vmatprep.mubr.bf16.mxu0 %v7700_v0  ;;  %3843 = vmatprep.mubr.bf16.mxu1 %v7700_v0  ;;  %v6845_v23 = vcombine.high %v340_v18, %v404_v19  ;;  %v279_v11 = vld [vmem:[%s7804_s5 + $0x2a0] sm:$0xff] }
  0x9b   : > { %3773 = vmatpush1.bf16.msra.mxu0 %v6834_v26  ;;  %3814 = vmatpush1.bf16.msra.mxu1 %v6836_v27  ;;  %v468_v26 = vld [vmem:[%s7804_s5 + $0x888] sm:$0xff] }
  0x9c   : > { %3774 = vmatprep.subr.bf16.mxu0 %v6963_v28  ;;  %3815 = vmatprep.subr.bf16.mxu1 %v6965_v29  ;;  %v532_v27 = vld [vmem:[%s7804_s5 + $0xa88] sm:$0xff]  ;;  %v6842_v28 = vcombine.low %v339_v16, %v403_v17  ;;  %v6844_v29 = vcombine.low %v340_v18, %v404_v19  ;;  %v343_v18 = vld [vmem:[%s7804_s5 + $0x4a0] sm:$0xff] }
  0x9d   : > { %v6973_v31 = vcombine.high %v468_v26, %v532_v27  ;;  %v6972_v35 = vcombine.low %v468_v26, %v532_v27  ;;  %v407_v19 = vld [vmem:[%s7804_s5 + $0x6a0] sm:$0xff] }
  0x9e   : > { %v471_v26 = vld [vmem:[%s7804_s5 + $0x8a0] sm:$0xff] }
  0x9f   : > { %3775 = vmatpush1.bf16.msra.mxu0 %v6962_v32  ;;  %3816 = vmatpush1.bf16.msra.mxu1 %v6964_v33  ;;  %v595_v32 = vld [vmem:[%s7804_s5 + $0xc80] sm:$0x77]  ;;  %v596_v33 = vld [vmem:[%s7804_s5 + $0xc88] sm:$0x77] }
  0xa0   : > { %7218 = vmatprep.subr.msk.bf16.mxu0 %vm2893_vm0, %v7091_v34  ;;  %7220 = vmatprep.subr.msk.bf16.mxu1 %vm2893_vm0, %v7093_v36  ;;  %v6970_v34 = vcombine.low %v467_v24, %v531_v25  ;;  %v7099_v36 = vcombine.high %v595_v32, %v595_v32  ;;  %v7098_v37 = vcombine.low %v595_v32, %v595_v32  ;;  %v535_v27 = vld [vmem:[%s7804_s5 + $0xaa0] sm:$0xff] }
  0xa1   : > { %v7101_v38 = vcombine.high %v596_v33, %v596_v33  ;;  %v7100_v39 = vcombine.low %v596_v33, %v596_v33  ;;  %v6851_v24 = vcombine.high %v343_v18, %v407_v19  ;;  %v6979_v32 = vcombine.high %v471_v26, %v535_v27 }
  0xa3   : > { %3777 = vmatpush1.bf16.msra.mxu0 %v2967_v42  ;;  %3818 = vmatpush1.bf16.msra.mxu1 %v2973_v45  ;;  %v214_v42 = vld [vmem:[%s7804_s5 + $0x98] sm:$0xff]  ;;  %v2991_v45 = vsel %vm2893_vm0, %v7098_v37, 0  ;;  %v2997_v47 = vsel %vm2893_vm0, %v7100_v39, 0 }
  0xa4   : > { %3852 = vmatprep.subr.bf16.mxu0 %v6711_v44  ;;  %3893 = vmatprep.subr.bf16.mxu1 %v6713_v46  ;;  %v278_v44 = vld [vmem:[%s7804_s5 + $0x298] sm:$0xff]  ;;  %v6719_v46 = vcombine.high %v213_v40, %v277_v41 }
  0xa5   : > { %v6721_v48 = vcombine.high %v214_v42, %v278_v44 }
  0xa6   : > { %7219 = vmatmul.mubr.msk.bf16.vlgmr.msra.gmra.mrb[24].mxu0 %vm2889_vm1, %v7842_v43  ;;  %7221 = vmatmul.mubr.msk.bf16.vlgmr.msra.gmra.mrb[24].mxu1 %vm2889_vm1, %v7842_v43 }
  0xa7   : > { %3853 = vmatpush1.bf16.msra.mxu0 %v6710_v51  ;;  %3894 = vmatpush1.bf16.msra.mxu1 %v6712_v52  ;;  %v342_v51 = vld [vmem:[%s7804_s5 + $0x498] sm:$0xff] }
  0xa8   : > { %3854 = vmatprep.subr.bf16.mxu0 %v6839_v53  ;;  %3895 = vmatprep.subr.bf16.mxu1 %v6841_v54  ;;  %v406_v52 = vld [vmem:[%s7804_s5 + $0x698] sm:$0xff]  ;;  %v6718_v53 = vcombine.low %v213_v40, %v277_v41  ;;  %v6720_v54 = vcombine.low %v214_v42, %v278_v44  ;;  %v217_v41 = vld [vmem:[%s7804_s5 + $0xb0] sm:$0xff] }
  0xa9   : > { %3884 = vmatprep.mubr.bf16.mxu0 %v7700_v0  ;;  %3925 = vmatprep.mubr.bf16.mxu1 %v7700_v0  ;;  %v6849_v56 = vcombine.high %v342_v51, %v406_v52  ;;  %v281_v42 = vld [vmem:[%s7804_s5 + $0x2b0] sm:$0xff]  ;;  %v218_v44 = vld [vmem:[%s7804_s5 + $0xb8] sm:$0xff] }
  0xab   : > { %3855 = vmatpush1.bf16.msra.mxu0 %v6838_v59  ;;  %3896 = vmatpush1.bf16.msra.mxu1 %v6840_v60  ;;  %v470_v59 = vld [vmem:[%s7804_s5 + $0x898] sm:$0xff] }
  0xac   : > { %3856 = vmatprep.subr.bf16.mxu0 %v6967_v61  ;;  %3897 = vmatprep.subr.bf16.mxu1 %v6969_v62  ;;  %v534_v60 = vld [vmem:[%s7804_s5 + $0xa98] sm:$0xff]  ;;  %v6846_v61 = vcombine.low %v341_v49, %v405_v50  ;;  %v6848_v62 = vcombine.low %v342_v51, %v406_v52  ;;  %v345_v50 = vld [vmem:[%s7804_s5 + $0x4b0] sm:$0xff] }
  0xad   : > { %v6977_v1 = vcombine.high %v470_v59, %v534_v60  ;;  %v6976_v5 = vcombine.low %v470_v59, %v534_v60  ;;  %v409_v51 = vld [vmem:[%s7804_s5 + $0x6b0] sm:$0xff]  ;;  %v346_v52 = vld [vmem:[%s7804_s5 + $0x4b8] sm:$0xff]  ;;  %v8092_v60 = vld [vmem:[%s8820_s0] sm:$0xf] }
  0xae   : > { %v537_v59 = vld [vmem:[%s7804_s5 + $0xab0] sm:$0xff] }
  0xaf   : > { %3857 = vmatpush1.bf16.msra.mxu0 %v6966_v2  ;;  %3898 = vmatpush1.bf16.msra.mxu1 %v6968_v3  ;;  %v597_v2 = vld [vmem:[%s7804_s5 + $0xc90] sm:$0x77]  ;;  %v598_v3 = vld [vmem:[%s7804_s5 + $0xc98] sm:$0x77] }
  0xb0   : > { %7222 = vmatprep.subr.msk.bf16.mxu0 %vm2893_vm0, %v7095_v4  ;;  %7224 = vmatprep.subr.msk.bf16.mxu1 %vm2893_vm0, %v7097_v6  ;;  %v6974_v4 = vcombine.low %v469_v57, %v533_v58  ;;  %v7103_v6 = vcombine.high %v597_v2, %v597_v2  ;;  %v7102_v7 = vcombine.low %v597_v2, %v597_v2  ;;  %v473_v58 = vld [vmem:[%s7804_s5 + $0x8b0] sm:$0xff] }
  0xb1   : > { %v7105_v8 = vcombine.high %v598_v3, %v598_v3  ;;  %v7104_v9 = vcombine.low %v598_v3, %v598_v3  ;;  %v6983_v2 = vcombine.high %v473_v58, %v537_v59 }
  0xb3   : > { %3859 = vmatpush1.bf16.msra.mxu0 %v2979_v12  ;;  %3900 = vmatpush1.bf16.msra.mxu1 %v2985_v14  ;;  %v216_v12 = vld [vmem:[%s7804_s5 + $0xa8] sm:$0xff]  ;;  %v3003_v14 = vsel %vm2893_vm0, %v7102_v7, 0  ;;  %v3009_v16 = vsel %vm2893_vm0, %v7104_v9, 0 }
  0xb4   : > { %3934 = vmatprep.subr.bf16.mxu0 %v6715_v13  ;;  %3975 = vmatprep.subr.bf16.mxu1 %v6717_v15  ;;  %v280_v13 = vld [vmem:[%s7804_s5 + $0x2a8] sm:$0xff]  ;;  %v6723_v15 = vcombine.high %v215_v10, %v279_v11 }
  0xb5   : > { %v6725_v17 = vcombine.high %v216_v12, %v280_v13 }
  0xb6   : > { %7223 = vmatmul.mubr.msk.bf16.vlgmr.msra.gmra.mrb[28].mxu0 %vm2889_vm1, %v7842_v43  ;;  %7225 = vmatmul.mubr.msk.bf16.vlgmr.msra.gmra.mrb[28].mxu1 %vm2889_vm1, %v7842_v43 }
  0xb7   : > { %3935 = vmatpush1.bf16.msra.mxu0 %v6714_v20  ;;  %3976 = vmatpush1.bf16.msra.mxu1 %v6716_v21  ;;  %v344_v20 = vld [vmem:[%s7804_s5 + $0x4a8] sm:$0xff] }
  0xb8   : > { %3936 = vmatprep.subr.bf16.mxu0 %v6843_v22  ;;  %3977 = vmatprep.subr.bf16.mxu1 %v6845_v23  ;;  %v408_v21 = vld [vmem:[%s7804_s5 + $0x6a8] sm:$0xff]  ;;  %v6722_v22 = vcombine.low %v215_v10, %v279_v11  ;;  %v6724_v23 = vcombine.low %v216_v12, %v280_v13  ;;  %v219_v12 = vld [vmem:[%s7804_s5 + $0xc0] sm:$0xff] }
  0xb9   : > { %3966 = vmatprep.mubr.bf16.mxu0 %v7700_v0  ;;  %4007 = vmatprep.mubr.bf16.mxu1 %v7700_v0  ;;  %v6853_v25 = vcombine.high %v344_v20, %v408_v21  ;;  %v283_v13 = vld [vmem:[%s7804_s5 + $0x2c0] sm:$0xff] }
  0xbb   : > { %3937 = vmatpush1.bf16.msra.mxu0 %v6842_v28  ;;  %3978 = vmatpush1.bf16.msra.mxu1 %v6844_v29  ;;  %v472_v28 = vld [vmem:[%s7804_s5 + $0x8a8] sm:$0xff] }
  0xbc   : > { %3938 = vmatprep.subr.bf16.mxu0 %v6971_v30  ;;  %3979 = vmatprep.subr.bf16.mxu1 %v6973_v31  ;;  %v536_v29 = vld [vmem:[%s7804_s5 + $0xaa8] sm:$0xff]  ;;  %v6850_v30 = vcombine.low %v343_v18, %v407_v19  ;;  %v6852_v31 = vcombine.low %v344_v20, %v408_v21  ;;  %v347_v20 = vld [vmem:[%s7804_s5 + $0x4c0] sm:$0xff] }
  0xbd   : > { %v6981_v33 = vcombine.high %v472_v28, %v536_v29  ;;  %v411_v21 = vld [vmem:[%s7804_s5 + $0x6c0] sm:$0xff] }
  0xbf   : > { %3939 = vmatpush1.bf16.msra.mxu0 %v6970_v34  ;;  %3980 = vmatpush1.bf16.msra.mxu1 %v6972_v35  ;;  %v599_v34 = vld [vmem:[%s7804_s5 + $0xca0] sm:$0x77]  ;;  %v600_v35 = vld [vmem:[%s7804_s5 + $0xca8] sm:$0x77] }
  0xc0   : > { %7226 = vmatprep.subr.msk.bf16.mxu0 %vm2893_vm0, %v7099_v36  ;;  %7228 = vmatprep.subr.msk.bf16.mxu1 %vm2893_vm0, %v7101_v38  ;;  %v6980_v36 = vcombine.low %v472_v28, %v536_v29  ;;  %v7107_v37 = vcombine.high %v599_v34, %v599_v34  ;;  %v7106_v38 = vcombine.low %v599_v34, %v599_v34  ;;  %v475_v28 = vld [vmem:[%s7804_s5 + $0x8c0] sm:$0xff] }
  0xc1   : > { %v7109_v39 = vcombine.high %v600_v35, %v600_v35  ;;  %v7108_v40 = vcombine.low %v600_v35, %v600_v35  ;;  %v539_v29 = vld [vmem:[%s7804_s5 + $0xac0] sm:$0xff] }
  0xc2   : > { %v6987_v34 = vcombine.high %v475_v28, %v539_v29 }
  0xc3   : > { %3941 = vmatpush1.bf16.msra.mxu0 %v2991_v45  ;;  %3982 = vmatpush1.bf16.msra.mxu1 %v2997_v47  ;;  %v282_v45 = vld [vmem:[%s7804_s5 + $0x2b8] sm:$0xff]  ;;  %v6727_v47 = vcombine.high %v217_v41, %v281_v42 }
  0xc4   : > { %4016 = vmatprep.subr.bf16.mxu0 %v6719_v46  ;;  %4057 = vmatprep.subr.bf16.mxu1 %v6721_v48  ;;  %v3015_v46 = vsel %vm2893_vm0, %v7106_v38, 0  ;;  %v3021_v48 = vsel %vm2893_vm0, %v7108_v40, 0  ;;  %v6729_v49 = vcombine.high %v218_v44, %v282_v45 }
  0xc6   : > { %7227 = vmatmul.mubr.msk.bf16.vlgmr.msra.gmra.mrb[32].mxu0 %vm2889_vm1, %v7842_v43  ;;  %7229 = vmatmul.mubr.msk.bf16.vlgmr.msra.gmra.mrb[32].mxu1 %vm2889_vm1, %v7842_v43 }
  0xc7   : > { %4017 = vmatpush1.bf16.msra.mxu0 %v6718_v53  ;;  %4058 = vmatpush1.bf16.msra.mxu1 %v6720_v54  ;;  %v410_v53 = vld [vmem:[%s7804_s5 + $0x6b8] sm:$0xff]  ;;  %v6726_v54 = vcombine.low %v217_v41, %v281_v42 }
  0xc8   : > { %4018 = vmatprep.subr.bf16.mxu0 %v6847_v55  ;;  %4059 = vmatprep.subr.bf16.mxu1 %v6849_v56  ;;  %v6728_v55 = vcombine.low %v218_v44, %v282_v45  ;;  %v6855_v56 = vcombine.high %v345_v50, %v409_v51  ;;  %v6857_v57 = vcombine.high %v346_v52, %v410_v53  ;;  %v221_v44 = vld [vmem:[%s7804_s5 + $0xd0] sm:$0xff] }
  0xc9   : > { %4048 = vmatprep.mubr.bf16.mxu0 %v7700_v0  ;;  %4089 = vmatprep.mubr.bf16.mxu1 %v7700_v0  ;;  %v285_v45 = vld [vmem:[%s7804_s5 + $0x2d0] sm:$0xff] }
  0xcb   : > { %4019 = vmatpush1.bf16.msra.mxu0 %v6846_v61  ;;  %4060 = vmatpush1.bf16.msra.mxu1 %v6848_v62  ;;  %v474_v61 = vld [vmem:[%s7804_s5 + $0x8b8] sm:$0xff] }
  0xcc   : > { %4020 = vmatprep.subr.bf16.mxu0 %v6975_v63  ;;  %4061 = vmatprep.subr.bf16.mxu1 %v6977_v1  ;;  %v538_v62 = vld [vmem:[%s7804_s5 + $0xab8] sm:$0xff]  ;;  %v6854_v63 = vcombine.low %v345_v50, %v409_v51  ;;  %v6856_v1 = vcombine.low %v346_v52, %v410_v53  ;;  %v349_v52 = vld [vmem:[%s7804_s5 + $0x4d0] sm:$0xff] }
  0xcd   : > { %v6985_v3 = vcombine.high %v474_v61, %v538_v62  ;;  %v6984_v7 = vcombine.low %v474_v61, %v538_v62  ;;  %v413_v53 = vld [vmem:[%s7804_s5 + $0x6d0] sm:$0xff] }
  0xce   : > { %v477_v61 = vld [vmem:[%s7804_s5 + $0x8d0] sm:$0xff] }
  0xcf   : > { %4021 = vmatpush1.bf16.msra.mxu0 %v6974_v4  ;;  %4062 = vmatpush1.bf16.msra.mxu1 %v6976_v5  ;;  %v601_v4 = vld [vmem:[%s7804_s5 + $0xcb0] sm:$0x77]  ;;  %v602_v5 = vld [vmem:[%s7804_s5 + $0xcb8] sm:$0x77] }
  0xd0   : > { %7230 = vmatprep.subr.msk.bf16.mxu0 %vm2893_vm0, %v7103_v6  ;;  %7232 = vmatprep.subr.msk.bf16.mxu1 %vm2893_vm0, %v7105_v8  ;;  %v6982_v6 = vcombine.low %v473_v58, %v537_v59  ;;  %v7111_v8 = vcombine.high %v601_v4, %v601_v4  ;;  %v7110_v9 = vcombine.low %v601_v4, %v601_v4  ;;  %v541_v62 = vld [vmem:[%s7804_s5 + $0xad0] sm:$0xff] }
  0xd1   : > { %v7113_v10 = vcombine.high %v602_v5, %v602_v5  ;;  %v7112_v11 = vcombine.low %v602_v5, %v602_v5  ;;  %v6863_v58 = vcombine.high %v349_v52, %v413_v53  ;;  %v6991_v4 = vcombine.high %v477_v61, %v541_v62 }
  0xd3   : > { %4023 = vmatpush1.bf16.msra.mxu0 %v3003_v14  ;;  %4064 = vmatpush1.bf16.msra.mxu1 %v3009_v16  ;;  %v220_v14 = vld [vmem:[%s7804_s5 + $0xc8] sm:$0xff]  ;;  %v3027_v16 = vsel %vm2893_vm0, %v7110_v9, 0  ;;  %v3033_v18 = vsel %vm2893_vm0, %v7112_v11, 0 }
  0xd4   : > { %4098 = vmatprep.subr.bf16.mxu0 %v6723_v15  ;;  %4139 = vmatprep.subr.bf16.mxu1 %v6725_v17  ;;  %v284_v15 = vld [vmem:[%s7804_s5 + $0x2c8] sm:$0xff]  ;;  %v6731_v17 = vcombine.high %v219_v12, %v283_v13 }
  0xd5   : > { %v6733_v19 = vcombine.high %v220_v14, %v284_v15 }
  0xd6   : > { %7231 = vmatmul.mubr.msk.bf16.vlgmr.msra.gmra.mrb[36].mxu0 %vm2889_vm1, %v7842_v43  ;;  %7233 = vmatmul.mubr.msk.bf16.vlgmr.msra.gmra.mrb[36].mxu1 %vm2889_vm1, %v7842_v43  ;;  %v6978_v43 = vcombine.low %v471_v26, %v535_v27  ;;  %v6859_v26 = vcombine.high %v347_v20, %v411_v21 }
  0xd7   : > { %4099 = vmatpush1.bf16.msra.mxu0 %v6722_v22  ;;  %4140 = vmatpush1.bf16.msra.mxu1 %v6724_v23  ;;  %v348_v22 = vld [vmem:[%s7804_s5 + $0x4c8] sm:$0xff] }
  0xd8   : > { %4100 = vmatprep.subr.bf16.mxu0 %v6851_v24  ;;  %4141 = vmatprep.subr.bf16.mxu1 %v6853_v25  ;;  %v412_v23 = vld [vmem:[%s7804_s5 + $0x6c8] sm:$0xff]  ;;  %v6730_v24 = vcombine.low %v219_v12, %v283_v13  ;;  %v6732_v25 = vcombine.low %v220_v14, %v284_v15  ;;  %v223_v14 = vld [vmem:[%s7804_s5 + $0xe0] sm:$0xff] }
  0xd9   : > { %4130 = vmatprep.mubr.bf16.mxu0 %v7700_v0  ;;  %4171 = vmatprep.mubr.bf16.mxu1 %v7700_v0  ;;  %v6861_v27 = vcombine.high %v348_v22, %v412_v23  ;;  %v287_v15 = vld [vmem:[%s7804_s5 + $0x2e0] sm:$0xff] }
  0xdb   : > { %4101 = vmatpush1.bf16.msra.mxu0 %v6850_v30  ;;  %4142 = vmatpush1.bf16.msra.mxu1 %v6852_v31  ;;  %v476_v30 = vld [vmem:[%s7804_s5 + $0x8c8] sm:$0xff] }
  0xdc   : > { %4102 = vmatprep.subr.bf16.mxu0 %v6979_v32  ;;  %4143 = vmatprep.subr.bf16.mxu1 %v6981_v33  ;;  %v540_v31 = vld [vmem:[%s7804_s5 + $0xac8] sm:$0xff]  ;;  %v6858_v32 = vcombine.low %v347_v20, %v411_v21  ;;  %v6860_v33 = vcombine.low %v348_v22, %v412_v23  ;;  %v351_v22 = vld [vmem:[%s7804_s5 + $0x4e0] sm:$0xff] }
  0xdd   : > { %v6989_v35 = vcombine.high %v476_v30, %v540_v31  ;;  %v6988_v38 = vcombine.low %v476_v30, %v540_v31  ;;  %v415_v23 = vld [vmem:[%s7804_s5 + $0x6e0] sm:$0xff] }
  0xde   : > { %v479_v30 = vld [vmem:[%s7804_s5 + $0x8e0] sm:$0xff] }
  0xdf   : > { %4103 = vmatpush1.bf16.msra.mxu0 %v6978_v43  ;;  %4144 = vmatpush1.bf16.msra.mxu1 %v6980_v36  ;;  %v603_v43 = vld [vmem:[%s7804_s5 + $0xcc0] sm:$0x77]  ;;  %v604_v36 = vld [vmem:[%s7804_s5 + $0xcc8] sm:$0x77] }
  0xe0   : > { %7234 = vmatprep.subr.msk.bf16.mxu0 %vm2893_vm0, %v7107_v37  ;;  %7236 = vmatprep.subr.msk.bf16.mxu1 %vm2893_vm0, %v7109_v39  ;;  %v6986_v37 = vcombine.low %v475_v28, %v539_v29  ;;  %v7115_v39 = vcombine.high %v603_v43, %v603_v43  ;;  %v7114_v40 = vcombine.low %v603_v43, %v603_v43  ;;  %v543_v31 = vld [vmem:[%s7804_s5 + $0xae0] sm:$0xff] }
  0xe1   : > { %v7117_v41 = vcombine.high %v604_v36, %v604_v36  ;;  %v7116_v42 = vcombine.low %v604_v36, %v604_v36  ;;  %v6867_v28 = vcombine.high %v351_v22, %v415_v23  ;;  %v6995_v36 = vcombine.high %v479_v30, %v543_v31 }
  0xe3   : > { %4105 = vmatpush1.bf16.msra.mxu0 %v3015_v46  ;;  %4146 = vmatpush1.bf16.msra.mxu1 %v3021_v48  ;;  %v222_v46 = vld [vmem:[%s7804_s5 + $0xd8] sm:$0xff]  ;;  %v3039_v48 = vsel %vm2893_vm0, %v7114_v40, 0  ;;  %v3045_v50 = vsel %vm2893_vm0, %v7116_v42, 0 }
  0xe4   : > { %4180 = vmatprep.subr.bf16.mxu0 %v6727_v47  ;;  %4221 = vmatprep.subr.bf16.mxu1 %v6729_v49  ;;  %v286_v47 = vld [vmem:[%s7804_s5 + $0x2d8] sm:$0xff]  ;;  %v6735_v49 = vcombine.high %v221_v44, %v285_v45 }
  0xe5   : > { %v6737_v51 = vcombine.high %v222_v46, %v286_v47 }
  0xe6   : > { %7235 = vmatmul.mubr.msk.bf16.vlgmr.msra.gmra.mrb[40].mxu0 %vm2889_vm1, %v8092_v60  ;;  %7237 = vmatmul.mubr.msk.bf16.vlgmr.msra.gmra.mrb[40].mxu1 %vm2889_vm1, %v8092_v60 }
  0xe7   : > { %4181 = vmatpush1.bf16.msra.mxu0 %v6726_v54  ;;  %4222 = vmatpush1.bf16.msra.mxu1 %v6728_v55  ;;  %v350_v54 = vld [vmem:[%s7804_s5 + $0x4d8] sm:$0xff] }
  0xe8   : > { %4182 = vmatprep.subr.bf16.mxu0 %v6855_v56  ;;  %4223 = vmatprep.subr.bf16.mxu1 %v6857_v57  ;;  %v414_v55 = vld [vmem:[%s7804_s5 + $0x6d8] sm:$0xff]  ;;  %v6734_v56 = vcombine.low %v221_v44, %v285_v45  ;;  %v6736_v57 = vcombine.low %v222_v46, %v286_v47  ;;  %v608_v44 = vld [vmem:[%s7804_s5 + $0xce8] sm:$0x77] }
  0xe9   : > { %4212 = vmatprep.mubr.bf16.mxu0 %v7700_v0  ;;  %4253 = vmatprep.mubr.bf16.mxu1 %v7700_v0  ;;  %v6865_v59 = vcombine.high %v350_v54, %v414_v55 }
  0xeb   : > { %4183 = vmatpush1.bf16.msra.mxu0 %v6854_v63  ;;  %4224 = vmatpush1.bf16.msra.mxu1 %v6856_v1  ;;  %v478_v63 = vld [vmem:[%s7804_s5 + $0x8d8] sm:$0xff] }
  0xec   : > { %4184 = vmatprep.subr.bf16.mxu0 %v6983_v2  ;;  %4225 = vmatprep.subr.bf16.mxu1 %v6985_v3  ;;  %v542_v1 = vld [vmem:[%s7804_s5 + $0xad8] sm:$0xff]  ;;  %v6862_v2 = vcombine.low %v349_v52, %v413_v53  ;;  %v6864_v3 = vcombine.low %v350_v54, %v414_v55 }
  0xed   : > { %v6993_v5 = vcombine.high %v478_v63, %v542_v1  ;;  %v6992_v9 = vcombine.low %v478_v63, %v542_v1  ;;  %v225_v63 = vld [vmem:[%s7804_s5 + $0xf0] sm:$0xff] }
  0xee   : > { %v289_v1 = vld [vmem:[%s7804_s5 + $0x2f0] sm:$0xff] }
  0xef   : > { %4185 = vmatpush1.bf16.msra.mxu0 %v6982_v6  ;;  %4226 = vmatpush1.bf16.msra.mxu1 %v6984_v7  ;;  %v605_v6 = vld [vmem:[%s7804_s5 + $0xcd0] sm:$0x77]  ;;  %v606_v7 = vld [vmem:[%s7804_s5 + $0xcd8] sm:$0x77] }
  0xf0   : > { %7238 = vmatprep.subr.msk.bf16.mxu0 %vm2893_vm0, %v7111_v8  ;;  %7240 = vmatprep.subr.msk.bf16.mxu1 %vm2893_vm0, %v7113_v10  ;;  %v6990_v8 = vcombine.low %v477_v61, %v541_v62  ;;  %v7119_v10 = vcombine.high %v605_v6, %v605_v6  ;;  %v7118_v11 = vcombine.low %v605_v6, %v605_v6 }
  0xf1   : > { %v7121_v12 = vcombine.high %v606_v7, %v606_v7  ;;  %v7120_v13 = vcombine.low %v606_v7, %v606_v7  ;;  %v7125_v61 = vcombine.high %v608_v44, %v608_v44  ;;  %v7124_v62 = vcombine.low %v608_v44, %v608_v44 }
  0xf3   : > { %4187 = vmatpush1.bf16.msra.mxu0 %v3027_v16  ;;  %4228 = vmatpush1.bf16.msra.mxu1 %v3033_v18  ;;  %v224_v16 = vld [vmem:[%s7804_s5 + $0xe8] sm:$0xff]  ;;  %v3051_v18 = vsel %vm2893_vm0, %v7118_v11, 0  ;;  %v3057_v20 = vsel %vm2893_vm0, %v7120_v13, 0  ;;  %v353_v11 = vld [vmem:[%s7804_s5 + $0x4f0] sm:$0xff]  ;;  %v354_v13 = vld [vmem:[%s7804_s5 + $0x4f8] sm:$0xff] }
  0xf4   : > { %4262 = vmatprep.subr.bf16.mxu0 %v6731_v17  ;;  %4303 = vmatprep.subr.bf16.mxu1 %v6733_v19  ;;  %v288_v17 = vld [vmem:[%s7804_s5 + $0x2e8] sm:$0xff]  ;;  %v6739_v19 = vcombine.high %v223_v14, %v287_v15 }
  0xf5   : > { %v6741_v21 = vcombine.high %v224_v16, %v288_v17 }
  0xf6   : > { %7239 = vmatmul.mubr.msk.bf16.vlgmr.msra.gmra.mrb[44].mxu0 %vm2889_vm1, %v8092_v60  ;;  %7241 = vmatmul.mubr.msk.bf16.vlgmr.msra.gmra.mrb[44].mxu1 %vm2889_vm1, %v8092_v60 }
  0xf7   : > { %4263 = vmatpush1.bf16.msra.mxu0 %v6730_v24  ;;  %4304 = vmatpush1.bf16.msra.mxu1 %v6732_v25  ;;  %v352_v24 = vld [vmem:[%s7804_s5 + $0x4e8] sm:$0xff] }
  0xf8   : > { %4264 = vmatprep.subr.bf16.mxu0 %v6859_v26  ;;  %4305 = vmatprep.subr.bf16.mxu1 %v6861_v27  ;;  %v416_v25 = vld [vmem:[%s7804_s5 + $0x6e8] sm:$0xff]  ;;  %v6738_v26 = vcombine.low %v223_v14, %v287_v15  ;;  %v6740_v27 = vcombine.low %v224_v16, %v288_v17  ;;  %v418_v14 = vld [vmem:[%s7804_s5 + $0x6f8] sm:$0xff]  ;;  %v6742_v15 = vcombine.low %v225_v63, %v289_v1 }
  0xf9   : > { %4294 = vmatprep.mubr.bf16.mxu0 %v7700_v0  ;;  %4335 = vmatprep.mubr.bf16.mxu1 %v7700_v0  ;;  %v6869_v29 = vcombine.high %v352_v24, %v416_v25  ;;  %v6868_v43 = vcombine.low %v352_v24, %v416_v25  ;;  %v6872_v24 = vcombine.low %v354_v13, %v418_v14 }
  0xfb   : > { %4265 = vmatpush1.bf16.msra.mxu0 %v6858_v32  ;;  %4306 = vmatpush1.bf16.msra.mxu1 %v6860_v33  ;;  %v480_v32 = vld [vmem:[%s7804_s5 + $0x8e8] sm:$0xff] }
  0xfc   : > { %4266 = vmatprep.subr.bf16.mxu0 %v6987_v34  ;;  %4307 = vmatprep.subr.bf16.mxu1 %v6989_v35  ;;  %v544_v33 = vld [vmem:[%s7804_s5 + $0xae8] sm:$0xff]  ;;  %v8174_v34 = vpop.permute.xlu0 %646  ;;  %v6866_v35 = vcombine.low %v351_v22, %v415_v23  ;;  %v546_v22 = vld [vmem:[%s7804_s5 + $0xaf8] sm:$0xff] }
  0xff   : > { %4267 = vmatpush1.bf16.msra.mxu0 %v6986_v37  ;;  %4308 = vmatpush1.bf16.msra.mxu1 %v6988_v38  ;;  %v6997_v38 = vcombine.high %v480_v32, %v544_v33 }
 0x100   : > { %7242 = vmatprep.subr.msk.bf16.mxu0 %vm2893_vm0, %v7115_v39  ;;  %7244 = vmatprep.subr.msk.bf16.mxu1 %vm2893_vm0, %v7117_v41  ;;  %v607_v39 = vld [vmem:[%s7804_s5 + $0xce0] sm:$0x77] }
 0x101   : > { %v7123_v55 = vcombine.high %v607_v39, %v607_v39 }
 0x103   : > { %4269 = vmatpush1.bf16.msra.mxu0 %v3039_v48  ;;  %4310 = vmatpush1.bf16.msra.mxu1 %v3045_v50  ;;  %v6996_v50 = vcombine.low %v480_v32, %v544_v33  ;;  %v610_v32 = vld [vmem:[%s7804_s5 + $0xcf8] sm:$0x77] }
 0x104   : > { %4344 = vmatprep.subr.bf16.mxu0 %v6735_v49  ;;  %4385 = vmatprep.subr.bf16.mxu1 %v6737_v51  ;;  %v6994_v49 = vcombine.low %v479_v30, %v543_v31 }
 0x106   : > { %7243 = vmatmul.mubr.msk.bf16.vlgmr.msra.gmra.mrb[48].mxu0 %vm2889_vm1, %v8092_v60  ;;  %7245 = vmatmul.mubr.msk.bf16.vlgmr.msra.gmra.mrb[48].mxu1 %vm2889_vm1, %v8092_v60 }
 0x107   : > { %4345 = vmatpush1.bf16.msra.mxu0 %v6734_v56  ;;  %4386 = vmatpush1.bf16.msra.mxu1 %v6736_v57  ;;  %v7122_v56 = vcombine.low %v607_v39, %v607_v39 }
 0x108   : > { %4346 = vmatprep.subr.bf16.mxu0 %v6863_v58  ;;  %4387 = vmatprep.subr.bf16.mxu1 %v6865_v59 }
 0x109   : > { %4376 = vmatprep.mubr.bf16.mxu0 %v7700_v0  ;;  %4417 = vmatprep.mubr.bf16.mxu1 %v7700_v0  ;;  %v3063_v7 = vsel %vm2893_vm0, %v7122_v56, 0 }
 0x10b   : > { %4347 = vmatpush1.bf16.msra.mxu0 %v6862_v2  ;;  %4388 = vmatpush1.bf16.msra.mxu1 %v6864_v3  ;;  %v226_v3 = vld [vmem:[%s7804_s5 + $0xf8] sm:$0xff] }
 0x10c   : > { %4348 = vmatprep.subr.bf16.mxu0 %v6991_v4  ;;  %4389 = vmatprep.subr.bf16.mxu1 %v6993_v5  ;;  %v290_v4 = vld [vmem:[%s7804_s5 + $0x2f8] sm:$0xff] }
 0x10d   : > { %v6744_v16 = vcombine.low %v226_v3, %v290_v4 }
 0x10f   : > { %4349 = vmatpush1.bf16.msra.mxu0 %v6990_v8  ;;  %4390 = vmatpush1.bf16.msra.mxu1 %v6992_v9  ;;  %v6743_v8 = vcombine.high %v225_v63, %v289_v1  ;;  %v3069_v9 = vsel %vm2893_vm0, %v7124_v62, 0  ;;  %v355_v63 = vld [vmem:[%s7804_s5 + $0x500] sm:$0xff] }
 0x110   : > { %7246 = vmatprep.subr.msk.bf16.mxu0 %vm2893_vm0, %v7119_v10  ;;  %7248 = vmatprep.subr.msk.bf16.mxu1 %vm2893_vm0, %v7121_v12  ;;  %v6745_v10 = vcombine.high %v226_v3, %v290_v4  ;;  %v417_v12 = vld [vmem:[%s7804_s5 + $0x6f0] sm:$0xff]  ;;  %v419_v1 = vld [vmem:[%s7804_s5 + $0x700] sm:$0xff]  ;;  %v420_v3 = vld [vmem:[%s7804_s5 + $0x708] sm:$0xff] }
 0x111   : > { %v6871_v17 = vcombine.high %v353_v11, %v417_v12  ;;  %v6870_v23 = vcombine.low %v353_v11, %v417_v12  ;;  %v548_v11 = vld [vmem:[%s7804_s5 + $0xb08] sm:$0xff]  ;;  %v6874_v12 = vcombine.low %v355_v63, %v419_v1 }
 0x113   : > { %4351 = vmatpush1.bf16.msra.mxu0 %v3051_v18  ;;  %4392 = vmatpush1.bf16.msra.mxu1 %v3057_v20  ;;  %v6873_v18 = vcombine.high %v354_v13, %v418_v14  ;;  %v545_v20 = vld [vmem:[%s7804_s5 + $0xaf0] sm:$0xff] }
 0x114   : > { %4426 = vmatprep.subr.bf16.mxu0 %v6739_v19  ;;  %4467 = vmatprep.subr.bf16.mxu1 %v6741_v21  ;;  %v481_v19 = vld [vmem:[%s7804_s5 + $0x8f0] sm:$0xff]  ;;  %v482_v21 = vld [vmem:[%s7804_s5 + $0x8f8] sm:$0xff] }
 0x115   : > { %v6999_v25 = vcombine.high %v481_v19, %v545_v20 }
 0x116   : > { %7247 = vmatmul.mubr.msk.bf16.vlgmr.msra.gmra.mrb[52].mxu0 %vm2889_vm1, %v8092_v60  ;;  %7249 = vmatmul.mubr.msk.bf16.vlgmr.msra.gmra.mrb[52].mxu1 %vm2889_vm1, %v8092_v60 }
 0x117   : > { %4427 = vmatpush1.bf16.msra.mxu0 %v6738_v26  ;;  %4468 = vmatpush1.bf16.msra.mxu1 %v6740_v27  ;;  %v7001_v27 = vcombine.high %v482_v21, %v546_v22 }
 0x118   : > { %4428 = vmatprep.subr.bf16.mxu0 %v6867_v28  ;;  %4469 = vmatprep.subr.bf16.mxu1 %v6869_v29  ;;  %v609_v28 = vld [vmem:[%s7804_s5 + $0xcf0] sm:$0x77] }
 0x119   : > { %v3312_v37 = vpop.f32.mrb[0].mxu0  ;;  %4458 = vmatprep.mubr.bf16.mxu0 %v7700_v0  ;;  %v3353_v40 = vpop.f32.mrb[0].mxu1  ;;  %4499 = vmatprep.mubr.bf16.mxu1 %v7700_v0  ;;  %v7127_v44 = vcombine.high %v609_v28, %v609_v28 }
 0x11a   : > { %v3313_v41 = vadd.f32 %v3312_v37, %v8174_v34  ;;  %v3314_v42 = vpop.f32.mrb[1].mxu0  ;;  %v3354_v46 = vadd.f32 %v3353_v40, %v8174_v34  ;;  %v3355_v47 = vpop.f32.mrb[1].mxu1  ;;  %v6998_v37 = vcombine.low %v481_v19, %v545_v20 }
 0x11b   : > { %v3315_v45 = vadd.f32 %v3314_v42, %v8174_v34  ;;  %v3316_v48 = vpop.f32.mrb[2].mxu0  ;;  %4429 = vmatpush1.bf16.msra.mxu0 %v6866_v35  ;;  %v3356_v52 = vadd.f32 %v3355_v47, %v8174_v34  ;;  %v3357_v53 = vpop.f32.mrb[2].mxu1  ;;  %4470 = vmatpush1.bf16.msra.mxu1 %v6868_v43 }
 0x11c   : > { %v5902_v51 = vmax.f32 %v3313_v41, 0.0  ;;  %v3317_v54 = vpop.f32.mrb[3].mxu0  ;;  %4430 = vmatprep.subr.bf16.mxu0 %v6995_v36  ;;  %v5904_v58 = vmax.f32 %v3354_v46, 0.0  ;;  %v3358_v59 = vpop.f32.mrb[3].mxu1  ;;  %4471 = vmatprep.subr.bf16.mxu1 %v6997_v38  ;;  %v7000_v38 = vcombine.low %v482_v21, %v546_v22  ;;  %v612_v21 = vld [vmem:[%s7804_s5 + $0xd08] sm:$0x77] }
 0x11d   : > { %v5903_v57 = vmax.f32 %v3315_v45, 0.0  ;;  %v5905_v2 = vmax.f32 %v3356_v52, 0.0  ;;  %v7126_v45 = vcombine.low %v609_v28, %v609_v28  ;;  %v291_v52 = vld [vmem:[%s7804_s5 + $0x300] sm:$0xff]  ;;  %v228_v54 = vld [vmem:[%s7804_s5 + $0x108] sm:$0xff] }
 0x11f   : > { %v7389_v5 = vpack.c.bf16 %v5903_v57, %v5902_v51  ;;  %4431 = vmatpush1.bf16.msra.mxu0 %v6994_v49  ;;  %v7390_v6 = vpack.c.bf16 %v5905_v2, %v5904_v58  ;;  %4472 = vmatpush1.bf16.msra.mxu1 %v6996_v50  ;;  %v7129_v49 = vcombine.high %v610_v32, %v610_v32  ;;  %v227_v51 = vld [vmem:[%s7804_s5 + $0x100] sm:$0xff]  ;;  %v3075_v58 = vsel %vm2893_vm0, %v7126_v45, 0  ;;  %v356_v2 = vld [vmem:[%s7804_s5 + $0x508] sm:$0xff] }
 0x120   : > { %7250 = vmatprep.subr.msk.bf16.mxu0 %vm2893_vm0, %v7123_v55  ;;  %7252 = vmatprep.subr.msk.bf16.mxu1 %vm2893_vm0, %v7125_v61  ;;  %v7128_v50 = vcombine.low %v610_v32, %v610_v32  ;;  %v292_v55 = vld [vmem:[%s7804_s5 + $0x308] sm:$0xff]  ;;  %v6747_v59 = vcombine.high %v227_v51, %v291_v52  ;;  %v6746_v4 = vcombine.low %v227_v51, %v291_v52  ;;  %v357_v51 = vld [vmem:[%s7804_s5 + $0x510] sm:$0xff] }
 0x121   : > { %6542 = vst [vmem:[%s8193_s9] sm:$0xff] %v7389_v5  ;;  %6543 = vst [vmem:[%s8193_s9 + $0x8] sm:$0xff] %v7390_v6  ;;  %v6749_v62 = vcombine.high %v228_v54, %v292_v55  ;;  %v6748_v5 = vcombine.low %v228_v54, %v292_v55  ;;  %v6875_v6 = vcombine.high %v355_v63, %v419_v1  ;;  %v421_v52 = vld [vmem:[%s7804_s5 + $0x710] sm:$0xff]  ;;  %v422_v54 = vld [vmem:[%s7804_s5 + $0x718] sm:$0xff] }
 0x122   : > { %v3081_v61 = vsel %vm2893_vm0, %v7128_v50, 0  ;;  %v6876_v13 = vcombine.low %v356_v2, %v420_v3  ;;  %v550_v63 = vld [vmem:[%s7804_s5 + $0xb18] sm:$0xff]  ;;  %v6878_v1 = vcombine.low %v357_v51, %v421_v52 }
 0x123   : > { %4433 = vmatpush1.bf16.msra.mxu0 %v3063_v7  ;;  %4474 = vmatpush1.bf16.msra.mxu1 %v3069_v9  ;;  %v6877_v7 = vcombine.high %v356_v2, %v420_v3  ;;  %v547_v9 = vld [vmem:[%s7804_s5 + $0xb00] sm:$0xff] }
 0x124   : > { %4508 = vmatprep.subr.bf16.mxu0 %v6743_v8  ;;  %4549 = vmatprep.subr.bf16.mxu1 %v6745_v10  ;;  %v483_v8 = vld [vmem:[%s7804_s5 + $0x900] sm:$0xff]  ;;  %v484_v10 = vld [vmem:[%s7804_s5 + $0x908] sm:$0xff] }
 0x125   : > { %v7003_v14 = vcombine.high %v483_v8, %v547_v9 }
 0x126   : > { %7251 = vmatmul.mubr.msk.bf16.vlgmr.msra.gmra.mrb[56].mxu0 %vm2889_vm1, %v8092_v60  ;;  %7253 = vmatmul.mubr.msk.bf16.vlgmr.msra.gmra.mrb[56].mxu1 %vm2889_vm1, %v8092_v60 }
 0x127   : > { %4509 = vmatpush1.bf16.msra.mxu0 %v6742_v15  ;;  %4550 = vmatpush1.bf16.msra.mxu1 %v6744_v16  ;;  %v7005_v16 = vcombine.high %v484_v10, %v548_v11 }
 0x128   : > { %4510 = vmatprep.subr.bf16.mxu0 %v6871_v17  ;;  %4551 = vmatprep.subr.bf16.mxu1 %v6873_v18  ;;  %v611_v17 = vld [vmem:[%s7804_s5 + $0xd00] sm:$0x77] }
 0x129   : > { %v3394_v26 = vpop.f32.mrb[4].mxu0  ;;  %4540 = vmatprep.mubr.bf16.mxu0 %v7700_v0  ;;  %v3435_v30 = vpop.f32.mrb[4].mxu1  ;;  %4581 = vmatprep.mubr.bf16.mxu1 %v7700_v0  ;;  %v7131_v32 = vcombine.high %v611_v17, %v611_v17 }
 0x12a   : > { %v3395_v29 = vadd.f32 %v3394_v26, %v8174_v34  ;;  %v3396_v31 = vpop.f32.mrb[5].mxu0  ;;  %v3436_v33 = vadd.f32 %v3435_v30, %v8174_v34  ;;  %v3437_v43 = vpop.f32.mrb[5].mxu1  ;;  %v7002_v26 = vcombine.low %v483_v8, %v547_v9 }
 0x12b   : > { %v3397_v35 = vadd.f32 %v3396_v31, %v8174_v34  ;;  %v3398_v36 = vpop.f32.mrb[6].mxu0  ;;  %4511 = vmatpush1.bf16.msra.mxu0 %v6870_v23  ;;  %v3438_v40 = vadd.f32 %v3437_v43, %v8174_v34  ;;  %v3439_v41 = vpop.f32.mrb[6].mxu1  ;;  %4552 = vmatpush1.bf16.msra.mxu1 %v6872_v24 }
 0x12c   : > { %v5906_v39 = vmax.f32 %v3395_v29, 0.0  ;;  %v3399_v42 = vpop.f32.mrb[7].mxu0  ;;  %4512 = vmatprep.subr.bf16.mxu0 %v6999_v25  ;;  %v5908_v46 = vmax.f32 %v3436_v33, 0.0  ;;  %v3440_v48 = vpop.f32.mrb[7].mxu1  ;;  %4553 = vmatprep.subr.bf16.mxu1 %v7001_v27  ;;  %v7004_v27 = vcombine.low %v484_v10, %v548_v11  ;;  %v7130_v33 = vcombine.low %v611_v17, %v611_v17  ;;  %v614_v10 = vld [vmem:[%s7804_s5 + $0xd18] sm:$0x77] }
 0x12d   : > { %v5907_v47 = vmax.f32 %v3397_v35, 0.0  ;;  %v5909_v53 = vmax.f32 %v3438_v40, 0.0  ;;  %v293_v40 = vld [vmem:[%s7804_s5 + $0x310] sm:$0xff]  ;;  %v230_v42 = vld [vmem:[%s7804_s5 + $0x118] sm:$0xff] }
 0x12f   : > { %v7391_v56 = vpack.c.bf16 %v5907_v47, %v5906_v39  ;;  %4513 = vmatpush1.bf16.msra.mxu0 %v6998_v37  ;;  %v7392_v57 = vpack.c.bf16 %v5909_v53, %v5908_v46  ;;  %4554 = vmatpush1.bf16.msra.mxu1 %v7000_v38  ;;  %v7133_v37 = vcombine.high %v612_v21, %v612_v21  ;;  %v229_v39 = vld [vmem:[%s7804_s5 + $0x110] sm:$0xff]  ;;  %v3087_v47 = vsel %vm2893_vm0, %v7130_v33, 0  ;;  %v358_v53 = vld [vmem:[%s7804_s5 + $0x518] sm:$0xff] }
 0x130   : > { %7254 = vmatprep.subr.msk.bf16.mxu0 %vm2893_vm0, %v7127_v44  ;;  %7256 = vmatprep.subr.msk.bf16.mxu1 %vm2893_vm0, %v7129_v49  ;;  %v7132_v38 = vcombine.low %v612_v21, %v612_v21  ;;  %v294_v44 = vld [vmem:[%s7804_s5 + $0x318] sm:$0xff]  ;;  %v6751_v48 = vcombine.high %v229_v39, %v293_v40  ;;  %v6750_v55 = vcombine.low %v229_v39, %v293_v40  ;;  %v359_v39 = vld [vmem:[%s7804_s5 + $0x520] sm:$0xff] }
 0x131   : > { %6544 = vst [vmem:[%s8193_s9 + $0x10] sm:$0xff] %v7391_v56  ;;  %6545 = vst [vmem:[%s8193_s9 + $0x18] sm:$0xff] %v7392_v57  ;;  %v6753_v50 = vcombine.high %v230_v42, %v294_v44  ;;  %v6752_v56 = vcombine.low %v230_v42, %v294_v44  ;;  %v6879_v57 = vcombine.high %v357_v51, %v421_v52  ;;  %v423_v40 = vld [vmem:[%s7804_s5 + $0x720] sm:$0xff]  ;;  %v424_v42 = vld [vmem:[%s7804_s5 + $0x728] sm:$0xff] }
 0x132   : > { %v3093_v49 = vsel %vm2893_vm0, %v7132_v38, 0  ;;  %v6880_v2 = vcombine.low %v358_v53, %v422_v54  ;;  %v552_v51 = vld [vmem:[%s7804_s5 + $0xb28] sm:$0xff]  ;;  %v6882_v52 = vcombine.low %v359_v39, %v423_v40 }
 0x133   : > { %4515 = vmatpush1.bf16.msra.mxu0 %v3075_v58  ;;  %4556 = vmatpush1.bf16.msra.mxu1 %v3081_v61  ;;  %v6881_v58 = vcombine.high %v358_v53, %v422_v54  ;;  %v549_v61 = vld [vmem:[%s7804_s5 + $0xb10] sm:$0xff] }
 0x134   : > { %4590 = vmatprep.subr.bf16.mxu0 %v6747_v59  ;;  %4631 = vmatprep.subr.bf16.mxu1 %v6749_v62  ;;  %v485_v59 = vld [vmem:[%s7804_s5 + $0x910] sm:$0xff]  ;;  %v486_v62 = vld [vmem:[%s7804_s5 + $0x918] sm:$0xff] }
 0x135   : > { %v7007_v3 = vcombine.high %v485_v59, %v549_v61 }
 0x136   : > { %7255 = vmatmul.mubr.msk.bf16.vlgmr.msra.gmra.mrb[60].mxu0 %vm2889_vm1, %v8092_v60  ;;  %7257 = vmatmul.mubr.msk.bf16.vlgmr.msra.gmra.mrb[60].mxu1 %vm2889_vm1, %v8092_v60 }
 0x137   : > { %4591 = vmatpush1.bf16.msra.mxu0 %v6746_v4  ;;  %4632 = vmatpush1.bf16.msra.mxu1 %v6748_v5  ;;  %v7009_v5 = vcombine.high %v486_v62, %v550_v63 }
 0x138   : > { %4592 = vmatprep.subr.bf16.mxu0 %v6875_v6  ;;  %4633 = vmatprep.subr.bf16.mxu1 %v6877_v7  ;;  %v613_v6 = vld [vmem:[%s7804_s5 + $0xd10] sm:$0x77] }
 0x139   : > { %v3476_v15 = vpop.f32.mrb[8].mxu0  ;;  %4622 = vmatprep.mubr.bf16.mxu0 %v7700_v0  ;;  %v3517_v19 = vpop.f32.mrb[8].mxu1  ;;  %4663 = vmatprep.mubr.bf16.mxu1 %v7700_v0  ;;  %v7135_v21 = vcombine.high %v613_v6, %v613_v6 }
 0x13a   : > { %v3477_v18 = vadd.f32 %v3476_v15, %v8174_v34  ;;  %v3478_v20 = vpop.f32.mrb[9].mxu0  ;;  %v3518_v22 = vadd.f32 %v3517_v19, %v8174_v34  ;;  %v3519_v24 = vpop.f32.mrb[9].mxu1  ;;  %v7006_v15 = vcombine.low %v485_v59, %v549_v61 }
 0x13b   : > { %v3479_v23 = vadd.f32 %v3478_v20, %v8174_v34  ;;  %v3480_v25 = vpop.f32.mrb[10].mxu0  ;;  %4593 = vmatpush1.bf16.msra.mxu0 %v6874_v12  ;;  %v3520_v29 = vadd.f32 %v3519_v24, %v8174_v34  ;;  %v3521_v30 = vpop.f32.mrb[10].mxu1  ;;  %4634 = vmatpush1.bf16.msra.mxu1 %v6876_v13 }
 0x13c   : > { %v5910_v28 = vmax.f32 %v3477_v18, 0.0  ;;  %v3481_v31 = vpop.f32.mrb[11].mxu0  ;;  %4594 = vmatprep.subr.bf16.mxu0 %v7003_v14  ;;  %v5912_v35 = vmax.f32 %v3518_v22, 0.0  ;;  %v3522_v36 = vpop.f32.mrb[11].mxu1  ;;  %4635 = vmatprep.subr.bf16.mxu1 %v7005_v16  ;;  %v7008_v16 = vcombine.low %v486_v62, %v550_v63  ;;  %v7134_v22 = vcombine.low %v613_v6, %v613_v6  ;;  %v616_v62 = vld [vmem:[%s7804_s5 + $0xd28] sm:$0x77] }
 0x13d   : > { %v5911_v43 = vmax.f32 %v3479_v23, 0.0  ;;  %v5913_v41 = vmax.f32 %v3520_v29, 0.0  ;;  %v295_v29 = vld [vmem:[%s7804_s5 + $0x320] sm:$0xff]  ;;  %v232_v31 = vld [vmem:[%s7804_s5 + $0x128] sm:$0xff] }
 0x13f   : > { %v7393_v45 = vpack.c.bf16 %v5911_v43, %v5910_v28  ;;  %4595 = vmatpush1.bf16.msra.mxu0 %v7002_v26  ;;  %v7394_v46 = vpack.c.bf16 %v5913_v41, %v5912_v35  ;;  %4636 = vmatpush1.bf16.msra.mxu1 %v7004_v27  ;;  %v7137_v26 = vcombine.high %v614_v10, %v614_v10  ;;  %v231_v28 = vld [vmem:[%s7804_s5 + $0x120] sm:$0xff]  ;;  %v3099_v43 = vsel %vm2893_vm0, %v7134_v22, 0  ;;  %v360_v41 = vld [vmem:[%s7804_s5 + $0x528] sm:$0xff] }
 0x140   : > { %7258 = vmatprep.subr.msk.bf16.mxu0 %vm2893_vm0, %v7131_v32  ;;  %7260 = vmatprep.subr.msk.bf16.mxu1 %vm2893_vm0, %v7133_v37  ;;  %v7136_v27 = vcombine.low %v614_v10, %v614_v10  ;;  %v296_v32 = vld [vmem:[%s7804_s5 + $0x328] sm:$0xff]  ;;  %v6755_v36 = vcombine.high %v231_v28, %v295_v29  ;;  %v6754_v44 = vcombine.low %v231_v28, %v295_v29  ;;  %v425_v28 = vld [vmem:[%s7804_s5 + $0x730] sm:$0xff]  ;;  %v362_v29 = vld [vmem:[%s7804_s5 + $0x538] sm:$0xff] }
 0x141   : > { %6546 = vst [vmem:[%s8193_s9 + $0x20] sm:$0xff] %v7393_v45  ;;  %6547 = vst [vmem:[%s8193_s9 + $0x28] sm:$0xff] %v7394_v46  ;;  %v6757_v38 = vcombine.high %v232_v31, %v296_v32  ;;  %v6756_v45 = vcombine.low %v232_v31, %v296_v32  ;;  %v6883_v46 = vcombine.high %v359_v39, %v423_v40  ;;  %v554_v39 = vld [vmem:[%s7804_s5 + $0xb38] sm:$0xff] }
 0x142   : > { %v3105_v37 = vsel %vm2893_vm0, %v7136_v27, 0  ;;  %v6884_v53 = vcombine.low %v360_v41, %v424_v42  ;;  %v361_v27 = vld [vmem:[%s7804_s5 + $0x530] sm:$0xff] }
 0x143   : > { %4597 = vmatpush1.bf16.msra.mxu0 %v3087_v47  ;;  %4638 = vmatpush1.bf16.msra.mxu1 %v3093_v49  ;;  %v6885_v47 = vcombine.high %v360_v41, %v424_v42  ;;  %v551_v49 = vld [vmem:[%s7804_s5 + $0xb20] sm:$0xff]  ;;  %v6886_v40 = vcombine.low %v361_v27, %v425_v28 }
 0x144   : > { %4672 = vmatprep.subr.bf16.mxu0 %v6751_v48  ;;  %4713 = vmatprep.subr.bf16.mxu1 %v6753_v50  ;;  %v487_v48 = vld [vmem:[%s7804_s5 + $0x920] sm:$0xff]  ;;  %v488_v50 = vld [vmem:[%s7804_s5 + $0x928] sm:$0xff] }
 0x145   : > { %v7011_v54 = vcombine.high %v487_v48, %v551_v49 }
 0x146   : > { %7259 = vmatmul.mubr.msk.bf16.vlgmr.msra.gmra.mrb[64].mxu0 %vm2889_vm1, %v8092_v60  ;;  %7261 = vmatmul.mubr.msk.bf16.vlgmr.msra.gmra.mrb[64].mxu1 %vm2889_vm1, %v8092_v60 }
 0x147   : > { %4673 = vmatpush1.bf16.msra.mxu0 %v6750_v55  ;;  %4714 = vmatpush1.bf16.msra.mxu1 %v6752_v56  ;;  %v7013_v56 = vcombine.high %v488_v50, %v552_v51 }
 0x148   : > { %4674 = vmatprep.subr.bf16.mxu0 %v6879_v57  ;;  %4715 = vmatprep.subr.bf16.mxu1 %v6881_v58  ;;  %v615_v57 = vld [vmem:[%s7804_s5 + $0xd20] sm:$0x77] }
 0x149   : > { %v3558_v4 = vpop.f32.mrb[12].mxu0  ;;  %4704 = vmatprep.mubr.bf16.mxu0 %v7700_v0  ;;  %v3599_v8 = vpop.f32.mrb[12].mxu1  ;;  %4745 = vmatprep.mubr.bf16.mxu1 %v7700_v0  ;;  %v7138_v10 = vcombine.low %v615_v57, %v615_v57 }
 0x14a   : > { %v3559_v7 = vadd.f32 %v3558_v4, %v8174_v34  ;;  %v3560_v9 = vpop.f32.mrb[13].mxu0  ;;  %v3600_v11 = vadd.f32 %v3599_v8, %v8174_v34  ;;  %v3601_v13 = vpop.f32.mrb[13].mxu1  ;;  %v7012_v4 = vcombine.low %v488_v50, %v552_v51  ;;  %v618_v50 = vld [vmem:[%s7804_s5 + $0xd38] sm:$0x77] }
 0x14b   : > { %v3561_v12 = vadd.f32 %v3560_v9, %v8174_v34  ;;  %v3562_v14 = vpop.f32.mrb[14].mxu0  ;;  %4675 = vmatpush1.bf16.msra.mxu0 %v6878_v1  ;;  %v3602_v18 = vadd.f32 %v3601_v13, %v8174_v34  ;;  %v3603_v19 = vpop.f32.mrb[14].mxu1  ;;  %4716 = vmatpush1.bf16.msra.mxu1 %v6880_v2  ;;  %v7139_v9 = vcombine.high %v615_v57, %v615_v57 }
 0x14c   : > { %v5914_v17 = vmax.f32 %v3559_v7, 0.0  ;;  %v3563_v20 = vpop.f32.mrb[15].mxu0  ;;  %4676 = vmatprep.subr.bf16.mxu0 %v7007_v3  ;;  %v5916_v23 = vmax.f32 %v3600_v11, 0.0  ;;  %v3604_v25 = vpop.f32.mrb[15].mxu1  ;;  %4717 = vmatprep.subr.bf16.mxu1 %v7009_v5  ;;  %v7010_v3 = vcombine.low %v487_v48, %v551_v49  ;;  %v7141_v14 = vcombine.high %v616_v62, %v616_v62  ;;  %v234_v19 = vld [vmem:[%s7804_s5 + $0x138] sm:$0xff] }
 0x14d   : > { %v5915_v24 = vmax.f32 %v3561_v12, 0.0  ;;  %v5917_v30 = vmax.f32 %v3602_v18, 0.0  ;;  %v298_v20 = vld [vmem:[%s7804_s5 + $0x338] sm:$0xff] }
 0x14e   : > { %v6760_v32 = vcombine.low %v234_v19, %v298_v20 }
 0x14f   : > { %v7395_v33 = vpack.c.bf16 %v5915_v24, %v5914_v17  ;;  %4677 = vmatpush1.bf16.msra.mxu0 %v7006_v15  ;;  %v7396_v35 = vpack.c.bf16 %v5917_v30, %v5916_v23  ;;  %4718 = vmatpush1.bf16.msra.mxu1 %v7008_v16  ;;  %v7140_v15 = vcombine.low %v616_v62, %v616_v62  ;;  %v233_v16 = vld [vmem:[%s7804_s5 + $0x130] sm:$0xff]  ;;  %v3111_v23 = vsel %vm2893_vm0, %v7138_v10, 0  ;;  %v426_v30 = vld [vmem:[%s7804_s5 + $0x738] sm:$0xff] }
 0x150   : > { %7262 = vmatprep.subr.msk.bf16.mxu0 %vm2893_vm0, %v7135_v21  ;;  %7264 = vmatprep.subr.msk.bf16.mxu1 %vm2893_vm0, %v7137_v26  ;;  %v297_v17 = vld [vmem:[%s7804_s5 + $0x330] sm:$0xff]  ;;  %v6761_v26 = vcombine.high %v234_v19, %v298_v20  ;;  %v6888_v41 = vcombine.low %v362_v29, %v426_v30  ;;  %v428_v19 = vld [vmem:[%s7804_s5 + $0x748] sm:$0xff] }
 0x151   : > { %6548 = vst [vmem:[%s8193_s9 + $0x30] sm:$0xff] %v7395_v33  ;;  %6549 = vst [vmem:[%s8193_s9 + $0x38] sm:$0xff] %v7396_v35  ;;  %v6759_v24 = vcombine.high %v233_v16, %v297_v17  ;;  %v3117_v25 = vsel %vm2893_vm0, %v7140_v15, 0  ;;  %v6758_v31 = vcombine.low %v233_v16, %v297_v17  ;;  %v6887_v33 = vcombine.high %v361_v27, %v425_v28  ;;  %v363_v16 = vld [vmem:[%s7804_s5 + $0x540] sm:$0xff]  ;;  %v556_v27 = vld [vmem:[%s7804_s5 + $0xb48] sm:$0xff] }
 0x152   : > { %v6889_v35 = vcombine.high %v362_v29, %v426_v30  ;;  %v427_v17 = vld [vmem:[%s7804_s5 + $0x740] sm:$0xff] }
 0x153   : > { %4679 = vmatpush1.bf16.msra.mxu0 %v3099_v43  ;;  %4720 = vmatpush1.bf16.msra.mxu1 %v3105_v37  ;;  %v489_v43 = vld [vmem:[%s7804_s5 + $0x930] sm:$0xff]  ;;  %v8332_v37 = vld [vmem:[%s8820_s0] sm:$0xf]  ;;  %v6890_v28 = vcombine.low %v363_v16, %v427_v17 }
 0x154   : > { %4754 = vmatprep.subr.bf16.mxu0 %v6755_v36  ;;  %4795 = vmatprep.subr.bf16.mxu1 %v6757_v38  ;;  %v553_v36 = vld [vmem:[%s7804_s5 + $0xb30] sm:$0xff]  ;;  %v490_v38 = vld [vmem:[%s7804_s5 + $0x938] sm:$0xff] }
 0x155   : > { %v7015_v42 = vcombine.high %v489_v43, %v553_v36 }
 0x156   : > { %7263 = vmatmul.mubr.msk.bf16.vlgmr.msra.gmra.mrb[68].mxu0 %vm2889_vm1, %v8092_v60  ;;  %7265 = vmatmul.mubr.msk.bf16.vlgmr.msra.gmra.mrb[68].mxu1 %vm2889_vm1, %v8092_v60 }
 0x157   : > { %4755 = vmatpush1.bf16.msra.mxu0 %v6754_v44  ;;  %4796 = vmatpush1.bf16.msra.mxu1 %v6756_v45  ;;  %v7017_v45 = vcombine.high %v490_v38, %v554_v39 }
 0x158   : > { %4756 = vmatprep.subr.bf16.mxu0 %v6883_v46  ;;  %4797 = vmatprep.subr.bf16.mxu1 %v6885_v47  ;;  %v617_v46 = vld [vmem:[%s7804_s5 + $0xd30] sm:$0x77] }
 0x159   : > { %v3640_v55 = vpop.f32.mrb[16].mxu0  ;;  %4786 = vmatprep.mubr.bf16.mxu0 %v7700_v0  ;;  %v3681_v59 = vpop.f32.mrb[16].mxu1  ;;  %4827 = vmatprep.mubr.bf16.mxu1 %v7700_v0  ;;  %v7143_v62 = vcombine.high %v617_v46, %v617_v46 }
 0x15a   : > { %v3641_v58 = vadd.f32 %v3640_v55, %v8174_v34  ;;  %v3642_v61 = vpop.f32.mrb[17].mxu0  ;;  %v3682_v60 = vadd.f32 %v3681_v59, %v8174_v34  ;;  %v3683_v1 = vpop.f32.mrb[17].mxu1  ;;  %v7014_v55 = vcombine.low %v489_v43, %v553_v36 }
 0x15b   : > { %v3643_v63 = vadd.f32 %v3642_v61, %v8174_v34  ;;  %v3644_v2 = vpop.f32.mrb[18].mxu0  ;;  %4757 = vmatpush1.bf16.msra.mxu0 %v6882_v52  ;;  %v3684_v6 = vadd.f32 %v3683_v1, %v8174_v34  ;;  %v3685_v7 = vpop.f32.mrb[18].mxu1  ;;  %4798 = vmatpush1.bf16.msra.mxu1 %v6884_v53 }
 0x15c   : > { %v5918_v5 = vmax.f32 %v3641_v58, 0.0  ;;  %v3645_v8 = vpop.f32.mrb[19].mxu0  ;;  %4758 = vmatprep.subr.bf16.mxu0 %v7011_v54  ;;  %v5920_v11 = vmax.f32 %v3682_v60, 0.0  ;;  %v3686_v13 = vpop.f32.mrb[19].mxu1  ;;  %4799 = vmatprep.subr.bf16.mxu1 %v7013_v56  ;;  %v7016_v56 = vcombine.low %v490_v38, %v554_v39  ;;  %v7142_v60 = vcombine.low %v617_v46, %v617_v46  ;;  %v620_v38 = vld [vmem:[%s7804_s5 + $0xd48] sm:$0x77] }
 0x15d   : > { %v5919_v12 = vmax.f32 %v3643_v63, 0.0  ;;  %v5921_v18 = vmax.f32 %v3684_v6, 0.0  ;;  %v299_v6 = vld [vmem:[%s7804_s5 + $0x340] sm:$0xff]  ;;  %v236_v8 = vld [vmem:[%s7804_s5 + $0x148] sm:$0xff] }
 0x15f   : > { %v7397_v21 = vpack.c.bf16 %v5919_v12, %v5918_v5  ;;  %4759 = vmatpush1.bf16.msra.mxu0 %v7010_v3  ;;  %v7398_v22 = vpack.c.bf16 %v5921_v18, %v5920_v11  ;;  %4800 = vmatpush1.bf16.msra.mxu1 %v7012_v4  ;;  %v7145_v3 = vcombine.high %v618_v50, %v618_v50  ;;  %v235_v5 = vld [vmem:[%s7804_s5 + $0x140] sm:$0xff]  ;;  %v3123_v12 = vsel %vm2893_vm0, %v7142_v60, 0  ;;  %v364_v18 = vld [vmem:[%s7804_s5 + $0x548] sm:$0xff] }
 0x160   : > { %7266 = vmatprep.subr.msk.bf16.mxu0 %vm2893_vm0, %v7139_v9  ;;  %7268 = vmatprep.subr.msk.bf16.mxu1 %vm2893_vm0, %v7141_v14  ;;  %v7144_v4 = vcombine.low %v618_v50, %v618_v50  ;;  %v300_v9 = vld [vmem:[%s7804_s5 + $0x348] sm:$0xff]  ;;  %v6763_v13 = vcombine.high %v235_v5, %v299_v6  ;;  %v6762_v20 = vcombine.low %v235_v5, %v299_v6  ;;  %v365_v5 = vld [vmem:[%s7804_s5 + $0x550] sm:$0xff] }
 0x161   : > { %6550 = vst [vmem:[%s8193_s9 + $0x40] sm:$0xff] %v7397_v21  ;;  %6551 = vst [vmem:[%s8193_s9 + $0x48] sm:$0xff] %v7398_v22  ;;  %v6765_v15 = vcombine.high %v236_v8, %v300_v9  ;;  %v6764_v21 = vcombine.low %v236_v8, %v300_v9  ;;  %v6891_v22 = vcombine.high %v363_v16, %v427_v17  ;;  %v429_v6 = vld [vmem:[%s7804_s5 + $0x750] sm:$0xff]  ;;  %v430_v8 = vld [vmem:[%s7804_s5 + $0x758] sm:$0xff] }
 0x162   : > { %v3129_v14 = vsel %vm2893_vm0, %v7144_v4, 0  ;;  %v6892_v29 = vcombine.low %v364_v18, %v428_v19  ;;  %v558_v16 = vld [vmem:[%s7804_s5 + $0xb58] sm:$0xff]  ;;  %v6894_v17 = vcombine.low %v365_v5, %v429_v6 }
 0x163   : > { %4761 = vmatpush1.bf16.msra.mxu0 %v3111_v23  ;;  %4802 = vmatpush1.bf16.msra.mxu1 %v3117_v25  ;;  %v6893_v23 = vcombine.high %v364_v18, %v428_v19  ;;  %v555_v25 = vld [vmem:[%s7804_s5 + $0xb40] sm:$0xff] }
 0x164   : > { %4836 = vmatprep.subr.bf16.mxu0 %v6759_v24  ;;  %4877 = vmatprep.subr.bf16.mxu1 %v6761_v26  ;;  %v491_v24 = vld [vmem:[%s7804_s5 + $0x940] sm:$0xff]  ;;  %v492_v26 = vld [vmem:[%s7804_s5 + $0x948] sm:$0xff] }
 0x165   : > { %v7019_v30 = vcombine.high %v491_v24, %v555_v25 }
 0x166   : > { %7267 = vmatmul.mubr.msk.bf16.vlgmr.msra.gmra.mrb[72].mxu0 %vm2889_vm1, %v8332_v37  ;;  %7269 = vmatmul.mubr.msk.bf16.vlgmr.msra.gmra.mrb[72].mxu1 %vm2889_vm1, %v8332_v37 }
 0x167   : > { %4837 = vmatpush1.bf16.msra.mxu0 %v6758_v31  ;;  %4878 = vmatpush1.bf16.msra.mxu1 %v6760_v32  ;;  %v7021_v32 = vcombine.high %v492_v26, %v556_v27 }
 0x168   : > { %4838 = vmatprep.subr.bf16.mxu0 %v6887_v33  ;;  %4879 = vmatprep.subr.bf16.mxu1 %v6889_v35  ;;  %v619_v33 = vld [vmem:[%s7804_s5 + $0xd40] sm:$0x77] }
 0x169   : > { %v3722_v44 = vpop.f32.mrb[20].mxu0  ;;  %4868 = vmatprep.mubr.bf16.mxu0 %v7700_v0  ;;  %v3763_v48 = vpop.f32.mrb[20].mxu1  ;;  %4909 = vmatprep.mubr.bf16.mxu1 %v7700_v0  ;;  %v7147_v50 = vcombine.high %v619_v33, %v619_v33 }
 0x16a   : > { %v3723_v47 = vadd.f32 %v3722_v44, %v8174_v34  ;;  %v3724_v49 = vpop.f32.mrb[21].mxu0  ;;  %v3764_v51 = vadd.f32 %v3763_v48, %v8174_v34  ;;  %v3765_v53 = vpop.f32.mrb[21].mxu1  ;;  %v7018_v44 = vcombine.low %v491_v24, %v555_v25 }
 0x16b   : > { %v3725_v52 = vadd.f32 %v3724_v49, %v8174_v34  ;;  %v3726_v54 = vpop.f32.mrb[22].mxu0  ;;  %4839 = vmatpush1.bf16.msra.mxu0 %v6886_v40  ;;  %v3766_v58 = vadd.f32 %v3765_v53, %v8174_v34  ;;  %v3767_v59 = vpop.f32.mrb[22].mxu1  ;;  %4880 = vmatpush1.bf16.msra.mxu1 %v6888_v41 }
 0x16c   : > { %v5922_v57 = vmax.f32 %v3723_v47, 0.0  ;;  %v3727_v61 = vpop.f32.mrb[23].mxu0  ;;  %4840 = vmatprep.subr.bf16.mxu0 %v7015_v42  ;;  %v5924_v63 = vmax.f32 %v3764_v51, 0.0  ;;  %v3768_v2 = vpop.f32.mrb[23].mxu1  ;;  %4881 = vmatprep.subr.bf16.mxu1 %v7017_v45  ;;  %v7020_v45 = vcombine.low %v492_v26, %v556_v27  ;;  %v7146_v51 = vcombine.low %v619_v33, %v619_v33  ;;  %v622_v26 = vld [vmem:[%s7804_s5 + $0xd58] sm:$0x77] }
 0x16d   : > { %v5923_v1 = vmax.f32 %v3725_v52, 0.0  ;;  %v5925_v7 = vmax.f32 %v3766_v58, 0.0  ;;  %v301_v58 = vld [vmem:[%s7804_s5 + $0x350] sm:$0xff]  ;;  %v238_v61 = vld [vmem:[%s7804_s5 + $0x158] sm:$0xff] }
 0x16f   : > { %v7399_v10 = vpack.c.bf16 %v5923_v1, %v5922_v57  ;;  %4841 = vmatpush1.bf16.msra.mxu0 %v7014_v55  ;;  %v7400_v11 = vpack.c.bf16 %v5925_v7, %v5924_v63  ;;  %4882 = vmatpush1.bf16.msra.mxu1 %v7016_v56  ;;  %v7149_v55 = vcombine.high %v620_v38, %v620_v38  ;;  %v237_v57 = vld [vmem:[%s7804_s5 + $0x150] sm:$0xff]  ;;  %v3135_v1 = vsel %vm2893_vm0, %v7146_v51, 0  ;;  %v366_v7 = vld [vmem:[%s7804_s5 + $0x558] sm:$0xff] }
 0x170   : > { %7270 = vmatprep.subr.msk.bf16.mxu0 %vm2893_vm0, %v7143_v62  ;;  %7272 = vmatprep.subr.msk.bf16.mxu1 %vm2893_vm0, %v7145_v3  ;;  %v7148_v56 = vcombine.low %v620_v38, %v620_v38  ;;  %v302_v62 = vld [vmem:[%s7804_s5 + $0x358] sm:$0xff]  ;;  %v6767_v2 = vcombine.high %v237_v57, %v301_v58  ;;  %v6766_v9 = vcombine.low %v237_v57, %v301_v58  ;;  %v367_v57 = vld [vmem:[%s7804_s5 + $0x560] sm:$0xff] }
 0x171   : > { %6552 = vst [vmem:[%s8193_s9 + $0x50] sm:$0xff] %v7399_v10  ;;  %6553 = vst [vmem:[%s8193_s9 + $0x58] sm:$0xff] %v7400_v11  ;;  %v6769_v4 = vcombine.high %v238_v61, %v302_v62  ;;  %v6768_v10 = vcombine.low %v238_v61, %v302_v62  ;;  %v6895_v11 = vcombine.high %v365_v5, %v429_v6  ;;  %v431_v58 = vld [vmem:[%s7804_s5 + $0x760] sm:$0xff]  ;;  %v432_v61 = vld [vmem:[%s7804_s5 + $0x768] sm:$0xff] }
 0x172   : > { %v3141_v3 = vsel %vm2893_vm0, %v7148_v56, 0  ;;  %v6896_v18 = vcombine.low %v366_v7, %v430_v8  ;;  %v560_v5 = vld [vmem:[%s7804_s5 + $0xb68] sm:$0xff]  ;;  %v6898_v6 = vcombine.low %v367_v57, %v431_v58 }
 0x173   : > { %4843 = vmatpush1.bf16.msra.mxu0 %v3123_v12  ;;  %4884 = vmatpush1.bf16.msra.mxu1 %v3129_v14  ;;  %v6897_v12 = vcombine.high %v366_v7, %v430_v8  ;;  %v557_v14 = vld [vmem:[%s7804_s5 + $0xb50] sm:$0xff] }
 0x174   : > { %4918 = vmatprep.subr.bf16.mxu0 %v6763_v13  ;;  %4959 = vmatprep.subr.bf16.mxu1 %v6765_v15  ;;  %v493_v13 = vld [vmem:[%s7804_s5 + $0x950] sm:$0xff]  ;;  %v494_v15 = vld [vmem:[%s7804_s5 + $0x958] sm:$0xff] }
 0x175   : > { %v7023_v19 = vcombine.high %v493_v13, %v557_v14 }
 0x176   : > { %7271 = vmatmul.mubr.msk.bf16.vlgmr.msra.gmra.mrb[76].mxu0 %vm2889_vm1, %v8332_v37  ;;  %7273 = vmatmul.mubr.msk.bf16.vlgmr.msra.gmra.mrb[76].mxu1 %vm2889_vm1, %v8332_v37 }
 0x177   : > { %4919 = vmatpush1.bf16.msra.mxu0 %v6762_v20  ;;  %4960 = vmatpush1.bf16.msra.mxu1 %v6764_v21  ;;  %v7025_v21 = vcombine.high %v494_v15, %v558_v16 }
 0x178   : > { %4920 = vmatprep.subr.bf16.mxu0 %v6891_v22  ;;  %4961 = vmatprep.subr.bf16.mxu1 %v6893_v23  ;;  %v621_v22 = vld [vmem:[%s7804_s5 + $0xd50] sm:$0x77] }
 0x179   : > { %v3804_v31 = vpop.f32.mrb[24].mxu0  ;;  %4950 = vmatprep.mubr.bf16.mxu0 %v7700_v0  ;;  %v3845_v43 = vpop.f32.mrb[24].mxu1  ;;  %4991 = vmatprep.mubr.bf16.mxu1 %v7700_v0  ;;  %v7151_v38 = vcombine.high %v621_v22, %v621_v22 }
 0x17a   : > { %v3805_v35 = vadd.f32 %v3804_v31, %v8174_v34  ;;  %v3806_v36 = vpop.f32.mrb[25].mxu0  ;;  %v3846_v39 = vadd.f32 %v3845_v43, %v8174_v34  ;;  %v3847_v41 = vpop.f32.mrb[25].mxu1  ;;  %v7022_v31 = vcombine.low %v493_v13, %v557_v14 }
 0x17b   : > { %v3807_v40 = vadd.f32 %v3806_v36, %v8174_v34  ;;  %v3808_v42 = vpop.f32.mrb[26].mxu0  ;;  %4921 = vmatpush1.bf16.msra.mxu0 %v6890_v28  ;;  %v3848_v47 = vadd.f32 %v3847_v41, %v8174_v34  ;;  %v3849_v48 = vpop.f32.mrb[26].mxu1  ;;  %4962 = vmatpush1.bf16.msra.mxu1 %v6892_v29 }
 0x17c   : > { %v5926_v46 = vmax.f32 %v3805_v35, 0.0  ;;  %v3809_v49 = vpop.f32.mrb[27].mxu0  ;;  %4922 = vmatprep.subr.bf16.mxu0 %v7019_v30  ;;  %v5928_v52 = vmax.f32 %v3846_v39, 0.0  ;;  %v3850_v54 = vpop.f32.mrb[27].mxu1  ;;  %4963 = vmatprep.subr.bf16.mxu1 %v7021_v32  ;;  %v7024_v32 = vcombine.low %v494_v15, %v558_v16  ;;  %v7150_v39 = vcombine.low %v621_v22, %v621_v22  ;;  %v624_v15 = vld [vmem:[%s7804_s5 + $0xd68] sm:$0x77] }
 0x17d   : > { %v5927_v53 = vmax.f32 %v3807_v40, 0.0  ;;  %v5929_v59 = vmax.f32 %v3848_v47, 0.0  ;;  %v303_v47 = vld [vmem:[%s7804_s5 + $0x360] sm:$0xff]  ;;  %v240_v49 = vld [vmem:[%s7804_s5 + $0x168] sm:$0xff] }
 0x17f   : > { %v7401_v60 = vpack.c.bf16 %v5927_v53, %v5926_v46  ;;  %4923 = vmatpush1.bf16.msra.mxu0 %v7018_v44  ;;  %v7402_v63 = vpack.c.bf16 %v5929_v59, %v5928_v52  ;;  %4964 = vmatpush1.bf16.msra.mxu1 %v7020_v45  ;;  %v7153_v44 = vcombine.high %v622_v26, %v622_v26  ;;  %v239_v46 = vld [vmem:[%s7804_s5 + $0x160] sm:$0xff]  ;;  %v3147_v53 = vsel %vm2893_vm0, %v7150_v39, 0  ;;  %v368_v59 = vld [vmem:[%s7804_s5 + $0x568] sm:$0xff] }
 0x180   : > { %7274 = vmatprep.subr.msk.bf16.mxu0 %vm2893_vm0, %v7147_v50  ;;  %7276 = vmatprep.subr.msk.bf16.mxu1 %vm2893_vm0, %v7149_v55  ;;  %v7152_v45 = vcombine.low %v622_v26, %v622_v26  ;;  %v304_v50 = vld [vmem:[%s7804_s5 + $0x368] sm:$0xff]  ;;  %v6771_v54 = vcombine.high %v239_v46, %v303_v47  ;;  %v6770_v62 = vcombine.low %v239_v46, %v303_v47  ;;  %v369_v46 = vld [vmem:[%s7804_s5 + $0x570] sm:$0xff] }
 0x181   : > { %6554 = vst [vmem:[%s8193_s9 + $0x60] sm:$0xff] %v7401_v60  ;;  %6555 = vst [vmem:[%s8193_s9 + $0x68] sm:$0xff] %v7402_v63  ;;  %v6773_v56 = vcombine.high %v240_v49, %v304_v50  ;;  %v6772_v60 = vcombine.low %v240_v49, %v304_v50  ;;  %v6899_v63 = vcombine.high %v367_v57, %v431_v58  ;;  %v433_v47 = vld [vmem:[%s7804_s5 + $0x770] sm:$0xff]  ;;  %v434_v49 = vld [vmem:[%s7804_s5 + $0x778] sm:$0xff] }
 0x182   : > { %v3153_v55 = vsel %vm2893_vm0, %v7152_v45, 0  ;;  %v6900_v7 = vcombine.low %v368_v59, %v432_v61  ;;  %v562_v57 = vld [vmem:[%s7804_s5 + $0xb78] sm:$0xff]  ;;  %v6902_v58 = vcombine.low %v369_v46, %v433_v47 }
 0x183   : > { %4925 = vmatpush1.bf16.msra.mxu0 %v3135_v1  ;;  %4966 = vmatpush1.bf16.msra.mxu1 %v3141_v3  ;;  %v6901_v1 = vcombine.high %v368_v59, %v432_v61  ;;  %v559_v3 = vld [vmem:[%s7804_s5 + $0xb60] sm:$0xff] }
 0x184   : > { %5000 = vmatprep.subr.bf16.mxu0 %v6767_v2  ;;  %5041 = vmatprep.subr.bf16.mxu1 %v6769_v4  ;;  %v495_v2 = vld [vmem:[%s7804_s5 + $0x960] sm:$0xff]  ;;  %v496_v4 = vld [vmem:[%s7804_s5 + $0x968] sm:$0xff] }
 0x185   : > { %v7027_v8 = vcombine.high %v495_v2, %v559_v3 }
 0x186   : > { %7275 = vmatmul.mubr.msk.bf16.vlgmr.msra.gmra.mrb[80].mxu0 %vm2889_vm1, %v8332_v37  ;;  %7277 = vmatmul.mubr.msk.bf16.vlgmr.msra.gmra.mrb[80].mxu1 %vm2889_vm1, %v8332_v37 }
 0x187   : > { %5001 = vmatpush1.bf16.msra.mxu0 %v6766_v9  ;;  %5042 = vmatpush1.bf16.msra.mxu1 %v6768_v10  ;;  %v7029_v10 = vcombine.high %v496_v4, %v560_v5 }
 0x188   : > { %5002 = vmatprep.subr.bf16.mxu0 %v6895_v11  ;;  %5043 = vmatprep.subr.bf16.mxu1 %v6897_v12  ;;  %v623_v11 = vld [vmem:[%s7804_s5 + $0xd60] sm:$0x77] }
 0x189   : > { %v3886_v20 = vpop.f32.mrb[28].mxu0  ;;  %5032 = vmatprep.mubr.bf16.mxu0 %v7700_v0  ;;  %v3927_v24 = vpop.f32.mrb[28].mxu1  ;;  %5073 = vmatprep.mubr.bf16.mxu1 %v7700_v0  ;;  %v7155_v26 = vcombine.high %v623_v11, %v623_v11 }
 0x18a   : > { %v3887_v23 = vadd.f32 %v3886_v20, %v8174_v34  ;;  %v3888_v25 = vpop.f32.mrb[29].mxu0  ;;  %v3928_v27 = vadd.f32 %v3927_v24, %v8174_v34  ;;  %v3929_v29 = vpop.f32.mrb[29].mxu1  ;;  %v7026_v20 = vcombine.low %v495_v2, %v559_v3 }
 0x18b   : > { %v3889_v28 = vadd.f32 %v3888_v25, %v8174_v34  ;;  %v3890_v30 = vpop.f32.mrb[30].mxu0  ;;  %5003 = vmatpush1.bf16.msra.mxu0 %v6894_v17  ;;  %v3930_v35 = vadd.f32 %v3929_v29, %v8174_v34  ;;  %v3931_v43 = vpop.f32.mrb[30].mxu1  ;;  %5044 = vmatpush1.bf16.msra.mxu1 %v6896_v18 }
 0x18c   : > { %v5930_v33 = vmax.f32 %v3887_v23, 0.0  ;;  %v3891_v36 = vpop.f32.mrb[31].mxu0  ;;  %5004 = vmatprep.subr.bf16.mxu0 %v7023_v19  ;;  %v5932_v40 = vmax.f32 %v3928_v27, 0.0  ;;  %v3932_v42 = vpop.f32.mrb[31].mxu1  ;;  %5045 = vmatprep.subr.bf16.mxu1 %v7025_v21  ;;  %v7028_v21 = vcombine.low %v496_v4, %v560_v5  ;;  %v7154_v27 = vcombine.low %v623_v11, %v623_v11  ;;  %v626_v4 = vld [vmem:[%s7804_s5 + $0xd78] sm:$0x77] }
 0x18d   : > { %v5931_v41 = vmax.f32 %v3889_v28, 0.0  ;;  %v5933_v48 = vmax.f32 %v3930_v35, 0.0  ;;  %v305_v35 = vld [vmem:[%s7804_s5 + $0x370] sm:$0xff]  ;;  %v242_v36 = vld [vmem:[%s7804_s5 + $0x178] sm:$0xff] }
 0x18f   : > { %v7403_v51 = vpack.c.bf16 %v5931_v41, %v5930_v33  ;;  %5005 = vmatpush1.bf16.msra.mxu0 %v7022_v31  ;;  %v7404_v52 = vpack.c.bf16 %v5933_v48, %v5932_v40  ;;  %5046 = vmatpush1.bf16.msra.mxu1 %v7024_v32  ;;  %v7157_v31 = vcombine.high %v624_v15, %v624_v15  ;;  %v241_v33 = vld [vmem:[%s7804_s5 + $0x170] sm:$0xff]  ;;  %v3159_v41 = vsel %vm2893_vm0, %v7154_v27, 0  ;;  %v370_v48 = vld [vmem:[%s7804_s5 + $0x578] sm:$0xff] }
 0x190   : > { %7278 = vmatprep.subr.msk.bf16.mxu0 %vm2893_vm0, %v7151_v38  ;;  %7280 = vmatprep.subr.msk.bf16.mxu1 %vm2893_vm0, %v7153_v44  ;;  %v7156_v32 = vcombine.low %v624_v15, %v624_v15  ;;  %v306_v38 = vld [vmem:[%s7804_s5 + $0x378] sm:$0xff]  ;;  %v6775_v42 = vcombine.high %v241_v33, %v305_v35  ;;  %v6774_v50 = vcombine.low %v241_v33, %v305_v35  ;;  %v371_v33 = vld [vmem:[%s7804_s5 + $0x580] sm:$0xff] }
 0x191   : > { %6556 = vst [vmem:[%s8193_s9 + $0x70] sm:$0xff] %v7403_v51  ;;  %6557 = vst [vmem:[%s8193_s9 + $0x78] sm:$0xff] %v7404_v52  ;;  %v6777_v45 = vcombine.high %v242_v36, %v306_v38  ;;  %v6776_v51 = vcombine.low %v242_v36, %v306_v38  ;;  %v6903_v52 = vcombine.high %v369_v46, %v433_v47  ;;  %v435_v35 = vld [vmem:[%s7804_s5 + $0x780] sm:$0xff]  ;;  %v436_v36 = vld [vmem:[%s7804_s5 + $0x788] sm:$0xff] }
 0x192   : > { %v3165_v44 = vsel %vm2893_vm0, %v7156_v32, 0  ;;  %v6904_v59 = vcombine.low %v370_v48, %v434_v49  ;;  %v564_v46 = vld [vmem:[%s7804_s5 + $0xb88] sm:$0xff]  ;;  %v6906_v47 = vcombine.low %v371_v33, %v435_v35 }
 0x193   : > { %5007 = vmatpush1.bf16.msra.mxu0 %v3147_v53  ;;  %5048 = vmatpush1.bf16.msra.mxu1 %v3153_v55  ;;  %v6905_v53 = vcombine.high %v370_v48, %v434_v49  ;;  %v561_v55 = vld [vmem:[%s7804_s5 + $0xb70] sm:$0xff] }
 0x194   : > { %5082 = vmatprep.subr.bf16.mxu0 %v6771_v54  ;;  %5123 = vmatprep.subr.bf16.mxu1 %v6773_v56  ;;  %v497_v54 = vld [vmem:[%s7804_s5 + $0x970] sm:$0xff]  ;;  %v498_v56 = vld [vmem:[%s7804_s5 + $0x978] sm:$0xff] }
 0x195   : > { %v7031_v61 = vcombine.high %v497_v54, %v561_v55 }
 0x196   : > { %7279 = vmatmul.mubr.msk.bf16.vlgmr.msra.gmra.mrb[84].mxu0 %vm2889_vm1, %v8332_v37  ;;  %7281 = vmatmul.mubr.msk.bf16.vlgmr.msra.gmra.mrb[84].mxu1 %vm2889_vm1, %v8332_v37 }
 0x197   : > { %5083 = vmatpush1.bf16.msra.mxu0 %v6770_v62  ;;  %5124 = vmatpush1.bf16.msra.mxu1 %v6772_v60  ;;  %v7033_v60 = vcombine.high %v498_v56, %v562_v57 }
 0x198   : > { %5084 = vmatprep.subr.bf16.mxu0 %v6899_v63  ;;  %5125 = vmatprep.subr.bf16.mxu1 %v6901_v1  ;;  %v625_v63 = vld [vmem:[%s7804_s5 + $0xd70] sm:$0x77] }
 0x199   : > { %v3968_v9 = vpop.f32.mrb[32].mxu0  ;;  %5114 = vmatprep.mubr.bf16.mxu0 %v7700_v0  ;;  %v4009_v13 = vpop.f32.mrb[32].mxu1  ;;  %5155 = vmatprep.mubr.bf16.mxu1 %v7700_v0  ;;  %v7159_v15 = vcombine.high %v625_v63, %v625_v63 }
 0x19a   : > { %v3969_v12 = vadd.f32 %v3968_v9, %v8174_v34  ;;  %v3970_v14 = vpop.f32.mrb[33].mxu0  ;;  %v4010_v16 = vadd.f32 %v4009_v13, %v8174_v34  ;;  %v4011_v18 = vpop.f32.mrb[33].mxu1  ;;  %v7030_v9 = vcombine.low %v497_v54, %v561_v55 }
 0x19b   : > { %v3971_v17 = vadd.f32 %v3970_v14, %v8174_v34  ;;  %v3972_v19 = vpop.f32.mrb[34].mxu0  ;;  %5085 = vmatpush1.bf16.msra.mxu0 %v6898_v6  ;;  %v4012_v23 = vadd.f32 %v4011_v18, %v8174_v34  ;;  %v4013_v24 = vpop.f32.mrb[34].mxu1  ;;  %5126 = vmatpush1.bf16.msra.mxu1 %v6900_v7 }
 0x19c   : > { %v5934_v22 = vmax.f32 %v3969_v12, 0.0  ;;  %v3973_v25 = vpop.f32.mrb[35].mxu0  ;;  %5086 = vmatprep.subr.bf16.mxu0 %v7027_v8  ;;  %v5936_v28 = vmax.f32 %v4010_v16, 0.0  ;;  %v4014_v30 = vpop.f32.mrb[35].mxu1  ;;  %5127 = vmatprep.subr.bf16.mxu1 %v7029_v10  ;;  %v7032_v10 = vcombine.low %v498_v56, %v562_v57  ;;  %v7158_v16 = vcombine.low %v625_v63, %v625_v63  ;;  %v628_v56 = vld [vmem:[%s7804_s5 + $0xd88] sm:$0x77] }
 0x19d   : > { %v5935_v29 = vmax.f32 %v3971_v17, 0.0  ;;  %v5937_v43 = vmax.f32 %v4012_v23, 0.0  ;;  %v307_v23 = vld [vmem:[%s7804_s5 + $0x380] sm:$0xff]  ;;  %v244_v25 = vld [vmem:[%s7804_s5 + $0x188] sm:$0xff] }
 0x19f   : > { %v7405_v39 = vpack.c.bf16 %v5935_v29, %v5934_v22  ;;  %5087 = vmatpush1.bf16.msra.mxu0 %v7026_v20  ;;  %v7406_v40 = vpack.c.bf16 %v5937_v43, %v5936_v28  ;;  %5128 = vmatpush1.bf16.msra.mxu1 %v7028_v21  ;;  %v7161_v20 = vcombine.high %v626_v4, %v626_v4  ;;  %v243_v22 = vld [vmem:[%s7804_s5 + $0x180] sm:$0xff]  ;;  %v3171_v29 = vsel %vm2893_vm0, %v7158_v16, 0  ;;  %v372_v43 = vld [vmem:[%s7804_s5 + $0x588] sm:$0xff] }
 0x1a0   : > { %7282 = vmatprep.subr.msk.bf16.mxu0 %vm2893_vm0, %v7155_v26  ;;  %7284 = vmatprep.subr.msk.bf16.mxu1 %vm2893_vm0, %v7157_v31  ;;  %v7160_v21 = vcombine.low %v626_v4, %v626_v4  ;;  %v308_v26 = vld [vmem:[%s7804_s5 + $0x388] sm:$0xff]  ;;  %v6779_v30 = vcombine.high %v243_v22, %v307_v23  ;;  %v6778_v38 = vcombine.low %v243_v22, %v307_v23  ;;  %v373_v22 = vld [vmem:[%s7804_s5 + $0x590] sm:$0xff] }
 0x1a1   : > { %6558 = vst [vmem:[%s8193_s9 + $0x80] sm:$0xff] %v7405_v39  ;;  %6559 = vst [vmem:[%s8193_s9 + $0x88] sm:$0xff] %v7406_v40  ;;  %v6781_v32 = vcombine.high %v244_v25, %v308_v26  ;;  %v6780_v39 = vcombine.low %v244_v25, %v308_v26  ;;  %v6907_v40 = vcombine.high %v371_v33, %v435_v35  ;;  %v437_v23 = vld [vmem:[%s7804_s5 + $0x790] sm:$0xff]  ;;  %v438_v25 = vld [vmem:[%s7804_s5 + $0x798] sm:$0xff] }
 0x1a2   : > { %v3177_v31 = vsel %vm2893_vm0, %v7160_v21, 0  ;;  %v6908_v48 = vcombine.low %v372_v43, %v436_v36  ;;  %v566_v33 = vld [vmem:[%s7804_s5 + $0xb98] sm:$0xff]  ;;  %v6910_v35 = vcombine.low %v373_v22, %v437_v23 }
 0x1a3   : > { %5089 = vmatpush1.bf16.msra.mxu0 %v3159_v41  ;;  %5130 = vmatpush1.bf16.msra.mxu1 %v3165_v44  ;;  %v6909_v41 = vcombine.high %v372_v43, %v436_v36  ;;  %v563_v44 = vld [vmem:[%s7804_s5 + $0xb80] sm:$0xff] }
 0x1a4   : > { %5164 = vmatprep.subr.bf16.mxu0 %v6775_v42  ;;  %5205 = vmatprep.subr.bf16.mxu1 %v6777_v45  ;;  %v499_v42 = vld [vmem:[%s7804_s5 + $0x980] sm:$0xff]  ;;  %v500_v45 = vld [vmem:[%s7804_s5 + $0x988] sm:$0xff] }
 0x1a5   : > { %v7035_v49 = vcombine.high %v499_v42, %v563_v44 }
 0x1a6   : > { %7283 = vmatmul.mubr.msk.bf16.vlgmr.msra.gmra.mrb[88].mxu0 %vm2889_vm1, %v8332_v37  ;;  %7285 = vmatmul.mubr.msk.bf16.vlgmr.msra.gmra.mrb[88].mxu1 %vm2889_vm1, %v8332_v37 }
 0x1a7   : > { %5165 = vmatpush1.bf16.msra.mxu0 %v6774_v50  ;;  %5206 = vmatpush1.bf16.msra.mxu1 %v6776_v51  ;;  %v7037_v51 = vcombine.high %v500_v45, %v564_v46 }
 0x1a8   : > { %5166 = vmatprep.subr.bf16.mxu0 %v6903_v52  ;;  %5207 = vmatprep.subr.bf16.mxu1 %v6905_v53  ;;  %v627_v52 = vld [vmem:[%s7804_s5 + $0xd80] sm:$0x77] }
 0x1a9   : > { %v4050_v62 = vpop.f32.mrb[36].mxu0  ;;  %5196 = vmatprep.mubr.bf16.mxu0 %v7700_v0  ;;  %v4091_v2 = vpop.f32.mrb[36].mxu1  ;;  %5237 = vmatprep.mubr.bf16.mxu1 %v7700_v0  ;;  %v7163_v4 = vcombine.high %v627_v52, %v627_v52 }
 0x1aa   : > { %v4051_v1 = vadd.f32 %v4050_v62, %v8174_v34  ;;  %v4052_v3 = vpop.f32.mrb[37].mxu0  ;;  %v4092_v5 = vadd.f32 %v4091_v2, %v8174_v34  ;;  %v4093_v7 = vpop.f32.mrb[37].mxu1  ;;  %v7034_v62 = vcombine.low %v499_v42, %v563_v44 }
 0x1ab   : > { %v4053_v6 = vadd.f32 %v4052_v3, %v8174_v34  ;;  %v4054_v8 = vpop.f32.mrb[38].mxu0  ;;  %5167 = vmatpush1.bf16.msra.mxu0 %v6902_v58  ;;  %v4094_v12 = vadd.f32 %v4093_v7, %v8174_v34  ;;  %v4095_v13 = vpop.f32.mrb[38].mxu1  ;;  %5208 = vmatpush1.bf16.msra.mxu1 %v6904_v59 }
 0x1ac   : > { %v5938_v11 = vmax.f32 %v4051_v1, 0.0  ;;  %v4055_v14 = vpop.f32.mrb[39].mxu0  ;;  %5168 = vmatprep.subr.bf16.mxu0 %v7031_v61  ;;  %v5940_v17 = vmax.f32 %v4092_v5, 0.0  ;;  %v4096_v19 = vpop.f32.mrb[39].mxu1  ;;  %5209 = vmatprep.subr.bf16.mxu1 %v7033_v60  ;;  %v7036_v60 = vcombine.low %v500_v45, %v564_v46  ;;  %v7162_v5 = vcombine.low %v627_v52, %v627_v52  ;;  %v630_v45 = vld [vmem:[%s7804_s5 + $0xd98] sm:$0x77] }
 0x1ad   : > { %v5939_v18 = vmax.f32 %v4053_v6, 0.0  ;;  %v5941_v24 = vmax.f32 %v4094_v12, 0.0  ;;  %v309_v12 = vld [vmem:[%s7804_s5 + $0x390] sm:$0xff]  ;;  %v246_v14 = vld [vmem:[%s7804_s5 + $0x198] sm:$0xff] }
 0x1af   : > { %v7407_v27 = vpack.c.bf16 %v5939_v18, %v5938_v11  ;;  %5169 = vmatpush1.bf16.msra.mxu0 %v7030_v9  ;;  %v7408_v28 = vpack.c.bf16 %v5941_v24, %v5940_v17  ;;  %5210 = vmatpush1.bf16.msra.mxu1 %v7032_v10  ;;  %v7165_v9 = vcombine.high %v628_v56, %v628_v56  ;;  %v245_v11 = vld [vmem:[%s7804_s5 + $0x190] sm:$0xff]  ;;  %v3183_v18 = vsel %vm2893_vm0, %v7162_v5, 0  ;;  %v374_v24 = vld [vmem:[%s7804_s5 + $0x598] sm:$0xff] }
 0x1b0   : > { %7286 = vmatprep.subr.msk.bf16.mxu0 %vm2893_vm0, %v7159_v15  ;;  %7288 = vmatprep.subr.msk.bf16.mxu1 %vm2893_vm0, %v7161_v20  ;;  %v7164_v10 = vcombine.low %v628_v56, %v628_v56  ;;  %v310_v15 = vld [vmem:[%s7804_s5 + $0x398] sm:$0xff]  ;;  %v6783_v19 = vcombine.high %v245_v11, %v309_v12  ;;  %v6782_v26 = vcombine.low %v245_v11, %v309_v12  ;;  %v375_v11 = vld [vmem:[%s7804_s5 + $0x5a0] sm:$0xff] }
 0x1b1   : > { %6560 = vst [vmem:[%s8193_s9 + $0x90] sm:$0xff] %v7407_v27  ;;  %6561 = vst [vmem:[%s8193_s9 + $0x98] sm:$0xff] %v7408_v28  ;;  %v6785_v21 = vcombine.high %v246_v14, %v310_v15  ;;  %v6784_v27 = vcombine.low %v246_v14, %v310_v15  ;;  %v6911_v28 = vcombine.high %v373_v22, %v437_v23  ;;  %v439_v12 = vld [vmem:[%s7804_s5 + $0x7a0] sm:$0xff]  ;;  %v440_v14 = vld [vmem:[%s7804_s5 + $0x7a8] sm:$0xff] }
 0x1b2   : > { %v3189_v20 = vsel %vm2893_vm0, %v7164_v10, 0  ;;  %v6912_v43 = vcombine.low %v374_v24, %v438_v25  ;;  %v568_v22 = vld [vmem:[%s7804_s5 + $0xba8] sm:$0xff]  ;;  %v6914_v23 = vcombine.low %v375_v11, %v439_v12 }
 0x1b3   : > { %5171 = vmatpush1.bf16.msra.mxu0 %v3171_v29  ;;  %5212 = vmatpush1.bf16.msra.mxu1 %v3177_v31  ;;  %v6913_v29 = vcombine.high %v374_v24, %v438_v25  ;;  %v565_v31 = vld [vmem:[%s7804_s5 + $0xb90] sm:$0xff] }
 0x1b4   : > { %5246 = vmatprep.subr.bf16.mxu0 %v6779_v30  ;;  %5287 = vmatprep.subr.bf16.mxu1 %v6781_v32  ;;  %v501_v30 = vld [vmem:[%s7804_s5 + $0x990] sm:$0xff]  ;;  %v502_v32 = vld [vmem:[%s7804_s5 + $0x998] sm:$0xff] }
 0x1b5   : > { %v7039_v36 = vcombine.high %v501_v30, %v565_v31 }
 0x1b6   : > { %7287 = vmatmul.mubr.msk.bf16.vlgmr.msra.gmra.mrb[92].mxu0 %vm2889_vm1, %v8332_v37  ;;  %7289 = vmatmul.mubr.msk.bf16.vlgmr.msra.gmra.mrb[92].mxu1 %vm2889_vm1, %v8332_v37 }
 0x1b7   : > { %5247 = vmatpush1.bf16.msra.mxu0 %v6778_v38  ;;  %5288 = vmatpush1.bf16.msra.mxu1 %v6780_v39  ;;  %v7041_v39 = vcombine.high %v502_v32, %v566_v33 }
 0x1b8   : > { %5248 = vmatprep.subr.bf16.mxu0 %v6907_v40  ;;  %5289 = vmatprep.subr.bf16.mxu1 %v6909_v41  ;;  %v629_v40 = vld [vmem:[%s7804_s5 + $0xd90] sm:$0x77] }
 0x1b9   : > { %v4132_v50 = vpop.f32.mrb[40].mxu0  ;;  %5278 = vmatprep.mubr.bf16.mxu0 %v7700_v0  ;;  %v4173_v54 = vpop.f32.mrb[40].mxu1  ;;  %5319 = vmatprep.mubr.bf16.mxu1 %v7700_v0  ;;  %v7167_v56 = vcombine.high %v629_v40, %v629_v40 }
 0x1ba   : > { %v4133_v53 = vadd.f32 %v4132_v50, %v8174_v34  ;;  %v4134_v55 = vpop.f32.mrb[41].mxu0  ;;  %v4174_v57 = vadd.f32 %v4173_v54, %v8174_v34  ;;  %v4175_v59 = vpop.f32.mrb[41].mxu1  ;;  %v7038_v50 = vcombine.low %v501_v30, %v565_v31 }
 0x1bb   : > { %v4135_v58 = vadd.f32 %v4134_v55, %v8174_v34  ;;  %v4136_v61 = vpop.f32.mrb[42].mxu0  ;;  %5249 = vmatpush1.bf16.msra.mxu0 %v6906_v47  ;;  %v4176_v1 = vadd.f32 %v4175_v59, %v8174_v34  ;;  %v4177_v2 = vpop.f32.mrb[42].mxu1  ;;  %5290 = vmatpush1.bf16.msra.mxu1 %v6908_v48 }
 0x1bc   : > { %v5942_v63 = vmax.f32 %v4133_v53, 0.0  ;;  %v4137_v3 = vpop.f32.mrb[43].mxu0  ;;  %5250 = vmatprep.subr.bf16.mxu0 %v7035_v49  ;;  %v5944_v6 = vmax.f32 %v4174_v57, 0.0  ;;  %v4178_v8 = vpop.f32.mrb[43].mxu1  ;;  %5291 = vmatprep.subr.bf16.mxu1 %v7037_v51  ;;  %v7040_v51 = vcombine.low %v502_v32, %v566_v33  ;;  %v7166_v57 = vcombine.low %v629_v40, %v629_v40  ;;  %v632_v32 = vld [vmem:[%s7804_s5 + $0xda8] sm:$0x77] }
 0x1bd   : > { %v5943_v7 = vmax.f32 %v4135_v58, 0.0  ;;  %v5945_v13 = vmax.f32 %v4176_v1, 0.0  ;;  %v311_v1 = vld [vmem:[%s7804_s5 + $0x3a0] sm:$0xff]  ;;  %v248_v3 = vld [vmem:[%s7804_s5 + $0x1a8] sm:$0xff] }
 0x1bf   : > { %v7409_v16 = vpack.c.bf16 %v5943_v7, %v5942_v63  ;;  %5251 = vmatpush1.bf16.msra.mxu0 %v7034_v62  ;;  %v7410_v17 = vpack.c.bf16 %v5945_v13, %v5944_v6  ;;  %5292 = vmatpush1.bf16.msra.mxu1 %v7036_v60  ;;  %v7169_v62 = vcombine.high %v630_v45, %v630_v45  ;;  %v247_v63 = vld [vmem:[%s7804_s5 + $0x1a0] sm:$0xff]  ;;  %v3195_v7 = vsel %vm2893_vm0, %v7166_v57, 0  ;;  %v376_v13 = vld [vmem:[%s7804_s5 + $0x5a8] sm:$0xff] }
 0x1c0   : > { %7290 = vmatprep.subr.msk.bf16.mxu0 %vm2893_vm0, %v7163_v4  ;;  %7292 = vmatprep.subr.msk.bf16.mxu1 %vm2893_vm0, %v7165_v9  ;;  %v7168_v60 = vcombine.low %v630_v45, %v630_v45  ;;  %v312_v4 = vld [vmem:[%s7804_s5 + $0x3a8] sm:$0xff]  ;;  %v6787_v8 = vcombine.high %v247_v63, %v311_v1  ;;  %v6786_v15 = vcombine.low %v247_v63, %v311_v1  ;;  %v441_v63 = vld [vmem:[%s7804_s5 + $0x7b0] sm:$0xff]  ;;  %v378_v1 = vld [vmem:[%s7804_s5 + $0x5b8] sm:$0xff] }
 0x1c1   : > { %6562 = vst [vmem:[%s8193_s9 + $0xa0] sm:$0xff] %v7409_v16  ;;  %6563 = vst [vmem:[%s8193_s9 + $0xa8] sm:$0xff] %v7410_v17  ;;  %v6789_v10 = vcombine.high %v248_v3, %v312_v4  ;;  %v6788_v16 = vcombine.low %v248_v3, %v312_v4  ;;  %v6915_v17 = vcombine.high %v375_v11, %v439_v12  ;;  %v570_v11 = vld [vmem:[%s7804_s5 + $0xbb8] sm:$0xff] }
 0x1c2   : > { %v3201_v9 = vsel %vm2893_vm0, %v7168_v60, 0  ;;  %v6916_v24 = vcombine.low %v376_v13, %v440_v14  ;;  %v377_v60 = vld [vmem:[%s7804_s5 + $0x5b0] sm:$0xff] }
 0x1c3   : > { %5253 = vmatpush1.bf16.msra.mxu0 %v3183_v18  ;;  %5294 = vmatpush1.bf16.msra.mxu1 %v3189_v20  ;;  %v6917_v18 = vcombine.high %v376_v13, %v440_v14  ;;  %v567_v20 = vld [vmem:[%s7804_s5 + $0xba0] sm:$0xff]  ;;  %v6918_v12 = vcombine.low %v377_v60, %v441_v63 }
 0x1c4   : > { %5328 = vmatprep.subr.bf16.mxu0 %v6783_v19  ;;  %5369 = vmatprep.subr.bf16.mxu1 %v6785_v21  ;;  %v503_v19 = vld [vmem:[%s7804_s5 + $0x9a0] sm:$0xff]  ;;  %v504_v21 = vld [vmem:[%s7804_s5 + $0x9a8] sm:$0xff] }
 0x1c5   : > { %v7043_v25 = vcombine.high %v503_v19, %v567_v20 }
 0x1c6   : > { %7291 = vmatmul.mubr.msk.bf16.vlgmr.msra.gmra.mrb[96].mxu0 %vm2889_vm1, %v8332_v37  ;;  %7293 = vmatmul.mubr.msk.bf16.vlgmr.msra.gmra.mrb[96].mxu1 %vm2889_vm1, %v8332_v37 }
 0x1c7   : > { %5329 = vmatpush1.bf16.msra.mxu0 %v6782_v26  ;;  %5370 = vmatpush1.bf16.msra.mxu1 %v6784_v27  ;;  %v7045_v27 = vcombine.high %v504_v21, %v568_v22 }
 0x1c8   : > { %5330 = vmatprep.subr.bf16.mxu0 %v6911_v28  ;;  %5371 = vmatprep.subr.bf16.mxu1 %v6913_v29  ;;  %v631_v28 = vld [vmem:[%s7804_s5 + $0xda0] sm:$0x77] }
 0x1c9   : > { %v4214_v38 = vpop.f32.mrb[44].mxu0  ;;  %5360 = vmatprep.mubr.bf16.mxu0 %v7700_v0  ;;  %v4255_v42 = vpop.f32.mrb[44].mxu1  ;;  %5401 = vmatprep.mubr.bf16.mxu1 %v7700_v0  ;;  %v7170_v45 = vcombine.low %v631_v28, %v631_v28 }
 0x1ca   : > { %v4215_v41 = vadd.f32 %v4214_v38, %v8174_v34  ;;  %v4216_v44 = vpop.f32.mrb[45].mxu0  ;;  %v4256_v46 = vadd.f32 %v4255_v42, %v8174_v34  ;;  %v4257_v48 = vpop.f32.mrb[45].mxu1  ;;  %v7044_v38 = vcombine.low %v504_v21, %v568_v22  ;;  %v634_v21 = vld [vmem:[%s7804_s5 + $0xdb8] sm:$0x77] }
 0x1cb   : > { %v4217_v47 = vadd.f32 %v4216_v44, %v8174_v34  ;;  %v4218_v49 = vpop.f32.mrb[46].mxu0  ;;  %5331 = vmatpush1.bf16.msra.mxu0 %v6910_v35  ;;  %v4258_v53 = vadd.f32 %v4257_v48, %v8174_v34  ;;  %v4259_v54 = vpop.f32.mrb[46].mxu1  ;;  %5372 = vmatpush1.bf16.msra.mxu1 %v6912_v43  ;;  %v7171_v44 = vcombine.high %v631_v28, %v631_v28 }
 0x1cc   : > { %v5946_v52 = vmax.f32 %v4215_v41, 0.0  ;;  %v4219_v55 = vpop.f32.mrb[47].mxu0  ;;  %5332 = vmatprep.subr.bf16.mxu0 %v7039_v36  ;;  %v5948_v58 = vmax.f32 %v4256_v46, 0.0  ;;  %v4260_v61 = vpop.f32.mrb[47].mxu1  ;;  %5373 = vmatprep.subr.bf16.mxu1 %v7041_v39  ;;  %v7042_v36 = vcombine.low %v503_v19, %v567_v20  ;;  %v7173_v49 = vcombine.high %v632_v32, %v632_v32  ;;  %v250_v54 = vld [vmem:[%s7804_s5 + $0x1b8] sm:$0xff] }
 0x1cd   : > { %v5947_v59 = vmax.f32 %v4217_v47, 0.0  ;;  %v5949_v2 = vmax.f32 %v4258_v53, 0.0  ;;  %v314_v55 = vld [vmem:[%s7804_s5 + $0x3b8] sm:$0xff] }
 0x1ce   : > { %v6792_v4 = vcombine.low %v250_v54, %v314_v55 }
 0x1cf   : > { %v7411_v5 = vpack.c.bf16 %v5947_v59, %v5946_v52  ;;  %5333 = vmatpush1.bf16.msra.mxu0 %v7038_v50  ;;  %v7412_v6 = vpack.c.bf16 %v5949_v2, %v5948_v58  ;;  %5374 = vmatpush1.bf16.msra.mxu1 %v7040_v51  ;;  %v7172_v50 = vcombine.low %v632_v32, %v632_v32  ;;  %v249_v51 = vld [vmem:[%s7804_s5 + $0x1b0] sm:$0xff]  ;;  %v3207_v58 = vsel %vm2893_vm0, %v7170_v45, 0  ;;  %v442_v2 = vld [vmem:[%s7804_s5 + $0x7b8] sm:$0xff] }
 0x1d0   : > { %7294 = vmatprep.subr.msk.bf16.mxu0 %vm2893_vm0, %v7167_v56  ;;  %7296 = vmatprep.subr.msk.bf16.mxu1 %vm2893_vm0, %v7169_v62  ;;  %v313_v52 = vld [vmem:[%s7804_s5 + $0x3b0] sm:$0xff]  ;;  %v6793_v62 = vcombine.high %v250_v54, %v314_v55  ;;  %v6920_v13 = vcombine.low %v378_v1, %v442_v2  ;;  %v444_v54 = vld [vmem:[%s7804_s5 + $0x7c8] sm:$0xff] }
 0x1d1   : > { %6564 = vst [vmem:[%s8193_s9 + $0xb0] sm:$0xff] %v7411_v5  ;;  %6565 = vst [vmem:[%s8193_s9 + $0xb8] sm:$0xff] %v7412_v6  ;;  %v6791_v59 = vcombine.high %v249_v51, %v313_v52  ;;  %v3213_v61 = vsel %vm2893_vm0, %v7172_v50, 0  ;;  %v6790_v3 = vcombine.low %v249_v51, %v313_v52  ;;  %v6919_v5 = vcombine.high %v377_v60, %v441_v63  ;;  %v379_v51 = vld [vmem:[%s7804_s5 + $0x5c0] sm:$0xff]  ;;  %v572_v60 = vld [vmem:[%s7804_s5 + $0xbc8] sm:$0xff] }
 0x1d2   : > { %v6921_v6 = vcombine.high %v378_v1, %v442_v2  ;;  %v443_v52 = vld [vmem:[%s7804_s5 + $0x7c0] sm:$0xff] }
 0x1d3   : > { %5335 = vmatpush1.bf16.msra.mxu0 %v3195_v7  ;;  %5376 = vmatpush1.bf16.msra.mxu1 %v3201_v9  ;;  %v505_v7 = vld [vmem:[%s7804_s5 + $0x9b0] sm:$0xff]  ;;  %v8577_v9 = vld [vmem:[%s8820_s0] sm:$0xf]  ;;  %v6922_v63 = vcombine.low %v379_v51, %v443_v52 }
 0x1d4   : > { %5410 = vmatprep.subr.bf16.mxu0 %v6787_v8  ;;  %5451 = vmatprep.subr.bf16.mxu1 %v6789_v10  ;;  %v569_v8 = vld [vmem:[%s7804_s5 + $0xbb0] sm:$0xff]  ;;  %v506_v10 = vld [vmem:[%s7804_s5 + $0x9b8] sm:$0xff] }
 0x1d5   : > { %v7047_v14 = vcombine.high %v505_v7, %v569_v8 }
 0x1d6   : > { %7295 = vmatmul.mubr.msk.bf16.vlgmr.msra.gmra.mrb[100].mxu0 %vm2889_vm1, %v8332_v37  ;;  %7297 = vmatmul.mubr.msk.bf16.vlgmr.msra.gmra.mrb[100].mxu1 %vm2889_vm1, %v8332_v37 }
 0x1d7   : > { %5411 = vmatpush1.bf16.msra.mxu0 %v6786_v15  ;;  %5452 = vmatpush1.bf16.msra.mxu1 %v6788_v16  ;;  %v7049_v16 = vcombine.high %v506_v10, %v570_v11 }
 0x1d8   : > { %5412 = vmatprep.subr.bf16.mxu0 %v6915_v17  ;;  %5453 = vmatprep.subr.bf16.mxu1 %v6917_v18  ;;  %v633_v17 = vld [vmem:[%s7804_s5 + $0xdb0] sm:$0x77] }
 0x1d9   : > { %v4296_v26 = vpop.f32.mrb[48].mxu0  ;;  %5442 = vmatprep.mubr.bf16.mxu0 %v7700_v0  ;;  %v4337_v30 = vpop.f32.mrb[48].mxu1  ;;  %5483 = vmatprep.mubr.bf16.mxu1 %v7700_v0  ;;  %v7175_v32 = vcombine.high %v633_v17, %v633_v17 }
 0x1da   : > { %v4297_v29 = vadd.f32 %v4296_v26, %v8174_v34  ;;  %v4298_v31 = vpop.f32.mrb[49].mxu0  ;;  %v4338_v37 = vadd.f32 %v4337_v30, %v8174_v34  ;;  %v4339_v35 = vpop.f32.mrb[49].mxu1  ;;  %v7046_v26 = vcombine.low %v505_v7, %v569_v8 }
 0x1db   : > { %v4299_v33 = vadd.f32 %v4298_v31, %v8174_v34  ;;  %v4300_v43 = vpop.f32.mrb[50].mxu0  ;;  %5413 = vmatpush1.bf16.msra.mxu0 %v6914_v23  ;;  %v4340_v40 = vadd.f32 %v4339_v35, %v8174_v34  ;;  %v4341_v41 = vpop.f32.mrb[50].mxu1  ;;  %5454 = vmatpush1.bf16.msra.mxu1 %v6916_v24 }
 0x1dc   : > { %v5950_v39 = vmax.f32 %v4297_v29, 0.0  ;;  %v4301_v42 = vpop.f32.mrb[51].mxu0  ;;  %5414 = vmatprep.subr.bf16.mxu0 %v7043_v25  ;;  %v5952_v46 = vmax.f32 %v4338_v37, 0.0  ;;  %v4342_v48 = vpop.f32.mrb[51].mxu1  ;;  %5455 = vmatprep.subr.bf16.mxu1 %v7045_v27  ;;  %v7048_v27 = vcombine.low %v506_v10, %v570_v11  ;;  %v7174_v37 = vcombine.low %v633_v17, %v633_v17  ;;  %v636_v10 = vld [vmem:[%s7804_s5 + $0xdc8] sm:$0x77] }
 0x1dd   : > { %v5951_v47 = vmax.f32 %v4299_v33, 0.0  ;;  %v5953_v53 = vmax.f32 %v4340_v40, 0.0  ;;  %v315_v40 = vld [vmem:[%s7804_s5 + $0x3c0] sm:$0xff]  ;;  %v252_v42 = vld [vmem:[%s7804_s5 + $0x1c8] sm:$0xff] }
 0x1df   : > { %v7413_v56 = vpack.c.bf16 %v5951_v47, %v5950_v39  ;;  %5415 = vmatpush1.bf16.msra.mxu0 %v7042_v36  ;;  %v7414_v57 = vpack.c.bf16 %v5953_v53, %v5952_v46  ;;  %5456 = vmatpush1.bf16.msra.mxu1 %v7044_v38  ;;  %v7177_v36 = vcombine.high %v634_v21, %v634_v21  ;;  %v251_v39 = vld [vmem:[%s7804_s5 + $0x1c0] sm:$0xff]  ;;  %v3219_v47 = vsel %vm2893_vm0, %v7174_v37, 0  ;;  %v380_v53 = vld [vmem:[%s7804_s5 + $0x5c8] sm:$0xff] }
 0x1e0   : > { %7298 = vmatprep.subr.msk.bf16.mxu0 %vm2893_vm0, %v7171_v44  ;;  %7300 = vmatprep.subr.msk.bf16.mxu1 %vm2893_vm0, %v7173_v49  ;;  %v7176_v38 = vcombine.low %v634_v21, %v634_v21  ;;  %v316_v44 = vld [vmem:[%s7804_s5 + $0x3c8] sm:$0xff]  ;;  %v6795_v48 = vcombine.high %v251_v39, %v315_v40  ;;  %v6794_v55 = vcombine.low %v251_v39, %v315_v40  ;;  %v381_v39 = vld [vmem:[%s7804_s5 + $0x5d0] sm:$0xff] }
 0x1e1   : > { %6566 = vst [vmem:[%s8193_s9 + $0xc0] sm:$0xff] %v7413_v56  ;;  %6567 = vst [vmem:[%s8193_s9 + $0xc8] sm:$0xff] %v7414_v57  ;;  %v6797_v50 = vcombine.high %v252_v42, %v316_v44  ;;  %v6796_v56 = vcombine.low %v252_v42, %v316_v44  ;;  %v6923_v57 = vcombine.high %v379_v51, %v443_v52  ;;  %v445_v40 = vld [vmem:[%s7804_s5 + $0x7d0] sm:$0xff]  ;;  %v446_v42 = vld [vmem:[%s7804_s5 + $0x7d8] sm:$0xff] }
 0x1e2   : > { %v3225_v49 = vsel %vm2893_vm0, %v7176_v38, 0  ;;  %v6924_v1 = vcombine.low %v380_v53, %v444_v54  ;;  %v574_v51 = vld [vmem:[%s7804_s5 + $0xbd8] sm:$0xff]  ;;  %v6926_v52 = vcombine.low %v381_v39, %v445_v40 }
 0x1e3   : > { %5417 = vmatpush1.bf16.msra.mxu0 %v3207_v58  ;;  %5458 = vmatpush1.bf16.msra.mxu1 %v3213_v61  ;;  %v6925_v58 = vcombine.high %v380_v53, %v444_v54  ;;  %v571_v61 = vld [vmem:[%s7804_s5 + $0xbc0] sm:$0xff] }
 0x1e4   : > { %5492 = vmatprep.subr.bf16.mxu0 %v6791_v59  ;;  %5533 = vmatprep.subr.bf16.mxu1 %v6793_v62  ;;  %v507_v59 = vld [vmem:[%s7804_s5 + $0x9c0] sm:$0xff]  ;;  %v508_v62 = vld [vmem:[%s7804_s5 + $0x9c8] sm:$0xff] }
 0x1e5   : > { %v7051_v2 = vcombine.high %v507_v59, %v571_v61 }
 0x1e6   : > { %7299 = vmatmul.mubr.msk.bf16.vlgmr.msra.gmra.mrb[104].mxu0 %vm2889_vm1, %v8577_v9  ;;  %7301 = vmatmul.mubr.msk.bf16.vlgmr.msra.gmra.mrb[104].mxu1 %vm2889_vm1, %v8577_v9 }
 0x1e7   : > { %5493 = vmatpush1.bf16.msra.mxu0 %v6790_v3  ;;  %5534 = vmatpush1.bf16.msra.mxu1 %v6792_v4  ;;  %v7053_v4 = vcombine.high %v508_v62, %v572_v60 }
 0x1e8   : > { %5494 = vmatprep.subr.bf16.mxu0 %v6919_v5  ;;  %5535 = vmatprep.subr.bf16.mxu1 %v6921_v6  ;;  %v635_v5 = vld [vmem:[%s7804_s5 + $0xdc0] sm:$0x77] }
 0x1e9   : > { %v4378_v15 = vpop.f32.mrb[52].mxu0  ;;  %5524 = vmatprep.mubr.bf16.mxu0 %v7700_v0  ;;  %v4419_v19 = vpop.f32.mrb[52].mxu1  ;;  %5565 = vmatprep.mubr.bf16.mxu1 %v7700_v0  ;;  %v7179_v21 = vcombine.high %v635_v5, %v635_v5 }
 0x1ea   : > { %v4379_v18 = vadd.f32 %v4378_v15, %v8174_v34  ;;  %v4380_v20 = vpop.f32.mrb[53].mxu0  ;;  %v4420_v22 = vadd.f32 %v4419_v19, %v8174_v34  ;;  %v4421_v24 = vpop.f32.mrb[53].mxu1  ;;  %v7050_v15 = vcombine.low %v507_v59, %v571_v61 }
 0x1eb   : > { %v4381_v23 = vadd.f32 %v4380_v20, %v8174_v34  ;;  %v4382_v25 = vpop.f32.mrb[54].mxu0  ;;  %5495 = vmatpush1.bf16.msra.mxu0 %v6918_v12  ;;  %v4422_v29 = vadd.f32 %v4421_v24, %v8174_v34  ;;  %v4423_v30 = vpop.f32.mrb[54].mxu1  ;;  %5536 = vmatpush1.bf16.msra.mxu1 %v6920_v13 }
 0x1ec   : > { %v5954_v28 = vmax.f32 %v4379_v18, 0.0  ;;  %v4383_v31 = vpop.f32.mrb[55].mxu0  ;;  %5496 = vmatprep.subr.bf16.mxu0 %v7047_v14  ;;  %v5956_v33 = vmax.f32 %v4420_v22, 0.0  ;;  %v4424_v43 = vpop.f32.mrb[55].mxu1  ;;  %5537 = vmatprep.subr.bf16.mxu1 %v7049_v16  ;;  %v7052_v16 = vcombine.low %v508_v62, %v572_v60  ;;  %v7178_v22 = vcombine.low %v635_v5, %v635_v5  ;;  %v638_v62 = vld [vmem:[%s7804_s5 + $0xdd8] sm:$0x77] }
 0x1ed   : > { %v5955_v35 = vmax.f32 %v4381_v23, 0.0  ;;  %v5957_v41 = vmax.f32 %v4422_v29, 0.0  ;;  %v317_v29 = vld [vmem:[%s7804_s5 + $0x3d0] sm:$0xff]  ;;  %v254_v31 = vld [vmem:[%s7804_s5 + $0x1d8] sm:$0xff] }
 0x1ef   : > { %v7415_v45 = vpack.c.bf16 %v5955_v35, %v5954_v28  ;;  %5497 = vmatpush1.bf16.msra.mxu0 %v7046_v26  ;;  %v7416_v46 = vpack.c.bf16 %v5957_v41, %v5956_v33  ;;  %5538 = vmatpush1.bf16.msra.mxu1 %v7048_v27  ;;  %v7181_v26 = vcombine.high %v636_v10, %v636_v10  ;;  %v253_v28 = vld [vmem:[%s7804_s5 + $0x1d0] sm:$0xff]  ;;  %v3231_v35 = vsel %vm2893_vm0, %v7178_v22, 0  ;;  %v382_v41 = vld [vmem:[%s7804_s5 + $0x5d8] sm:$0xff] }
 0x1f0   : > { %7302 = vmatprep.subr.msk.bf16.mxu0 %vm2893_vm0, %v7175_v32  ;;  %7304 = vmatprep.subr.msk.bf16.mxu1 %vm2893_vm0, %v7177_v36  ;;  %v7180_v27 = vcombine.low %v636_v10, %v636_v10  ;;  %v318_v32 = vld [vmem:[%s7804_s5 + $0x3d8] sm:$0xff]  ;;  %v6799_v43 = vcombine.high %v253_v28, %v317_v29  ;;  %v6798_v44 = vcombine.low %v253_v28, %v317_v29  ;;  %v383_v28 = vld [vmem:[%s7804_s5 + $0x5e0] sm:$0xff] }
 0x1f1   : > { %6568 = vst [vmem:[%s8193_s9 + $0xd0] sm:$0xff] %v7415_v45  ;;  %6569 = vst [vmem:[%s8193_s9 + $0xd8] sm:$0xff] %v7416_v46  ;;  %v6801_v38 = vcombine.high %v254_v31, %v318_v32  ;;  %v6800_v45 = vcombine.low %v254_v31, %v318_v32  ;;  %v6927_v46 = vcombine.high %v381_v39, %v445_v40  ;;  %v447_v29 = vld [vmem:[%s7804_s5 + $0x7e0] sm:$0xff]  ;;  %v448_v31 = vld [vmem:[%s7804_s5 + $0x7e8] sm:$0xff] }
 0x1f2   : > { %v3237_v36 = vsel %vm2893_vm0, %v7180_v27, 0  ;;  %v6928_v53 = vcombine.low %v382_v41, %v446_v42  ;;  %v576_v39 = vld [vmem:[%s7804_s5 + $0xbe8] sm:$0xff]  ;;  %v6930_v40 = vcombine.low %v383_v28, %v447_v29 }
 0x1f3   : > { %5499 = vmatpush1.bf16.msra.mxu0 %v3219_v47  ;;  %5540 = vmatpush1.bf16.msra.mxu1 %v3225_v49  ;;  %v6929_v47 = vcombine.high %v382_v41, %v446_v42  ;;  %v573_v49 = vld [vmem:[%s7804_s5 + $0xbd0] sm:$0xff] }
 0x1f4   : > { %5574 = vmatprep.subr.bf16.mxu0 %v6795_v48  ;;  %5615 = vmatprep.subr.bf16.mxu1 %v6797_v50  ;;  %v509_v48 = vld [vmem:[%s7804_s5 + $0x9d0] sm:$0xff]  ;;  %v510_v50 = vld [vmem:[%s7804_s5 + $0x9d8] sm:$0xff] }
 0x1f5   : > { %v7055_v54 = vcombine.high %v509_v48, %v573_v49 }
 0x1f6   : > { %7303 = vmatmul.mubr.msk.bf16.vlgmr.msra.gmra.mrb[108].mxu0 %vm2889_vm1, %v8577_v9  ;;  %7305 = vmatmul.mubr.msk.bf16.vlgmr.msra.gmra.mrb[108].mxu1 %vm2889_vm1, %v8577_v9 }
 0x1f7   : > { %5575 = vmatpush1.bf16.msra.mxu0 %v6794_v55  ;;  %5616 = vmatpush1.bf16.msra.mxu1 %v6796_v56  ;;  %v7057_v56 = vcombine.high %v510_v50, %v574_v51 }
 0x1f8   : > { %5576 = vmatprep.subr.bf16.mxu0 %v6923_v57  ;;  %5617 = vmatprep.subr.bf16.mxu1 %v6925_v58  ;;  %v637_v57 = vld [vmem:[%s7804_s5 + $0xdd0] sm:$0x77] }
 0x1f9   : > { %v4460_v3 = vpop.f32.mrb[56].mxu0  ;;  %5606 = vmatprep.mubr.bf16.mxu0 %v7700_v0  ;;  %v4501_v7 = vpop.f32.mrb[56].mxu1  ;;  %5647 = vmatprep.mubr.bf16.mxu1 %v7700_v0  ;;  %v7183_v10 = vcombine.high %v637_v57, %v637_v57 }
 0x1fa   : > { %v4461_v6 = vadd.f32 %v4460_v3, %v8174_v34  ;;  %v4462_v8 = vpop.f32.mrb[57].mxu0  ;;  %v4502_v11 = vadd.f32 %v4501_v7, %v8174_v34  ;;  %v4503_v13 = vpop.f32.mrb[57].mxu1  ;;  %v7054_v3 = vcombine.low %v509_v48, %v573_v49 }
 0x1fb   : > { %v4463_v12 = vadd.f32 %v4462_v8, %v8174_v34  ;;  %v4464_v14 = vpop.f32.mrb[58].mxu0  ;;  %5577 = vmatpush1.bf16.msra.mxu0 %v6922_v63  ;;  %v4504_v18 = vadd.f32 %v4503_v13, %v8174_v34  ;;  %v4505_v19 = vpop.f32.mrb[58].mxu1  ;;  %5618 = vmatpush1.bf16.msra.mxu1 %v6924_v1 }
 0x1fc   : > { %v5958_v17 = vmax.f32 %v4461_v6, 0.0  ;;  %v4465_v20 = vpop.f32.mrb[59].mxu0  ;;  %5578 = vmatprep.subr.bf16.mxu0 %v7051_v2  ;;  %v5960_v23 = vmax.f32 %v4502_v11, 0.0  ;;  %v4506_v25 = vpop.f32.mrb[59].mxu1  ;;  %5619 = vmatprep.subr.bf16.mxu1 %v7053_v4  ;;  %v7056_v4 = vcombine.low %v510_v50, %v574_v51  ;;  %v7182_v11 = vcombine.low %v637_v57, %v637_v57  ;;  %v640_v50 = vld [vmem:[%s7804_s5 + $0xde8] sm:$0x77] }
 0x1fd   : > { %v5959_v24 = vmax.f32 %v4463_v12, 0.0  ;;  %v5961_v30 = vmax.f32 %v4504_v18, 0.0  ;;  %v319_v18 = vld [vmem:[%s7804_s5 + $0x3e0] sm:$0xff]  ;;  %v256_v20 = vld [vmem:[%s7804_s5 + $0x1e8] sm:$0xff] }
 0x1ff   : > { %v7417_v37 = vpack.c.bf16 %v5959_v24, %v5958_v17  ;;  %5579 = vmatpush1.bf16.msra.mxu0 %v7050_v15  ;;  %v7418_v33 = vpack.c.bf16 %v5961_v30, %v5960_v23  ;;  %5620 = vmatpush1.bf16.msra.mxu1 %v7052_v16  ;;  %v7185_v15 = vcombine.high %v638_v62, %v638_v62  ;;  %v255_v17 = vld [vmem:[%s7804_s5 + $0x1e0] sm:$0xff]  ;;  %v3243_v24 = vsel %vm2893_vm0, %v7182_v11, 0  ;;  %v384_v30 = vld [vmem:[%s7804_s5 + $0x5e8] sm:$0xff] }
 0x200   : > { %7306 = vmatprep.subr.msk.bf16.mxu0 %vm2893_vm0, %v7179_v21  ;;  %7308 = vmatprep.subr.msk.bf16.mxu1 %vm2893_vm0, %v7181_v26  ;;  %v7184_v16 = vcombine.low %v638_v62, %v638_v62  ;;  %v320_v21 = vld [vmem:[%s7804_s5 + $0x3e8] sm:$0xff]  ;;  %v6803_v25 = vcombine.high %v255_v17, %v319_v18  ;;  %v6802_v32 = vcombine.low %v255_v17, %v319_v18  ;;  %v385_v17 = vld [vmem:[%s7804_s5 + $0x5f0] sm:$0xff] }
 0x201   : > { %6570 = vst [vmem:[%s8193_s9 + $0xe0] sm:$0xff] %v7417_v37  ;;  %6571 = vst [vmem:[%s8193_s9 + $0xe8] sm:$0xff] %v7418_v33  ;;  %v6805_v27 = vcombine.high %v256_v20, %v320_v21  ;;  %v6804_v37 = vcombine.low %v256_v20, %v320_v21  ;;  %v6931_v33 = vcombine.high %v383_v28, %v447_v29  ;;  %v449_v18 = vld [vmem:[%s7804_s5 + $0x7f0] sm:$0xff]  ;;  %v450_v20 = vld [vmem:[%s7804_s5 + $0x7f8] sm:$0xff] }
 0x202   : > { %v3249_v26 = vsel %vm2893_vm0, %v7184_v16, 0  ;;  %v6932_v41 = vcombine.low %v384_v30, %v448_v31  ;;  %v578_v28 = vld [vmem:[%s7804_s5 + $0xbf8] sm:$0xff]  ;;  %v6934_v29 = vcombine.low %v385_v17, %v449_v18 }
 0x203   : > { %5581 = vmatpush1.bf16.msra.mxu0 %v3231_v35  ;;  %5622 = vmatpush1.bf16.msra.mxu1 %v3237_v36  ;;  %v6933_v35 = vcombine.high %v384_v30, %v448_v31  ;;  %v575_v36 = vld [vmem:[%s7804_s5 + $0xbe0] sm:$0xff] }
 0x204   : > { %5656 = vmatprep.subr.bf16.mxu0 %v6799_v43  ;;  %5697 = vmatprep.subr.bf16.mxu1 %v6801_v38  ;;  %v511_v43 = vld [vmem:[%s7804_s5 + $0x9e0] sm:$0xff]  ;;  %v512_v38 = vld [vmem:[%s7804_s5 + $0x9e8] sm:$0xff] }
 0x205   : > { %v7059_v42 = vcombine.high %v511_v43, %v575_v36 }
 0x206   : > { %7307 = vmatmul.mubr.msk.bf16.vlgmr.msra.gmra.mrb[112].mxu0 %vm2889_vm1, %v8577_v9  ;;  %7309 = vmatmul.mubr.msk.bf16.vlgmr.msra.gmra.mrb[112].mxu1 %vm2889_vm1, %v8577_v9 }
 0x207   : > { %5657 = vmatpush1.bf16.msra.mxu0 %v6798_v44  ;;  %5698 = vmatpush1.bf16.msra.mxu1 %v6800_v45  ;;  %v7061_v45 = vcombine.high %v512_v38, %v576_v39 }
 0x208   : > { %5658 = vmatprep.subr.bf16.mxu0 %v6927_v46  ;;  %5699 = vmatprep.subr.bf16.mxu1 %v6929_v47  ;;  %v639_v46 = vld [vmem:[%s7804_s5 + $0xde0] sm:$0x77] }
 0x209   : > { %v4542_v55 = vpop.f32.mrb[60].mxu0  ;;  %5688 = vmatprep.mubr.bf16.mxu0 %v7700_v0  ;;  %v4583_v59 = vpop.f32.mrb[60].mxu1  ;;  %5729 = vmatprep.mubr.bf16.mxu1 %v7700_v0  ;;  %v7187_v62 = vcombine.high %v639_v46, %v639_v46 }
 0x20a   : > { %v4543_v58 = vadd.f32 %v4542_v55, %v8174_v34  ;;  %v4544_v61 = vpop.f32.mrb[61].mxu0  ;;  %v4584_v60 = vadd.f32 %v4583_v59, %v8174_v34  ;;  %v4585_v1 = vpop.f32.mrb[61].mxu1  ;;  %v7058_v55 = vcombine.low %v511_v43, %v575_v36 }
 0x20b   : > { %v4545_v63 = vadd.f32 %v4544_v61, %v8174_v34  ;;  %v4546_v2 = vpop.f32.mrb[62].mxu0  ;;  %5659 = vmatpush1.bf16.msra.mxu0 %v6926_v52  ;;  %v4586_v6 = vadd.f32 %v4585_v1, %v8174_v34  ;;  %v4587_v7 = vpop.f32.mrb[62].mxu1  ;;  %5700 = vmatpush1.bf16.msra.mxu1 %v6928_v53 }
 0x20c   : > { %v5962_v5 = vmax.f32 %v4543_v58, 0.0  ;;  %v4547_v8 = vpop.f32.mrb[63].mxu0  ;;  %5660 = vmatprep.subr.bf16.mxu0 %v7055_v54  ;;  %v5964_v12 = vmax.f32 %v4584_v60, 0.0  ;;  %v4588_v14 = vpop.f32.mrb[63].mxu1  ;;  %5701 = vmatprep.subr.bf16.mxu1 %v7057_v56  ;;  %v7060_v56 = vcombine.low %v512_v38, %v576_v39  ;;  %v7186_v60 = vcombine.low %v639_v46, %v639_v46  ;;  %v642_v38 = vld [vmem:[%s7804_s5 + $0xdf8] sm:$0x77] }
 0x20d   : > { %v5963_v13 = vmax.f32 %v4545_v63, 0.0  ;;  %v5965_v19 = vmax.f32 %v4586_v6, 0.0  ;;  %v321_v6 = vld [vmem:[%s7804_s5 + $0x3f0] sm:$0xff]  ;;  %v258_v8 = vld [vmem:[%s7804_s5 + $0x1f8] sm:$0xff] }
 0x20f   : > { %v7419_v22 = vpack.c.bf16 %v5963_v13, %v5962_v5  ;;  %5661 = vmatpush1.bf16.msra.mxu0 %v7054_v3  ;;  %v7420_v23 = vpack.c.bf16 %v5965_v19, %v5964_v12  ;;  %5702 = vmatpush1.bf16.msra.mxu1 %v7056_v4  ;;  %v7189_v3 = vcombine.high %v640_v50, %v640_v50  ;;  %v257_v5 = vld [vmem:[%s7804_s5 + $0x1f0] sm:$0xff]  ;;  %v3255_v13 = vsel %vm2893_vm0, %v7186_v60, 0  ;;  %v386_v19 = vld [vmem:[%s7804_s5 + $0x5f8] sm:$0xff] }
 0x210   : > { %7310 = vmatprep.subr.msk.bf16.mxu0 %vm2893_vm0, %v7183_v10  ;;  %7312 = vmatprep.subr.msk.bf16.mxu1 %vm2893_vm0, %v7185_v15  ;;  %v7188_v4 = vcombine.low %v640_v50, %v640_v50  ;;  %v322_v10 = vld [vmem:[%s7804_s5 + $0x3f8] sm:$0xff]  ;;  %v6807_v14 = vcombine.high %v257_v5, %v321_v6  ;;  %v6806_v21 = vcombine.low %v257_v5, %v321_v6 }
 0x211   : > { %6572 = vst [vmem:[%s8193_s9 + $0xf0] sm:$0xff] %v7419_v22  ;;  %6573 = vst [vmem:[%s8193_s9 + $0xf8] sm:$0xff] %v7420_v23  ;;  %v6809_v16 = vcombine.high %v258_v8, %v322_v10  ;;  %v6808_v22 = vcombine.low %v258_v8, %v322_v10  ;;  %v6935_v23 = vcombine.high %v385_v17, %v449_v18 }
 0x212   : > { %v3261_v15 = vsel %vm2893_vm0, %v7188_v4, 0  ;;  %v6936_v30 = vcombine.low %v386_v19, %v450_v20 }
 0x213   : > { %5663 = vmatpush1.bf16.msra.mxu0 %v3243_v24  ;;  %5704 = vmatpush1.bf16.msra.mxu1 %v3249_v26  ;;  %v6937_v24 = vcombine.high %v386_v19, %v450_v20  ;;  %v577_v26 = vld [vmem:[%s7804_s5 + $0xbf0] sm:$0xff] }
 0x214   : > { %5738 = vmatprep.subr.bf16.mxu0 %v6803_v25  ;;  %5779 = vmatprep.subr.bf16.mxu1 %v6805_v27  ;;  %v513_v25 = vld [vmem:[%s7804_s5 + $0x9f0] sm:$0xff]  ;;  %v514_v27 = vld [vmem:[%s7804_s5 + $0x9f8] sm:$0xff] }
 0x215   : > { %v7063_v31 = vcombine.high %v513_v25, %v577_v26 }
 0x216   : > { %7311 = vmatmul.mubr.msk.bf16.vlgmr.msra.gmra.mrb[116].mxu0 %vm2889_vm1, %v8577_v9  ;;  %7313 = vmatmul.mubr.msk.bf16.vlgmr.msra.gmra.mrb[116].mxu1 %vm2889_vm1, %v8577_v9 }
 0x217   : > { %5739 = vmatpush1.bf16.msra.mxu0 %v6802_v32  ;;  %5780 = vmatpush1.bf16.msra.mxu1 %v6804_v37  ;;  %v7065_v37 = vcombine.high %v514_v27, %v578_v28 }
 0x218   : > { %5740 = vmatprep.subr.bf16.mxu0 %v6931_v33  ;;  %5781 = vmatprep.subr.bf16.mxu1 %v6933_v35  ;;  %v641_v33 = vld [vmem:[%s7804_s5 + $0xdf0] sm:$0x77] }
 0x219   : > { %v4624_v44 = vpop.f32.mrb[64].mxu0  ;;  %5770 = vmatprep.mubr.bf16.mxu0 %v7700_v0  ;;  %v4665_v48 = vpop.f32.mrb[64].mxu1  ;;  %5811 = vmatprep.mubr.bf16.mxu1 %v7700_v0  ;;  %v7191_v50 = vcombine.high %v641_v33, %v641_v33 }
 0x21a   : > { %v4625_v47 = vadd.f32 %v4624_v44, %v8174_v34  ;;  %v4626_v49 = vpop.f32.mrb[65].mxu0  ;;  %v4666_v51 = vadd.f32 %v4665_v48, %v8174_v34  ;;  %v4667_v53 = vpop.f32.mrb[65].mxu1  ;;  %v7062_v44 = vcombine.low %v513_v25, %v577_v26 }
 0x21b   : > { %v4627_v52 = vadd.f32 %v4626_v49, %v8174_v34  ;;  %v4628_v54 = vpop.f32.mrb[66].mxu0  ;;  %5741 = vmatpush1.bf16.msra.mxu0 %v6930_v40  ;;  %v4668_v58 = vadd.f32 %v4667_v53, %v8174_v34  ;;  %v4669_v59 = vpop.f32.mrb[66].mxu1  ;;  %5782 = vmatpush1.bf16.msra.mxu1 %v6932_v41 }
 0x21c   : > { %v5966_v57 = vmax.f32 %v4625_v47, 0.0  ;;  %v4629_v61 = vpop.f32.mrb[67].mxu0  ;;  %5742 = vmatprep.subr.bf16.mxu0 %v7059_v42  ;;  %v5968_v63 = vmax.f32 %v4666_v51, 0.0  ;;  %v4670_v2 = vpop.f32.mrb[67].mxu1  ;;  %5783 = vmatprep.subr.bf16.mxu1 %v7061_v45  ;;  %v7064_v45 = vcombine.low %v514_v27, %v578_v28  ;;  %v7190_v51 = vcombine.low %v641_v33, %v641_v33 }
 0x21d   : > { %v5967_v1 = vmax.f32 %v4627_v52, 0.0  ;;  %v5969_v7 = vmax.f32 %v4668_v58, 0.0  ;;  %v7193_v54 = vcombine.high %v642_v38, %v642_v38 }
 0x21e   : > { %v3267_v59 = vsel %vm2893_vm0, %v7190_v51, 0 }
 0x21f   : > { %v7421_v11 = vpack.c.bf16 %v5967_v1, %v5966_v57  ;;  %5743 = vmatpush1.bf16.msra.mxu0 %v7058_v55  ;;  %v7422_v12 = vpack.c.bf16 %v5969_v7, %v5968_v63  ;;  %5784 = vmatpush1.bf16.msra.mxu1 %v7060_v56  ;;  %v7192_v55 = vcombine.low %v642_v38, %v642_v38 }
 0x220   : > { %7314 = vmatprep.subr.msk.bf16.mxu0 %vm2893_vm0, %v7187_v62  ;;  %7316 = vmatprep.subr.msk.bf16.mxu1 %vm2893_vm0, %v7189_v3 }
 0x221   : > { %6574 = vst [vmem:[%s8193_s9 + $0x100] sm:$0xff] %v7421_v11  ;;  %6575 = vst [vmem:[%s8193_s9 + $0x108] sm:$0xff] %v7422_v12  ;;  %v3273_v61 = vsel %vm2893_vm0, %v7192_v55, 0 }
 0x223   : > { %5745 = vmatpush1.bf16.msra.mxu0 %v3255_v13  ;;  %5786 = vmatpush1.bf16.msra.mxu1 %v3261_v15 }
 0x224   : > { %5820 = vmatprep.subr.bf16.mxu0 %v6807_v14  ;;  %5861 = vmatprep.subr.bf16.mxu1 %v6809_v16 }
 0x226   : > { %7315 = vmatmul.mubr.msk.bf16.vlgmr.msra.gmra.mrb[120].mxu0 %vm2889_vm1, %v8577_v9  ;;  %7317 = vmatmul.mubr.msk.bf16.vlgmr.msra.gmra.mrb[120].mxu1 %vm2889_vm1, %v8577_v9 }
 0x227   : > { %5821 = vmatpush1.bf16.msra.mxu0 %v6806_v21  ;;  %5862 = vmatpush1.bf16.msra.mxu1 %v6808_v22 }
 0x228   : > { %5822 = vmatprep.subr.bf16.mxu0 %v6935_v23  ;;  %5863 = vmatprep.subr.bf16.mxu1 %v6937_v24 }
 0x229   : > { %v4706_v32 = vpop.f32.mrb[68].mxu0  ;;  %5852 = vmatprep.mubr.bf16.mxu0 %v7700_v0  ;;  %v4747_v43 = vpop.f32.mrb[68].mxu1  ;;  %5893 = vmatprep.mubr.bf16.mxu1 %v7700_v0 }
 0x22a   : > { %v4707_v35 = vadd.f32 %v4706_v32, %v8174_v34  ;;  %v4708_v36 = vpop.f32.mrb[69].mxu0  ;;  %v4748_v39 = vadd.f32 %v4747_v43, %v8174_v34  ;;  %v4749_v41 = vpop.f32.mrb[69].mxu1 }
 0x22b   : > { %v4709_v40 = vadd.f32 %v4708_v36, %v8174_v34  ;;  %v4710_v42 = vpop.f32.mrb[70].mxu0  ;;  %5823 = vmatpush1.bf16.msra.mxu0 %v6934_v29  ;;  %v4750_v47 = vadd.f32 %v4749_v41, %v8174_v34  ;;  %v4751_v48 = vpop.f32.mrb[70].mxu1  ;;  %5864 = vmatpush1.bf16.msra.mxu1 %v6936_v30 }
 0x22c   : > { %v5970_v46 = vmax.f32 %v4707_v35, 0.0  ;;  %v4711_v49 = vpop.f32.mrb[71].mxu0  ;;  %5824 = vmatprep.subr.bf16.mxu0 %v7063_v31  ;;  %v5972_v0 = vmax.f32 %v4748_v39, 0.0  ;;  %v4752_v53 = vpop.f32.mrb[71].mxu1  ;;  %5865 = vmatprep.subr.bf16.mxu1 %v7065_v37 }
 0x22d   : > { %v5971_v52 = vmax.f32 %v4709_v40, 0.0  ;;  %v5973_v56 = vmax.f32 %v4750_v47, 0.0 }
 0x22f   : > { %v7423_v57 = vpack.c.bf16 %v5971_v52, %v5970_v46  ;;  %5825 = vmatpush1.bf16.msra.mxu0 %v7062_v44  ;;  %v7424_v58 = vpack.c.bf16 %v5973_v56, %v5972_v0  ;;  %5866 = vmatpush1.bf16.msra.mxu1 %v7064_v45 }
 0x230   : > { %7318 = vmatprep.subr.msk.bf16.mxu0 %vm2893_vm0, %v7191_v50  ;;  %7320 = vmatprep.subr.msk.bf16.mxu1 %vm2893_vm0, %v7193_v54 }
 0x231   : > { %6576 = vst [vmem:[%s8193_s9 + $0x110] sm:$0xff] %v7423_v57  ;;  %6577 = vst [vmem:[%s8193_s9 + $0x118] sm:$0xff] %v7424_v58 }
 0x233   : > { %5827 = vmatpush1.bf16.msra.mxu0 %v3267_v59  ;;  %5868 = vmatpush1.bf16.msra.mxu1 %v3273_v61 }
 0x236   : > { %7319 = vmatmul.mubr.msk.bf16.vlgmr.msra.gmra.mrb[124].mxu0 %vm2889_vm1, %v8577_v9  ;;  %7321 = vmatmul.mubr.msk.bf16.vlgmr.msra.gmra.mrb[124].mxu1 %vm2889_vm1, %v8577_v9 }
 0x239   : > { %v4788_v62 = vpop.f32.mrb[72].mxu0  ;;  %v4829_v63 = vpop.f32.mrb[72].mxu1 }
 0x23a   : > { %v4789_v60 = vadd.f32 %v4788_v62, %v8174_v34  ;;  %v4790_v1 = vpop.f32.mrb[73].mxu0  ;;  %v4830_v2 = vadd.f32 %v4829_v63, %v8174_v34  ;;  %v4831_v4 = vpop.f32.mrb[73].mxu1 }
 0x23b   : > { %v4791_v3 = vadd.f32 %v4790_v1, %v8174_v34  ;;  %v4792_v5 = vpop.f32.mrb[74].mxu0  ;;  %v4832_v7 = vadd.f32 %v4831_v4, %v8174_v34  ;;  %v4833_v8 = vpop.f32.mrb[74].mxu1 }
 0x23c   : > { %v5974_v6 = vmax.f32 %v4789_v60, 0.0  ;;  %v4793_v10 = vpop.f32.mrb[75].mxu0  ;;  %v5976_v11 = vmax.f32 %v4830_v2, 0.0  ;;  %v4834_v12 = vpop.f32.mrb[75].mxu1 }
 0x23d   : > { %v5975_v9 = vmax.f32 %v4791_v3, 0.0  ;;  %v5977_v13 = vmax.f32 %v4832_v7, 0.0 }
 0x23f   : > { %v7425_v14 = vpack.c.bf16 %v5975_v9, %v5974_v6  ;;  %v7426_v15 = vpack.c.bf16 %v5977_v13, %v5976_v11 }
 0x241   : > { %6578 = vst [vmem:[%s8193_s9 + $0x120] sm:$0xff] %v7425_v14  ;;  %6579 = vst [vmem:[%s8193_s9 + $0x128] sm:$0xff] %v7426_v15 }
 0x249   : > { %v4870_v16 = vpop.f32.mrb[76].mxu0  ;;  %v4911_v18 = vpop.f32.mrb[76].mxu1 }
 0x24a   : > { %v4871_v17 = vadd.f32 %v4870_v16, %v8174_v34  ;;  %v4872_v19 = vpop.f32.mrb[77].mxu0  ;;  %v4912_v20 = vadd.f32 %v4911_v18, %v8174_v34  ;;  %v4913_v22 = vpop.f32.mrb[77].mxu1 }
 0x24b   : > { %v4873_v21 = vadd.f32 %v4872_v19, %v8174_v34  ;;  %v4874_v23 = vpop.f32.mrb[78].mxu0  ;;  %v4914_v25 = vadd.f32 %v4913_v22, %v8174_v34  ;;  %v4915_v26 = vpop.f32.mrb[78].mxu1 }
 0x24c   : > { %v5978_v24 = vmax.f32 %v4871_v17, 0.0  ;;  %v4875_v27 = vpop.f32.mrb[79].mxu0  ;;  %v5980_v28 = vmax.f32 %v4912_v20, 0.0  ;;  %v4916_v30 = vpop.f32.mrb[79].mxu1 }
 0x24d   : > { %v5979_v29 = vmax.f32 %v4873_v21, 0.0  ;;  %v5981_v31 = vmax.f32 %v4914_v25, 0.0 }
 0x24f   : > { %v7427_v32 = vpack.c.bf16 %v5979_v29, %v5978_v24  ;;  %v7428_v37 = vpack.c.bf16 %v5981_v31, %v5980_v28 }
 0x251   : > { %6580 = vst [vmem:[%s8193_s9 + $0x130] sm:$0xff] %v7427_v32  ;;  %6581 = vst [vmem:[%s8193_s9 + $0x138] sm:$0xff] %v7428_v37 }
 0x259   : > { %v4952_v33 = vpop.f32.mrb[80].mxu0  ;;  %v4993_v43 = vpop.f32.mrb[80].mxu1 }
 0x25a   : > { %v4953_v35 = vadd.f32 %v4952_v33, %v8174_v34  ;;  %v4954_v36 = vpop.f32.mrb[81].mxu0  ;;  %v4994_v38 = vadd.f32 %v4993_v43, %v8174_v34  ;;  %v4995_v40 = vpop.f32.mrb[81].mxu1 }
 0x25b   : > { %v4955_v39 = vadd.f32 %v4954_v36, %v8174_v34  ;;  %v4956_v41 = vpop.f32.mrb[82].mxu0  ;;  %v4996_v44 = vadd.f32 %v4995_v40, %v8174_v34  ;;  %v4997_v45 = vpop.f32.mrb[82].mxu1 }
 0x25c   : > { %v5982_v42 = vmax.f32 %v4953_v35, 0.0  ;;  %v4957_v46 = vpop.f32.mrb[83].mxu0  ;;  %v5984_v47 = vmax.f32 %v4994_v38, 0.0  ;;  %v4998_v49 = vpop.f32.mrb[83].mxu1 }
 0x25d   : > { %v5983_v48 = vmax.f32 %v4955_v39, 0.0  ;;  %v5985_v50 = vmax.f32 %v4996_v44, 0.0 }
 0x25f   : > { %v7429_v51 = vpack.c.bf16 %v5983_v48, %v5982_v42  ;;  %v7430_v0 = vpack.c.bf16 %v5985_v50, %v5984_v47 }
 0x261   : > { %6582 = vst [vmem:[%s8193_s9 + $0x140] sm:$0xff] %v7429_v51  ;;  %6583 = vst [vmem:[%s8193_s9 + $0x148] sm:$0xff] %v7430_v0 }
 0x269   : > { %v5034_v52 = vpop.f32.mrb[84].mxu0  ;;  %v5075_v54 = vpop.f32.mrb[84].mxu1 }
 0x26a   : > { %v5035_v53 = vadd.f32 %v5034_v52, %v8174_v34  ;;  %v5036_v55 = vpop.f32.mrb[85].mxu0  ;;  %v5076_v56 = vadd.f32 %v5075_v54, %v8174_v34  ;;  %v5077_v58 = vpop.f32.mrb[85].mxu1 }
 0x26b   : > { %v5037_v57 = vadd.f32 %v5036_v55, %v8174_v34  ;;  %v5038_v59 = vpop.f32.mrb[86].mxu0  ;;  %v5078_v62 = vadd.f32 %v5077_v58, %v8174_v34  ;;  %v5079_v60 = vpop.f32.mrb[86].mxu1 }
 0x26c   : > { %v5986_v61 = vmax.f32 %v5035_v53, 0.0  ;;  %v5039_v63 = vpop.f32.mrb[87].mxu0  ;;  %v5988_v1 = vmax.f32 %v5076_v56, 0.0  ;;  %v5080_v3 = vpop.f32.mrb[87].mxu1 }
 0x26d   : > { %v5987_v2 = vmax.f32 %v5037_v57, 0.0  ;;  %v5989_v4 = vmax.f32 %v5078_v62, 0.0 }
 0x26f   : > { %v7431_v5 = vpack.c.bf16 %v5987_v2, %v5986_v61  ;;  %v7432_v6 = vpack.c.bf16 %v5989_v4, %v5988_v1 }
 0x271   : > { %6584 = vst [vmem:[%s8193_s9 + $0x150] sm:$0xff] %v7431_v5  ;;  %6585 = vst [vmem:[%s8193_s9 + $0x158] sm:$0xff] %v7432_v6 }
 0x279   : > { %v5116_v7 = vpop.f32.mrb[88].mxu0  ;;  %v5157_v10 = vpop.f32.mrb[88].mxu1 }
 0x27a   : > { %v5117_v8 = vadd.f32 %v5116_v7, %v8174_v34  ;;  %v5118_v11 = vpop.f32.mrb[89].mxu0  ;;  %v5158_v9 = vadd.f32 %v5157_v10, %v8174_v34  ;;  %v5159_v13 = vpop.f32.mrb[89].mxu1 }
 0x27b   : > { %v5119_v12 = vadd.f32 %v5118_v11, %v8174_v34  ;;  %v5120_v14 = vpop.f32.mrb[90].mxu0  ;;  %v5160_v16 = vadd.f32 %v5159_v13, %v8174_v34  ;;  %v5161_v17 = vpop.f32.mrb[90].mxu1 }
 0x27c   : > { %v5990_v15 = vmax.f32 %v5117_v8, 0.0  ;;  %v5121_v18 = vpop.f32.mrb[91].mxu0  ;;  %v5992_v19 = vmax.f32 %v5158_v9, 0.0  ;;  %v5162_v21 = vpop.f32.mrb[91].mxu1 }
 0x27d   : > { %v5991_v20 = vmax.f32 %v5119_v12, 0.0  ;;  %v5993_v22 = vmax.f32 %v5160_v16, 0.0 }
 0x27f   : > { %v7433_v23 = vpack.c.bf16 %v5991_v20, %v5990_v15  ;;  %v7434_v24 = vpack.c.bf16 %v5993_v22, %v5992_v19 }
 0x281   : > { %6586 = vst [vmem:[%s8193_s9 + $0x160] sm:$0xff] %v7433_v23  ;;  %6587 = vst [vmem:[%s8193_s9 + $0x168] sm:$0xff] %v7434_v24 }
 0x289   : > { %v5198_v25 = vpop.f32.mrb[92].mxu0  ;;  %v5239_v27 = vpop.f32.mrb[92].mxu1 }
 0x28a   : > { %v5199_v26 = vadd.f32 %v5198_v25, %v8174_v34  ;;  %v5200_v28 = vpop.f32.mrb[93].mxu0  ;;  %v5240_v29 = vadd.f32 %v5239_v27, %v8174_v34  ;;  %v5241_v31 = vpop.f32.mrb[93].mxu1 }
 0x28b   : > { %v5201_v30 = vadd.f32 %v5200_v28, %v8174_v34  ;;  %v5202_v32 = vpop.f32.mrb[94].mxu0  ;;  %v5242_v33 = vadd.f32 %v5241_v31, %v8174_v34  ;;  %v5243_v35 = vpop.f32.mrb[94].mxu1 }
 0x28c   : > { %v5994_v37 = vmax.f32 %v5199_v26, 0.0  ;;  %v5203_v43 = vpop.f32.mrb[95].mxu0  ;;  %v5996_v36 = vmax.f32 %v5240_v29, 0.0  ;;  %v5244_v39 = vpop.f32.mrb[95].mxu1 }
 0x28d   : > { %v5995_v38 = vmax.f32 %v5201_v30, 0.0  ;;  %v5997_v40 = vmax.f32 %v5242_v33, 0.0 }
 0x28f   : > { %v7435_v41 = vpack.c.bf16 %v5995_v38, %v5994_v37  ;;  %v7436_v42 = vpack.c.bf16 %v5997_v40, %v5996_v36 }
 0x291   : > { %6588 = vst [vmem:[%s8193_s9 + $0x170] sm:$0xff] %v7435_v41  ;;  %6589 = vst [vmem:[%s8193_s9 + $0x178] sm:$0xff] %v7436_v42 }
 0x299   : > { %v5280_v44 = vpop.f32.mrb[96].mxu0  ;;  %v5321_v46 = vpop.f32.mrb[96].mxu1 }
 0x29a   : > { %v5281_v45 = vadd.f32 %v5280_v44, %v8174_v34  ;;  %v5282_v47 = vpop.f32.mrb[97].mxu0  ;;  %v5322_v48 = vadd.f32 %v5321_v46, %v8174_v34  ;;  %v5323_v50 = vpop.f32.mrb[97].mxu1 }
 0x29b   : > { %v5283_v49 = vadd.f32 %v5282_v47, %v8174_v34  ;;  %v5284_v51 = vpop.f32.mrb[98].mxu0  ;;  %v5324_v52 = vadd.f32 %v5323_v50, %v8174_v34  ;;  %v5325_v53 = vpop.f32.mrb[98].mxu1 }
 0x29c   : > { %v5998_v0 = vmax.f32 %v5281_v45, 0.0  ;;  %v5285_v54 = vpop.f32.mrb[99].mxu0  ;;  %v6000_v55 = vmax.f32 %v5322_v48, 0.0  ;;  %v5326_v57 = vpop.f32.mrb[99].mxu1 }
 0x29d   : > { %v5999_v56 = vmax.f32 %v5283_v49, 0.0  ;;  %v6001_v58 = vmax.f32 %v5324_v52, 0.0 }
 0x29f   : > { %v7437_v59 = vpack.c.bf16 %v5999_v56, %v5998_v0  ;;  %v7438_v61 = vpack.c.bf16 %v6001_v58, %v6000_v55 }
 0x2a1   : > { %6590 = vst [vmem:[%s8193_s9 + $0x180] sm:$0xff] %v7437_v59  ;;  %6591 = vst [vmem:[%s8193_s9 + $0x188] sm:$0xff] %v7438_v61 }
 0x2a9   : > { %v5362_v62 = vpop.f32.mrb[100].mxu0  ;;  %v5403_v63 = vpop.f32.mrb[100].mxu1 }
 0x2aa   : > { %v5363_v60 = vadd.f32 %v5362_v62, %v8174_v34  ;;  %v5364_v1 = vpop.f32.mrb[101].mxu0  ;;  %v5404_v2 = vadd.f32 %v5403_v63, %v8174_v34  ;;  %v5405_v4 = vpop.f32.mrb[101].mxu1 }
 0x2ab   : > { %v5365_v3 = vadd.f32 %v5364_v1, %v8174_v34  ;;  %v5366_v5 = vpop.f32.mrb[102].mxu0  ;;  %v5406_v7 = vadd.f32 %v5405_v4, %v8174_v34  ;;  %v5407_v8 = vpop.f32.mrb[102].mxu1 }
 0x2ac   : > { %v6002_v6 = vmax.f32 %v5363_v60, 0.0  ;;  %v5367_v10 = vpop.f32.mrb[103].mxu0  ;;  %v6004_v11 = vmax.f32 %v5404_v2, 0.0  ;;  %v5408_v12 = vpop.f32.mrb[103].mxu1 }
 0x2ad   : > { %v6003_v9 = vmax.f32 %v5365_v3, 0.0  ;;  %v6005_v13 = vmax.f32 %v5406_v7, 0.0 }
 0x2af   : > { %v7439_v14 = vpack.c.bf16 %v6003_v9, %v6002_v6  ;;  %v7440_v15 = vpack.c.bf16 %v6005_v13, %v6004_v11 }
 0x2b1   : > { %6592 = vst [vmem:[%s8193_s9 + $0x190] sm:$0xff] %v7439_v14  ;;  %6593 = vst [vmem:[%s8193_s9 + $0x198] sm:$0xff] %v7440_v15 }
 0x2b9   : > { %v5444_v16 = vpop.f32.mrb[104].mxu0  ;;  %v5485_v18 = vpop.f32.mrb[104].mxu1 }
 0x2ba   : > { %v5445_v17 = vadd.f32 %v5444_v16, %v8174_v34  ;;  %v5446_v19 = vpop.f32.mrb[105].mxu0  ;;  %v5486_v20 = vadd.f32 %v5485_v18, %v8174_v34  ;;  %v5487_v22 = vpop.f32.mrb[105].mxu1 }
 0x2bb   : > { %v5447_v21 = vadd.f32 %v5446_v19, %v8174_v34  ;;  %v5448_v23 = vpop.f32.mrb[106].mxu0  ;;  %v5488_v25 = vadd.f32 %v5487_v22, %v8174_v34  ;;  %v5489_v26 = vpop.f32.mrb[106].mxu1 }
 0x2bc   : > { %v6006_v24 = vmax.f32 %v5445_v17, 0.0  ;;  %v5449_v27 = vpop.f32.mrb[107].mxu0  ;;  %v6008_v28 = vmax.f32 %v5486_v20, 0.0  ;;  %v5490_v30 = vpop.f32.mrb[107].mxu1 }
 0x2bd   : > { %v6007_v29 = vmax.f32 %v5447_v21, 0.0  ;;  %v6009_v31 = vmax.f32 %v5488_v25, 0.0 }
 0x2bf   : > { %v7441_v32 = vpack.c.bf16 %v6007_v29, %v6006_v24  ;;  %v7442_v37 = vpack.c.bf16 %v6009_v31, %v6008_v28 }
 0x2c1   : > { %6594 = vst [vmem:[%s8193_s9 + $0x1a0] sm:$0xff] %v7441_v32  ;;  %6595 = vst [vmem:[%s8193_s9 + $0x1a8] sm:$0xff] %v7442_v37 }
 0x2c9   : > { %v5526_v33 = vpop.f32.mrb[108].mxu0  ;;  %v5567_v43 = vpop.f32.mrb[108].mxu1 }
 0x2ca   : > { %v5527_v35 = vadd.f32 %v5526_v33, %v8174_v34  ;;  %v5528_v36 = vpop.f32.mrb[109].mxu0  ;;  %v5568_v38 = vadd.f32 %v5567_v43, %v8174_v34  ;;  %v5569_v40 = vpop.f32.mrb[109].mxu1 }
 0x2cb   : > { %v5529_v39 = vadd.f32 %v5528_v36, %v8174_v34  ;;  %v5530_v41 = vpop.f32.mrb[110].mxu0  ;;  %v5570_v44 = vadd.f32 %v5569_v40, %v8174_v34  ;;  %v5571_v45 = vpop.f32.mrb[110].mxu1 }
 0x2cc   : > { %v6010_v42 = vmax.f32 %v5527_v35, 0.0  ;;  %v5531_v46 = vpop.f32.mrb[111].mxu0  ;;  %v6012_v47 = vmax.f32 %v5568_v38, 0.0  ;;  %v5572_v49 = vpop.f32.mrb[111].mxu1 }
 0x2cd   : > { %v6011_v48 = vmax.f32 %v5529_v39, 0.0  ;;  %v6013_v50 = vmax.f32 %v5570_v44, 0.0 }
 0x2cf   : > { %v7443_v51 = vpack.c.bf16 %v6011_v48, %v6010_v42  ;;  %v7444_v0 = vpack.c.bf16 %v6013_v50, %v6012_v47 }
 0x2d1   : > { %6596 = vst [vmem:[%s8193_s9 + $0x1b0] sm:$0xff] %v7443_v51  ;;  %6597 = vst [vmem:[%s8193_s9 + $0x1b8] sm:$0xff] %v7444_v0 }
 0x2d9   : > { %v5608_v52 = vpop.f32.mrb[112].mxu0  ;;  %v5649_v54 = vpop.f32.mrb[112].mxu1 }
 0x2da   : > { %v5609_v53 = vadd.f32 %v5608_v52, %v8174_v34  ;;  %v5610_v55 = vpop.f32.mrb[113].mxu0  ;;  %v5650_v56 = vadd.f32 %v5649_v54, %v8174_v34  ;;  %v5651_v58 = vpop.f32.mrb[113].mxu1 }
 0x2db   : > { %v5611_v57 = vadd.f32 %v5610_v55, %v8174_v34  ;;  %v5612_v59 = vpop.f32.mrb[114].mxu0  ;;  %v5652_v62 = vadd.f32 %v5651_v58, %v8174_v34  ;;  %v5653_v60 = vpop.f32.mrb[114].mxu1 }
 0x2dc   : > { %v6014_v61 = vmax.f32 %v5609_v53, 0.0  ;;  %v5613_v63 = vpop.f32.mrb[115].mxu0  ;;  %v6016_v1 = vmax.f32 %v5650_v56, 0.0  ;;  %v5654_v3 = vpop.f32.mrb[115].mxu1 }
 0x2dd   : > { %v6015_v2 = vmax.f32 %v5611_v57, 0.0  ;;  %v6017_v4 = vmax.f32 %v5652_v62, 0.0 }
 0x2df   : > { %v7445_v5 = vpack.c.bf16 %v6015_v2, %v6014_v61  ;;  %v7446_v6 = vpack.c.bf16 %v6017_v4, %v6016_v1 }
 0x2e1   : > { %6598 = vst [vmem:[%s8193_s9 + $0x1c0] sm:$0xff] %v7445_v5  ;;  %6599 = vst [vmem:[%s8193_s9 + $0x1c8] sm:$0xff] %v7446_v6 }
 0x2e9   : > { %v5690_v7 = vpop.f32.mrb[116].mxu0  ;;  %v5731_v10 = vpop.f32.mrb[116].mxu1 }
 0x2ea   : > { %v5691_v8 = vadd.f32 %v5690_v7, %v8174_v34  ;;  %v5692_v11 = vpop.f32.mrb[117].mxu0  ;;  %v5732_v9 = vadd.f32 %v5731_v10, %v8174_v34  ;;  %v5733_v13 = vpop.f32.mrb[117].mxu1 }
 0x2eb   : > { %v5693_v12 = vadd.f32 %v5692_v11, %v8174_v34  ;;  %v5694_v14 = vpop.f32.mrb[118].mxu0  ;;  %v5734_v16 = vadd.f32 %v5733_v13, %v8174_v34  ;;  %v5735_v17 = vpop.f32.mrb[118].mxu1 }
 0x2ec   : > { %v6018_v15 = vmax.f32 %v5691_v8, 0.0  ;;  %v5695_v18 = vpop.f32.mrb[119].mxu0  ;;  %v6020_v19 = vmax.f32 %v5732_v9, 0.0  ;;  %v5736_v21 = vpop.f32.mrb[119].mxu1 }
 0x2ed   : > { %v6019_v20 = vmax.f32 %v5693_v12, 0.0  ;;  %v6021_v22 = vmax.f32 %v5734_v16, 0.0 }
 0x2ef   : > { %v7447_v23 = vpack.c.bf16 %v6019_v20, %v6018_v15  ;;  %v7448_v24 = vpack.c.bf16 %v6021_v22, %v6020_v19 }
 0x2f1   : > { %6600 = vst [vmem:[%s8193_s9 + $0x1d0] sm:$0xff] %v7447_v23  ;;  %6601 = vst [vmem:[%s8193_s9 + $0x1d8] sm:$0xff] %v7448_v24 }
 0x2f9   : > { %v5772_v25 = vpop.f32.mrb[120].mxu0  ;;  %v5813_v27 = vpop.f32.mrb[120].mxu1 }
 0x2fa   : > { %v5773_v26 = vadd.f32 %v5772_v25, %v8174_v34  ;;  %v5774_v28 = vpop.f32.mrb[121].mxu0  ;;  %v5814_v29 = vadd.f32 %v5813_v27, %v8174_v34  ;;  %v5815_v31 = vpop.f32.mrb[121].mxu1 }
 0x2fb   : > { %v5775_v30 = vadd.f32 %v5774_v28, %v8174_v34  ;;  %v5776_v32 = vpop.f32.mrb[122].mxu0  ;;  %v5816_v33 = vadd.f32 %v5815_v31, %v8174_v34  ;;  %v5817_v35 = vpop.f32.mrb[122].mxu1 }
 0x2fc   : > { %v6022_v37 = vmax.f32 %v5773_v26, 0.0  ;;  %v5777_v43 = vpop.f32.mrb[123].mxu0  ;;  %v6024_v36 = vmax.f32 %v5814_v29, 0.0  ;;  %v5818_v39 = vpop.f32.mrb[123].mxu1 }
 0x2fd   : > { %v6023_v38 = vmax.f32 %v5775_v30, 0.0  ;;  %v6025_v40 = vmax.f32 %v5816_v33, 0.0 }
 0x2ff   : > { %v7449_v41 = vpack.c.bf16 %v6023_v38, %v6022_v37  ;;  %v7450_v42 = vpack.c.bf16 %v6025_v40, %v6024_v36 }
 0x301   : > { %6602 = vst [vmem:[%s8193_s9 + $0x1e0] sm:$0xff] %v7449_v41  ;;  %6603 = vst [vmem:[%s8193_s9 + $0x1e8] sm:$0xff] %v7450_v42 }
 0x309   : > { %v5854_v44 = vpop.f32.mrb[124].mxu0  ;;  %v5895_v46 = vpop.f32.mrb[124].mxu1 }
 0x30a   : > { %v5855_v45 = vadd.f32 %v5854_v44, %v8174_v34  ;;  %v5856_v47 = vpop.f32.mrb[125].mxu0  ;;  %v5896_v48 = vadd.f32 %v5895_v46, %v8174_v34  ;;  %v5897_v50 = vpop.f32.mrb[125].mxu1 }
 0x30b   : > { %v5857_v49 = vadd.f32 %v5856_v47, %v8174_v34  ;;  %v5858_v51 = vpop.f32.mrb[126].mxu0  ;;  %v5898_v52 = vadd.f32 %v5897_v50, %v8174_v34  ;;  %v5899_v53 = vpop.f32.mrb[126].mxu1 }
 0x30c   : > { %v6026_v0 = vmax.f32 %v5855_v45, 0.0  ;;  %v5859_v54 = vpop.f32.mrb[127].mxu0  ;;  %v6028_v55 = vmax.f32 %v5896_v48, 0.0  ;;  %v5900_v57 = vpop.f32.mrb[127].mxu1 }
 0x30d   : > { %v6027_v56 = vmax.f32 %v5857_v49, 0.0  ;;  %v6029_v58 = vmax.f32 %v5898_v52, 0.0 }
 0x30f   : > { %v7451_v59 = vpack.c.bf16 %v6027_v56, %v6026_v0  ;;  %v7452_v61 = vpack.c.bf16 %v6029_v58, %v6028_v55 }
 0x311   : > { %6604 = vst [vmem:[%s8193_s9 + $0x1f0] sm:$0xff] %v7451_v59  ;;  %6605 = vst [vmem:[%s8193_s9 + $0x1f8] sm:$0xff] %v7452_v61 }
 0x312 PF: > { %p13_p8 = scmp.ge.s32.totalorder %s7741_s17, 6   ;;  %s8826_s12 = smov %s7686_s13 }
 0x313   : > { %s8827_s13 = smov %s7690_s14  ;;  %s8828_s14 = smov %s7751_s20 }
 0x314   : > { %s8829_s15 = smov %s7741_s17  ;;  %15 = sbr.rel (!%p13_p8) target bundleno = 3 (0x3), region = 72 }
 0x31b   :  { %6628 = vsyncpa [#allocation3], 1 }
 0x31c   :  { %6630 = vsyncpa [#allocation3 + $0x1], 1 }

// kernel: image_encoder_affine_forward.4
= control target key start
LH: loop header
LB: loop body
LE: loop exit
PB: predicated region body
PF: predicated region fallthrough
CT: control target
= control target key end

     0   :  { %s2974_s12 = smov 0   ;;  %s2976_s13 = smov 0   ;;  %s3821_s0 = inlined_call_operand.vmem [shape: bf16[16,216], index: 0, kind: input, shape index: {}]   ;;  %s3822_s1 = inlined_call_operand.vmem [shape: bf16[216,8192], index: 1, kind: input, shape index: {}]   ;;  %s3823_s2 = inlined_call_operand.vmem [shape: f32[16,1], index: 2, kind: input, shape index: {}]   ;;  %s3824_s3 = inlined_call_operand.vmem [shape: bf16[16,8192], index: 3, kind: output, shape index: {}]  }
   0x1   :  { %s2978_s14 = smov 0  }
   0x2 LB: > { %s2591_s15 = sadd.s32 4294967295, %s2951_s14   ;;  %s2991_s16 = sadd.s32 1, %s2951_s14   ;;  %s2951_s14 = sphi %s2978_s14, %s3828_s14   ;;  %s2947_s13 = sphi %s2976_s13, %s3827_s13   ;;  %s2943_s12 = sphi %s2974_s12, %s3826_s12  }
   0x3   : > { %s38_s17 = ssub.s32 %s2951_s14, %s2991_s16  ;;  %s41_s18 = sadd.s32 1, %s2947_s13 }
   0x4   : > { %p39_p0 = scmp.eq.s32.totalorder %s38_s17, 0  ;;  %p48_p1 = scmp.ne.s32.totalorder %s2947_s13, %s2943_s12 }
   0x5   : > { %p49_p2 = scmp.eq.s32.totalorder %s2951_s14, 0  ;;  %p99_p3 = scmp.eq.s32.totalorder %s2591_s15, 3 }
   0x6   : > { %s3002_s19 = scalar_select %p39_p0, %s2947_s13, %s41_s18  }
   0x7   : > { %p50_p4 = por %p49_p2, %p48_p1  ;;  %p3004_p5 = por %p99_p3, %p48_p1 }
   0x8   : > { %p2594_p6 = scmp.ge.s32.totalorder %s2951_s14, 4 }
   0xa   : > { %127 = sbr.rel (%p2594_p6) target bundleno = 130 (0x82), region = 24 }
  0x11   : > { %130 = sbr.rel (!%p50_p4) target bundleno = 130 (0x82), region = 28  ;;  %s132_s21 = sand.u32 (%p50_p4), 1, %s2947_s13  }
  0x12   : > { %s2862_s22 = sshll.u32 (%p50_p4), %s2951_s14, 6  ;;  %s2880_s23 = smul.u32 (%p50_p4), 1728, %s132_s21 }
  0x13   : > { %s3014_s26 = scalar_lea.vmem (%p50_p4), %s3822_s1, %s2862_s22 }
  0x14   : > { %v150_v0 = vld [vmem:[%s3014_s26] sm:$0xff] (%p50_p4)  ;;  %v152_v1 = vld [vmem:[%s3014_s26 + $0x8] sm:$0xff] (%p50_p4)  ;;  %v154_v2 = vld [vmem:[%s3014_s26 + $0x10] sm:$0xff] (%p50_p4)  ;;  %s3022_s27 = scalar_lea.vmem (%p50_p4), [#allocation2], %s2880_s23 }
  0x15   : > { %v156_v3 = vld [vmem:[%s3014_s26 + $0x18] sm:$0xff] (%p50_p4)  ;;  %v158_v4 = vld [vmem:[%s3014_s26 + $0x20] sm:$0xff] (%p50_p4)  ;;  %v160_v5 = vld [vmem:[%s3014_s26 + $0x28] sm:$0xff] (%p50_p4)  ;;  %151 = vst [vmem:[%s3022_s27] sm:$0xff] (%p50_p4), %v150_v0 }
  0x16   : > { %153 = vst [vmem:[%s3022_s27 + $0x8] sm:$0xff] (%p50_p4), %v152_v1  ;;  %155 = vst [vmem:[%s3022_s27 + $0x10] sm:$0xff] (%p50_p4), %v154_v2  ;;  %v162_v6 = vld [vmem:[%s3014_s26 + $0x30] sm:$0xff] (%p50_p4)  ;;  %v164_v7 = vld [vmem:[%s3014_s26 + $0x38] sm:$0xff] (%p50_p4) }
  0x17   : > { %157 = vst [vmem:[%s3022_s27 + $0x18] sm:$0xff] (%p50_p4), %v156_v3  ;;  %159 = vst [vmem:[%s3022_s27 + $0x20] sm:$0xff] (%p50_p4), %v158_v4  ;;  %v166_v8 = vld [vmem:[%s3014_s26 + $0x100] sm:$0xff] (%p50_p4)  ;;  %v168_v9 = vld [vmem:[%s3014_s26 + $0x108] sm:$0xff] (%p50_p4) }
  0x18   : > { %161 = vst [vmem:[%s3022_s27 + $0x28] sm:$0xff] %v160_v5  ;;  %163 = vst [vmem:[%s3022_s27 + $0x30] sm:$0xff] %v162_v6  ;;  %v170_v10 = vld [vmem:[%s3014_s26 + $0x110] sm:$0xff]  ;;  %v172_v11 = vld [vmem:[%s3014_s26 + $0x118] sm:$0xff] }
  0x19   : > { %165 = vst [vmem:[%s3022_s27 + $0x38] sm:$0xff] %v164_v7  ;;  %167 = vst [vmem:[%s3022_s27 + $0x40] sm:$0xff] %v166_v8  ;;  %v174_v12 = vld [vmem:[%s3014_s26 + $0x120] sm:$0xff]  ;;  %v176_v13 = vld [vmem:[%s3014_s26 + $0x128] sm:$0xff] }
  0x1a   : > { %169 = vst [vmem:[%s3022_s27 + $0x48] sm:$0xff] %v168_v9  ;;  %171 = vst [vmem:[%s3022_s27 + $0x50] sm:$0xff] %v170_v10  ;;  %v178_v14 = vld [vmem:[%s3014_s26 + $0x130] sm:$0xff]  ;;  %v180_v15 = vld [vmem:[%s3014_s26 + $0x138] sm:$0xff] }
  0x1b   : > { %173 = vst [vmem:[%s3022_s27 + $0x58] sm:$0xff] %v172_v11  ;;  %175 = vst [vmem:[%s3022_s27 + $0x60] sm:$0xff] %v174_v12  ;;  %v182_v16 = vld [vmem:[%s3014_s26 + $0x200] sm:$0xff]  ;;  %v184_v17 = vld [vmem:[%s3014_s26 + $0x208] sm:$0xff] }
  0x1c   : > { %177 = vst [vmem:[%s3022_s27 + $0x68] sm:$0xff] %v176_v13  ;;  %179 = vst [vmem:[%s3022_s27 + $0x70] sm:$0xff] %v178_v14  ;;  %v186_v18 = vld [vmem:[%s3014_s26 + $0x210] sm:$0xff]  ;;  %v188_v19 = vld [vmem:[%s3014_s26 + $0x218] sm:$0xff] }
  0x1d   : > { %181 = vst [vmem:[%s3022_s27 + $0x78] sm:$0xff] %v180_v15  ;;  %183 = vst [vmem:[%s3022_s27 + $0x80] sm:$0xff] %v182_v16  ;;  %v190_v20 = vld [vmem:[%s3014_s26 + $0x220] sm:$0xff]  ;;  %v192_v21 = vld [vmem:[%s3014_s26 + $0x228] sm:$0xff] }
  0x1e   : > { %185 = vst [vmem:[%s3022_s27 + $0x88] sm:$0xff] %v184_v17  ;;  %187 = vst [vmem:[%s3022_s27 + $0x90] sm:$0xff] %v186_v18  ;;  %v194_v22 = vld [vmem:[%s3014_s26 + $0x230] sm:$0xff]  ;;  %v196_v23 = vld [vmem:[%s3014_s26 + $0x238] sm:$0xff] }
  0x1f   : > { %189 = vst [vmem:[%s3022_s27 + $0x98] sm:$0xff] %v188_v19  ;;  %191 = vst [vmem:[%s3022_s27 + $0xa0] sm:$0xff] %v190_v20  ;;  %v198_v24 = vld [vmem:[%s3014_s26 + $0x300] sm:$0xff]  ;;  %v200_v25 = vld [vmem:[%s3014_s26 + $0x308] sm:$0xff] }
  0x20   : > { %193 = vst [vmem:[%s3022_s27 + $0xa8] sm:$0xff] %v192_v21  ;;  %195 = vst [vmem:[%s3022_s27 + $0xb0] sm:$0xff] %v194_v22  ;;  %v202_v26 = vld [vmem:[%s3014_s26 + $0x310] sm:$0xff]  ;;  %v204_v27 = vld [vmem:[%s3014_s26 + $0x318] sm:$0xff] }
  0x21   : > { %197 = vst [vmem:[%s3022_s27 + $0xb8] sm:$0xff] %v196_v23  ;;  %199 = vst [vmem:[%s3022_s27 + $0xc0] sm:$0xff] %v198_v24  ;;  %v206_v28 = vld [vmem:[%s3014_s26 + $0x320] sm:$0xff]  ;;  %v208_v29 = vld [vmem:[%s3014_s26 + $0x328] sm:$0xff] }
  0x22   : > { %201 = vst [vmem:[%s3022_s27 + $0xc8] sm:$0xff] %v200_v25  ;;  %203 = vst [vmem:[%s3022_s27 + $0xd0] sm:$0xff] %v202_v26  ;;  %v210_v30 = vld [vmem:[%s3014_s26 + $0x330] sm:$0xff]  ;;  %v212_v31 = vld [vmem:[%s3014_s26 + $0x338] sm:$0xff] }
  0x23   : > { %205 = vst [vmem:[%s3022_s27 + $0xd8] sm:$0xff] %v204_v27  ;;  %207 = vst [vmem:[%s3022_s27 + $0xe0] sm:$0xff] %v206_v28  ;;  %v214_v32 = vld [vmem:[%s3014_s26 + $0x400] sm:$0xff]  ;;  %v216_v33 = vld [vmem:[%s3014_s26 + $0x408] sm:$0xff] }
  0x24   : > { %209 = vst [vmem:[%s3022_s27 + $0xe8] sm:$0xff] %v208_v29  ;;  %211 = vst [vmem:[%s3022_s27 + $0xf0] sm:$0xff] %v210_v30  ;;  %v218_v34 = vld [vmem:[%s3014_s26 + $0x410] sm:$0xff]  ;;  %v220_v35 = vld [vmem:[%s3014_s26 + $0x418] sm:$0xff] }
  0x25   : > { %213 = vst [vmem:[%s3022_s27 + $0xf8] sm:$0xff] %v212_v31  ;;  %215 = vst [vmem:[%s3022_s27 + $0x100] sm:$0xff] %v214_v32  ;;  %v222_v36 = vld [vmem:[%s3014_s26 + $0x420] sm:$0xff]  ;;  %v224_v37 = vld [vmem:[%s3014_s26 + $0x428] sm:$0xff] }
  0x26   : > { %217 = vst [vmem:[%s3022_s27 + $0x108] sm:$0xff] %v216_v33  ;;  %219 = vst [vmem:[%s3022_s27 + $0x110] sm:$0xff] %v218_v34  ;;  %v226_v38 = vld [vmem:[%s3014_s26 + $0x430] sm:$0xff]  ;;  %v228_v39 = vld [vmem:[%s3014_s26 + $0x438] sm:$0xff] }
  0x27   : > { %221 = vst [vmem:[%s3022_s27 + $0x118] sm:$0xff] %v220_v35  ;;  %223 = vst [vmem:[%s3022_s27 + $0x120] sm:$0xff] %v222_v36  ;;  %v230_v40 = vld [vmem:[%s3014_s26 + $0x500] sm:$0xff]  ;;  %v232_v41 = vld [vmem:[%s3014_s26 + $0x508] sm:$0xff] }
  0x28   : > { %225 = vst [vmem:[%s3022_s27 + $0x128] sm:$0xff] %v224_v37  ;;  %227 = vst [vmem:[%s3022_s27 + $0x130] sm:$0xff] %v226_v38  ;;  %v234_v42 = vld [vmem:[%s3014_s26 + $0x510] sm:$0xff]  ;;  %v236_v43 = vld [vmem:[%s3014_s26 + $0x518] sm:$0xff] }
  0x29   : > { %229 = vst [vmem:[%s3022_s27 + $0x138] sm:$0xff] %v228_v39  ;;  %231 = vst [vmem:[%s3022_s27 + $0x140] sm:$0xff] %v230_v40  ;;  %v238_v44 = vld [vmem:[%s3014_s26 + $0x520] sm:$0xff]  ;;  %v240_v45 = vld [vmem:[%s3014_s26 + $0x528] sm:$0xff] }
  0x2a   : > { %233 = vst [vmem:[%s3022_s27 + $0x148] sm:$0xff] %v232_v41  ;;  %235 = vst [vmem:[%s3022_s27 + $0x150] sm:$0xff] %v234_v42  ;;  %v242_v46 = vld [vmem:[%s3014_s26 + $0x530] sm:$0xff]  ;;  %v244_v47 = vld [vmem:[%s3014_s26 + $0x538] sm:$0xff] }
  0x2b   : > { %237 = vst [vmem:[%s3022_s27 + $0x158] sm:$0xff] %v236_v43  ;;  %239 = vst [vmem:[%s3022_s27 + $0x160] sm:$0xff] %v238_v44  ;;  %v246_v48 = vld [vmem:[%s3014_s26 + $0x600] sm:$0xff]  ;;  %v248_v49 = vld [vmem:[%s3014_s26 + $0x608] sm:$0xff] }
  0x2c   : > { %241 = vst [vmem:[%s3022_s27 + $0x168] sm:$0xff] %v240_v45  ;;  %243 = vst [vmem:[%s3022_s27 + $0x170] sm:$0xff] %v242_v46  ;;  %v250_v50 = vld [vmem:[%s3014_s26 + $0x610] sm:$0xff]  ;;  %v252_v51 = vld [vmem:[%s3014_s26 + $0x618] sm:$0xff] }
  0x2d   : > { %245 = vst [vmem:[%s3022_s27 + $0x178] sm:$0xff] %v244_v47  ;;  %247 = vst [vmem:[%s3022_s27 + $0x180] sm:$0xff] %v246_v48  ;;  %v254_v52 = vld [vmem:[%s3014_s26 + $0x620] sm:$0xff]  ;;  %v256_v53 = vld [vmem:[%s3014_s26 + $0x628] sm:$0xff] }
  0x2e   : > { %249 = vst [vmem:[%s3022_s27 + $0x188] sm:$0xff] %v248_v49  ;;  %251 = vst [vmem:[%s3022_s27 + $0x190] sm:$0xff] %v250_v50  ;;  %v258_v54 = vld [vmem:[%s3014_s26 + $0x630] sm:$0xff]  ;;  %v260_v55 = vld [vmem:[%s3014_s26 + $0x638] sm:$0xff] }
  0x2f   : > { %253 = vst [vmem:[%s3022_s27 + $0x198] sm:$0xff] %v252_v51  ;;  %255 = vst [vmem:[%s3022_s27 + $0x1a0] sm:$0xff] %v254_v52  ;;  %v262_v56 = vld [vmem:[%s3014_s26 + $0x700] sm:$0xff]  ;;  %v264_v57 = vld [vmem:[%s3014_s26 + $0x708] sm:$0xff] }
  0x30   : > { %257 = vst [vmem:[%s3022_s27 + $0x1a8] sm:$0xff] %v256_v53  ;;  %259 = vst [vmem:[%s3022_s27 + $0x1b0] sm:$0xff] %v258_v54  ;;  %v266_v58 = vld [vmem:[%s3014_s26 + $0x710] sm:$0xff]  ;;  %v268_v59 = vld [vmem:[%s3014_s26 + $0x718] sm:$0xff] }
  0x31   : > { %261 = vst [vmem:[%s3022_s27 + $0x1b8] sm:$0xff] %v260_v55  ;;  %263 = vst [vmem:[%s3022_s27 + $0x1c0] sm:$0xff] %v262_v56  ;;  %v270_v60 = vld [vmem:[%s3014_s26 + $0x720] sm:$0xff]  ;;  %v272_v61 = vld [vmem:[%s3014_s26 + $0x728] sm:$0xff] }
  0x32   : > { %265 = vst [vmem:[%s3022_s27 + $0x1c8] sm:$0xff] %v264_v57  ;;  %267 = vst [vmem:[%s3022_s27 + $0x1d0] sm:$0xff] %v266_v58  ;;  %v274_v62 = vld [vmem:[%s3014_s26 + $0x730] sm:$0xff]  ;;  %v276_v63 = vld [vmem:[%s3014_s26 + $0x738] sm:$0xff] }
  0x33   : > { %269 = vst [vmem:[%s3022_s27 + $0x1d8] sm:$0xff] %v268_v59  ;;  %271 = vst [vmem:[%s3022_s27 + $0x1e0] sm:$0xff] %v270_v60  ;;  %v278_v0 = vld [vmem:[%s3014_s26 + $0x800] sm:$0xff]  ;;  %v280_v1 = vld [vmem:[%s3014_s26 + $0x808] sm:$0xff] }
  0x34   : > { %273 = vst [vmem:[%s3022_s27 + $0x1e8] sm:$0xff] %v272_v61  ;;  %275 = vst [vmem:[%s3022_s27 + $0x1f0] sm:$0xff] %v274_v62  ;;  %v282_v2 = vld [vmem:[%s3014_s26 + $0x810] sm:$0xff]  ;;  %v284_v3 = vld [vmem:[%s3014_s26 + $0x818] sm:$0xff] }
  0x35   : > { %277 = vst [vmem:[%s3022_s27 + $0x1f8] sm:$0xff] %v276_v63  ;;  %279 = vst [vmem:[%s3022_s27 + $0x200] sm:$0xff] %v278_v0  ;;  %v286_v4 = vld [vmem:[%s3014_s26 + $0x820] sm:$0xff]  ;;  %v288_v5 = vld [vmem:[%s3014_s26 + $0x828] sm:$0xff] }
  0x36   : > { %281 = vst [vmem:[%s3022_s27 + $0x208] sm:$0xff] %v280_v1  ;;  %283 = vst [vmem:[%s3022_s27 + $0x210] sm:$0xff] %v282_v2  ;;  %v290_v6 = vld [vmem:[%s3014_s26 + $0x830] sm:$0xff]  ;;  %v292_v7 = vld [vmem:[%s3014_s26 + $0x838] sm:$0xff] }
  0x37   : > { %285 = vst [vmem:[%s3022_s27 + $0x218] sm:$0xff] %v284_v3  ;;  %287 = vst [vmem:[%s3022_s27 + $0x220] sm:$0xff] %v286_v4  ;;  %v294_v8 = vld [vmem:[%s3014_s26 + $0x900] sm:$0xff]  ;;  %v296_v9 = vld [vmem:[%s3014_s26 + $0x908] sm:$0xff] }
  0x38   : > { %289 = vst [vmem:[%s3022_s27 + $0x228] sm:$0xff] %v288_v5  ;;  %291 = vst [vmem:[%s3022_s27 + $0x230] sm:$0xff] %v290_v6  ;;  %v298_v10 = vld [vmem:[%s3014_s26 + $0x910] sm:$0xff]  ;;  %v300_v11 = vld [vmem:[%s3014_s26 + $0x918] sm:$0xff] }
  0x39   : > { %293 = vst [vmem:[%s3022_s27 + $0x238] sm:$0xff] %v292_v7  ;;  %295 = vst [vmem:[%s3022_s27 + $0x240] sm:$0xff] %v294_v8  ;;  %v302_v12 = vld [vmem:[%s3014_s26 + $0x920] sm:$0xff]  ;;  %v304_v13 = vld [vmem:[%s3014_s26 + $0x928] sm:$0xff] }
  0x3a   : > { %297 = vst [vmem:[%s3022_s27 + $0x248] sm:$0xff] %v296_v9  ;;  %299 = vst [vmem:[%s3022_s27 + $0x250] sm:$0xff] %v298_v10  ;;  %v306_v14 = vld [vmem:[%s3014_s26 + $0x930] sm:$0xff]  ;;  %v308_v15 = vld [vmem:[%s3014_s26 + $0x938] sm:$0xff] }
  0x3b   : > { %301 = vst [vmem:[%s3022_s27 + $0x258] sm:$0xff] %v300_v11  ;;  %303 = vst [vmem:[%s3022_s27 + $0x260] sm:$0xff] %v302_v12  ;;  %v310_v16 = vld [vmem:[%s3014_s26 + $0xa00] sm:$0xff]  ;;  %v312_v17 = vld [vmem:[%s3014_s26 + $0xa08] sm:$0xff] }
  0x3c   : > { %305 = vst [vmem:[%s3022_s27 + $0x268] sm:$0xff] %v304_v13  ;;  %307 = vst [vmem:[%s3022_s27 + $0x270] sm:$0xff] %v306_v14  ;;  %v314_v18 = vld [vmem:[%s3014_s26 + $0xa10] sm:$0xff]  ;;  %v316_v19 = vld [vmem:[%s3014_s26 + $0xa18] sm:$0xff] }
  0x3d   : > { %309 = vst [vmem:[%s3022_s27 + $0x278] sm:$0xff] %v308_v15  ;;  %311 = vst [vmem:[%s3022_s27 + $0x280] sm:$0xff] %v310_v16  ;;  %v318_v20 = vld [vmem:[%s3014_s26 + $0xa20] sm:$0xff]  ;;  %v320_v21 = vld [vmem:[%s3014_s26 + $0xa28] sm:$0xff] }
  0x3e   : > { %313 = vst [vmem:[%s3022_s27 + $0x288] sm:$0xff] %v312_v17  ;;  %315 = vst [vmem:[%s3022_s27 + $0x290] sm:$0xff] %v314_v18  ;;  %v322_v22 = vld [vmem:[%s3014_s26 + $0xa30] sm:$0xff]  ;;  %v324_v23 = vld [vmem:[%s3014_s26 + $0xa38] sm:$0xff] }
  0x3f   : > { %317 = vst [vmem:[%s3022_s27 + $0x298] sm:$0xff] %v316_v19  ;;  %319 = vst [vmem:[%s3022_s27 + $0x2a0] sm:$0xff] %v318_v20  ;;  %v326_v24 = vld [vmem:[%s3014_s26 + $0xb00] sm:$0xff]  ;;  %v328_v25 = vld [vmem:[%s3014_s26 + $0xb08] sm:$0xff] }
  0x40   : > { %321 = vst [vmem:[%s3022_s27 + $0x2a8] sm:$0xff] %v320_v21  ;;  %323 = vst [vmem:[%s3022_s27 + $0x2b0] sm:$0xff] %v322_v22  ;;  %v330_v26 = vld [vmem:[%s3014_s26 + $0xb10] sm:$0xff]  ;;  %v332_v27 = vld [vmem:[%s3014_s26 + $0xb18] sm:$0xff] }
  0x41   : > { %325 = vst [vmem:[%s3022_s27 + $0x2b8] sm:$0xff] %v324_v23  ;;  %327 = vst [vmem:[%s3022_s27 + $0x2c0] sm:$0xff] %v326_v24  ;;  %v334_v28 = vld [vmem:[%s3014_s26 + $0xb20] sm:$0xff]  ;;  %v336_v29 = vld [vmem:[%s3014_s26 + $0xb28] sm:$0xff] }
  0x42   : > { %329 = vst [vmem:[%s3022_s27 + $0x2c8] sm:$0xff] %v328_v25  ;;  %331 = vst [vmem:[%s3022_s27 + $0x2d0] sm:$0xff] %v330_v26  ;;  %v338_v30 = vld [vmem:[%s3014_s26 + $0xb30] sm:$0xff]  ;;  %v340_v31 = vld [vmem:[%s3014_s26 + $0xb38] sm:$0xff] }
  0x43   : > { %333 = vst [vmem:[%s3022_s27 + $0x2d8] sm:$0xff] %v332_v27  ;;  %335 = vst [vmem:[%s3022_s27 + $0x2e0] sm:$0xff] %v334_v28  ;;  %v342_v32 = vld [vmem:[%s3014_s26 + $0xc00] sm:$0xff]  ;;  %v344_v33 = vld [vmem:[%s3014_s26 + $0xc08] sm:$0xff] }
  0x44   : > { %337 = vst [vmem:[%s3022_s27 + $0x2e8] sm:$0xff] %v336_v29  ;;  %339 = vst [vmem:[%s3022_s27 + $0x2f0] sm:$0xff] %v338_v30  ;;  %v346_v34 = vld [vmem:[%s3014_s26 + $0xc10] sm:$0xff]  ;;  %v348_v35 = vld [vmem:[%s3014_s26 + $0xc18] sm:$0xff] }
  0x45   : > { %341 = vst [vmem:[%s3022_s27 + $0x2f8] sm:$0xff] %v340_v31  ;;  %343 = vst [vmem:[%s3022_s27 + $0x300] sm:$0xff] %v342_v32  ;;  %v350_v36 = vld [vmem:[%s3014_s26 + $0xc20] sm:$0xff]  ;;  %v352_v37 = vld [vmem:[%s3014_s26 + $0xc28] sm:$0xff] }
  0x46   : > { %345 = vst [vmem:[%s3022_s27 + $0x308] sm:$0xff] %v344_v33  ;;  %347 = vst [vmem:[%s3022_s27 + $0x310] sm:$0xff] %v346_v34  ;;  %v354_v38 = vld [vmem:[%s3014_s26 + $0xc30] sm:$0xff]  ;;  %v356_v39 = vld [vmem:[%s3014_s26 + $0xc38] sm:$0xff] }
  0x47   : > { %349 = vst [vmem:[%s3022_s27 + $0x318] sm:$0xff] %v348_v35  ;;  %351 = vst [vmem:[%s3022_s27 + $0x320] sm:$0xff] %v350_v36  ;;  %v358_v40 = vld [vmem:[%s3014_s26 + $0xd00] sm:$0xff]  ;;  %v360_v41 = vld [vmem:[%s3014_s26 + $0xd08] sm:$0xff] }
  0x48   : > { %353 = vst [vmem:[%s3022_s27 + $0x328] sm:$0xff] %v352_v37  ;;  %355 = vst [vmem:[%s3022_s27 + $0x330] sm:$0xff] %v354_v38  ;;  %v362_v42 = vld [vmem:[%s3014_s26 + $0xd10] sm:$0xff]  ;;  %v364_v43 = vld [vmem:[%s3014_s26 + $0xd18] sm:$0xff] }
  0x49   : > { %357 = vst [vmem:[%s3022_s27 + $0x338] sm:$0xff] %v356_v39  ;;  %359 = vst [vmem:[%s3022_s27 + $0x340] sm:$0xff] %v358_v40  ;;  %v366_v44 = vld [vmem:[%s3014_s26 + $0xd20] sm:$0xff]  ;;  %v368_v45 = vld [vmem:[%s3014_s26 + $0xd28] sm:$0xff] }
  0x4a   : > { %361 = vst [vmem:[%s3022_s27 + $0x348] sm:$0xff] %v360_v41  ;;  %363 = vst [vmem:[%s3022_s27 + $0x350] sm:$0xff] %v362_v42  ;;  %v370_v46 = vld [vmem:[%s3014_s26 + $0xd30] sm:$0xff]  ;;  %v372_v47 = vld [vmem:[%s3014_s26 + $0xd38] sm:$0xff] }
  0x4b   : > { %365 = vst [vmem:[%s3022_s27 + $0x358] sm:$0xff] %v364_v43  ;;  %367 = vst [vmem:[%s3022_s27 + $0x360] sm:$0xff] %v366_v44  ;;  %v374_v48 = vld [vmem:[%s3014_s26 + $0xe00] sm:$0xff]  ;;  %v376_v49 = vld [vmem:[%s3014_s26 + $0xe08] sm:$0xff] }
  0x4c   : > { %369 = vst [vmem:[%s3022_s27 + $0x368] sm:$0xff] %v368_v45  ;;  %371 = vst [vmem:[%s3022_s27 + $0x370] sm:$0xff] %v370_v46  ;;  %v378_v50 = vld [vmem:[%s3014_s26 + $0xe10] sm:$0xff]  ;;  %v380_v51 = vld [vmem:[%s3014_s26 + $0xe18] sm:$0xff] }
  0x4d   : > { %373 = vst [vmem:[%s3022_s27 + $0x378] sm:$0xff] %v372_v47  ;;  %375 = vst [vmem:[%s3022_s27 + $0x380] sm:$0xff] %v374_v48  ;;  %v382_v52 = vld [vmem:[%s3014_s26 + $0xe20] sm:$0xff]  ;;  %v384_v53 = vld [vmem:[%s3014_s26 + $0xe28] sm:$0xff] }
  0x4e   : > { %377 = vst [vmem:[%s3022_s27 + $0x388] sm:$0xff] %v376_v49  ;;  %379 = vst [vmem:[%s3022_s27 + $0x390] sm:$0xff] %v378_v50  ;;  %v386_v54 = vld [vmem:[%s3014_s26 + $0xe30] sm:$0xff]  ;;  %v388_v55 = vld [vmem:[%s3014_s26 + $0xe38] sm:$0xff] }
  0x4f   : > { %381 = vst [vmem:[%s3022_s27 + $0x398] sm:$0xff] %v380_v51  ;;  %383 = vst [vmem:[%s3022_s27 + $0x3a0] sm:$0xff] %v382_v52  ;;  %v390_v56 = vld [vmem:[%s3014_s26 + $0xf00] sm:$0xff]  ;;  %v392_v57 = vld [vmem:[%s3014_s26 + $0xf08] sm:$0xff] }
  0x50   : > { %385 = vst [vmem:[%s3022_s27 + $0x3a8] sm:$0xff] %v384_v53  ;;  %387 = vst [vmem:[%s3022_s27 + $0x3b0] sm:$0xff] %v386_v54  ;;  %v394_v58 = vld [vmem:[%s3014_s26 + $0xf10] sm:$0xff]  ;;  %v396_v59 = vld [vmem:[%s3014_s26 + $0xf18] sm:$0xff] }
  0x51   : > { %389 = vst [vmem:[%s3022_s27 + $0x3b8] sm:$0xff] %v388_v55  ;;  %391 = vst [vmem:[%s3022_s27 + $0x3c0] sm:$0xff] %v390_v56  ;;  %v398_v60 = vld [vmem:[%s3014_s26 + $0xf20] sm:$0xff]  ;;  %v400_v61 = vld [vmem:[%s3014_s26 + $0xf28] sm:$0xff] }
  0x52   : > { %393 = vst [vmem:[%s3022_s27 + $0x3c8] sm:$0xff] %v392_v57  ;;  %395 = vst [vmem:[%s3022_s27 + $0x3d0] sm:$0xff] %v394_v58  ;;  %v402_v62 = vld [vmem:[%s3014_s26 + $0xf30] sm:$0xff]  ;;  %v404_v63 = vld [vmem:[%s3014_s26 + $0xf38] sm:$0xff] }
  0x53   : > { %397 = vst [vmem:[%s3022_s27 + $0x3d8] sm:$0xff] %v396_v59  ;;  %399 = vst [vmem:[%s3022_s27 + $0x3e0] sm:$0xff] %v398_v60  ;;  %v406_v0 = vld [vmem:[%s3014_s26 + $0x1000] sm:$0xff]  ;;  %v408_v1 = vld [vmem:[%s3014_s26 + $0x1008] sm:$0xff] }
  0x54   : > { %401 = vst [vmem:[%s3022_s27 + $0x3e8] sm:$0xff] %v400_v61  ;;  %403 = vst [vmem:[%s3022_s27 + $0x3f0] sm:$0xff] %v402_v62  ;;  %v410_v2 = vld [vmem:[%s3014_s26 + $0x1010] sm:$0xff]  ;;  %v412_v3 = vld [vmem:[%s3014_s26 + $0x1018] sm:$0xff] }
  0x55   : > { %405 = vst [vmem:[%s3022_s27 + $0x3f8] sm:$0xff] %v404_v63  ;;  %407 = vst [vmem:[%s3022_s27 + $0x400] sm:$0xff] %v406_v0  ;;  %v414_v4 = vld [vmem:[%s3014_s26 + $0x1020] sm:$0xff]  ;;  %v416_v5 = vld [vmem:[%s3014_s26 + $0x1028] sm:$0xff] }
  0x56   : > { %409 = vst [vmem:[%s3022_s27 + $0x408] sm:$0xff] %v408_v1  ;;  %411 = vst [vmem:[%s3022_s27 + $0x410] sm:$0xff] %v410_v2  ;;  %v418_v6 = vld [vmem:[%s3014_s26 + $0x1030] sm:$0xff]  ;;  %v420_v7 = vld [vmem:[%s3014_s26 + $0x1038] sm:$0xff] }
  0x57   : > { %413 = vst [vmem:[%s3022_s27 + $0x418] sm:$0xff] %v412_v3  ;;  %415 = vst [vmem:[%s3022_s27 + $0x420] sm:$0xff] %v414_v4  ;;  %v422_v8 = vld [vmem:[%s3014_s26 + $0x1100] sm:$0xff]  ;;  %v424_v9 = vld [vmem:[%s3014_s26 + $0x1108] sm:$0xff] }
  0x58   : > { %417 = vst [vmem:[%s3022_s27 + $0x428] sm:$0xff] %v416_v5  ;;  %419 = vst [vmem:[%s3022_s27 + $0x430] sm:$0xff] %v418_v6  ;;  %v426_v10 = vld [vmem:[%s3014_s26 + $0x1110] sm:$0xff]  ;;  %v428_v11 = vld [vmem:[%s3014_s26 + $0x1118] sm:$0xff] }
  0x59   : > { %421 = vst [vmem:[%s3022_s27 + $0x438] sm:$0xff] %v420_v7  ;;  %423 = vst [vmem:[%s3022_s27 + $0x440] sm:$0xff] %v422_v8  ;;  %v430_v12 = vld [vmem:[%s3014_s26 + $0x1120] sm:$0xff]  ;;  %v432_v13 = vld [vmem:[%s3014_s26 + $0x1128] sm:$0xff] }
  0x5a   : > { %425 = vst [vmem:[%s3022_s27 + $0x448] sm:$0xff] %v424_v9  ;;  %427 = vst [vmem:[%s3022_s27 + $0x450] sm:$0xff] %v426_v10  ;;  %v434_v14 = vld [vmem:[%s3014_s26 + $0x1130] sm:$0xff]  ;;  %v436_v15 = vld [vmem:[%s3014_s26 + $0x1138] sm:$0xff] }
  0x5b   : > { %429 = vst [vmem:[%s3022_s27 + $0x458] sm:$0xff] %v428_v11  ;;  %431 = vst [vmem:[%s3022_s27 + $0x460] sm:$0xff] %v430_v12  ;;  %v438_v16 = vld [vmem:[%s3014_s26 + $0x1200] sm:$0xff]  ;;  %v440_v17 = vld [vmem:[%s3014_s26 + $0x1208] sm:$0xff] }
  0x5c   : > { %433 = vst [vmem:[%s3022_s27 + $0x468] sm:$0xff] %v432_v13  ;;  %435 = vst [vmem:[%s3022_s27 + $0x470] sm:$0xff] %v434_v14  ;;  %v442_v18 = vld [vmem:[%s3014_s26 + $0x1210] sm:$0xff]  ;;  %v444_v19 = vld [vmem:[%s3014_s26 + $0x1218] sm:$0xff] }
  0x5d   : > { %437 = vst [vmem:[%s3022_s27 + $0x478] sm:$0xff] %v436_v15  ;;  %439 = vst [vmem:[%s3022_s27 + $0x480] sm:$0xff] %v438_v16  ;;  %v446_v20 = vld [vmem:[%s3014_s26 + $0x1220] sm:$0xff]  ;;  %v448_v21 = vld [vmem:[%s3014_s26 + $0x1228] sm:$0xff] }
  0x5e   : > { %441 = vst [vmem:[%s3022_s27 + $0x488] sm:$0xff] %v440_v17  ;;  %443 = vst [vmem:[%s3022_s27 + $0x490] sm:$0xff] %v442_v18  ;;  %v450_v22 = vld [vmem:[%s3014_s26 + $0x1230] sm:$0xff]  ;;  %v452_v23 = vld [vmem:[%s3014_s26 + $0x1238] sm:$0xff] }
  0x5f   : > { %445 = vst [vmem:[%s3022_s27 + $0x498] sm:$0xff] %v444_v19  ;;  %447 = vst [vmem:[%s3022_s27 + $0x4a0] sm:$0xff] %v446_v20  ;;  %v454_v24 = vld [vmem:[%s3014_s26 + $0x1300] sm:$0xff]  ;;  %v456_v25 = vld [vmem:[%s3014_s26 + $0x1308] sm:$0xff] }
  0x60   : > { %449 = vst [vmem:[%s3022_s27 + $0x4a8] sm:$0xff] %v448_v21  ;;  %451 = vst [vmem:[%s3022_s27 + $0x4b0] sm:$0xff] %v450_v22  ;;  %v458_v26 = vld [vmem:[%s3014_s26 + $0x1310] sm:$0xff]  ;;  %v460_v27 = vld [vmem:[%s3014_s26 + $0x1318] sm:$0xff] }
  0x61   : > { %453 = vst [vmem:[%s3022_s27 + $0x4b8] sm:$0xff] %v452_v23  ;;  %455 = vst [vmem:[%s3022_s27 + $0x4c0] sm:$0xff] %v454_v24  ;;  %v462_v28 = vld [vmem:[%s3014_s26 + $0x1320] sm:$0xff]  ;;  %v464_v29 = vld [vmem:[%s3014_s26 + $0x1328] sm:$0xff] }
  0x62   : > { %457 = vst [vmem:[%s3022_s27 + $0x4c8] sm:$0xff] %v456_v25  ;;  %459 = vst [vmem:[%s3022_s27 + $0x4d0] sm:$0xff] %v458_v26  ;;  %v466_v30 = vld [vmem:[%s3014_s26 + $0x1330] sm:$0xff]  ;;  %v468_v31 = vld [vmem:[%s3014_s26 + $0x1338] sm:$0xff] }
  0x63   : > { %461 = vst [vmem:[%s3022_s27 + $0x4d8] sm:$0xff] %v460_v27  ;;  %463 = vst [vmem:[%s3022_s27 + $0x4e0] sm:$0xff] %v462_v28  ;;  %v470_v32 = vld [vmem:[%s3014_s26 + $0x1400] sm:$0xff]  ;;  %v472_v33 = vld [vmem:[%s3014_s26 + $0x1408] sm:$0xff] }
  0x64   : > { %465 = vst [vmem:[%s3022_s27 + $0x4e8] sm:$0xff] %v464_v29  ;;  %467 = vst [vmem:[%s3022_s27 + $0x4f0] sm:$0xff] %v466_v30  ;;  %v474_v34 = vld [vmem:[%s3014_s26 + $0x1410] sm:$0xff]  ;;  %v476_v35 = vld [vmem:[%s3014_s26 + $0x1418] sm:$0xff] }
  0x65   : > { %469 = vst [vmem:[%s3022_s27 + $0x4f8] sm:$0xff] %v468_v31  ;;  %471 = vst [vmem:[%s3022_s27 + $0x500] sm:$0xff] %v470_v32  ;;  %v478_v36 = vld [vmem:[%s3014_s26 + $0x1420] sm:$0xff]  ;;  %v480_v37 = vld [vmem:[%s3014_s26 + $0x1428] sm:$0xff] }
  0x66   : > { %473 = vst [vmem:[%s3022_s27 + $0x508] sm:$0xff] %v472_v33  ;;  %475 = vst [vmem:[%s3022_s27 + $0x510] sm:$0xff] %v474_v34  ;;  %v482_v38 = vld [vmem:[%s3014_s26 + $0x1430] sm:$0xff]  ;;  %v484_v39 = vld [vmem:[%s3014_s26 + $0x1438] sm:$0xff] }
  0x67   : > { %477 = vst [vmem:[%s3022_s27 + $0x518] sm:$0xff] %v476_v35  ;;  %479 = vst [vmem:[%s3022_s27 + $0x520] sm:$0xff] %v478_v36  ;;  %v486_v40 = vld [vmem:[%s3014_s26 + $0x1500] sm:$0xff]  ;;  %v488_v41 = vld [vmem:[%s3014_s26 + $0x1508] sm:$0xff] }
  0x68   : > { %481 = vst [vmem:[%s3022_s27 + $0x528] sm:$0xff] %v480_v37  ;;  %483 = vst [vmem:[%s3022_s27 + $0x530] sm:$0xff] %v482_v38  ;;  %v490_v42 = vld [vmem:[%s3014_s26 + $0x1510] sm:$0xff]  ;;  %v492_v43 = vld [vmem:[%s3014_s26 + $0x1518] sm:$0xff] }
  0x69   : > { %485 = vst [vmem:[%s3022_s27 + $0x538] sm:$0xff] %v484_v39  ;;  %487 = vst [vmem:[%s3022_s27 + $0x540] sm:$0xff] %v486_v40  ;;  %v494_v44 = vld [vmem:[%s3014_s26 + $0x1520] sm:$0xff]  ;;  %v496_v45 = vld [vmem:[%s3014_s26 + $0x1528] sm:$0xff] }
  0x6a   : > { %489 = vst [vmem:[%s3022_s27 + $0x548] sm:$0xff] %v488_v41  ;;  %491 = vst [vmem:[%s3022_s27 + $0x550] sm:$0xff] %v490_v42  ;;  %v498_v46 = vld [vmem:[%s3014_s26 + $0x1530] sm:$0xff]  ;;  %v500_v47 = vld [vmem:[%s3014_s26 + $0x1538] sm:$0xff] }
  0x6b   : > { %493 = vst [vmem:[%s3022_s27 + $0x558] sm:$0xff] %v492_v43  ;;  %495 = vst [vmem:[%s3022_s27 + $0x560] sm:$0xff] %v494_v44  ;;  %v502_v48 = vld [vmem:[%s3014_s26 + $0x1600] sm:$0xff]  ;;  %v504_v49 = vld [vmem:[%s3014_s26 + $0x1608] sm:$0xff] }
  0x6c   : > { %497 = vst [vmem:[%s3022_s27 + $0x568] sm:$0xff] %v496_v45  ;;  %499 = vst [vmem:[%s3022_s27 + $0x570] sm:$0xff] %v498_v46  ;;  %v506_v50 = vld [vmem:[%s3014_s26 + $0x1610] sm:$0xff]  ;;  %v508_v51 = vld [vmem:[%s3014_s26 + $0x1618] sm:$0xff] }
  0x6d   : > { %501 = vst [vmem:[%s3022_s27 + $0x578] sm:$0xff] %v500_v47  ;;  %503 = vst [vmem:[%s3022_s27 + $0x580] sm:$0xff] %v502_v48  ;;  %v510_v52 = vld [vmem:[%s3014_s26 + $0x1620] sm:$0xff]  ;;  %v512_v53 = vld [vmem:[%s3014_s26 + $0x1628] sm:$0xff] }
  0x6e   : > { %505 = vst [vmem:[%s3022_s27 + $0x588] sm:$0xff] %v504_v49  ;;  %507 = vst [vmem:[%s3022_s27 + $0x590] sm:$0xff] %v506_v50  ;;  %v514_v54 = vld [vmem:[%s3014_s26 + $0x1630] sm:$0xff]  ;;  %v516_v55 = vld [vmem:[%s3014_s26 + $0x1638] sm:$0xff] }
  0x6f   : > { %509 = vst [vmem:[%s3022_s27 + $0x598] sm:$0xff] %v508_v51  ;;  %511 = vst [vmem:[%s3022_s27 + $0x5a0] sm:$0xff] %v510_v52  ;;  %v518_v56 = vld [vmem:[%s3014_s26 + $0x1700] sm:$0xff]  ;;  %v520_v57 = vld [vmem:[%s3014_s26 + $0x1708] sm:$0xff] }
  0x70   : > { %513 = vst [vmem:[%s3022_s27 + $0x5a8] sm:$0xff] %v512_v53  ;;  %515 = vst [vmem:[%s3022_s27 + $0x5b0] sm:$0xff] %v514_v54  ;;  %v522_v58 = vld [vmem:[%s3014_s26 + $0x1710] sm:$0xff]  ;;  %v524_v59 = vld [vmem:[%s3014_s26 + $0x1718] sm:$0xff] }
  0x71   : > { %517 = vst [vmem:[%s3022_s27 + $0x5b8] sm:$0xff] %v516_v55  ;;  %519 = vst [vmem:[%s3022_s27 + $0x5c0] sm:$0xff] %v518_v56  ;;  %v526_v60 = vld [vmem:[%s3014_s26 + $0x1720] sm:$0xff]  ;;  %v528_v61 = vld [vmem:[%s3014_s26 + $0x1728] sm:$0xff] }
  0x72   : > { %521 = vst [vmem:[%s3022_s27 + $0x5c8] sm:$0xff] %v520_v57  ;;  %523 = vst [vmem:[%s3022_s27 + $0x5d0] sm:$0xff] %v522_v58  ;;  %v530_v62 = vld [vmem:[%s3014_s26 + $0x1730] sm:$0xff]  ;;  %v532_v63 = vld [vmem:[%s3014_s26 + $0x1738] sm:$0xff] }
  0x73   : > { %525 = vst [vmem:[%s3022_s27 + $0x5d8] sm:$0xff] %v524_v59  ;;  %527 = vst [vmem:[%s3022_s27 + $0x5e0] sm:$0xff] %v526_v60  ;;  %v534_v0 = vld [vmem:[%s3014_s26 + $0x1800] sm:$0xff]  ;;  %v536_v1 = vld [vmem:[%s3014_s26 + $0x1808] sm:$0xff] }
  0x74   : > { %529 = vst [vmem:[%s3022_s27 + $0x5e8] sm:$0xff] %v528_v61  ;;  %531 = vst [vmem:[%s3022_s27 + $0x5f0] sm:$0xff] %v530_v62  ;;  %v538_v2 = vld [vmem:[%s3014_s26 + $0x1810] sm:$0xff]  ;;  %v540_v3 = vld [vmem:[%s3014_s26 + $0x1818] sm:$0xff] }
  0x75   : > { %533 = vst [vmem:[%s3022_s27 + $0x5f8] sm:$0xff] %v532_v63  ;;  %535 = vst [vmem:[%s3022_s27 + $0x600] sm:$0xff] %v534_v0  ;;  %v542_v4 = vld [vmem:[%s3014_s26 + $0x1820] sm:$0xff]  ;;  %v544_v5 = vld [vmem:[%s3014_s26 + $0x1828] sm:$0xff] }
  0x76   : > { %537 = vst [vmem:[%s3022_s27 + $0x608] sm:$0xff] %v536_v1  ;;  %539 = vst [vmem:[%s3022_s27 + $0x610] sm:$0xff] %v538_v2  ;;  %v546_v6 = vld [vmem:[%s3014_s26 + $0x1830] sm:$0xff]  ;;  %v548_v7 = vld [vmem:[%s3014_s26 + $0x1838] sm:$0xff] }
  0x77   : > { %541 = vst [vmem:[%s3022_s27 + $0x618] sm:$0xff] %v540_v3  ;;  %543 = vst [vmem:[%s3022_s27 + $0x620] sm:$0xff] %v542_v4  ;;  %v550_v8 = vld [vmem:[%s3014_s26 + $0x1900] sm:$0xff]  ;;  %v552_v9 = vld [vmem:[%s3014_s26 + $0x1908] sm:$0xff] }
  0x78   : > { %545 = vst [vmem:[%s3022_s27 + $0x628] sm:$0xff] %v544_v5  ;;  %547 = vst [vmem:[%s3022_s27 + $0x630] sm:$0xff] %v546_v6  ;;  %v554_v10 = vld [vmem:[%s3014_s26 + $0x1910] sm:$0xff]  ;;  %v556_v11 = vld [vmem:[%s3014_s26 + $0x1918] sm:$0xff] }
  0x79   : > { %549 = vst [vmem:[%s3022_s27 + $0x638] sm:$0xff] %v548_v7  ;;  %551 = vst [vmem:[%s3022_s27 + $0x640] sm:$0xff] %v550_v8  ;;  %v558_v12 = vld [vmem:[%s3014_s26 + $0x1920] sm:$0xff]  ;;  %v560_v13 = vld [vmem:[%s3014_s26 + $0x1928] sm:$0xff] }
  0x7a   : > { %553 = vst [vmem:[%s3022_s27 + $0x648] sm:$0xff] %v552_v9  ;;  %555 = vst [vmem:[%s3022_s27 + $0x650] sm:$0xff] %v554_v10  ;;  %v562_v14 = vld [vmem:[%s3014_s26 + $0x1930] sm:$0xff]  ;;  %v564_v15 = vld [vmem:[%s3014_s26 + $0x1938] sm:$0xff] }
  0x7b   : > { %557 = vst [vmem:[%s3022_s27 + $0x658] sm:$0xff] %v556_v11  ;;  %559 = vst [vmem:[%s3022_s27 + $0x660] sm:$0xff] %v558_v12  ;;  %v566_v16 = vld [vmem:[%s3014_s26 + $0x1a00] sm:$0xff]  ;;  %v568_v17 = vld [vmem:[%s3014_s26 + $0x1a08] sm:$0xff] }
  0x7c   : > { %561 = vst [vmem:[%s3022_s27 + $0x668] sm:$0xff] %v560_v13  ;;  %563 = vst [vmem:[%s3022_s27 + $0x670] sm:$0xff] %v562_v14  ;;  %v570_v18 = vld [vmem:[%s3014_s26 + $0x1a10] sm:$0xff]  ;;  %v572_v19 = vld [vmem:[%s3014_s26 + $0x1a18] sm:$0xff] }
  0x7d   : > { %565 = vst [vmem:[%s3022_s27 + $0x678] sm:$0xff] %v564_v15  ;;  %567 = vst [vmem:[%s3022_s27 + $0x680] sm:$0xff] %v566_v16  ;;  %v574_v20 = vld [vmem:[%s3014_s26 + $0x1a20] sm:$0xff]  ;;  %v576_v21 = vld [vmem:[%s3014_s26 + $0x1a28] sm:$0xff] }
  0x7e   : > { %569 = vst [vmem:[%s3022_s27 + $0x688] sm:$0xff] %v568_v17  ;;  %571 = vst [vmem:[%s3022_s27 + $0x690] sm:$0xff] %v570_v18  ;;  %v578_v22 = vld [vmem:[%s3014_s26 + $0x1a30] sm:$0xff]  ;;  %v580_v23 = vld [vmem:[%s3014_s26 + $0x1a38] sm:$0xff] }
  0x7f   : > { %573 = vst [vmem:[%s3022_s27 + $0x698] sm:$0xff] %v572_v19  ;;  %575 = vst [vmem:[%s3022_s27 + $0x6a0] sm:$0xff] %v574_v20 }
  0x80   : > { %577 = vst [vmem:[%s3022_s27 + $0x6a8] sm:$0xff] %v576_v21  ;;  %579 = vst [vmem:[%s3022_s27 + $0x6b0] sm:$0xff] %v578_v22 }
  0x81   : > { %581 = vst [vmem:[%s3022_s27 + $0x6b8] sm:$0xff] %v580_v23 }
  0x82 PF: > { %p2597_p7 = scmp.ge.s32.totalorder %s2951_s14, 1  ;;  %p586_p8 = scmp.lt.s32.totalorder %s2951_s14, 5 }
  0x84   : > { %p587_p9 = pnand %p2597_p7, %p586_p8 }
  0x85   : > { %s593_s28 = sand.u32 (!%p587_p9), 1, %s2943_s12   ;;  %v3456_v24 = vld [vmem:[%s3821_s0 + $0x4] ss:$8 sps:$4 sm:$0xff] (!%p587_p9)   ;;  %vm1937_vm0 = vcmask (!%p587_p9), 719872   ;;  %v2953_v3 = vmov (!%p587_p9), 0   ;;  %vm1941_vm1 = vcmask (!%p587_p9), 1043456  }
  0x86   : > { %590 = sbr.rel (%p587_p9) target bundleno = 596 (0x254), region = 51  ;;  %2826 = vmatprep.mubr.msk.bf16.mxu0 (!%p587_p9), %vm1937_vm0, %v3456_v24  ;;  %2828 = vmatprep.mubr.msk.bf16.mxu1 (!%p587_p9), %vm1937_vm0, %v3456_v24  ;;  %s2598_s23 = sshll.u32 (!%p587_p9), %s593_s28, 7 }
  0x87   : > { %s2881_s4 = smul.u32 (!%p587_p9), 1728, %s593_s28  ;;  %2907 = vset.pattern.permute.xlu0 (!%p587_p9), %v2953_v3  ;;  %s3746_s12 = scalar_lea.vmem (!%p587_p9), [#allocation3], %s2598_s23 }
  0x89   : > { %s3464_s5 = scalar_lea.vmem (!%p587_p9), [#allocation2], %s2881_s4 }
  0x8a   : > { %v620_v25 = vld [vmem:[%s3464_s5] sm:$0xff] (!%p587_p9)  ;;  %v621_v27 = vld [vmem:[%s3464_s5 + $0x8] sm:$0xff] (!%p587_p9) }
  0x8b   : > { %v628_v26 = vld [vmem:[%s3464_s5 + $0x40] sm:$0xff] (!%p587_p9)  ;;  %v629_v29 = vld [vmem:[%s3464_s5 + $0x48] sm:$0xff] (!%p587_p9) }
  0x8c   : > { %v2602_v28 = vcombine.high (!%p587_p9), %v620_v25, %v628_v26  ;;  %v2601_v30 = vcombine.low (!%p587_p9), %v620_v25, %v628_v26  ;;  %v636_v31 = vld [vmem:[%s3464_s5 + $0x80] sm:$0xff] (!%p587_p9)  ;;  %v2604_v33 = vcombine.high (!%p587_p9), %v621_v27, %v629_v29  ;;  %v2603_v34 = vcombine.low (!%p587_p9), %v621_v27, %v629_v29  ;;  %v637_v36 = vld [vmem:[%s3464_s5 + $0x88] sm:$0xff] (!%p587_p9) }
  0x8d   : > { %v644_v32 = vld [vmem:[%s3464_s5 + $0xc0] sm:$0xff]  ;;  %v645_v37 = vld [vmem:[%s3464_s5 + $0xc8] sm:$0xff]  ;;  %s2879_s24 = sshll.u32 (%p3004_p5), %s2591_s15, 6 }
  0x8e   : > { %v2618_v35 = vcombine.high %v636_v31, %v644_v32  ;;  %v652_v38 = vld [vmem:[%s3464_s5 + $0x100] sm:$0xff]  ;;  %1990 = vmatprep.subr.bf16.mxu0 %v2602_v28  ;;  %v2620_v39 = vcombine.high %v637_v36, %v645_v37  ;;  %v653_v41 = vld [vmem:[%s3464_s5 + $0x108] sm:$0xff]  ;;  %2033 = vmatprep.subr.bf16.mxu1 %v2604_v33  ;;  %v2617_v43 = vcombine.low %v636_v31, %v644_v32  ;;  %s2487_s20 = scalar_lea.vmem (%p3004_p5), %s3824_s3, %s2879_s24 }
  0x8f   : > { %v660_v40 = vld [vmem:[%s3464_s5 + $0x140] sm:$0xff]  ;;  %v661_v42 = vld [vmem:[%s3464_s5 + $0x148] sm:$0xff]  ;;  %1991 = vmatpush1.bf16.msra.mxu0 %v2601_v30  ;;  %2034 = vmatpush1.bf16.msra.mxu1 %v2603_v34  ;;  %v2619_v44 = vcombine.low %v637_v36, %v645_v37 }
  0x90   : > { %1992 = vmatprep.subr.bf16.mxu0 %v2618_v35  ;;  %v2634_v45 = vcombine.high %v652_v38, %v660_v40  ;;  %2035 = vmatprep.subr.bf16.mxu1 %v2620_v39  ;;  %v2636_v46 = vcombine.high %v653_v41, %v661_v42  ;;  %v668_v47 = vld [vmem:[%s3464_s5 + $0x180] sm:$0xff]  ;;  %v669_v49 = vld [vmem:[%s3464_s5 + $0x188] sm:$0xff]  ;;  %v2633_v51 = vcombine.low %v652_v38, %v660_v40 }
  0x91   : > { %v676_v48 = vld [vmem:[%s3464_s5 + $0x1c0] sm:$0xff]  ;;  %v677_v50 = vld [vmem:[%s3464_s5 + $0x1c8] sm:$0xff]  ;;  %v2635_v52 = vcombine.low %v653_v41, %v661_v42 }
  0x92   : > { %v2650_v53 = vcombine.high %v668_v47, %v676_v48  ;;  %v2652_v54 = vcombine.high %v669_v49, %v677_v50  ;;  %v684_v55 = vld [vmem:[%s3464_s5 + $0x200] sm:$0xff]  ;;  %v685_v57 = vld [vmem:[%s3464_s5 + $0x208] sm:$0xff]  ;;  %v2649_v59 = vcombine.low %v668_v47, %v676_v48  ;;  %v2651_v60 = vcombine.low %v669_v49, %v677_v50 }
  0x93   : > { %1993 = vmatpush1.bf16.msra.mxu0 %v2617_v43  ;;  %2036 = vmatpush1.bf16.msra.mxu1 %v2619_v44  ;;  %v692_v56 = vld [vmem:[%s3464_s5 + $0x240] sm:$0xff]  ;;  %v693_v58 = vld [vmem:[%s3464_s5 + $0x248] sm:$0xff] }
  0x94   : > { %1994 = vmatprep.subr.bf16.mxu0 %v2634_v45  ;;  %2037 = vmatprep.subr.bf16.mxu1 %v2636_v46  ;;  %v2666_v61 = vcombine.high %v684_v55, %v692_v56  ;;  %v2668_v62 = vcombine.high %v685_v57, %v693_v58  ;;  %v700_v63 = vld [vmem:[%s3464_s5 + $0x280] sm:$0xff]  ;;  %v701_v1 = vld [vmem:[%s3464_s5 + $0x288] sm:$0xff]  ;;  %v2665_v4 = vcombine.low %v684_v55, %v692_v56 }
  0x95   : > { %v708_v0 = vld [vmem:[%s3464_s5 + $0x2c0] sm:$0xff]  ;;  %v709_v2 = vld [vmem:[%s3464_s5 + $0x2c8] sm:$0xff]  ;;  %v2667_v5 = vcombine.low %v685_v57, %v693_v58 }
  0x96   : > { %v2682_v6 = vcombine.high %v700_v63, %v708_v0  ;;  %v2684_v7 = vcombine.high %v701_v1, %v709_v2  ;;  %v716_v8 = vld [vmem:[%s3464_s5 + $0x300] sm:$0xff]  ;;  %v717_v10 = vld [vmem:[%s3464_s5 + $0x308] sm:$0xff]  ;;  %v2681_v12 = vcombine.low %v700_v63, %v708_v0  ;;  %v2683_v13 = vcombine.low %v701_v1, %v709_v2 }
  0x97   : > { %1995 = vmatpush1.bf16.msra.mxu0 %v2633_v51  ;;  %2038 = vmatpush1.bf16.msra.mxu1 %v2635_v52  ;;  %v724_v9 = vld [vmem:[%s3464_s5 + $0x340] sm:$0xff]  ;;  %v725_v11 = vld [vmem:[%s3464_s5 + $0x348] sm:$0xff] }
  0x98   : > { %1996 = vmatprep.subr.bf16.mxu0 %v2650_v53  ;;  %2039 = vmatprep.subr.bf16.mxu1 %v2652_v54  ;;  %v2698_v14 = vcombine.high %v716_v8, %v724_v9  ;;  %v2700_v15 = vcombine.high %v717_v10, %v725_v11  ;;  %v732_v16 = vld [vmem:[%s3464_s5 + $0x380] sm:$0xff]  ;;  %v733_v18 = vld [vmem:[%s3464_s5 + $0x388] sm:$0xff]  ;;  %v2697_v20 = vcombine.low %v716_v8, %v724_v9 }
  0x99   : > { %v740_v17 = vld [vmem:[%s3464_s5 + $0x3c0] sm:$0xff]  ;;  %v741_v19 = vld [vmem:[%s3464_s5 + $0x3c8] sm:$0xff]  ;;  %v2699_v21 = vcombine.low %v717_v10, %v725_v11  ;;  %v622_v11 = vld [vmem:[%s3464_s5 + $0x10] sm:$0xff] }
  0x9a   : > { %v2714_v22 = vcombine.high %v732_v16, %v740_v17  ;;  %v2716_v23 = vcombine.high %v733_v18, %v741_v19  ;;  %v748_v25 = vld [vmem:[%s3464_s5 + $0x400] sm:$0xff]  ;;  %v749_v27 = vld [vmem:[%s3464_s5 + $0x408] sm:$0xff]  ;;  %v2713_v29 = vcombine.low %v732_v16, %v740_v17  ;;  %v2715_v30 = vcombine.low %v733_v18, %v741_v19  ;;  %v638_v19 = vld [vmem:[%s3464_s5 + $0x90] sm:$0xff] }
  0x9b   : > { %1997 = vmatpush1.bf16.msra.mxu0 %v2649_v59  ;;  %2040 = vmatpush1.bf16.msra.mxu1 %v2651_v60  ;;  %v756_v26 = vld [vmem:[%s3464_s5 + $0x440] sm:$0xff]  ;;  %v757_v28 = vld [vmem:[%s3464_s5 + $0x448] sm:$0xff] }
  0x9c   : > { %1998 = vmatprep.subr.bf16.mxu0 %v2666_v61  ;;  %2041 = vmatprep.subr.bf16.mxu1 %v2668_v62  ;;  %v2730_v31 = vcombine.high %v748_v25, %v756_v26  ;;  %v2732_v32 = vcombine.high %v749_v27, %v757_v28  ;;  %v764_v33 = vld [vmem:[%s3464_s5 + $0x480] sm:$0xff]  ;;  %v765_v35 = vld [vmem:[%s3464_s5 + $0x488] sm:$0xff]  ;;  %v2729_v37 = vcombine.low %v748_v25, %v756_v26 }
  0x9d   : > { %v772_v34 = vld [vmem:[%s3464_s5 + $0x4c0] sm:$0xff]  ;;  %v773_v36 = vld [vmem:[%s3464_s5 + $0x4c8] sm:$0xff]  ;;  %v2731_v38 = vcombine.low %v749_v27, %v757_v28 }
  0x9e   : > { %v2746_v39 = vcombine.high %v764_v33, %v772_v34  ;;  %v2748_v40 = vcombine.high %v765_v35, %v773_v36  ;;  %v780_v41 = vld [vmem:[%s3464_s5 + $0x500] sm:$0xff]  ;;  %v781_v43 = vld [vmem:[%s3464_s5 + $0x508] sm:$0xff]  ;;  %v2745_v45 = vcombine.low %v764_v33, %v772_v34  ;;  %v2747_v46 = vcombine.low %v765_v35, %v773_v36 }
  0x9f   : > { %1999 = vmatpush1.bf16.msra.mxu0 %v2665_v4  ;;  %2042 = vmatpush1.bf16.msra.mxu1 %v2667_v5  ;;  %v788_v42 = vld [vmem:[%s3464_s5 + $0x540] sm:$0xff]  ;;  %v789_v44 = vld [vmem:[%s3464_s5 + $0x548] sm:$0xff] }
  0xa0   : > { %2000 = vmatprep.subr.bf16.mxu0 %v2682_v6  ;;  %2043 = vmatprep.subr.bf16.mxu1 %v2684_v7  ;;  %v2762_v47 = vcombine.high %v780_v41, %v788_v42  ;;  %v2764_v48 = vcombine.high %v781_v43, %v789_v44  ;;  %v796_v49 = vld [vmem:[%s3464_s5 + $0x580] sm:$0xff]  ;;  %v797_v51 = vld [vmem:[%s3464_s5 + $0x588] sm:$0xff]  ;;  %v2761_v53 = vcombine.low %v780_v41, %v788_v42 }
  0xa1   : > { %v804_v50 = vld [vmem:[%s3464_s5 + $0x5c0] sm:$0xff]  ;;  %v805_v52 = vld [vmem:[%s3464_s5 + $0x5c8] sm:$0xff]  ;;  %v2763_v54 = vcombine.low %v781_v43, %v789_v44 }
  0xa2   : > { %v2778_v55 = vcombine.high %v796_v49, %v804_v50  ;;  %v2780_v56 = vcombine.high %v797_v51, %v805_v52  ;;  %v812_v57 = vld [vmem:[%s3464_s5 + $0x600] sm:$0xff]  ;;  %v813_v59 = vld [vmem:[%s3464_s5 + $0x608] sm:$0xff]  ;;  %v2777_v61 = vcombine.low %v796_v49, %v804_v50  ;;  %v2779_v62 = vcombine.low %v797_v51, %v805_v52 }
  0xa3   : > { %2001 = vmatpush1.bf16.msra.mxu0 %v2681_v12  ;;  %2044 = vmatpush1.bf16.msra.mxu1 %v2683_v13  ;;  %v820_v58 = vld [vmem:[%s3464_s5 + $0x640] sm:$0xff]  ;;  %v821_v60 = vld [vmem:[%s3464_s5 + $0x648] sm:$0xff]  ;;  %v630_v12 = vld [vmem:[%s3464_s5 + $0x50] sm:$0xff] }
  0xa4   : > { %2002 = vmatprep.subr.bf16.mxu0 %v2698_v14  ;;  %2045 = vmatprep.subr.bf16.mxu1 %v2700_v15  ;;  %v2794_v63 = vcombine.high %v812_v57, %v820_v58  ;;  %v836_v0 = vld [vmem:[%s3823_s2] sm:$0xff]  ;;  %v2796_v1 = vcombine.high %v813_v59, %v821_v60  ;;  %v829_v3 = vld [vmem:[%s3464_s5 + $0x688] sm:$0xff]  ;;  %v2793_v5 = vcombine.low %v812_v57, %v820_v58  ;;  %v623_v13 = vld [vmem:[%s3464_s5 + $0x18] sm:$0xff] }
  0xa5   : > { %v828_v2 = vld [vmem:[%s3464_s5 + $0x680] sm:$0xff]  ;;  %840 = vperm.xlu0 %2907, %v836_v0   ;;  %v837_v4 = vld [vmem:[%s3823_s2 + $0x8] sm:$0xff]  ;;  %v2795_v6 = vcombine.low %v813_v59, %v821_v60  ;;  %v2812_v9 = vcombine.high %v829_v3, %v829_v3  ;;  %v2811_v10 = vcombine.low %v829_v3, %v829_v3  ;;  %v631_v14 = vld [vmem:[%s3464_s5 + $0x58] sm:$0xff]  ;;  %v2606_v16 = vcombine.high %v622_v11, %v630_v12 }
  0xa6   : > { %v2810_v7 = vcombine.high %v828_v2, %v828_v2  ;;  %v2809_v8 = vcombine.low %v828_v2, %v828_v2  ;;  %v2608_v18 = vcombine.high %v623_v13, %v631_v14  ;;  %v2605_v25 = vcombine.low %v622_v11, %v630_v12  ;;  %v727_v0 = vld [vmem:[%s3464_s5 + $0x358] sm:$0xff] }
  0xa7   : > { %2003 = vmatpush1.bf16.msra.mxu0 %v2697_v20  ;;  %2046 = vmatpush1.bf16.msra.mxu1 %v2699_v21  ;;  %v1949_v17 = vsel %vm1941_vm1, %v2811_v10, 0  ;;  %v646_v20 = vld [vmem:[%s3464_s5 + $0xd0] sm:$0xff]  ;;  %v3539_v21 = vld [vmem:[%s3821_s0] ss:$8 sps:$4 sm:$0xff]   ;;  %v2607_v26 = vcombine.low %v623_v13, %v631_v14 }
  0xa8   : > { %2004 = vmatprep.subr.bf16.mxu0 %v2714_v22  ;;  %2047 = vmatprep.subr.bf16.mxu1 %v2716_v23  ;;  %v1943_v15 = vsel %vm1941_vm1, %v2809_v8, 0  ;;  %v639_v22 = vld [vmem:[%s3464_s5 + $0x98] sm:$0xff]  ;;  %v2622_v27 = vcombine.high %v638_v19, %v646_v20  ;;  %v2621_v33 = vcombine.low %v638_v19, %v646_v20  ;;  %v750_v13 = vld [vmem:[%s3464_s5 + $0x410] sm:$0xff] }
  0xa9   : > { %845 = vperm.xlu0 %2907, %v837_v4   ;;  %v647_v23 = vld [vmem:[%s3464_s5 + $0xd8] sm:$0xff]  ;;  %v758_v14 = vld [vmem:[%s3464_s5 + $0x450] sm:$0xff] }
  0xaa   : > { %v2624_v28 = vcombine.high %v639_v22, %v647_v23  ;;  %v2623_v34 = vcombine.low %v639_v22, %v647_v23  ;;  %v743_v8 = vld [vmem:[%s3464_s5 + $0x3d8] sm:$0xff]  ;;  %v2734_v19 = vcombine.high %v750_v13, %v758_v14  ;;  %v766_v22 = vld [vmem:[%s3464_s5 + $0x490] sm:$0xff] }
  0xab   : > { %2005 = vmatpush1.bf16.msra.mxu0 %v2713_v29  ;;  %2048 = vmatpush1.bf16.msra.mxu1 %v2715_v30  ;;  %v654_v29 = vld [vmem:[%s3464_s5 + $0x110] sm:$0xff] }
  0xac   : > { %2006 = vmatprep.subr.bf16.mxu0 %v2730_v31  ;;  %2049 = vmatprep.subr.bf16.mxu1 %v2732_v32  ;;  %v662_v30 = vld [vmem:[%s3464_s5 + $0x150] sm:$0xff]  ;;  %v655_v31 = vld [vmem:[%s3464_s5 + $0x118] sm:$0xff] }
  0xad   : > { %v663_v32 = vld [vmem:[%s3464_s5 + $0x158] sm:$0xff]  ;;  %v2638_v35 = vcombine.high %v654_v29, %v662_v30  ;;  %v2637_v41 = vcombine.low %v654_v29, %v662_v30  ;;  %v774_v23 = vld [vmem:[%s3464_s5 + $0x4d0] sm:$0xff] }
  0xae   : > { %v2640_v36 = vcombine.high %v655_v31, %v663_v32  ;;  %v2639_v42 = vcombine.low %v655_v31, %v663_v32  ;;  %v2750_v29 = vcombine.high %v766_v22, %v774_v23  ;;  %v782_v31 = vld [vmem:[%s3464_s5 + $0x510] sm:$0xff] }
  0xaf   : > { %2007 = vmatpush1.bf16.msra.mxu0 %v2729_v37  ;;  %2050 = vmatpush1.bf16.msra.mxu1 %v2731_v38  ;;  %v670_v37 = vld [vmem:[%s3464_s5 + $0x190] sm:$0xff] }
  0xb0   : > { %2008 = vmatprep.subr.bf16.mxu0 %v2746_v39  ;;  %2051 = vmatprep.subr.bf16.mxu1 %v2748_v40  ;;  %v678_v38 = vld [vmem:[%s3464_s5 + $0x1d0] sm:$0xff]  ;;  %v671_v39 = vld [vmem:[%s3464_s5 + $0x198] sm:$0xff] }
  0xb1   : > { %v679_v40 = vld [vmem:[%s3464_s5 + $0x1d8] sm:$0xff]  ;;  %v2654_v43 = vcombine.high %v670_v37, %v678_v38  ;;  %v2653_v49 = vcombine.low %v670_v37, %v678_v38  ;;  %v790_v32 = vld [vmem:[%s3464_s5 + $0x550] sm:$0xff] }
  0xb2   : > { %v2656_v44 = vcombine.high %v671_v39, %v679_v40  ;;  %v2655_v50 = vcombine.low %v671_v39, %v679_v40  ;;  %v2766_v37 = vcombine.high %v782_v31, %v790_v32  ;;  %v798_v39 = vld [vmem:[%s3464_s5 + $0x590] sm:$0xff] }
  0xb3   : > { %2009 = vmatpush1.bf16.msra.mxu0 %v2745_v45  ;;  %2052 = vmatpush1.bf16.msra.mxu1 %v2747_v46  ;;  %v686_v45 = vld [vmem:[%s3464_s5 + $0x210] sm:$0xff] }
  0xb4   : > { %2010 = vmatprep.subr.bf16.mxu0 %v2762_v47  ;;  %2053 = vmatprep.subr.bf16.mxu1 %v2764_v48  ;;  %v694_v46 = vld [vmem:[%s3464_s5 + $0x250] sm:$0xff]  ;;  %v687_v47 = vld [vmem:[%s3464_s5 + $0x218] sm:$0xff] }
  0xb5   : > { %v695_v48 = vld [vmem:[%s3464_s5 + $0x258] sm:$0xff]  ;;  %v2670_v51 = vcombine.high %v686_v45, %v694_v46  ;;  %v2669_v57 = vcombine.low %v686_v45, %v694_v46  ;;  %v806_v40 = vld [vmem:[%s3464_s5 + $0x5d0] sm:$0xff] }
  0xb6   : > { %v2672_v52 = vcombine.high %v687_v47, %v695_v48  ;;  %v2671_v58 = vcombine.low %v687_v47, %v695_v48  ;;  %v2782_v45 = vcombine.high %v798_v39, %v806_v40  ;;  %v814_v47 = vld [vmem:[%s3464_s5 + $0x610] sm:$0xff] }
  0xb7   : > { %2011 = vmatpush1.bf16.msra.mxu0 %v2761_v53  ;;  %2054 = vmatpush1.bf16.msra.mxu1 %v2763_v54  ;;  %v702_v53 = vld [vmem:[%s3464_s5 + $0x290] sm:$0xff] }
  0xb8   : > { %2012 = vmatprep.subr.bf16.mxu0 %v2778_v55  ;;  %2055 = vmatprep.subr.bf16.mxu1 %v2780_v56  ;;  %v710_v54 = vld [vmem:[%s3464_s5 + $0x2d0] sm:$0xff]  ;;  %v703_v55 = vld [vmem:[%s3464_s5 + $0x298] sm:$0xff] }
  0xb9   : > { %v711_v56 = vld [vmem:[%s3464_s5 + $0x2d8] sm:$0xff]  ;;  %v2686_v59 = vcombine.high %v702_v53, %v710_v54  ;;  %v822_v48 = vld [vmem:[%s3464_s5 + $0x650] sm:$0xff] }
  0xba   : > { %v2688_v60 = vcombine.high %v703_v55, %v711_v56  ;;  %v2687_v2 = vcombine.low %v703_v55, %v711_v56  ;;  %v830_v55 = vld [vmem:[%s3464_s5 + $0x690] sm:$0xff]  ;;  %v831_v56 = vld [vmem:[%s3464_s5 + $0x698] sm:$0xff] }
  0xbb   : > { %2013 = vmatpush1.bf16.msra.mxu0 %v2777_v61  ;;  %2056 = vmatpush1.bf16.msra.mxu1 %v2779_v62  ;;  %v718_v61 = vld [vmem:[%s3464_s5 + $0x310] sm:$0xff] }
  0xbc   : > { %2014 = vmatprep.subr.bf16.mxu0 %v2794_v63  ;;  %2057 = vmatprep.subr.bf16.mxu1 %v2796_v1  ;;  %v726_v62 = vld [vmem:[%s3464_s5 + $0x350] sm:$0xff]  ;;  %v719_v63 = vld [vmem:[%s3464_s5 + $0x318] sm:$0xff]  ;;  %v2685_v1 = vcombine.low %v702_v53, %v710_v54  ;;  %v2798_v53 = vcombine.high %v814_v47, %v822_v48 }
  0xbd   : > { %v2702_v3 = vcombine.high %v718_v61, %v726_v62  ;;  %v2704_v4 = vcombine.high %v719_v63, %v727_v0  ;;  %v2703_v10 = vcombine.low %v719_v63, %v727_v0  ;;  %v624_v63 = vld [vmem:[%s3464_s5 + $0x20] sm:$0xff] }
  0xbe   : > { %v632_v0 = vld [vmem:[%s3464_s5 + $0x60] sm:$0xff] }
  0xbf   : > { %2015 = vmatpush1.bf16.msra.mxu0 %v2793_v5  ;;  %2058 = vmatpush1.bf16.msra.mxu1 %v2795_v6  ;;  %v734_v5 = vld [vmem:[%s3464_s5 + $0x390] sm:$0xff] }
  0xc0   : > { %2825 = vmatprep.subr.msk.bf16.mxu0 %vm1941_vm1, %v2810_v7  ;;  %2827 = vmatprep.subr.msk.bf16.mxu1 %vm1941_vm1, %v2812_v9  ;;  %v742_v6 = vld [vmem:[%s3464_s5 + $0x3d0] sm:$0xff]  ;;  %v735_v7 = vld [vmem:[%s3464_s5 + $0x398] sm:$0xff]  ;;  %v2701_v9 = vcombine.low %v718_v61, %v726_v62  ;;  %v2816_v61 = vcombine.high %v831_v56, %v831_v56  ;;  %v2815_v62 = vcombine.low %v831_v56, %v831_v56  ;;  %v736_v56 = vld [vmem:[%s3464_s5 + $0x3a0] sm:$0xff] }
  0xc1   : > { %v2718_v11 = vcombine.high %v734_v5, %v742_v6  ;;  %v2720_v12 = vcombine.high %v735_v7, %v743_v8 }
  0xc3   : > { %2017 = vmatpush1.bf16.msra.mxu0 %v1943_v15  ;;  %2060 = vmatpush1.bf16.msra.mxu1 %v1949_v17  ;;  %v751_v15 = vld [vmem:[%s3464_s5 + $0x418] sm:$0xff]  ;;  %v2717_v17 = vcombine.low %v734_v5, %v742_v6  ;;  %v1961_v5 = vsel %vm1941_vm1, %v2815_v62, 0 }
  0xc4   : > { %2076 = vmatprep.subr.bf16.mxu0 %v2606_v16  ;;  %2119 = vmatprep.subr.bf16.mxu1 %v2608_v18  ;;  %v759_v16 = vld [vmem:[%s3464_s5 + $0x458] sm:$0xff]  ;;  %v2719_v18 = vcombine.low %v735_v7, %v743_v8  ;;  %v640_v7 = vld [vmem:[%s3464_s5 + $0xa0] sm:$0xff] }
  0xc5   : > { %v2736_v20 = vcombine.high %v751_v15, %v759_v16  ;;  %v648_v8 = vld [vmem:[%s3464_s5 + $0xe0] sm:$0xff] }
  0xc6   : > { %2023 = vmatmul.mubr.bf16.vlgmr.msra.gmra.mrb[0].mxu0 %v3539_v21  ;;  %2066 = vmatmul.mubr.bf16.vlgmr.msra.gmra.mrb[0].mxu1 %v3539_v21 }
  0xc7   : > { %2077 = vmatpush1.bf16.msra.mxu0 %v2605_v25  ;;  %2120 = vmatpush1.bf16.msra.mxu1 %v2607_v26  ;;  %v767_v25 = vld [vmem:[%s3464_s5 + $0x498] sm:$0xff] }
  0xc8   : > { %2078 = vmatprep.subr.bf16.mxu0 %v2622_v27  ;;  %2121 = vmatprep.subr.bf16.mxu1 %v2624_v28  ;;  %v775_v26 = vld [vmem:[%s3464_s5 + $0x4d8] sm:$0xff]  ;;  %v2733_v27 = vcombine.low %v750_v13, %v758_v14  ;;  %v2735_v28 = vcombine.low %v751_v15, %v759_v16  ;;  %v2626_v13 = vcombine.high %v640_v7, %v648_v8  ;;  %v656_v15 = vld [vmem:[%s3464_s5 + $0x120] sm:$0xff] }
  0xc9   : > { %2830 = vmatprep.mubr.msk.bf16.mxu0 %vm1937_vm0, %v3456_v24  ;;  %2832 = vmatprep.mubr.msk.bf16.mxu1 %vm1937_vm0, %v3456_v24  ;;  %v2752_v30 = vcombine.high %v767_v25, %v775_v26  ;;  %v664_v16 = vld [vmem:[%s3464_s5 + $0x160] sm:$0xff] }
  0xcb   : > { %2079 = vmatpush1.bf16.msra.mxu0 %v2621_v33  ;;  %2122 = vmatpush1.bf16.msra.mxu1 %v2623_v34  ;;  %v783_v33 = vld [vmem:[%s3464_s5 + $0x518] sm:$0xff] }
  0xcc   : > { %2080 = vmatprep.subr.bf16.mxu0 %v2638_v35  ;;  %2123 = vmatprep.subr.bf16.mxu1 %v2640_v36  ;;  %v791_v34 = vld [vmem:[%s3464_s5 + $0x558] sm:$0xff]  ;;  %v2749_v35 = vcombine.low %v766_v22, %v774_v23  ;;  %v2751_v36 = vcombine.low %v767_v25, %v775_v26  ;;  %v2642_v22 = vcombine.high %v656_v15, %v664_v16  ;;  %v672_v25 = vld [vmem:[%s3464_s5 + $0x1a0] sm:$0xff] }
  0xcd   : > { %v2768_v38 = vcombine.high %v783_v33, %v791_v34  ;;  %v680_v26 = vld [vmem:[%s3464_s5 + $0x1e0] sm:$0xff] }
  0xcf   : > { %2081 = vmatpush1.bf16.msra.mxu0 %v2637_v41  ;;  %2124 = vmatpush1.bf16.msra.mxu1 %v2639_v42  ;;  %v799_v41 = vld [vmem:[%s3464_s5 + $0x598] sm:$0xff] }
  0xd0   : > { %2082 = vmatprep.subr.bf16.mxu0 %v2654_v43  ;;  %2125 = vmatprep.subr.bf16.mxu1 %v2656_v44  ;;  %v807_v42 = vld [vmem:[%s3464_s5 + $0x5d8] sm:$0xff]  ;;  %v2765_v43 = vcombine.low %v782_v31, %v790_v32  ;;  %v2767_v44 = vcombine.low %v783_v33, %v791_v34  ;;  %v2658_v31 = vcombine.high %v672_v25, %v680_v26  ;;  %v688_v33 = vld [vmem:[%s3464_s5 + $0x220] sm:$0xff] }
  0xd1   : > { %v2784_v46 = vcombine.high %v799_v41, %v807_v42  ;;  %v696_v34 = vld [vmem:[%s3464_s5 + $0x260] sm:$0xff] }
  0xd3   : > { %2083 = vmatpush1.bf16.msra.mxu0 %v2653_v49  ;;  %2126 = vmatpush1.bf16.msra.mxu1 %v2655_v50  ;;  %v815_v49 = vld [vmem:[%s3464_s5 + $0x618] sm:$0xff] }
  0xd4   : > { %2084 = vmatprep.subr.bf16.mxu0 %v2670_v51  ;;  %2127 = vmatprep.subr.bf16.mxu1 %v2672_v52  ;;  %v823_v50 = vld [vmem:[%s3464_s5 + $0x658] sm:$0xff]  ;;  %v2781_v51 = vcombine.low %v798_v39, %v806_v40  ;;  %v2783_v52 = vcombine.low %v799_v41, %v807_v42  ;;  %v704_v40 = vld [vmem:[%s3464_s5 + $0x2a0] sm:$0xff]  ;;  %v705_v42 = vld [vmem:[%s3464_s5 + $0x2a8] sm:$0xff] }
  0xd5   : > { %v2800_v54 = vcombine.high %v815_v49, %v823_v50  ;;  %v712_v41 = vld [vmem:[%s3464_s5 + $0x2e0] sm:$0xff] }
  0xd7   : > { %2085 = vmatpush1.bf16.msra.mxu0 %v2669_v57  ;;  %2128 = vmatpush1.bf16.msra.mxu1 %v2671_v58  ;;  %v2797_v57 = vcombine.low %v814_v47, %v822_v48  ;;  %v2799_v58 = vcombine.low %v815_v49, %v823_v50  ;;  %v720_v48 = vld [vmem:[%s3464_s5 + $0x320] sm:$0xff]  ;;  %v721_v50 = vld [vmem:[%s3464_s5 + $0x328] sm:$0xff] }
  0xd8   : > { %2086 = vmatprep.subr.bf16.mxu0 %v2686_v59  ;;  %2129 = vmatprep.subr.bf16.mxu1 %v2688_v60  ;;  %v2814_v59 = vcombine.high %v830_v55, %v830_v55  ;;  %v2813_v60 = vcombine.low %v830_v55, %v830_v55  ;;  %v728_v49 = vld [vmem:[%s3464_s5 + $0x360] sm:$0xff] }
  0xdb   : > { %2087 = vmatpush1.bf16.msra.mxu0 %v2685_v1  ;;  %2130 = vmatpush1.bf16.msra.mxu1 %v2687_v2  ;;  %v625_v1 = vld [vmem:[%s3464_s5 + $0x28] sm:$0xff] }
  0xdc   : > { %2088 = vmatprep.subr.bf16.mxu0 %v2702_v3  ;;  %2131 = vmatprep.subr.bf16.mxu1 %v2704_v4  ;;  %v633_v2 = vld [vmem:[%s3464_s5 + $0x68] sm:$0xff]  ;;  %v1955_v3 = vsel %vm1941_vm1, %v2813_v60, 0  ;;  %v2610_v4 = vcombine.high %v624_v63, %v632_v0  ;;  %v2705_v60 = vcombine.low %v720_v48, %v728_v49 }
  0xdd   : > { %v2612_v6 = vcombine.high %v625_v1, %v633_v2 }
  0xdf   : > { %2089 = vmatpush1.bf16.msra.mxu0 %v2701_v9  ;;  %2132 = vmatpush1.bf16.msra.mxu1 %v2703_v10  ;;  %v641_v9 = vld [vmem:[%s3464_s5 + $0xa8] sm:$0xff] }
  0xe0   : > { %2090 = vmatprep.subr.bf16.mxu0 %v2718_v11  ;;  %2133 = vmatprep.subr.bf16.mxu1 %v2720_v12  ;;  %v649_v10 = vld [vmem:[%s3464_s5 + $0xe8] sm:$0xff]  ;;  %v2609_v11 = vcombine.low %v624_v63, %v632_v0  ;;  %v2611_v12 = vcombine.low %v625_v1, %v633_v2  ;;  %v752_v0 = vld [vmem:[%s3464_s5 + $0x420] sm:$0xff] }
  0xe1   : > { %v2628_v14 = vcombine.high %v641_v9, %v649_v10  ;;  %v760_v1 = vld [vmem:[%s3464_s5 + $0x460] sm:$0xff]  ;;  %v753_v2 = vld [vmem:[%s3464_s5 + $0x428] sm:$0xff] }
  0xe3   : > { %2091 = vmatpush1.bf16.msra.mxu0 %v2717_v17  ;;  %2134 = vmatpush1.bf16.msra.mxu1 %v2719_v18  ;;  %v657_v17 = vld [vmem:[%s3464_s5 + $0x128] sm:$0xff] }
  0xe4   : > { %2092 = vmatprep.subr.bf16.mxu0 %v2734_v19  ;;  %2135 = vmatprep.subr.bf16.mxu1 %v2736_v20  ;;  %v665_v18 = vld [vmem:[%s3464_s5 + $0x168] sm:$0xff]  ;;  %v2625_v19 = vcombine.low %v640_v7, %v648_v8  ;;  %v2627_v20 = vcombine.low %v641_v9, %v649_v10  ;;  %v768_v8 = vld [vmem:[%s3464_s5 + $0x4a0] sm:$0xff] }
  0xe5   : > { %v2644_v23 = vcombine.high %v657_v17, %v665_v18  ;;  %v776_v9 = vld [vmem:[%s3464_s5 + $0x4e0] sm:$0xff]  ;;  %v769_v10 = vld [vmem:[%s3464_s5 + $0x4a8] sm:$0xff] }
  0xe7   : > { %2093 = vmatpush1.bf16.msra.mxu0 %v2733_v27  ;;  %2136 = vmatpush1.bf16.msra.mxu1 %v2735_v28  ;;  %v673_v27 = vld [vmem:[%s3464_s5 + $0x1a8] sm:$0xff] }
  0xe8   : > { %2094 = vmatprep.subr.bf16.mxu0 %v2750_v29  ;;  %2137 = vmatprep.subr.bf16.mxu1 %v2752_v30  ;;  %v681_v28 = vld [vmem:[%s3464_s5 + $0x1e8] sm:$0xff]  ;;  %v2641_v29 = vcombine.low %v656_v15, %v664_v16  ;;  %v2643_v30 = vcombine.low %v657_v17, %v665_v18  ;;  %v784_v16 = vld [vmem:[%s3464_s5 + $0x520] sm:$0xff] }
  0xe9   : > { %v2660_v32 = vcombine.high %v673_v27, %v681_v28  ;;  %v792_v17 = vld [vmem:[%s3464_s5 + $0x560] sm:$0xff]  ;;  %v785_v18 = vld [vmem:[%s3464_s5 + $0x528] sm:$0xff] }
  0xeb   : > { %2095 = vmatpush1.bf16.msra.mxu0 %v2749_v35  ;;  %2138 = vmatpush1.bf16.msra.mxu1 %v2751_v36  ;;  %v689_v35 = vld [vmem:[%s3464_s5 + $0x228] sm:$0xff] }
  0xec   : > { %2096 = vmatprep.subr.bf16.mxu0 %v2766_v37  ;;  %2139 = vmatprep.subr.bf16.mxu1 %v2768_v38  ;;  %v697_v36 = vld [vmem:[%s3464_s5 + $0x268] sm:$0xff]  ;;  %v2657_v37 = vcombine.low %v672_v25, %v680_v26  ;;  %v2674_v38 = vcombine.high %v688_v33, %v696_v34  ;;  %v800_v26 = vld [vmem:[%s3464_s5 + $0x5a0] sm:$0xff] }
  0xed   : > { %v2676_v39 = vcombine.high %v689_v35, %v697_v36 }
  0xef   : > { %2097 = vmatpush1.bf16.msra.mxu0 %v2765_v43  ;;  %2140 = vmatpush1.bf16.msra.mxu1 %v2767_v44  ;;  %v713_v43 = vld [vmem:[%s3464_s5 + $0x2e8] sm:$0xff]  ;;  %v2673_v44 = vcombine.low %v688_v33, %v696_v34  ;;  %v816_v34 = vld [vmem:[%s3464_s5 + $0x620] sm:$0xff] }
  0xf0   : > { %2098 = vmatprep.subr.bf16.mxu0 %v2782_v45  ;;  %2141 = vmatprep.subr.bf16.mxu1 %v2784_v46  ;;  %v2675_v45 = vcombine.low %v689_v35, %v697_v36  ;;  %v2690_v46 = vcombine.high %v704_v40, %v712_v41  ;;  %v2692_v47 = vcombine.high %v705_v42, %v713_v43  ;;  %v824_v35 = vld [vmem:[%s3464_s5 + $0x660] sm:$0xff]  ;;  %v817_v36 = vld [vmem:[%s3464_s5 + $0x628] sm:$0xff] }
  0xf3   : > { %2099 = vmatpush1.bf16.msra.mxu0 %v2781_v51  ;;  %2142 = vmatpush1.bf16.msra.mxu1 %v2783_v52  ;;  %v729_v51 = vld [vmem:[%s3464_s5 + $0x368] sm:$0xff]  ;;  %v2689_v52 = vcombine.low %v704_v40, %v712_v41  ;;  %v832_v41 = vld [vmem:[%s3464_s5 + $0x6a0] sm:$0xff] }
  0xf4   : > { %2100 = vmatprep.subr.bf16.mxu0 %v2798_v53  ;;  %2143 = vmatprep.subr.bf16.mxu1 %v2800_v54  ;;  %v2691_v53 = vcombine.low %v705_v42, %v713_v43  ;;  %v2706_v54 = vcombine.high %v720_v48, %v728_v49  ;;  %v2708_v55 = vcombine.high %v721_v50, %v729_v51  ;;  %v833_v42 = vld [vmem:[%s3464_s5 + $0x6a8] sm:$0xff]  ;;  %v626_v49 = vld [vmem:[%s3464_s5 + $0x30] sm:$0xff] }
  0xf5   : > { %v2801_v43 = vcombine.low %v816_v34, %v824_v35  ;;  %v2819_v48 = vcombine.low %v833_v42, %v833_v42 }
  0xf7   : > { %2101 = vmatpush1.bf16.msra.mxu0 %v2797_v57  ;;  %2144 = vmatpush1.bf16.msra.mxu1 %v2799_v58  ;;  %v744_v57 = vld [vmem:[%s3464_s5 + $0x3e0] sm:$0xff]  ;;  %v737_v58 = vld [vmem:[%s3464_s5 + $0x3a8] sm:$0xff] }
  0xf8   : > { %2829 = vmatprep.subr.msk.bf16.mxu0 %vm1941_vm1, %v2814_v59  ;;  %2831 = vmatprep.subr.msk.bf16.mxu1 %vm1941_vm1, %v2816_v61  ;;  %v745_v59 = vld [vmem:[%s3464_s5 + $0x3e8] sm:$0xff]  ;;  %v2707_v61 = vcombine.low %v721_v50, %v729_v51  ;;  %v2722_v62 = vcombine.high %v736_v56, %v744_v57  ;;  %v634_v50 = vld [vmem:[%s3464_s5 + $0x70] sm:$0xff]  ;;  %v627_v51 = vld [vmem:[%s3464_s5 + $0x38] sm:$0xff] }
  0xf9   : > { %v2724_v63 = vcombine.high %v737_v58, %v745_v59 }
  0xfb   : > { %2103 = vmatpush1.bf16.msra.mxu0 %v1955_v3  ;;  %2146 = vmatpush1.bf16.msra.mxu1 %v1961_v5  ;;  %v761_v3 = vld [vmem:[%s3464_s5 + $0x468] sm:$0xff]  ;;  %v2723_v5 = vcombine.low %v737_v58, %v745_v59  ;;  %v650_v58 = vld [vmem:[%s3464_s5 + $0xf0] sm:$0xff]  ;;  %v643_v59 = vld [vmem:[%s3464_s5 + $0xb8] sm:$0xff] }
  0xfc   : > { %2162 = vmatprep.subr.bf16.mxu0 %v2610_v4  ;;  %2205 = vmatprep.subr.bf16.mxu1 %v2612_v6  ;;  %v2721_v4 = vcombine.low %v736_v56, %v744_v57  ;;  %v2738_v6 = vcombine.high %v752_v0, %v760_v1  ;;  %v2740_v7 = vcombine.high %v753_v2, %v761_v3  ;;  %v642_v57 = vld [vmem:[%s3464_s5 + $0xb0] sm:$0xff] }
  0xfe   : > { %2109 = vmatmul.mubr.bf16.vlgmr.msra.gmra.mrb[4].mxu0 %v3539_v21  ;;  %2152 = vmatmul.mubr.bf16.vlgmr.msra.gmra.mrb[4].mxu1 %v3539_v21 }
  0xff   : > { %2163 = vmatpush1.bf16.msra.mxu0 %v2609_v11  ;;  %2206 = vmatpush1.bf16.msra.mxu1 %v2611_v12  ;;  %v777_v11 = vld [vmem:[%s3464_s5 + $0x4e8] sm:$0xff]  ;;  %v2737_v12 = vcombine.low %v752_v0, %v760_v1  ;;  %v658_v1 = vld [vmem:[%s3464_s5 + $0x130] sm:$0xff] }
 0x100   : > { %2164 = vmatprep.subr.bf16.mxu0 %v2626_v13  ;;  %2207 = vmatprep.subr.bf16.mxu1 %v2628_v14  ;;  %v2739_v13 = vcombine.low %v753_v2, %v761_v3  ;;  %v2754_v14 = vcombine.high %v768_v8, %v776_v9  ;;  %v2756_v15 = vcombine.high %v769_v10, %v777_v11  ;;  %v666_v2 = vld [vmem:[%s3464_s5 + $0x170] sm:$0xff]  ;;  %v659_v3 = vld [vmem:[%s3464_s5 + $0x138] sm:$0xff] }
 0x101   : > { %2834 = vmatprep.mubr.msk.bf16.mxu0 %vm1937_vm0, %v3456_v24  ;;  %2836 = vmatprep.mubr.msk.bf16.mxu1 %vm1937_vm0, %v3456_v24  ;;  %v2659_v24 = vcombine.low %v673_v27, %v681_v28  ;;  %v808_v27 = vld [vmem:[%s3464_s5 + $0x5e0] sm:$0xff]  ;;  %v801_v28 = vld [vmem:[%s3464_s5 + $0x5a8] sm:$0xff] }
 0x103   : > { %2165 = vmatpush1.bf16.msra.mxu0 %v2625_v19  ;;  %2208 = vmatpush1.bf16.msra.mxu1 %v2627_v20  ;;  %v793_v19 = vld [vmem:[%s3464_s5 + $0x568] sm:$0xff]  ;;  %v2753_v20 = vcombine.low %v768_v8, %v776_v9  ;;  %v674_v9 = vld [vmem:[%s3464_s5 + $0x1b0] sm:$0xff] }
 0x104   : > { %2166 = vmatprep.subr.bf16.mxu0 %v2642_v22  ;;  %2209 = vmatprep.subr.bf16.mxu1 %v2644_v23  ;;  %v2755_v22 = vcombine.low %v769_v10, %v777_v11  ;;  %v2770_v23 = vcombine.high %v784_v16, %v792_v17  ;;  %v2772_v25 = vcombine.high %v785_v18, %v793_v19  ;;  %v682_v10 = vld [vmem:[%s3464_s5 + $0x1f0] sm:$0xff]  ;;  %v2927_v11 = vld [vmem:[%s3821_s0 + $0x4] ss:$8 sps:$4 sm:$0xff]  }
 0x107   : > { %2167 = vmatpush1.bf16.msra.mxu0 %v2641_v29  ;;  %2210 = vmatpush1.bf16.msra.mxu1 %v2643_v30  ;;  %v809_v29 = vld [vmem:[%s3464_s5 + $0x5e8] sm:$0xff]  ;;  %v2769_v30 = vcombine.low %v784_v16, %v792_v17  ;;  %v2662_v16 = vcombine.high %v674_v9, %v682_v10 }
 0x108   : > { %2168 = vmatprep.subr.bf16.mxu0 %v2658_v31  ;;  %2211 = vmatprep.subr.bf16.mxu1 %v2660_v32  ;;  %v2771_v31 = vcombine.low %v785_v18, %v793_v19  ;;  %v2786_v32 = vcombine.high %v800_v26, %v808_v27  ;;  %v2788_v33 = vcombine.high %v801_v28, %v809_v29  ;;  %v690_v18 = vld [vmem:[%s3464_s5 + $0x230] sm:$0xff] }
 0x109   : > { %v698_v19 = vld [vmem:[%s3464_s5 + $0x270] sm:$0xff] }
 0x10b   : > { %2169 = vmatpush1.bf16.msra.mxu0 %v2657_v37  ;;  %2212 = vmatpush1.bf16.msra.mxu1 %v2659_v24  ;;  %v825_v37 = vld [vmem:[%s3464_s5 + $0x668] sm:$0xff]  ;;  %v2785_v24 = vcombine.low %v800_v26, %v808_v27  ;;  %v2678_v26 = vcombine.high %v690_v18, %v698_v19 }
 0x10c   : > { %2170 = vmatprep.subr.bf16.mxu0 %v2674_v38  ;;  %2213 = vmatprep.subr.bf16.mxu1 %v2676_v39  ;;  %v2787_v38 = vcombine.low %v801_v28, %v809_v29  ;;  %v2802_v39 = vcombine.high %v816_v34, %v824_v35  ;;  %v2804_v40 = vcombine.high %v817_v36, %v825_v37  ;;  %v706_v28 = vld [vmem:[%s3464_s5 + $0x2b0] sm:$0xff] }
 0x10d   : > { %v714_v29 = vld [vmem:[%s3464_s5 + $0x2f0] sm:$0xff] }
 0x10e   : > { %v2694_v34 = vcombine.high %v706_v28, %v714_v29 }
 0x10f   : > { %2171 = vmatpush1.bf16.msra.mxu0 %v2673_v44  ;;  %2214 = vmatpush1.bf16.msra.mxu1 %v2675_v45  ;;  %v2803_v44 = vcombine.low %v817_v36, %v825_v37  ;;  %v2818_v45 = vcombine.high %v832_v41, %v832_v41  ;;  %v722_v36 = vld [vmem:[%s3464_s5 + $0x330] sm:$0xff] }
 0x110   : > { %2172 = vmatprep.subr.bf16.mxu0 %v2690_v46  ;;  %2215 = vmatprep.subr.bf16.mxu1 %v2692_v47  ;;  %v2817_v46 = vcombine.low %v832_v41, %v832_v41  ;;  %v2820_v47 = vcombine.high %v833_v42, %v833_v42  ;;  %v730_v37 = vld [vmem:[%s3464_s5 + $0x370] sm:$0xff] }
 0x111   : > { %v2710_v41 = vcombine.high %v722_v36, %v730_v37 }
 0x113   : > { %2173 = vmatpush1.bf16.msra.mxu0 %v2689_v52  ;;  %2216 = vmatpush1.bf16.msra.mxu1 %v2691_v53  ;;  %v635_v52 = vld [vmem:[%s3464_s5 + $0x78] sm:$0xff]  ;;  %v1967_v53 = vsel %vm1941_vm1, %v2817_v46, 0 }
 0x114   : > { %2174 = vmatprep.subr.bf16.mxu0 %v2706_v54  ;;  %2217 = vmatprep.subr.bf16.mxu1 %v2708_v55  ;;  %v2614_v54 = vcombine.high %v626_v49, %v634_v50  ;;  %v1973_v55 = vsel %vm1941_vm1, %v2819_v48, 0  ;;  %v2616_v56 = vcombine.high %v627_v51, %v635_v52  ;;  %v747_v46 = vld [vmem:[%s3464_s5 + $0x3f8] sm:$0xff] }
 0x117   : > { %2175 = vmatpush1.bf16.msra.mxu0 %v2705_v60  ;;  %2218 = vmatpush1.bf16.msra.mxu1 %v2707_v61  ;;  %v651_v60 = vld [vmem:[%s3464_s5 + $0xf8] sm:$0xff]  ;;  %v2613_v61 = vcombine.low %v626_v49, %v634_v50 }
 0x118   : > { %2176 = vmatprep.subr.bf16.mxu0 %v2722_v62  ;;  %2219 = vmatprep.subr.bf16.mxu1 %v2724_v63  ;;  %v2615_v62 = vcombine.low %v627_v51, %v635_v52  ;;  %v2630_v63 = vcombine.high %v642_v57, %v650_v58  ;;  %v2632_v0 = vcombine.high %v643_v59, %v651_v60  ;;  %v754_v51 = vld [vmem:[%s3464_s5 + $0x430] sm:$0xff] }
 0x119   : > { %v762_v52 = vld [vmem:[%s3464_s5 + $0x470] sm:$0xff] }
 0x11b   : > { %2177 = vmatpush1.bf16.msra.mxu0 %v2721_v4  ;;  %2220 = vmatpush1.bf16.msra.mxu1 %v2723_v5  ;;  %v667_v4 = vld [vmem:[%s3464_s5 + $0x178] sm:$0xff]  ;;  %v2629_v5 = vcombine.low %v642_v57, %v650_v58  ;;  %v2742_v57 = vcombine.high %v754_v51, %v762_v52 }
 0x11c   : > { %2178 = vmatprep.subr.bf16.mxu0 %v2738_v6  ;;  %2221 = vmatprep.subr.bf16.mxu1 %v2740_v7  ;;  %v2631_v6 = vcombine.low %v643_v59, %v651_v60  ;;  %v2646_v7 = vcombine.high %v658_v1, %v666_v2  ;;  %v2648_v8 = vcombine.high %v659_v3, %v667_v4  ;;  %v770_v59 = vld [vmem:[%s3464_s5 + $0x4b0] sm:$0xff] }
 0x11d   : > { %v778_v60 = vld [vmem:[%s3464_s5 + $0x4f0] sm:$0xff] }
 0x11f   : > { %2179 = vmatpush1.bf16.msra.mxu0 %v2737_v12  ;;  %2222 = vmatpush1.bf16.msra.mxu1 %v2739_v13  ;;  %v675_v12 = vld [vmem:[%s3464_s5 + $0x1b8] sm:$0xff] }
 0x120   : > { %2180 = vmatprep.subr.bf16.mxu0 %v2754_v14  ;;  %2223 = vmatprep.subr.bf16.mxu1 %v2756_v15  ;;  %v683_v13 = vld [vmem:[%s3464_s5 + $0x1f8] sm:$0xff]  ;;  %v2645_v14 = vcombine.low %v658_v1, %v666_v2  ;;  %v2647_v15 = vcombine.low %v659_v3, %v667_v4  ;;  %v2758_v1 = vcombine.high %v770_v59, %v778_v60  ;;  %v786_v3 = vld [vmem:[%s3464_s5 + $0x530] sm:$0xff] }
 0x121   : > { %v2664_v17 = vcombine.high %v675_v12, %v683_v13  ;;  %v794_v4 = vld [vmem:[%s3464_s5 + $0x570] sm:$0xff] }
 0x123   : > { %2181 = vmatpush1.bf16.msra.mxu0 %v2753_v20  ;;  %2224 = vmatpush1.bf16.msra.mxu1 %v2755_v22  ;;  %v691_v20 = vld [vmem:[%s3464_s5 + $0x238] sm:$0xff] }
 0x124   : > { %2182 = vmatprep.subr.bf16.mxu0 %v2770_v23  ;;  %2225 = vmatprep.subr.bf16.mxu1 %v2772_v25  ;;  %v699_v22 = vld [vmem:[%s3464_s5 + $0x278] sm:$0xff]  ;;  %v2661_v23 = vcombine.low %v674_v9, %v682_v10  ;;  %v2663_v25 = vcombine.low %v675_v12, %v683_v13  ;;  %v2774_v9 = vcombine.high %v786_v3, %v794_v4  ;;  %v810_v12 = vld [vmem:[%s3464_s5 + $0x5f0] sm:$0xff] }
 0x125   : > { %v2680_v27 = vcombine.high %v691_v20, %v699_v22  ;;  %v803_v13 = vld [vmem:[%s3464_s5 + $0x5b8] sm:$0xff] }
 0x127   : > { %2183 = vmatpush1.bf16.msra.mxu0 %v2769_v30  ;;  %2226 = vmatpush1.bf16.msra.mxu1 %v2771_v31  ;;  %v707_v30 = vld [vmem:[%s3464_s5 + $0x2b8] sm:$0xff] }
 0x128   : > { %2184 = vmatprep.subr.bf16.mxu0 %v2786_v32  ;;  %2227 = vmatprep.subr.bf16.mxu1 %v2788_v33  ;;  %v715_v31 = vld [vmem:[%s3464_s5 + $0x2f8] sm:$0xff]  ;;  %v2677_v32 = vcombine.low %v690_v18, %v698_v19  ;;  %v2679_v33 = vcombine.low %v691_v20, %v699_v22  ;;  %v818_v19 = vld [vmem:[%s3464_s5 + $0x630] sm:$0xff] }
 0x129   : > { %v2696_v35 = vcombine.high %v707_v30, %v715_v31  ;;  %v826_v20 = vld [vmem:[%s3464_s5 + $0x670] sm:$0xff]  ;;  %v819_v22 = vld [vmem:[%s3464_s5 + $0x638] sm:$0xff] }
 0x12b   : > { %2185 = vmatpush1.bf16.msra.mxu0 %v2785_v24  ;;  %2228 = vmatpush1.bf16.msra.mxu1 %v2787_v38  ;;  %v723_v24 = vld [vmem:[%s3464_s5 + $0x338] sm:$0xff] }
 0x12c   : > { %2186 = vmatprep.subr.bf16.mxu0 %v2802_v39  ;;  %2229 = vmatprep.subr.bf16.mxu1 %v2804_v40  ;;  %v731_v38 = vld [vmem:[%s3464_s5 + $0x378] sm:$0xff]  ;;  %v2693_v39 = vcombine.low %v706_v28, %v714_v29  ;;  %v2695_v40 = vcombine.low %v707_v30, %v715_v31  ;;  %v834_v29 = vld [vmem:[%s3464_s5 + $0x6b0] sm:$0xff]  ;;  %v2805_v31 = vcombine.low %v818_v19, %v826_v20 }
 0x12d   : > { %v2712_v42 = vcombine.high %v723_v24, %v731_v38  ;;  %v2711_v48 = vcombine.low %v723_v24, %v731_v38  ;;  %v835_v30 = vld [vmem:[%s3464_s5 + $0x6b8] sm:$0xff]  ;;  %v2928_v38 = vld [vmem:[%s3821_s0] ss:$8 sps:$4 sm:$0xff]  }
 0x12f   : > { %2187 = vmatpush1.bf16.msra.mxu0 %v2801_v43  ;;  %2230 = vmatpush1.bf16.msra.mxu1 %v2803_v44  ;;  %v738_v43 = vld [vmem:[%s3464_s5 + $0x3b0] sm:$0xff] }
 0x130   : > { %2833 = vmatprep.subr.msk.bf16.mxu0 %vm1941_vm1, %v2818_v45  ;;  %2835 = vmatprep.subr.msk.bf16.mxu1 %vm1941_vm1, %v2820_v47  ;;  %v746_v44 = vld [vmem:[%s3464_s5 + $0x3f0] sm:$0xff]  ;;  %v739_v45 = vld [vmem:[%s3464_s5 + $0x3b8] sm:$0xff]  ;;  %v2709_v47 = vcombine.low %v722_v36, %v730_v37  ;;  %v2823_v36 = vcombine.low %v835_v30, %v835_v30 }
 0x131   : > { %v2726_v49 = vcombine.high %v738_v43, %v746_v44  ;;  %v2728_v50 = vcombine.high %v739_v45, %v747_v46 }
 0x132   : > { %v1985_v24 = vsel %vm1941_vm1, %v2823_v36, 0 }
 0x133   : > { %2189 = vmatpush1.bf16.msra.mxu0 %v1967_v53  ;;  %2232 = vmatpush1.bf16.msra.mxu1 %v1973_v55  ;;  %v755_v53 = vld [vmem:[%s3464_s5 + $0x438] sm:$0xff]  ;;  %v2725_v55 = vcombine.low %v738_v43, %v746_v44 }
 0x134   : > { %2248 = vmatprep.subr.bf16.mxu0 %v2614_v54  ;;  %2291 = vmatprep.subr.bf16.mxu1 %v2616_v56  ;;  %v763_v54 = vld [vmem:[%s3464_s5 + $0x478] sm:$0xff]  ;;  %v2727_v56 = vcombine.low %v739_v45, %v747_v46 }
 0x135   : > { %v2744_v58 = vcombine.high %v755_v53, %v763_v54 }
 0x136   : > { %2195 = vmatmul.mubr.bf16.vlgmr.msra.gmra.mrb[8].mxu0 %v3539_v21  ;;  %2238 = vmatmul.mubr.bf16.vlgmr.msra.gmra.mrb[8].mxu1 %v3539_v21 }
 0x137   : > { %2249 = vmatpush1.bf16.msra.mxu0 %v2613_v61  ;;  %2292 = vmatpush1.bf16.msra.mxu1 %v2615_v62  ;;  %v771_v61 = vld [vmem:[%s3464_s5 + $0x4b8] sm:$0xff] }
 0x138   : > { %2250 = vmatprep.subr.bf16.mxu0 %v2630_v63  ;;  %2293 = vmatprep.subr.bf16.mxu1 %v2632_v0  ;;  %v779_v62 = vld [vmem:[%s3464_s5 + $0x4f8] sm:$0xff]  ;;  %v2741_v63 = vcombine.low %v754_v51, %v762_v52  ;;  %v2743_v0 = vcombine.low %v755_v53, %v763_v54 }
 0x139   : > { %2838 = vmatprep.mubr.msk.bf16.mxu0 %vm1937_vm0, %v2927_v11  ;;  %2840 = vmatprep.mubr.msk.bf16.mxu1 %vm1937_vm0, %v2927_v11  ;;  %v2760_v2 = vcombine.high %v771_v61, %v779_v62  ;;  %v802_v11 = vld [vmem:[%s3464_s5 + $0x5b0] sm:$0xff] }
 0x13b   : > { %2251 = vmatpush1.bf16.msra.mxu0 %v2629_v5  ;;  %2294 = vmatpush1.bf16.msra.mxu1 %v2631_v6  ;;  %v787_v5 = vld [vmem:[%s3464_s5 + $0x538] sm:$0xff] }
 0x13c   : > { %2252 = vmatprep.subr.bf16.mxu0 %v2646_v7  ;;  %2295 = vmatprep.subr.bf16.mxu1 %v2648_v8  ;;  %v795_v6 = vld [vmem:[%s3464_s5 + $0x578] sm:$0xff]  ;;  %v2757_v7 = vcombine.low %v770_v59, %v778_v60  ;;  %v2759_v8 = vcombine.low %v771_v61, %v779_v62 }
 0x13d   : > { %v2776_v10 = vcombine.high %v787_v5, %v795_v6 }
 0x13f   : > { %2253 = vmatpush1.bf16.msra.mxu0 %v2645_v14  ;;  %2296 = vmatpush1.bf16.msra.mxu1 %v2647_v15  ;;  %v811_v14 = vld [vmem:[%s3464_s5 + $0x5f8] sm:$0xff]  ;;  %v2773_v15 = vcombine.low %v786_v3, %v794_v4 }
 0x140   : > { %2254 = vmatprep.subr.bf16.mxu0 %v2662_v16  ;;  %2297 = vmatprep.subr.bf16.mxu1 %v2664_v17  ;;  %v2775_v16 = vcombine.low %v787_v5, %v795_v6  ;;  %v2790_v17 = vcombine.high %v802_v11, %v810_v12  ;;  %v2792_v18 = vcombine.high %v803_v13, %v811_v14 }
 0x143   : > { %2255 = vmatpush1.bf16.msra.mxu0 %v2661_v23  ;;  %2298 = vmatpush1.bf16.msra.mxu1 %v2663_v25  ;;  %v827_v23 = vld [vmem:[%s3464_s5 + $0x678] sm:$0xff]  ;;  %v2789_v25 = vcombine.low %v802_v11, %v810_v12 }
 0x144   : > { %2256 = vmatprep.subr.bf16.mxu0 %v2678_v26  ;;  %2299 = vmatprep.subr.bf16.mxu1 %v2680_v27  ;;  %v2791_v26 = vcombine.low %v803_v13, %v811_v14  ;;  %v2806_v27 = vcombine.high %v818_v19, %v826_v20  ;;  %v2808_v28 = vcombine.high %v819_v22, %v827_v23 }
 0x147   : > { %2257 = vmatpush1.bf16.msra.mxu0 %v2677_v32  ;;  %2300 = vmatpush1.bf16.msra.mxu1 %v2679_v33  ;;  %v2807_v32 = vcombine.low %v819_v22, %v827_v23  ;;  %v2822_v33 = vcombine.high %v834_v29, %v834_v29 }
 0x148   : > { %2258 = vmatprep.subr.bf16.mxu0 %v2694_v34  ;;  %2301 = vmatprep.subr.bf16.mxu1 %v2696_v35  ;;  %v2821_v34 = vcombine.low %v834_v29, %v834_v29  ;;  %v2824_v35 = vcombine.high %v835_v30, %v835_v30 }
 0x14a   : > { %v1979_v37 = vsel %vm1941_vm1, %v2821_v34, 0 }
 0x14b   : > { %2259 = vmatpush1.bf16.msra.mxu0 %v2693_v39  ;;  %2302 = vmatpush1.bf16.msra.mxu1 %v2695_v40  ;;  %v3732_v39 = vpop.permute.xlu0 %840 }
 0x14c   : > { %2260 = vmatprep.subr.bf16.mxu0 %v2710_v41  ;;  %2303 = vmatprep.subr.bf16.mxu1 %v2712_v42 }
 0x14f   : > { %2261 = vmatpush1.bf16.msra.mxu0 %v2709_v47  ;;  %2304 = vmatpush1.bf16.msra.mxu1 %v2711_v48  ;;  %v3734_v41 = vpop.permute.xlu0 %845 }
 0x150   : > { %2262 = vmatprep.subr.bf16.mxu0 %v2726_v49  ;;  %2305 = vmatprep.subr.bf16.mxu1 %v2728_v50 }
 0x153   : > { %2263 = vmatpush1.bf16.msra.mxu0 %v2725_v55  ;;  %2306 = vmatpush1.bf16.msra.mxu1 %v2727_v56 }
 0x154   : > { %2264 = vmatprep.subr.bf16.mxu0 %v2742_v57  ;;  %2307 = vmatprep.subr.bf16.mxu1 %v2744_v58 }
 0x157   : > { %2265 = vmatpush1.bf16.msra.mxu0 %v2741_v63  ;;  %2308 = vmatpush1.bf16.msra.mxu1 %v2743_v0 }
 0x158   : > { %2266 = vmatprep.subr.bf16.mxu0 %v2758_v1  ;;  %2309 = vmatprep.subr.bf16.mxu1 %v2760_v2 }
 0x15b   : > { %2267 = vmatpush1.bf16.msra.mxu0 %v2757_v7  ;;  %2310 = vmatpush1.bf16.msra.mxu1 %v2759_v8 }
 0x15c   : > { %2268 = vmatprep.subr.bf16.mxu0 %v2774_v9  ;;  %2311 = vmatprep.subr.bf16.mxu1 %v2776_v10 }
 0x15f   : > { %2269 = vmatpush1.bf16.msra.mxu0 %v2773_v15  ;;  %2312 = vmatpush1.bf16.msra.mxu1 %v2775_v16 }
 0x160   : > { %2270 = vmatprep.subr.bf16.mxu0 %v2790_v17  ;;  %2313 = vmatprep.subr.bf16.mxu1 %v2792_v18 }
 0x163   : > { %2271 = vmatpush1.bf16.msra.mxu0 %v2789_v25  ;;  %2314 = vmatpush1.bf16.msra.mxu1 %v2791_v26 }
 0x164   : > { %2272 = vmatprep.subr.bf16.mxu0 %v2806_v27  ;;  %2315 = vmatprep.subr.bf16.mxu1 %v2808_v28 }
 0x167   : > { %2273 = vmatpush1.bf16.msra.mxu0 %v2805_v31  ;;  %2316 = vmatpush1.bf16.msra.mxu1 %v2807_v32 }
 0x168   : > { %2837 = vmatprep.subr.msk.bf16.mxu0 %vm1941_vm1, %v2822_v33  ;;  %2839 = vmatprep.subr.msk.bf16.mxu1 %vm1941_vm1, %v2824_v35 }
 0x16b   : > { %2275 = vmatpush1.bf16.msra.mxu0 %v1979_v37  ;;  %2318 = vmatpush1.bf16.msra.mxu1 %v1985_v24 }
 0x16e   : > { %2281 = vmatmul.mubr.bf16.vlgmr.msra.gmra.mrb[12].mxu0 %v3539_v21  ;;  %2324 = vmatmul.mubr.bf16.vlgmr.msra.gmra.mrb[12].mxu1 %v2928_v38 }
 0x199   : > { %v2024_v40 = vpop.f32.mrb[0].mxu0  ;;  %v2067_v43 = vpop.f32.mrb[0].mxu1 }
 0x19a   : > { %v2025_v42 = vadd.f32 %v2024_v40, %v3732_v39  ;;  %v2026_v44 = vpop.f32.mrb[1].mxu0  ;;  %v2068_v45 = vadd.f32 %v2067_v43, %v3732_v39  ;;  %v2069_v46 = vpop.f32.mrb[1].mxu1 }
 0x19b   : > { %v2027_v21 = vadd.f32 %v2026_v44, %v3732_v39  ;;  %v2028_v47 = vpop.f32.mrb[2].mxu0  ;;  %v2070_v49 = vadd.f32 %v2069_v46, %v3732_v39  ;;  %v2071_v51 = vpop.f32.mrb[2].mxu1 }
 0x19c   : > { %v2334_v48 = vmax.f32 %v2025_v42, 0.0  ;;  %v2029_v50 = vadd.f32 %v2028_v47, %v3734_v41  ;;  %v2030_v52 = vpop.f32.mrb[3].mxu0  ;;  %v2336_v53 = vmax.f32 %v2068_v45, 0.0  ;;  %v2072_v55 = vadd.f32 %v2071_v51, %v3734_v41  ;;  %v2073_v57 = vpop.f32.mrb[3].mxu1 }
 0x19d   : > { %v2335_v54 = vmax.f32 %v2027_v21, 0.0  ;;  %v2031_v56 = vadd.f32 %v2030_v52, %v3734_v41  ;;  %v2337_v58 = vmax.f32 %v2070_v49, 0.0  ;;  %v2074_v60 = vadd.f32 %v2073_v57, %v3734_v41 }
 0x19e   : > { %v2350_v59 = vmax.f32 %v2029_v50, 0.0  ;;  %v2352_v62 = vmax.f32 %v2072_v55, 0.0 }
 0x19f   : > { %v2863_v61 = vpack.c.bf16 %v2335_v54, %v2334_v48  ;;  %v2351_v63 = vmax.f32 %v2031_v56, 0.0  ;;  %v2864_v0 = vpack.c.bf16 %v2337_v58, %v2336_v53  ;;  %v2353_v1 = vmax.f32 %v2074_v60, 0.0 }
 0x1a1   : > { %2462 = vst [vmem:[%s3746_s12] sm:$0xff] %v2863_v61  ;;  %v2871_v2 = vpack.c.bf16 %v2351_v63, %v2350_v59  ;;  %2463 = vst [vmem:[%s3746_s12 + $0x8] sm:$0xff] %v2864_v0  ;;  %v2872_v3 = vpack.c.bf16 %v2353_v1, %v2352_v62 }
 0x1a3   : > { %2470 = vst [vmem:[%s3746_s12 + $0x40] sm:$0xff] %v2871_v2  ;;  %2471 = vst [vmem:[%s3746_s12 + $0x48] sm:$0xff] %v2872_v3 }
 0x1d1   : > { %v2110_v4 = vpop.f32.mrb[4].mxu0  ;;  %v2153_v6 = vpop.f32.mrb[4].mxu1 }
 0x1d2   : > { %v2111_v5 = vadd.f32 %v2110_v4, %v3732_v39  ;;  %v2112_v7 = vpop.f32.mrb[5].mxu0  ;;  %v2154_v8 = vadd.f32 %v2153_v6, %v3732_v39  ;;  %v2155_v10 = vpop.f32.mrb[5].mxu1 }
 0x1d3   : > { %v2113_v9 = vadd.f32 %v2112_v7, %v3732_v39  ;;  %v2114_v11 = vpop.f32.mrb[6].mxu0  ;;  %v2156_v13 = vadd.f32 %v2155_v10, %v3732_v39  ;;  %v2157_v15 = vpop.f32.mrb[6].mxu1 }
 0x1d4   : > { %v2338_v12 = vmax.f32 %v2111_v5, 0.0  ;;  %v2115_v14 = vadd.f32 %v2114_v11, %v3734_v41  ;;  %v2116_v16 = vpop.f32.mrb[7].mxu0  ;;  %v2340_v17 = vmax.f32 %v2154_v8, 0.0  ;;  %v2158_v19 = vadd.f32 %v2157_v15, %v3734_v41  ;;  %v2159_v22 = vpop.f32.mrb[7].mxu1 }
 0x1d5   : > { %v2339_v18 = vmax.f32 %v2113_v9, 0.0  ;;  %v2117_v20 = vadd.f32 %v2116_v16, %v3734_v41  ;;  %v2341_v23 = vmax.f32 %v2156_v13, 0.0  ;;  %v2160_v26 = vadd.f32 %v2159_v22, %v3734_v41 }
 0x1d6   : > { %v2354_v25 = vmax.f32 %v2115_v14, 0.0  ;;  %v2356_v28 = vmax.f32 %v2158_v19, 0.0 }
 0x1d7   : > { %v2865_v27 = vpack.c.bf16 %v2339_v18, %v2338_v12  ;;  %v2355_v29 = vmax.f32 %v2117_v20, 0.0  ;;  %v2866_v30 = vpack.c.bf16 %v2341_v23, %v2340_v17  ;;  %v2357_v31 = vmax.f32 %v2160_v26, 0.0 }
 0x1d9   : > { %2464 = vst [vmem:[%s3746_s12 + $0x10] sm:$0xff] %v2865_v27  ;;  %v2873_v32 = vpack.c.bf16 %v2355_v29, %v2354_v25  ;;  %2465 = vst [vmem:[%s3746_s12 + $0x18] sm:$0xff] %v2866_v30  ;;  %v2874_v33 = vpack.c.bf16 %v2357_v31, %v2356_v28  ;;  %v2502_v27 = vld [vmem:[%s3746_s12 + $0x8] sm:$0xff] (%p3004_p5) }
 0x1da   : > { %2503 = vst [vmem:[%s2487_s20 + $0x8] sm:$0xff] (%p3004_p5), %v2502_v27 }
 0x1db   : > { %2472 = vst [vmem:[%s3746_s12 + $0x50] sm:$0xff] %v2873_v32  ;;  %2473 = vst [vmem:[%s3746_s12 + $0x58] sm:$0xff] %v2874_v33 }
 0x1e0   : > { %v2504_v28 = vld [vmem:[%s3746_s12 + $0x10] sm:$0xff] (%p3004_p5)  ;;  %v2506_v29 = vld [vmem:[%s3746_s12 + $0x18] sm:$0xff] (%p3004_p5) }
 0x1e1   : > { %2505 = vst [vmem:[%s2487_s20 + $0x10] sm:$0xff] (%p3004_p5), %v2504_v28  ;;  %2507 = vst [vmem:[%s2487_s20 + $0x18] sm:$0xff] (%p3004_p5), %v2506_v29 }
 0x209   : > { %v2196_v34 = vpop.f32.mrb[8].mxu0  ;;  %v2239_v36 = vpop.f32.mrb[8].mxu1 }
 0x20a   : > { %v2197_v35 = vadd.f32 %v2196_v34, %v3732_v39  ;;  %v2198_v37 = vpop.f32.mrb[9].mxu0  ;;  %v2240_v24 = vadd.f32 %v2239_v36, %v3732_v39  ;;  %v2241_v40 = vpop.f32.mrb[9].mxu1  ;;  %v2516_v34 = vld [vmem:[%s3746_s12 + $0x40] sm:$0xff] (%p3004_p5)  ;;  %v2520_v36 = vld [vmem:[%s3746_s12 + $0x50] sm:$0xff] (%p3004_p5) }
 0x20b   : > { %v2199_v38 = vadd.f32 %v2198_v37, %v3732_v39  ;;  %v2200_v42 = vpop.f32.mrb[10].mxu0  ;;  %v2242_v44 = vadd.f32 %v2241_v40, %v3732_v39  ;;  %v2243_v21 = vpop.f32.mrb[10].mxu1  ;;  %2517 = vst [vmem:[%s2487_s20 + $0x100] sm:$0xff] (%p3004_p5), %v2516_v34  ;;  %v2522_v37 = vld [vmem:[%s3746_s12 + $0x58] sm:$0xff] (%p3004_p5)  ;;  %2521 = vst [vmem:[%s2487_s20 + $0x110] sm:$0xff] (%p3004_p5), %v2520_v36 }
 0x20c   : > { %v2342_v43 = vmax.f32 %v2197_v35, 0.0  ;;  %v2201_v45 = vadd.f32 %v2200_v42, %v3734_v41  ;;  %v2202_v46 = vpop.f32.mrb[11].mxu0  ;;  %v2344_v47 = vmax.f32 %v2240_v24, 0.0  ;;  %v2244_v49 = vadd.f32 %v2243_v21, %v3734_v41  ;;  %v2245_v51 = vpop.f32.mrb[11].mxu1  ;;  %v2518_v35 = vld [vmem:[%s3746_s12 + $0x48] sm:$0xff] (%p3004_p5)  ;;  %2523 = vst [vmem:[%s2487_s20 + $0x118] sm:$0xff] (%p3004_p5), %v2522_v37 }
 0x20d   : > { %v2343_v48 = vmax.f32 %v2199_v38, 0.0  ;;  %v2203_v50 = vadd.f32 %v2202_v46, %v3734_v41  ;;  %v2345_v52 = vmax.f32 %v2242_v44, 0.0  ;;  %v2246_v54 = vadd.f32 %v2245_v51, %v3734_v41  ;;  %2519 = vst [vmem:[%s2487_s20 + $0x108] sm:$0xff] (%p3004_p5), %v2518_v35 }
 0x20e   : > { %v2358_v53 = vmax.f32 %v2201_v45, 0.0  ;;  %v2360_v56 = vmax.f32 %v2244_v49, 0.0 }
 0x20f   : > { %v2867_v55 = vpack.c.bf16 %v2343_v48, %v2342_v43  ;;  %v2359_v57 = vmax.f32 %v2203_v50, 0.0  ;;  %v2868_v58 = vpack.c.bf16 %v2345_v52, %v2344_v47  ;;  %v2361_v59 = vmax.f32 %v2246_v54, 0.0 }
 0x211   : > { %2466 = vst [vmem:[%s3746_s12 + $0x20] sm:$0xff] %v2867_v55  ;;  %v2875_v60 = vpack.c.bf16 %v2359_v57, %v2358_v53  ;;  %2467 = vst [vmem:[%s3746_s12 + $0x28] sm:$0xff] %v2868_v58  ;;  %v2876_v61 = vpack.c.bf16 %v2361_v59, %v2360_v56 }
 0x213   : > { %2474 = vst [vmem:[%s3746_s12 + $0x60] sm:$0xff] %v2875_v60  ;;  %2475 = vst [vmem:[%s3746_s12 + $0x68] sm:$0xff] %v2876_v61 }
 0x218   : > { %v2508_v30 = vld [vmem:[%s3746_s12 + $0x20] sm:$0xff] (%p3004_p5)  ;;  %v2510_v31 = vld [vmem:[%s3746_s12 + $0x28] sm:$0xff] (%p3004_p5) }
 0x219   : > { %2509 = vst [vmem:[%s2487_s20 + $0x20] sm:$0xff] (%p3004_p5), %v2508_v30  ;;  %2511 = vst [vmem:[%s2487_s20 + $0x28] sm:$0xff] (%p3004_p5), %v2510_v31 }
 0x21a   : > { %v2524_v24 = vld [vmem:[%s3746_s12 + $0x60] sm:$0xff] (%p3004_p5)  ;;  %v2526_v38 = vld [vmem:[%s3746_s12 + $0x68] sm:$0xff] (%p3004_p5) }
 0x21b   : > { %2525 = vst [vmem:[%s2487_s20 + $0x120] sm:$0xff] (%p3004_p5), %v2524_v24  ;;  %2527 = vst [vmem:[%s2487_s20 + $0x128] sm:$0xff] (%p3004_p5), %v2526_v38 }
 0x241   : > { %v2282_v62 = vpop.f32.mrb[12].mxu0  ;;  %v2325_v0 = vpop.f32.mrb[12].mxu1 }
 0x242   : > { %v2283_v63 = vadd.f32 %v2282_v62, %v3732_v39  ;;  %v2284_v1 = vpop.f32.mrb[13].mxu0  ;;  %v2326_v2 = vadd.f32 %v2325_v0, %v3732_v39  ;;  %v2327_v4 = vpop.f32.mrb[13].mxu1 }
 0x243   : > { %v2285_v3 = vadd.f32 %v2284_v1, %v3732_v39  ;;  %v2286_v5 = vpop.f32.mrb[14].mxu0  ;;  %v2328_v7 = vadd.f32 %v2327_v4, %v3732_v39  ;;  %v2329_v9 = vpop.f32.mrb[14].mxu1 }
 0x244   : > { %v2346_v6 = vmax.f32 %v2283_v63, 0.0  ;;  %v2287_v8 = vadd.f32 %v2286_v5, %v3734_v41  ;;  %v2288_v10 = vpop.f32.mrb[15].mxu0  ;;  %v2348_v11 = vmax.f32 %v2326_v2, 0.0  ;;  %v2330_v13 = vadd.f32 %v2329_v9, %v3734_v41  ;;  %v2331_v15 = vpop.f32.mrb[15].mxu1 }
 0x245   : > { %v2347_v12 = vmax.f32 %v2285_v3, 0.0  ;;  %v2289_v14 = vadd.f32 %v2288_v10, %v3734_v41  ;;  %v2349_v16 = vmax.f32 %v2328_v7, 0.0  ;;  %v2332_v18 = vadd.f32 %v2331_v15, %v3734_v41  ;;  %2484 = sbr.rel (!%p3004_p5) target bundleno = 596 (0x254), region = 59  ;;  %v2500_v41 = vld [vmem:[%s3746_s12] sm:$0xff] (%p3004_p5) }
 0x246   : > { %v2362_v17 = vmax.f32 %v2287_v8, 0.0  ;;  %v2364_v19 = vmax.f32 %v2330_v13, 0.0  ;;  %2501 = vst [vmem:[%s2487_s20] sm:$0xff] (%p3004_p5), %v2500_v41 }
 0x247   : > { %v2869_v39 = vpack.c.bf16 %v2347_v12, %v2346_v6  ;;  %v2363_v20 = vmax.f32 %v2289_v14, 0.0  ;;  %v2870_v22 = vpack.c.bf16 %v2349_v16, %v2348_v11  ;;  %v2365_v23 = vmax.f32 %v2332_v18, 0.0 }
 0x249   : > { %2468 = vst [vmem:[%s3746_s12 + $0x30] sm:$0xff] %v2869_v39  ;;  %v2877_v25 = vpack.c.bf16 %v2363_v20, %v2362_v17  ;;  %2469 = vst [vmem:[%s3746_s12 + $0x38] sm:$0xff] %v2870_v22  ;;  %v2878_v26 = vpack.c.bf16 %v2365_v23, %v2364_v19 }
 0x24b   : > { %2476 = vst [vmem:[%s3746_s12 + $0x70] sm:$0xff] %v2877_v25  ;;  %2477 = vst [vmem:[%s3746_s12 + $0x78] sm:$0xff] %v2878_v26 }
 0x250   : > { %v2512_v32 = vld [vmem:[%s3746_s12 + $0x30] sm:$0xff]  ;;  %v2514_v33 = vld [vmem:[%s3746_s12 + $0x38] sm:$0xff] }
 0x251   : > { %2513 = vst [vmem:[%s2487_s20 + $0x30] sm:$0xff] %v2512_v32  ;;  %2515 = vst [vmem:[%s2487_s20 + $0x38] sm:$0xff] %v2514_v33 }
 0x252   : > { %v2528_v40 = vld [vmem:[%s3746_s12 + $0x70] sm:$0xff]  ;;  %v2530_v42 = vld [vmem:[%s3746_s12 + $0x78] sm:$0xff] }
 0x253   : > { %2529 = vst [vmem:[%s2487_s20 + $0x130] sm:$0xff] %v2528_v40  ;;  %2531 = vst [vmem:[%s2487_s20 + $0x138] sm:$0xff] %v2530_v42 }
 0x254 PF: > { %p10_p10 = scmp.ge.s32.totalorder %s2991_s16, 6   ;;  %s3826_s12 = smov %s2947_s13 }
 0x255   : > { %s3827_s13 = smov %s3002_s19  ;;  %s3828_s14 = smov %s2991_s16 }
 0x256   :  { %12 = sbr.rel (!%p10_p10) target bundleno = 2 (0x2), region = 113 }

// kernel: image_encoder_affine_forward.5
= control target key start
LH: loop header
LB: loop body
LE: loop exit
PB: predicated region body
PF: predicated region fallthrough
CT: control target
= control target key end

     0   :  { %s1338_s12 = smov 0   ;;  %s1340_s13 = smov 0   ;;  %s1608_s0 = inlined_call_operand.vmem [shape: bf16[32,432], index: 0, kind: input, shape index: {}]   ;;  %s1609_s1 = inlined_call_operand.vmem [shape: bf16[432,1024], index: 1, kind: input, shape index: {}]   ;;  %s1610_s2 = inlined_call_operand.vmem [shape: f32[32,1], index: 2, kind: input, shape index: {}]   ;;  %s1611_s3 = inlined_call_operand.vmem [shape: bf16[32,1024], index: 3, kind: output, shape index: {}]  }
   0x1   :  { %s1342_s14 = smov 0  }
   0x2 LB: > { %s1068_s15 = sadd.s32 4294967295, %s1315_s14   ;;  %s1355_s16 = sadd.s32 1, %s1315_s14   ;;  %s1315_s14 = sphi %s1342_s14, %s1615_s14   ;;  %s1311_s13 = sphi %s1340_s13, %s1614_s13   ;;  %s1307_s12 = sphi %s1338_s12, %s1613_s12  }
   0x3   : > { %s38_s17 = ssub.s32 %s1315_s14, %s1355_s16  ;;  %s41_s18 = sadd.s32 1, %s1311_s13 }
   0x4   : > { %p39_p0 = scmp.eq.s32.totalorder %s38_s17, 0  ;;  %p48_p1 = scmp.ne.s32.totalorder %s1311_s13, %s1307_s12 }
   0x5   : > { %p49_p2 = scmp.eq.s32.totalorder %s1315_s14, 0  ;;  %p99_p3 = scmp.eq.s32.totalorder %s1068_s15, 3 }
   0x6   : > { %s1366_s19 = scalar_select %p39_p0, %s1311_s13, %s41_s18  }
   0x7   : > { %p50_p4 = por %p49_p2, %p48_p1  ;;  %p1368_p5 = por %p99_p3, %p48_p1 }
   0x8   : > { %p1071_p6 = scmp.ge.s32.totalorder %s1315_s14, 4 }
   0xa   : > { %127 = sbr.rel (%p1071_p6) target bundleno = 75 (0x4b), region = 24 }
  0x11   : > { %130 = sbr.rel (!%p50_p4) target bundleno = 75 (0x4b), region = 28  ;;  %s132_s21 = sand.u32 (%p50_p4), 1, %s1311_s13  }
  0x12   : > { %s1149_s22 = sshll.u32 (%p50_p4), %s1315_s14, 3  ;;  %s1171_s23 = smul.u32 (%p50_p4), 432, %s132_s21 }
  0x13   : > { %s1378_s26 = scalar_lea.vmem (%p50_p4), %s1609_s1, %s1149_s22 }
  0x14   : > { %v271_v0 = vld [vmem:[%s1378_s26] sm:$0xff] (%p50_p4)  ;;  %s1386_s27 = scalar_lea.vmem (%p50_p4), [#allocation2], %s1171_s23 }
  0x15   : > { %v273_v1 = vld [vmem:[%s1378_s26 + $0x20] sm:$0xff] (%p50_p4)  ;;  %272 = vst [vmem:[%s1386_s27] sm:$0xff] (%p50_p4), %v271_v0 }
  0x16   : > { %v275_v2 = vld [vmem:[%s1378_s26 + $0x40] sm:$0xff] (%p50_p4)  ;;  %274 = vst [vmem:[%s1386_s27 + $0x8] sm:$0xff] (%p50_p4), %v273_v1 }
  0x17   : > { %v277_v3 = vld [vmem:[%s1378_s26 + $0x60] sm:$0xff] (%p50_p4)  ;;  %276 = vst [vmem:[%s1386_s27 + $0x10] sm:$0xff] (%p50_p4), %v275_v2 }
  0x18   : > { %v279_v4 = vld [vmem:[%s1378_s26 + $0x80] sm:$0xff]  ;;  %278 = vst [vmem:[%s1386_s27 + $0x18] sm:$0xff] %v277_v3 }
  0x19   : > { %v281_v5 = vld [vmem:[%s1378_s26 + $0xa0] sm:$0xff]  ;;  %280 = vst [vmem:[%s1386_s27 + $0x20] sm:$0xff] %v279_v4 }
  0x1a   : > { %282 = vst [vmem:[%s1386_s27 + $0x28] sm:$0xff] %v281_v5  ;;  %v283_v6 = vld [vmem:[%s1378_s26 + $0xc0] sm:$0xff] }
  0x1b   : > { %v285_v7 = vld [vmem:[%s1378_s26 + $0xe0] sm:$0xff]  ;;  %284 = vst [vmem:[%s1386_s27 + $0x30] sm:$0xff] %v283_v6 }
  0x1c   : > { %v287_v8 = vld [vmem:[%s1378_s26 + $0x100] sm:$0xff]  ;;  %286 = vst [vmem:[%s1386_s27 + $0x38] sm:$0xff] %v285_v7 }
  0x1d   : > { %288 = vst [vmem:[%s1386_s27 + $0x40] sm:$0xff] %v287_v8  ;;  %v289_v9 = vld [vmem:[%s1378_s26 + $0x120] sm:$0xff] }
  0x1e   : > { %v291_v10 = vld [vmem:[%s1378_s26 + $0x140] sm:$0xff]  ;;  %290 = vst [vmem:[%s1386_s27 + $0x48] sm:$0xff] %v289_v9 }
  0x1f   : > { %v293_v11 = vld [vmem:[%s1378_s26 + $0x160] sm:$0xff]  ;;  %292 = vst [vmem:[%s1386_s27 + $0x50] sm:$0xff] %v291_v10 }
  0x20   : > { %294 = vst [vmem:[%s1386_s27 + $0x58] sm:$0xff] %v293_v11  ;;  %v295_v12 = vld [vmem:[%s1378_s26 + $0x180] sm:$0xff] }
  0x21   : > { %v297_v13 = vld [vmem:[%s1378_s26 + $0x1a0] sm:$0xff]  ;;  %296 = vst [vmem:[%s1386_s27 + $0x60] sm:$0xff] %v295_v12 }
  0x22   : > { %v299_v14 = vld [vmem:[%s1378_s26 + $0x1c0] sm:$0xff]  ;;  %298 = vst [vmem:[%s1386_s27 + $0x68] sm:$0xff] %v297_v13 }
  0x23   : > { %300 = vst [vmem:[%s1386_s27 + $0x70] sm:$0xff] %v299_v14  ;;  %v301_v15 = vld [vmem:[%s1378_s26 + $0x1e0] sm:$0xff] }
  0x24   : > { %v303_v16 = vld [vmem:[%s1378_s26 + $0x200] sm:$0xff]  ;;  %302 = vst [vmem:[%s1386_s27 + $0x78] sm:$0xff] %v301_v15 }
  0x25   : > { %v305_v17 = vld [vmem:[%s1378_s26 + $0x220] sm:$0xff]  ;;  %304 = vst [vmem:[%s1386_s27 + $0x80] sm:$0xff] %v303_v16 }
  0x26   : > { %306 = vst [vmem:[%s1386_s27 + $0x88] sm:$0xff] %v305_v17  ;;  %v307_v18 = vld [vmem:[%s1378_s26 + $0x240] sm:$0xff] }
  0x27   : > { %v309_v19 = vld [vmem:[%s1378_s26 + $0x260] sm:$0xff]  ;;  %308 = vst [vmem:[%s1386_s27 + $0x90] sm:$0xff] %v307_v18 }
  0x28   : > { %v311_v20 = vld [vmem:[%s1378_s26 + $0x280] sm:$0xff]  ;;  %310 = vst [vmem:[%s1386_s27 + $0x98] sm:$0xff] %v309_v19 }
  0x29   : > { %312 = vst [vmem:[%s1386_s27 + $0xa0] sm:$0xff] %v311_v20  ;;  %v313_v21 = vld [vmem:[%s1378_s26 + $0x2a0] sm:$0xff] }
  0x2a   : > { %v315_v22 = vld [vmem:[%s1378_s26 + $0x2c0] sm:$0xff]  ;;  %314 = vst [vmem:[%s1386_s27 + $0xa8] sm:$0xff] %v313_v21 }
  0x2b   : > { %v317_v23 = vld [vmem:[%s1378_s26 + $0x2e0] sm:$0xff]  ;;  %316 = vst [vmem:[%s1386_s27 + $0xb0] sm:$0xff] %v315_v22 }
  0x2c   : > { %318 = vst [vmem:[%s1386_s27 + $0xb8] sm:$0xff] %v317_v23  ;;  %v319_v24 = vld [vmem:[%s1378_s26 + $0x300] sm:$0xff] }
  0x2d   : > { %v321_v25 = vld [vmem:[%s1378_s26 + $0x320] sm:$0xff]  ;;  %320 = vst [vmem:[%s1386_s27 + $0xc0] sm:$0xff] %v319_v24 }
  0x2e   : > { %v323_v26 = vld [vmem:[%s1378_s26 + $0x340] sm:$0xff]  ;;  %322 = vst [vmem:[%s1386_s27 + $0xc8] sm:$0xff] %v321_v25 }
  0x2f   : > { %324 = vst [vmem:[%s1386_s27 + $0xd0] sm:$0xff] %v323_v26  ;;  %v325_v27 = vld [vmem:[%s1378_s26 + $0x360] sm:$0xff] }
  0x30   : > { %v327_v28 = vld [vmem:[%s1378_s26 + $0x380] sm:$0xff]  ;;  %326 = vst [vmem:[%s1386_s27 + $0xd8] sm:$0xff] %v325_v27 }
  0x31   : > { %v329_v29 = vld [vmem:[%s1378_s26 + $0x3a0] sm:$0xff]  ;;  %328 = vst [vmem:[%s1386_s27 + $0xe0] sm:$0xff] %v327_v28 }
  0x32   : > { %330 = vst [vmem:[%s1386_s27 + $0xe8] sm:$0xff] %v329_v29  ;;  %v331_v30 = vld [vmem:[%s1378_s26 + $0x3c0] sm:$0xff] }
  0x33   : > { %v333_v31 = vld [vmem:[%s1378_s26 + $0x3e0] sm:$0xff]  ;;  %332 = vst [vmem:[%s1386_s27 + $0xf0] sm:$0xff] %v331_v30 }
  0x34   : > { %v335_v32 = vld [vmem:[%s1378_s26 + $0x400] sm:$0xff]  ;;  %334 = vst [vmem:[%s1386_s27 + $0xf8] sm:$0xff] %v333_v31 }
  0x35   : > { %336 = vst [vmem:[%s1386_s27 + $0x100] sm:$0xff] %v335_v32  ;;  %v337_v33 = vld [vmem:[%s1378_s26 + $0x420] sm:$0xff] }
  0x36   : > { %v339_v34 = vld [vmem:[%s1378_s26 + $0x440] sm:$0xff]  ;;  %338 = vst [vmem:[%s1386_s27 + $0x108] sm:$0xff] %v337_v33 }
  0x37   : > { %v341_v35 = vld [vmem:[%s1378_s26 + $0x460] sm:$0xff]  ;;  %340 = vst [vmem:[%s1386_s27 + $0x110] sm:$0xff] %v339_v34 }
  0x38   : > { %342 = vst [vmem:[%s1386_s27 + $0x118] sm:$0xff] %v341_v35  ;;  %v343_v36 = vld [vmem:[%s1378_s26 + $0x480] sm:$0xff] }
  0x39   : > { %v345_v37 = vld [vmem:[%s1378_s26 + $0x4a0] sm:$0xff]  ;;  %344 = vst [vmem:[%s1386_s27 + $0x120] sm:$0xff] %v343_v36 }
  0x3a   : > { %v347_v38 = vld [vmem:[%s1378_s26 + $0x4c0] sm:$0xff]  ;;  %346 = vst [vmem:[%s1386_s27 + $0x128] sm:$0xff] %v345_v37 }
  0x3b   : > { %348 = vst [vmem:[%s1386_s27 + $0x130] sm:$0xff] %v347_v38  ;;  %v349_v39 = vld [vmem:[%s1378_s26 + $0x4e0] sm:$0xff] }
  0x3c   : > { %v351_v40 = vld [vmem:[%s1378_s26 + $0x500] sm:$0xff]  ;;  %350 = vst [vmem:[%s1386_s27 + $0x138] sm:$0xff] %v349_v39 }
  0x3d   : > { %v353_v41 = vld [vmem:[%s1378_s26 + $0x520] sm:$0xff]  ;;  %352 = vst [vmem:[%s1386_s27 + $0x140] sm:$0xff] %v351_v40 }
  0x3e   : > { %354 = vst [vmem:[%s1386_s27 + $0x148] sm:$0xff] %v353_v41  ;;  %v355_v42 = vld [vmem:[%s1378_s26 + $0x540] sm:$0xff] }
  0x3f   : > { %v357_v43 = vld [vmem:[%s1378_s26 + $0x560] sm:$0xff]  ;;  %356 = vst [vmem:[%s1386_s27 + $0x150] sm:$0xff] %v355_v42 }
  0x40   : > { %v359_v44 = vld [vmem:[%s1378_s26 + $0x580] sm:$0xff]  ;;  %358 = vst [vmem:[%s1386_s27 + $0x158] sm:$0xff] %v357_v43 }
  0x41   : > { %360 = vst [vmem:[%s1386_s27 + $0x160] sm:$0xff] %v359_v44  ;;  %v361_v45 = vld [vmem:[%s1378_s26 + $0x5a0] sm:$0xff] }
  0x42   : > { %v363_v46 = vld [vmem:[%s1378_s26 + $0x5c0] sm:$0xff]  ;;  %362 = vst [vmem:[%s1386_s27 + $0x168] sm:$0xff] %v361_v45 }
  0x43   : > { %v365_v47 = vld [vmem:[%s1378_s26 + $0x5e0] sm:$0xff]  ;;  %364 = vst [vmem:[%s1386_s27 + $0x170] sm:$0xff] %v363_v46 }
  0x44   : > { %366 = vst [vmem:[%s1386_s27 + $0x178] sm:$0xff] %v365_v47  ;;  %v367_v48 = vld [vmem:[%s1378_s26 + $0x600] sm:$0xff] }
  0x45   : > { %v369_v49 = vld [vmem:[%s1378_s26 + $0x620] sm:$0xff]  ;;  %368 = vst [vmem:[%s1386_s27 + $0x180] sm:$0xff] %v367_v48 }
  0x46   : > { %v371_v50 = vld [vmem:[%s1378_s26 + $0x640] sm:$0xff]  ;;  %370 = vst [vmem:[%s1386_s27 + $0x188] sm:$0xff] %v369_v49 }
  0x47   : > { %372 = vst [vmem:[%s1386_s27 + $0x190] sm:$0xff] %v371_v50  ;;  %v373_v51 = vld [vmem:[%s1378_s26 + $0x660] sm:$0xff] }
  0x48   : > { %v375_v52 = vld [vmem:[%s1378_s26 + $0x680] sm:$0xff]  ;;  %374 = vst [vmem:[%s1386_s27 + $0x198] sm:$0xff] %v373_v51 }
  0x49   : > { %v377_v53 = vld [vmem:[%s1378_s26 + $0x6a0] sm:$0xff]  ;;  %376 = vst [vmem:[%s1386_s27 + $0x1a0] sm:$0xff] %v375_v52 }
  0x4a   : > { %378 = vst [vmem:[%s1386_s27 + $0x1a8] sm:$0xff] %v377_v53 }
  0x4b PF: > { %p1074_p7 = scmp.ge.s32.totalorder %s1315_s14, 1  ;;  %p383_p8 = scmp.lt.s32.totalorder %s1315_s14, 5 }
  0x4d   : > { %p384_p9 = pnand %p1074_p7, %p383_p8 }
  0x4e   : > { %s390_s28 = sand.u32 (!%p384_p9), 1, %s1307_s12   ;;  %vm809_vm0 = vcmask (!%p384_p9), 392192   ;;  %v1283_v54 = vld [vmem:[%s1608_s0 + $0xc] ss:$16 sps:$4 sm:$0xff] (!%p384_p9)   ;;  %v1286_v55 = vld [vmem:[%s1608_s0 + $0x4] ss:$16 sps:$4 sm:$0xff] (!%p384_p9)  }
  0x4f   : > { %387 = sbr.rel (%p384_p9) target bundleno = 388 (0x184), region = 66  ;;  %v1317_v56 = vmov (!%p384_p9), 0   ;;  %1138 = vmatprep.mubr.msk.bf16.mxu0 (!%p384_p9), %vm809_vm0, %v1283_v54  ;;  %848 = vmatprep.mubr.bf16.mxu1 (!%p384_p9), %v1286_v55  ;;  %v477_v31 = vld [vmem:[%s1610_s2] sm:$0xff] (!%p384_p9)  ;;  %v479_v33 = vld [vmem:[%s1610_s2 + $0x10] sm:$0xff] (!%p384_p9)  ;;  %v478_v36 = vld [vmem:[%s1610_s2 + $0x8] sm:$0xff] (!%p384_p9) }
  0x50   : > { %s1172_s29 = smul.u32 (!%p384_p9), 432, %s390_s28  ;;  %1198 = vset.pattern.permute.xlu0 (!%p384_p9), %v1317_v56  ;;  %1199 = vset.pattern.permute.xlu1 (!%p384_p9), %v1317_v56  ;;  %v480_v38 = vld [vmem:[%s1610_s2 + $0x18] sm:$0xff] (!%p384_p9)  ;;  %v1284_v54 = vld [vmem:[%s1608_s0] ss:$16 sps:$4 sm:$0xff] (!%p384_p9)   ;;  %v1289_v55 = vld [vmem:[%s1608_s0 + $0x24] ss:$16 sps:$4 sm:$0xff] (!%p384_p9)  }
  0x51   : > { %483 = vperm.xlu0 (!%p384_p9), %1198, %v477_v31   ;;  %493 = vperm.xlu1 (!%p384_p9), %1199, %v479_v33   ;;  %v1281_v46 = vld [vmem:[%s1608_s0 + $0x8] ss:$16 sps:$4 sm:$0xff] (!%p384_p9)   ;;  %v1287_v47 = vld [vmem:[%s1608_s0 + $0x2c] ss:$16 sps:$4 sm:$0xff] (!%p384_p9)   ;;  %v1292_v56 = vld [vmem:[%s1608_s0 + $0x20] ss:$16 sps:$4 sm:$0xff] (!%p384_p9)  }
  0x52   : > { %s1502_s7 = scalar_lea.vmem (!%p384_p9), [#allocation2], %s1172_s29  ;;  %v1291_v52 = vld [vmem:[%s1608_s0 + $0x28] ss:$16 sps:$4 sm:$0xff] (!%p384_p9)  }
  0x53   : > { %v1200_v57 = vld [vmem:[%s1502_s7 + $0x4] ss:$8 sps:$4 sm:$0xff] (!%p384_p9)   ;;  %v1202_v58 = vld [vmem:[%s1502_s7] ss:$8 sps:$4 sm:$0xff] (!%p384_p9)   ;;  %v1203_v59 = vld [vmem:[%s1502_s7 + $0x14] ss:$8 sps:$4 sm:$0xff] (!%p384_p9)  }
  0x54   : > { %816 = vmatprep.subr.bf16.mxu1 (!%p384_p9), %v1200_v57  ;;  %v1205_v60 = vld [vmem:[%s1502_s7 + $0x10] ss:$8 sps:$4 sm:$0xff] (!%p384_p9)   ;;  %v1206_v61 = vld [vmem:[%s1502_s7 + $0x24] ss:$8 sps:$4 sm:$0xff] (!%p384_p9)   ;;  %v1208_v62 = vld [vmem:[%s1502_s7 + $0x20] ss:$8 sps:$4 sm:$0xff] (!%p384_p9)  }
  0x55   : > { %817 = vmatpush1.bf16.msra.mxu1 (!%p384_p9), %v1202_v58  ;;  %v1215_v63 = vld [vmem:[%s1502_s7 + $0x104] ss:$8 sps:$4 sm:$0xff] (!%p384_p9)   ;;  %v1209_v0 = vld [vmem:[%s1502_s7 + $0x34] ss:$8 sps:$4 sm:$0xff] (!%p384_p9)   ;;  %v1219_v1 = vld [vmem:[%s1502_s7 + $0x100] ss:$8 sps:$4 sm:$0xff] (!%p384_p9)   ;;  %488 = vperm.xlu0 (!%p384_p9), %1198, %v478_v36  }
  0x56   : > { %818 = vmatprep.subr.bf16.mxu1 %v1203_v59  ;;  %869 = vmatprep.subr.bf16.mxu0 %v1215_v63  ;;  %v1221_v2 = vld [vmem:[%s1502_s7 + $0x114] ss:$8 sps:$4 sm:$0xff]   ;;  %v1211_v3 = vld [vmem:[%s1502_s7 + $0x30] ss:$8 sps:$4 sm:$0xff]   ;;  %v1212_v4 = vld [vmem:[%s1502_s7 + $0x44] ss:$8 sps:$4 sm:$0xff]  }
  0x57   : > { %870 = vmatpush1.bf16.msra.mxu0 %v1219_v1  ;;  %v1225_v5 = vld [vmem:[%s1502_s7 + $0x110] ss:$8 sps:$4 sm:$0xff]   ;;  %v1227_v6 = vld [vmem:[%s1502_s7 + $0x124] ss:$8 sps:$4 sm:$0xff]   ;;  %v1214_v7 = vld [vmem:[%s1502_s7 + $0x40] ss:$8 sps:$4 sm:$0xff]   ;;  %498 = vperm.xlu1 %1199, %v480_v38  }
  0x58   : > { %871 = vmatprep.subr.bf16.mxu0 %v1221_v2  ;;  %v1231_v8 = vld [vmem:[%s1502_s7 + $0x120] ss:$8 sps:$4 sm:$0xff]   ;;  %v1233_v9 = vld [vmem:[%s1502_s7 + $0x134] ss:$8 sps:$4 sm:$0xff]   ;;  %v1237_v11 = vld [vmem:[%s1502_s7 + $0x130] ss:$8 sps:$4 sm:$0xff]  }
  0x59   : > { %819 = vmatpush1.bf16.msra.mxu1 %v1205_v60  ;;  %v1217_v10 = vld [vmem:[%s1502_s7 + $0x54] ss:$8 sps:$4 sm:$0xff]   ;;  %v1220_v12 = vld [vmem:[%s1502_s7 + $0x50] ss:$8 sps:$4 sm:$0xff]   ;;  %v1239_v13 = vld [vmem:[%s1502_s7 + $0x144] ss:$8 sps:$4 sm:$0xff]  }
  0x5a   : > { %820 = vmatprep.subr.bf16.mxu1 %v1206_v61  ;;  %v1223_v14 = vld [vmem:[%s1502_s7 + $0x64] ss:$8 sps:$4 sm:$0xff]   ;;  %v1226_v15 = vld [vmem:[%s1502_s7 + $0x60] ss:$8 sps:$4 sm:$0xff]   ;;  %v1245_v17 = vld [vmem:[%s1502_s7 + $0x154] ss:$8 sps:$4 sm:$0xff]  }
  0x5b   : > { %872 = vmatpush1.bf16.msra.mxu0 %v1225_v5  ;;  %v1243_v16 = vld [vmem:[%s1502_s7 + $0x140] ss:$8 sps:$4 sm:$0xff]   ;;  %v1229_v18 = vld [vmem:[%s1502_s7 + $0x74] ss:$8 sps:$4 sm:$0xff]   ;;  %v1249_v19 = vld [vmem:[%s1502_s7 + $0x150] ss:$8 sps:$4 sm:$0xff]  }
  0x5c   : > { %873 = vmatprep.subr.bf16.mxu0 %v1227_v6  ;;  %v1232_v20 = vld [vmem:[%s1502_s7 + $0x70] ss:$8 sps:$4 sm:$0xff]   ;;  %v1251_v21 = vld [vmem:[%s1502_s7 + $0x164] ss:$8 sps:$4 sm:$0xff]   ;;  %v1238_v23 = vld [vmem:[%s1502_s7 + $0x80] ss:$8 sps:$4 sm:$0xff]  }
  0x5d   : > { %821 = vmatpush1.bf16.msra.mxu1 %v1208_v62  ;;  %v1235_v22 = vld [vmem:[%s1502_s7 + $0x84] ss:$8 sps:$4 sm:$0xff]   ;;  %v1255_v24 = vld [vmem:[%s1502_s7 + $0x160] ss:$8 sps:$4 sm:$0xff]   ;;  %v1257_v25 = vld [vmem:[%s1502_s7 + $0x174] ss:$8 sps:$4 sm:$0xff]  }
  0x5e   : > { %822 = vmatprep.subr.bf16.mxu1 %v1209_v0  ;;  %v1241_v26 = vld [vmem:[%s1502_s7 + $0x94] ss:$8 sps:$4 sm:$0xff]   ;;  %v1261_v27 = vld [vmem:[%s1502_s7 + $0x170] ss:$8 sps:$4 sm:$0xff]   ;;  %v1263_v29 = vld [vmem:[%s1502_s7 + $0x184] ss:$8 sps:$4 sm:$0xff]  }
  0x5f   : > { %874 = vmatpush1.bf16.msra.mxu0 %v1231_v8  ;;  %v1244_v28 = vld [vmem:[%s1502_s7 + $0x90] ss:$8 sps:$4 sm:$0xff]   ;;  %v1247_v30 = vld [vmem:[%s1502_s7 + $0xa4] ss:$8 sps:$4 sm:$0xff]   ;;  %v1267_v32 = vld [vmem:[%s1502_s7 + $0x180] ss:$8 sps:$4 sm:$0xff]  }
  0x60   : > { %875 = vmatprep.subr.bf16.mxu0 %v1233_v9  ;;  %v1250_v34 = vld [vmem:[%s1502_s7 + $0xa0] ss:$8 sps:$4 sm:$0xff]   ;;  %v1269_v35 = vld [vmem:[%s1502_s7 + $0x194] ss:$8 sps:$4 sm:$0xff]   ;;  %v1273_v39 = vld [vmem:[%s1502_s7 + $0x190] ss:$8 sps:$4 sm:$0xff]  }
  0x61   : > { %823 = vmatpush1.bf16.msra.mxu1 %v1211_v3  ;;  %v1253_v37 = vld [vmem:[%s1502_s7 + $0xb4] ss:$8 sps:$4 sm:$0xff]   ;;  %v1256_v40 = vld [vmem:[%s1502_s7 + $0xb0] ss:$8 sps:$4 sm:$0xff]   ;;  %v1275_v41 = vld [vmem:[%s1502_s7 + $0x1a4] ss:$8 sps:$4 sm:$0xff]  }
  0x62   : > { %824 = vmatprep.subr.bf16.mxu1 %v1212_v4  ;;  %v1259_v42 = vld [vmem:[%s1502_s7 + $0xc4] ss:$8 sps:$4 sm:$0xff]   ;;  %v1279_v43 = vld [vmem:[%s1502_s7 + $0x1a0] ss:$8 sps:$4 sm:$0xff]   ;;  %v1265_v45 = vld [vmem:[%s1502_s7 + $0xd4] ss:$8 sps:$4 sm:$0xff]  }
  0x63   : > { %876 = vmatpush1.bf16.msra.mxu0 %v1237_v11  ;;  %v1262_v44 = vld [vmem:[%s1502_s7 + $0xc0] ss:$8 sps:$4 sm:$0xff]   ;;  %v1268_v48 = vld [vmem:[%s1502_s7 + $0xd0] ss:$8 sps:$4 sm:$0xff]   ;;  %v1271_v49 = vld [vmem:[%s1502_s7 + $0xe4] ss:$8 sps:$4 sm:$0xff]  }
  0x64   : > { %877 = vmatprep.subr.bf16.mxu0 %v1239_v13  ;;  %v1274_v50 = vld [vmem:[%s1502_s7 + $0xe0] ss:$8 sps:$4 sm:$0xff]   ;;  %v1277_v51 = vld [vmem:[%s1502_s7 + $0xf4] ss:$8 sps:$4 sm:$0xff]   ;;  %v1280_v53 = vld [vmem:[%s1502_s7 + $0xf0] ss:$8 sps:$4 sm:$0xff]  }
  0x65   : > { %825 = vmatpush1.bf16.msra.mxu1 %v1214_v7  ;;  %s1075_s7 = sshll.u32 %s390_s28, 5  ;;  %s1154_s12 = sshll.u32 (%p1368_p5), %s1068_s15, 3 }
  0x66   : > { %826 = vmatprep.subr.bf16.mxu1 %v1217_v10  ;;  %s411_s10 = scalar_lea.vmem [#allocation3], %s1075_s7  ;;  %s967_s17 = scalar_lea.vmem (%p1368_p5), %s1611_s3, %s1154_s12 }
  0x67   : > { %878 = vmatpush1.bf16.msra.mxu0 %v1243_v16 }
  0x68   : > { %879 = vmatprep.subr.bf16.mxu0 %v1245_v17 }
  0x69   : > { %827 = vmatpush1.bf16.msra.mxu1 %v1220_v12 }
  0x6a   : > { %828 = vmatprep.subr.bf16.mxu1 %v1223_v14 }
  0x6b   : > { %880 = vmatpush1.bf16.msra.mxu0 %v1249_v19 }
  0x6c   : > { %881 = vmatprep.subr.bf16.mxu0 %v1251_v21 }
  0x6d   : > { %829 = vmatpush1.bf16.msra.mxu1 %v1226_v15 }
  0x6e   : > { %830 = vmatprep.subr.bf16.mxu1 %v1229_v18 }
  0x6f   : > { %882 = vmatpush1.bf16.msra.mxu0 %v1255_v24 }
  0x70   : > { %883 = vmatprep.subr.bf16.mxu0 %v1257_v25 }
  0x71   : > { %831 = vmatpush1.bf16.msra.mxu1 %v1232_v20 }
  0x72   : > { %832 = vmatprep.subr.bf16.mxu1 %v1235_v22 }
  0x73   : > { %884 = vmatpush1.bf16.msra.mxu0 %v1261_v27 }
  0x74   : > { %885 = vmatprep.subr.bf16.mxu0 %v1263_v29 }
  0x75   : > { %833 = vmatpush1.bf16.msra.mxu1 %v1238_v23 }
  0x76   : > { %834 = vmatprep.subr.bf16.mxu1 %v1241_v26 }
  0x77   : > { %886 = vmatpush1.bf16.msra.mxu0 %v1267_v32 }
  0x78   : > { %887 = vmatprep.subr.bf16.mxu0 %v1269_v35 }
  0x79   : > { %835 = vmatpush1.bf16.msra.mxu1 %v1244_v28 }
  0x7a   : > { %836 = vmatprep.subr.bf16.mxu1 %v1247_v30 }
  0x7b   : > { %888 = vmatpush1.bf16.msra.mxu0 %v1273_v39 }
  0x7c   : > { %889 = vmatprep.subr.bf16.mxu0 %v1275_v41 }
  0x7d   : > { %837 = vmatpush1.bf16.msra.mxu1 %v1250_v34 }
  0x7e   : > { %838 = vmatprep.subr.bf16.mxu1 %v1253_v37 }
  0x7f   : > { %890 = vmatpush1.bf16.msra.mxu0 %v1279_v43 }
  0x81   : > { %839 = vmatpush1.bf16.msra.mxu1 %v1256_v40 }
  0x82   : > { %840 = vmatprep.subr.bf16.mxu1 %v1259_v42  ;;  %902 = vmatmul.mubr.bf16.vlgmr.msra.gmra.mrb[0].mxu0 %v1281_v46 }
  0x83   : > { %1139 = vmatprep.mubr.msk.bf16.mxu0 %vm809_vm0, %v1287_v47 }
  0x85   : > { %841 = vmatpush1.bf16.msra.mxu1 %v1262_v44 }
  0x86   : > { %842 = vmatprep.subr.bf16.mxu1 %v1265_v45 }
  0x89   : > { %843 = vmatpush1.bf16.msra.mxu1 %v1268_v48 }
  0x8a   : > { %844 = vmatprep.subr.bf16.mxu1 %v1271_v49  ;;  %912 = vmatmul.mubr.bf16.gmra.mrb[4].mxu0 %v1291_v52 }
  0x8d   : > { %845 = vmatpush1.bf16.msra.mxu1 %v1274_v50 }
  0x8e   : > { %846 = vmatprep.subr.bf16.mxu1 %v1277_v51 }
  0x91   : > { %847 = vmatpush1.bf16.msra.mxu1 %v1280_v53 }
  0x94   : > { %849 = vmatmul.mubr.bf16.vlgmr.msra.gmra.mrb[0].mxu1 %v1284_v54 }
  0x95   : > { %858 = vmatprep.mubr.bf16.mxu1 %v1289_v55 }
  0x9c   : > { %859 = vmatmul.mubr.bf16.gmra.mrb[4].mxu1 %v1292_v56 }
  0xd0   : > { %v484_v61 = vpop.permute.xlu0 %483  ;;  %v494_v12 = vpop.permute.xlu1 %493 }
  0xd4   : > { %v489_v3 = vpop.permute.xlu0 %488 }
  0xd6   : > { %v499_v25 = vpop.permute.xlu1 %498 }
 0x155   : > { %v903_v57 = vpop.f32.mrb[0].mxu0 }
 0x156   : > { %v905_v58 = vpop.f32.mrb[1].mxu0 }
 0x157   : > { %v907_v59 = vpop.f32.mrb[2].mxu0 }
 0x158   : > { %v909_v60 = vpop.f32.mrb[3].mxu0 }
 0x15d   : > { %v913_v62 = vpop.f32.mrb[4].mxu0 }
 0x15e   : > { %v915_v63 = vpop.f32.mrb[5].mxu0 }
 0x15f   : > { %v917_v0 = vpop.f32.mrb[6].mxu0 }
 0x160   : > { %v919_v1 = vpop.f32.mrb[7].mxu0 }
 0x167   : > { %v850_v2 = vpop.f32.mrb[0].mxu1 }
 0x168   : > { %v851_v4 = vadd.f32 %v850_v2, %v484_v61  ;;  %v852_v5 = vpop.f32.mrb[1].mxu1 }
 0x169   : > { %v853_v6 = vadd.f32 %v852_v5, %v484_v61  ;;  %v854_v7 = vpop.f32.mrb[2].mxu1 }
 0x16a   : > { %v904_v8 = vadd.f32 %v903_v57, %v851_v4  ;;  %v855_v9 = vadd.f32 %v854_v7, %v489_v3  ;;  %v856_v10 = vpop.f32.mrb[3].mxu1 }
 0x16b   : > { %v906_v11 = vadd.f32 %v905_v58, %v853_v6  ;;  %v857_v13 = vadd.f32 %v856_v10, %v489_v3 }
 0x16c   : > { %v922_v14 = vmax.f32 %v904_v8, 0.0  ;;  %v908_v15 = vadd.f32 %v907_v59, %v855_v9 }
 0x16d   : > { %v923_v16 = vmax.f32 %v906_v11, 0.0  ;;  %v910_v17 = vadd.f32 %v909_v60, %v857_v13 }
 0x16e   : > { %v924_v18 = vmax.f32 %v908_v15, 0.0 }
 0x16f   : > { %v1150_v19 = vpack.c.bf16 %v923_v16, %v922_v14  ;;  %v925_v20 = vmax.f32 %v910_v17, 0.0  ;;  %v860_v21 = vpop.f32.mrb[4].mxu1 }
 0x170   : > { %v861_v22 = vadd.f32 %v860_v21, %v494_v12  ;;  %v862_v23 = vpop.f32.mrb[5].mxu1 }
 0x171   : > { %954 = vst [vmem:[%s411_s10] sm:$0xff] %v1150_v19  ;;  %v1151_v24 = vpack.c.bf16 %v925_v20, %v924_v18  ;;  %v863_v26 = vadd.f32 %v862_v23, %v494_v12  ;;  %v864_v27 = vpop.f32.mrb[6].mxu1 }
 0x172   : > { %v914_v28 = vadd.f32 %v913_v62, %v861_v22  ;;  %v865_v29 = vadd.f32 %v864_v27, %v499_v25  ;;  %v866_v30 = vpop.f32.mrb[7].mxu1 }
 0x173   : > { %955 = vst [vmem:[%s411_s10 + $0x8] sm:$0xff] %v1151_v24  ;;  %v916_v31 = vadd.f32 %v915_v63, %v863_v26  ;;  %v867_v32 = vadd.f32 %v866_v30, %v499_v25 }
 0x174   : > { %v926_v33 = vmax.f32 %v914_v28, 0.0  ;;  %v918_v34 = vadd.f32 %v917_v0, %v865_v29 }
 0x175   : > { %v927_v35 = vmax.f32 %v916_v31, 0.0  ;;  %v920_v36 = vadd.f32 %v919_v1, %v867_v32  ;;  %964 = sbr.rel (!%p1368_p5) target bundleno = 388 (0x184), region = 74 }
 0x176   : > { %v928_v37 = vmax.f32 %v918_v34, 0.0 }
 0x177   : > { %v1152_v38 = vpack.c.bf16 %v927_v35, %v926_v33  ;;  %v929_v39 = vmax.f32 %v920_v36, 0.0 }
 0x178   : > { %v1001_v41 = vld [vmem:[%s411_s10] sm:$0xff] (%p1368_p5) }
 0x179   : > { %956 = vst [vmem:[%s411_s10 + $0x10] sm:$0xff] %v1152_v38  ;;  %v1153_v40 = vpack.c.bf16 %v929_v39, %v928_v37  ;;  %1002 = vst [vmem:[%s967_s17] sm:$0xff] (%p1368_p5), %v1001_v41 }
 0x17a   : > { %v1003_v42 = vld [vmem:[%s411_s10 + $0x8] sm:$0xff] (%p1368_p5) }
 0x17b   : > { %957 = vst [vmem:[%s411_s10 + $0x18] sm:$0xff] %v1153_v40  ;;  %1004 = vst [vmem:[%s967_s17 + $0x20] sm:$0xff] (%p1368_p5), %v1003_v42 }
 0x180   : > { %v1005_v43 = vld [vmem:[%s411_s10 + $0x10] sm:$0xff] }
 0x181   : > { %1006 = vst [vmem:[%s967_s17 + $0x40] sm:$0xff] %v1005_v43 }
 0x182   : > { %v1007_v44 = vld [vmem:[%s411_s10 + $0x18] sm:$0xff] }
 0x183   : > { %1008 = vst [vmem:[%s967_s17 + $0x60] sm:$0xff] %v1007_v44 }
 0x184 PF: > { %p10_p10 = scmp.ge.s32.totalorder %s1355_s16, 6   ;;  %s1613_s12 = smov %s1311_s13 }
 0x185   : > { %s1614_s13 = smov %s1366_s19  ;;  %s1615_s14 = smov %s1355_s16 }
 0x186   :  { %12 = sbr.rel (!%p10_p10) target bundleno = 2 (0x2), region = 143 }

</bundles_post_ra>
